<compile_context>
chip_gen: v7x
topology: tpu7x:2x2x1
jax: 0.10.0
libtpu: 0.0.40
codegen_flags: <defaults>
</compile_context>

<pallas_src>
import jax
import jax.numpy as jnp
from jax.experimental import pallas as pl
from jax.experimental.pallas import tpu as pltpu


def _store_padded(pad_ref, act_hwc):
    """Zero the (H+2, W+2, C) scratch and write the activation into its interior."""
    Hp, Wp, _ = pad_ref.shape
    pad_ref[...] = jnp.zeros_like(pad_ref)
    pad_ref[pl.ds(1, Hp - 2), pl.ds(1, Wp - 2), :] = act_hwc


def _conv3x3_layer(pad_ref, col_ref, w_ref, b_ref):
    """One 3x3 'same' conv as a single im2col matmul.

    pad_ref: (H+2, W+2, C)  bf16 VMEM scratch (zero-padded input activation)
    col_ref: (H*W, 9*C)     bf16 VMEM scratch (im2col patch buffer)
    w_ref:   (9*C, Cout)    bf16 (row index = (dy*3+dx)*C + c)
    b_ref:   (1, Cout)      f32
    returns  (H*W, Cout)    f32 pre-activation
    """
    Hp, Wp, C = pad_ref.shape
    H, W = Hp - 2, Wp - 2
    for dy in range(3):
        for dx in range(3):
            tap = dy * 3 + dx
            win = pad_ref[pl.ds(dy, H), pl.ds(dx, W), :]            # (H, W, C)
            col_ref[:, pl.ds(tap * C, C)] = win.reshape(H * W, C)
    acc = jnp.dot(col_ref[...], w_ref[...], preferred_element_type=jnp.float32)
    return acc + b_ref[...]


def _iic_kernel(xcol_ref,
                w1_ref, b1_ref,
                w2_ref, b2_ref,
                w3_ref, b3_ref,
                w4t_ref, b4c_ref,
                o_ref,
                pad1_ref, pad2_ref, col2_ref, col3_ref):
    Hp, Wp, _ = pad1_ref.shape
    H, W = Hp - 2, Wp - 2

    # --- layer 1: conv3x3(Cin -> 64) + ReLU (patches prebuilt in wrapper) ---
    a1 = jnp.dot(xcol_ref[0], w1_ref[...], preferred_element_type=jnp.float32)
    a1 = jnp.maximum(a1 + b1_ref[...], 0.0)                         # (H*W, 64) f32
    _store_padded(pad1_ref, a1.astype(jnp.bfloat16).reshape(H, W, -1))

    # --- layer 2: conv3x3(64 -> 128) + ReLU --------------------------------
    a2 = jnp.maximum(_conv3x3_layer(pad1_ref, col2_ref, w2_ref, b2_ref), 0.0)
    _store_padded(pad2_ref, a2.astype(jnp.bfloat16).reshape(H, W, -1))

    # --- layer 3: conv3x3(128 -> 256) + ReLU -------------------------------
    a3 = jnp.maximum(_conv3x3_layer(pad2_ref, col3_ref, w3_ref, b3_ref), 0.0)

    # --- 1x1 cluster head, emitted lane-dense as (NC, H*W) -----------------
    a3_t = jnp.transpose(a3.astype(jnp.bfloat16))                   # (256, H*W) bf16
    logits_t = jnp.dot(w4t_ref[...], a3_t,
                       preferred_element_type=jnp.float32)          # (NC, H*W)
    o_ref[0] = (logits_t + b4c_ref[...]).astype(o_ref.dtype)


def _im2col_patches(x_nhwc):
    """(B, H, W, C) -> (B, H*W, 9*C) im2col patches for a 3x3 'same' conv."""
    B, H, W, C = x_nhwc.shape
    xp = jnp.pad(x_nhwc, ((0, 0), (1, 1), (1, 1), (0, 0)))
    taps = [xp[:, dy:dy + H, dx:dx + W, :] for dy in range(3) for dx in range(3)]
    return jnp.concatenate(taps, axis=-1).reshape(B, H * W, 9 * C)


@jax.jit
def simple_iic_net(x_nchw, params):
    """Forward pass. x_nchw: (B, Cin, H, W) -> (B, num_clusters, H, W)."""
    w1, b1, w2, b2, w3, b3, w4, b4 = params
    B, Cin, H, W = x_nchw.shape
    C1, C2, C3 = w1.shape[-1], w2.shape[-1], w3.shape[-1]
    NC = w4.shape[-1]

    # Layer-1 im2col patches precomputed in XLA (tiny: B*H*W*18 elements).
    xcol = _im2col_patches(jnp.transpose(x_nchw, (0, 2, 3, 1))).astype(jnp.bfloat16)

    # Flatten 3x3 weights to (9*Cin, Cout); cast matmul operands to bf16.
    w1f = w1.reshape(-1, C1).astype(jnp.bfloat16)     # (9*Cin, 64)
    w2f = w2.reshape(-1, C2).astype(jnp.bfloat16)     # (576, 128)
    w3f = w3.reshape(-1, C3).astype(jnp.bfloat16)     # (1152, 256)
    w4t = jnp.transpose(w4).astype(jnp.bfloat16)      # (NC, 256)
    b4c = jnp.reshape(b4, (NC, 1))                    # column bias for (NC, H*W)

    full = lambda a: pl.BlockSpec(a.shape, lambda b: (0,) * a.ndim)

    out = pl.pallas_call(
        _iic_kernel,
        out_shape=jax.ShapeDtypeStruct((B, NC, H * W), jnp.float32),
        grid=(B,),
        in_specs=[
            pl.BlockSpec((1, H * W, 9 * Cin), lambda b: (b, 0, 0)),
            full(w1f), full(b1),
            full(w2f), full(b2),
            full(w3f), full(b3),
            full(w4t), full(b4c),
        ],
        out_specs=pl.BlockSpec((1, NC, H * W), lambda b: (b, 0, 0)),
        scratch_shapes=[
            pltpu.VMEM((H + 2, W + 2, C1), jnp.bfloat16),   # padded a1
            pltpu.VMEM((H + 2, W + 2, C2), jnp.bfloat16),   # padded a2
            pltpu.VMEM((H * W, 9 * C1), jnp.bfloat16),      # im2col for layer 2
            pltpu.VMEM((H * W, 9 * C2), jnp.bfloat16),      # im2col for layer 3
        ],
        compiler_params=pltpu.CompilerParams(
            dimension_semantics=("parallel",),
        ),
    )(xcol, w1f, b1, w2f, b2, w3f, b3, w4t, b4c)

    return out.reshape(B, NC, H, W)


@jax.jit
def _reference(x_nchw, params):
    """Pure-JAX reference with the same bf16 operand casts as the kernel."""
    w1, b1, w2, b2, w3, b3, w4, b4 = params
    x = jnp.transpose(x_nchw, (0, 2, 3, 1))

    def conv3x3(a_bf16, w, b):
        Bn, H, W, _ = a_bf16.shape
        cols = _im2col_patches(a_bf16)                               # (B, H*W, 9*C)
        wf = w.reshape(-1, w.shape[-1]).astype(jnp.bfloat16)
        y = jnp.einsum("bpk,kc->bpc", cols, wf,
                       preferred_element_type=jnp.float32) + b
        return y.reshape(Bn, H, W, -1)

    a1 = jnp.maximum(conv3x3(x.astype(jnp.bfloat16), w1, b1), 0.0).astype(jnp.bfloat16)
    a2 = jnp.maximum(conv3x3(a1, w2, b2), 0.0).astype(jnp.bfloat16)
    a3 = jnp.maximum(conv3x3(a2, w3, b3), 0.0)
    logits = jnp.einsum("bhwc,nc->bhwn", a3.astype(jnp.bfloat16),
                        jnp.transpose(w4).astype(jnp.bfloat16),
                        preferred_element_type=jnp.float32) + b4
    return jnp.transpose(logits, (0, 3, 1, 2))


def init_params(key, input_channels=2, num_clusters=10):
    """Deterministic synthetic init matching nn.Conv2d shapes (HWIO layout)."""
    ks = jax.random.split(key, 8)

    def w(k, shape, fan_in):
        return jax.random.normal(k, shape, jnp.float32) / jnp.sqrt(fan_in)

    w1 = w(ks[0], (3, 3, input_channels, 64), 3 * 3 * input_channels)
    b1 = 0.01 * jax.random.normal(ks[1], (1, 64), jnp.float32)
    w2 = w(ks[2], (3, 3, 64, 128), 3 * 3 * 64)
    b2 = 0.01 * jax.random.normal(ks[3], (1, 128), jnp.float32)
    w3 = w(ks[4], (3, 3, 128, 256), 3 * 3 * 128)
    b3 = 0.01 * jax.random.normal(ks[5], (1, 256), jnp.float32)
    w4 = w(ks[6], (256, num_clusters), 256)
    b4 = 0.01 * jax.random.normal(ks[7], (1, num_clusters), jnp.float32)
    return (w1, b1, w2, b2, w3, b3, w4, b4)


if __name__ == "__main__":
    key = jax.random.PRNGKey(0)
    k_x, k_p = jax.random.split(key)

    B, Cin, H, W = 2, 2, 16, 16
    num_clusters = 10

    x = jax.random.normal(k_x, (B, Cin, H, W), jnp.float32)
    params = init_params(k_p, input_channels=Cin, num_clusters=num_clusters)

    out = jax.block_until_ready(simple_iic_net(x, params))
    ref = jax.block_until_ready(_reference(x, params))

    assert out.shape == (B, num_clusters, H, W), out.shape
    assert bool(jnp.all(jnp.isfinite(out)))
    assert float(jnp.max(jnp.abs(out - ref))) < 5e-2
    print("KERNEL_OK")
</pallas_src>

<mosaic_0001>
module attributes {stable_mosaic.version = 11 : i64} {
  func.func @_iic_kernel(%arg0: i32, %arg1: memref<1x256x18xbf16, #tpu.memory_space<vmem>>, %arg2: memref<18x64xbf16, #tpu.memory_space<vmem>>, %arg3: memref<1x64xf32, #tpu.memory_space<vmem>>, %arg4: memref<576x128xbf16, #tpu.memory_space<vmem>>, %arg5: memref<1x128xf32, #tpu.memory_space<vmem>>, %arg6: memref<1152x256xbf16, #tpu.memory_space<vmem>>, %arg7: memref<1x256xf32, #tpu.memory_space<vmem>>, %arg8: memref<10x256xbf16, #tpu.memory_space<vmem>>, %arg9: memref<10x1xf32, #tpu.memory_space<vmem>>, %arg10: memref<1x10x256xf32, #tpu.memory_space<vmem>>, %arg11: memref<18x18x64xbf16, #tpu.memory_space<vmem>>, %arg12: memref<18x18x128xbf16, #tpu.memory_space<vmem>>, %arg13: memref<256x576xbf16, #tpu.memory_space<vmem>>, %arg14: memref<256x1152xbf16, #tpu.memory_space<vmem>>) attributes {dimension_semantics = [#tpu.dimension_semantics<parallel>], iteration_bounds = array<i64: 2>, scalar_prefetch = 0 : i64, scratch_operands = 4 : i64, tpu.core_type = #tpu.core_type<tc>, window_params = [{transform_indices = @transform_0, window_bounds = array<i64: 1, 256, 18>}, {pipeline_mode = #tpu.pipeline_mode<synchronous>, transform_indices = @transform_1, window_bounds = array<i64: 18, 64>}, {pipeline_mode = #tpu.pipeline_mode<synchronous>, transform_indices = @transform_2, window_bounds = array<i64: 1, 64>}, {pipeline_mode = #tpu.pipeline_mode<synchronous>, transform_indices = @transform_3, window_bounds = array<i64: 576, 128>}, {pipeline_mode = #tpu.pipeline_mode<synchronous>, transform_indices = @transform_4, window_bounds = array<i64: 1, 128>}, {pipeline_mode = #tpu.pipeline_mode<synchronous>, transform_indices = @transform_5, window_bounds = array<i64: 1152, 256>}, {pipeline_mode = #tpu.pipeline_mode<synchronous>, transform_indices = @transform_6, window_bounds = array<i64: 1, 256>}, {pipeline_mode = #tpu.pipeline_mode<synchronous>, transform_indices = @transform_7, window_bounds = array<i64: 10, 256>}, {pipeline_mode = #tpu.pipeline_mode<synchronous>, transform_indices = @transform_8, window_bounds = array<i64: 10, 1>}, {transform_indices = @transform_9, window_bounds = array<i64: 1, 10, 256>}]} {
    %c0 = arith.constant 0 : index
    %c0_0 = arith.constant 0 : index
    %c0_1 = arith.constant 0 : index
    %0 = vector.load %arg1[%c0, %c0_0, %c0_1] : memref<1x256x18xbf16, #tpu.memory_space<vmem>>, vector<1x256x18xbf16>
    %1 = vector.shape_cast %0 : vector<1x256x18xbf16> to vector<256x18xbf16>
    %c0_2 = arith.constant 0 : index
    %c0_3 = arith.constant 0 : index
    %2 = vector.load %arg2[%c0_2, %c0_3] : memref<18x64xbf16, #tpu.memory_space<vmem>>, vector<18x64xbf16>
    %cst = arith.constant dense<0.000000e+00> : vector<256x64xf32>
    %3 = tpu.matmul %1, %2, %cst {dimension_numbers = #tpu.dot_dimension_numbers<[1], [0], [0], [1], [0, 0, 1, 1], [], []>} : vector<256x18xbf16>, vector<18x64xbf16>, vector<256x64xf32> -> vector<256x64xf32>
    %c0_4 = arith.constant 0 : index
    %c0_5 = arith.constant 0 : index
    %4 = vector.load %arg3[%c0_4, %c0_5] : memref<1x64xf32, #tpu.memory_space<vmem>>, vector<1x64xf32>
    %5 = vector.broadcast %4 : vector<1x64xf32> to vector<256x64xf32>
    %6 = arith.addf %3, %5 : vector<256x64xf32>
    %cst_6 = arith.constant 0.000000e+00 : f32
    %7 = vector.broadcast %cst_6 : f32 to vector<256x64xf32>
    %8 = arith.maximumf %6, %7 : vector<256x64xf32>
    %9 = arith.truncf %8 : vector<256x64xf32> to vector<256x64xbf16>
    %10 = vector.shape_cast %9 : vector<256x64xbf16> to vector<16x16x64xbf16>
    %cst_7 = arith.constant 0.000000e+00 : bf16
    %11 = vector.broadcast %cst_7 : bf16 to vector<18x18x64xbf16>
    %c0_8 = arith.constant 0 : index
    %c0_9 = arith.constant 0 : index
    %c0_10 = arith.constant 0 : index
    %12 = vector.load %arg11[%c0_8, %c0_9, %c0_10] : memref<18x18x64xbf16, #tpu.memory_space<vmem>>, vector<18x18x64xbf16>
    tpu.vector_store %arg11[%c0_8, %c0_9, %c0_10], %11 {strides = array<i32>} : memref<18x18x64xbf16, #tpu.memory_space<vmem>>, vector<18x18x64xbf16>,
    %c1 = arith.constant 1 : index
    %c1_11 = arith.constant 1 : index
    %c0_12 = arith.constant 0 : index
    %13 = vector.load %arg11[%c1, %c1_11, %c0_12] : memref<18x18x64xbf16, #tpu.memory_space<vmem>>, vector<16x16x64xbf16>
    tpu.vector_store %arg11[%c1, %c1_11, %c0_12], %10 {strides = array<i32>} : memref<18x18x64xbf16, #tpu.memory_space<vmem>>, vector<16x16x64xbf16>,
    %c0_13 = arith.constant 0 : index
    %c0_14 = arith.constant 0 : index
    %c0_15 = arith.constant 0 : index
    %14 = vector.load %arg11[%c0_13, %c0_14, %c0_15] : memref<18x18x64xbf16, #tpu.memory_space<vmem>>, vector<16x16x64xbf16>
    %15 = vector.shape_cast %14 : vector<16x16x64xbf16> to vector<256x64xbf16>
    %c0_16 = arith.constant 0 : index
    %c0_17 = arith.constant 0 : index
    %16 = vector.load %arg13[%c0_16, %c0_17] : memref<256x576xbf16, #tpu.memory_space<vmem>>, vector<256x64xbf16>
    tpu.vector_store %arg13[%c0_16, %c0_17], %15 {strides = array<i32>} : memref<256x576xbf16, #tpu.memory_space<vmem>>, vector<256x64xbf16>,
    %c0_18 = arith.constant 0 : index
    %c1_19 = arith.constant 1 : index
    %c0_20 = arith.constant 0 : index
    %17 = vector.load %arg11[%c0_18, %c1_19, %c0_20] : memref<18x18x64xbf16, #tpu.memory_space<vmem>>, vector<16x16x64xbf16>
    %18 = vector.shape_cast %17 : vector<16x16x64xbf16> to vector<256x64xbf16>
    %c0_21 = arith.constant 0 : index
    %c64 = arith.constant 64 : index
    %19 = vector.load %arg13[%c0_21, %c64] : memref<256x576xbf16, #tpu.memory_space<vmem>>, vector<256x64xbf16>
    tpu.vector_store %arg13[%c0_21, %c64], %18 {strides = array<i32>} : memref<256x576xbf16, #tpu.memory_space<vmem>>, vector<256x64xbf16>,
    %c0_22 = arith.constant 0 : index
    %c2 = arith.constant 2 : index
    %c0_23 = arith.constant 0 : index
    %20 = vector.load %arg11[%c0_22, %c2, %c0_23] : memref<18x18x64xbf16, #tpu.memory_space<vmem>>, vector<16x16x64xbf16>
    %21 = vector.shape_cast %20 : vector<16x16x64xbf16> to vector<256x64xbf16>
    %c0_24 = arith.constant 0 : index
    %c128 = arith.constant 128 : index
    %22 = vector.load %arg13[%c0_24, %c128] : memref<256x576xbf16, #tpu.memory_space<vmem>>, vector<256x64xbf16>
    tpu.vector_store %arg13[%c0_24, %c128], %21 {strides = array<i32>} : memref<256x576xbf16, #tpu.memory_space<vmem>>, vector<256x64xbf16>,
    %c1_25 = arith.constant 1 : index
    %c0_26 = arith.constant 0 : index
    %c0_27 = arith.constant 0 : index
    %23 = vector.load %arg11[%c1_25, %c0_26, %c0_27] : memref<18x18x64xbf16, #tpu.memory_space<vmem>>, vector<16x16x64xbf16>
    %24 = vector.shape_cast %23 : vector<16x16x64xbf16> to vector<256x64xbf16>
    %c0_28 = arith.constant 0 : index
    %c192 = arith.constant 192 : index
    %25 = vector.load %arg13[%c0_28, %c192] : memref<256x576xbf16, #tpu.memory_space<vmem>>, vector<256x64xbf16>
    tpu.vector_store %arg13[%c0_28, %c192], %24 {strides = array<i32>} : memref<256x576xbf16, #tpu.memory_space<vmem>>, vector<256x64xbf16>,
    %c1_29 = arith.constant 1 : index
    %c1_30 = arith.constant 1 : index
    %c0_31 = arith.constant 0 : index
    %26 = vector.load %arg11[%c1_29, %c1_30, %c0_31] : memref<18x18x64xbf16, #tpu.memory_space<vmem>>, vector<16x16x64xbf16>
    %27 = vector.shape_cast %26 : vector<16x16x64xbf16> to vector<256x64xbf16>
    %c0_32 = arith.constant 0 : index
    %c256 = arith.constant 256 : index
    %28 = vector.load %arg13[%c0_32, %c256] : memref<256x576xbf16, #tpu.memory_space<vmem>>, vector<256x64xbf16>
    tpu.vector_store %arg13[%c0_32, %c256], %27 {strides = array<i32>} : memref<256x576xbf16, #tpu.memory_space<vmem>>, vector<256x64xbf16>,
    %c1_33 = arith.constant 1 : index
    %c2_34 = arith.constant 2 : index
    %c0_35 = arith.constant 0 : index
    %29 = vector.load %arg11[%c1_33, %c2_34, %c0_35] : memref<18x18x64xbf16, #tpu.memory_space<vmem>>, vector<16x16x64xbf16>
    %30 = vector.shape_cast %29 : vector<16x16x64xbf16> to vector<256x64xbf16>
    %c0_36 = arith.constant 0 : index
    %c320 = arith.constant 320 : index
    %31 = vector.load %arg13[%c0_36, %c320] : memref<256x576xbf16, #tpu.memory_space<vmem>>, vector<256x64xbf16>
    tpu.vector_store %arg13[%c0_36, %c320], %30 {strides = array<i32>} : memref<256x576xbf16, #tpu.memory_space<vmem>>, vector<256x64xbf16>,
    %c2_37 = arith.constant 2 : index
    %c0_38 = arith.constant 0 : index
    %c0_39 = arith.constant 0 : index
    %32 = vector.load %arg11[%c2_37, %c0_38, %c0_39] : memref<18x18x64xbf16, #tpu.memory_space<vmem>>, vector<16x16x64xbf16>
    %33 = vector.shape_cast %32 : vector<16x16x64xbf16> to vector<256x64xbf16>
    %c0_40 = arith.constant 0 : index
    %c384 = arith.constant 384 : index
    %34 = vector.load %arg13[%c0_40, %c384] : memref<256x576xbf16, #tpu.memory_space<vmem>>, vector<256x64xbf16>
    tpu.vector_store %arg13[%c0_40, %c384], %33 {strides = array<i32>} : memref<256x576xbf16, #tpu.memory_space<vmem>>, vector<256x64xbf16>,
    %c2_41 = arith.constant 2 : index
    %c1_42 = arith.constant 1 : index
    %c0_43 = arith.constant 0 : index
    %35 = vector.load %arg11[%c2_41, %c1_42, %c0_43] : memref<18x18x64xbf16, #tpu.memory_space<vmem>>, vector<16x16x64xbf16>
    %36 = vector.shape_cast %35 : vector<16x16x64xbf16> to vector<256x64xbf16>
    %c0_44 = arith.constant 0 : index
    %c448 = arith.constant 448 : index
    %37 = vector.load %arg13[%c0_44, %c448] : memref<256x576xbf16, #tpu.memory_space<vmem>>, vector<256x64xbf16>
    tpu.vector_store %arg13[%c0_44, %c448], %36 {strides = array<i32>} : memref<256x576xbf16, #tpu.memory_space<vmem>>, vector<256x64xbf16>,
    %c2_45 = arith.constant 2 : index
    %c2_46 = arith.constant 2 : index
    %c0_47 = arith.constant 0 : index
    %38 = vector.load %arg11[%c2_45, %c2_46, %c0_47] : memref<18x18x64xbf16, #tpu.memory_space<vmem>>, vector<16x16x64xbf16>
    %39 = vector.shape_cast %38 : vector<16x16x64xbf16> to vector<256x64xbf16>
    %c0_48 = arith.constant 0 : index
    %c512 = arith.constant 512 : index
    %40 = vector.load %arg13[%c0_48, %c512] : memref<256x576xbf16, #tpu.memory_space<vmem>>, vector<256x64xbf16>
    tpu.vector_store %arg13[%c0_48, %c512], %39 {strides = array<i32>} : memref<256x576xbf16, #tpu.memory_space<vmem>>, vector<256x64xbf16>,
    %c0_49 = arith.constant 0 : index
    %c0_50 = arith.constant 0 : index
    %41 = vector.load %arg13[%c0_49, %c0_50] : memref<256x576xbf16, #tpu.memory_space<vmem>>, vector<256x576xbf16>
    %c0_51 = arith.constant 0 : index
    %c0_52 = arith.constant 0 : index
    %42 = vector.load %arg4[%c0_51, %c0_52] : memref<576x128xbf16, #tpu.memory_space<vmem>>, vector<576x128xbf16>
    %cst_53 = arith.constant dense<0.000000e+00> : vector<256x128xf32>
    %43 = tpu.matmul %41, %42, %cst_53 {dimension_numbers = #tpu.dot_dimension_numbers<[1], [0], [0], [1], [0, 0, 1, 1], [], []>} : vector<256x576xbf16>, vector<576x128xbf16>, vector<256x128xf32> -> vector<256x128xf32>
    %c0_54 = arith.constant 0 : index
    %c0_55 = arith.constant 0 : index
    %44 = vector.load %arg5[%c0_54, %c0_55] : memref<1x128xf32, #tpu.memory_space<vmem>>, vector<1x128xf32>
    %45 = vector.broadcast %44 : vector<1x128xf32> to vector<256x128xf32>
    %46 = arith.addf %43, %45 : vector<256x128xf32>
    %cst_56 = arith.constant 0.000000e+00 : f32
    %47 = vector.broadcast %cst_56 : f32 to vector<256x128xf32>
    %48 = arith.maximumf %46, %47 : vector<256x128xf32>
    %49 = arith.truncf %48 : vector<256x128xf32> to vector<256x128xbf16>
    %50 = vector.shape_cast %49 : vector<256x128xbf16> to vector<16x16x128xbf16>
    %cst_57 = arith.constant 0.000000e+00 : bf16
    %51 = vector.broadcast %cst_57 : bf16 to vector<18x18x128xbf16>
    %c0_58 = arith.constant 0 : index
    %c0_59 = arith.constant 0 : index
    %c0_60 = arith.constant 0 : index
    %52 = vector.load %arg12[%c0_58, %c0_59, %c0_60] : memref<18x18x128xbf16, #tpu.memory_space<vmem>>, vector<18x18x128xbf16>
    tpu.vector_store %arg12[%c0_58, %c0_59, %c0_60], %51 {strides = array<i32>} : memref<18x18x128xbf16, #tpu.memory_space<vmem>>, vector<18x18x128xbf16>,
    %c1_61 = arith.constant 1 : index
    %c1_62 = arith.constant 1 : index
    %c0_63 = arith.constant 0 : index
    %53 = vector.load %arg12[%c1_61, %c1_62, %c0_63] : memref<18x18x128xbf16, #tpu.memory_space<vmem>>, vector<16x16x128xbf16>
    tpu.vector_store %arg12[%c1_61, %c1_62, %c0_63], %50 {strides = array<i32>} : memref<18x18x128xbf16, #tpu.memory_space<vmem>>, vector<16x16x128xbf16>,
    %c0_64 = arith.constant 0 : index
    %c0_65 = arith.constant 0 : index
    %c0_66 = arith.constant 0 : index
    %54 = vector.load %arg12[%c0_64, %c0_65, %c0_66] : memref<18x18x128xbf16, #tpu.memory_space<vmem>>, vector<16x16x128xbf16>
    %55 = vector.shape_cast %54 : vector<16x16x128xbf16> to vector<256x128xbf16>
    %c0_67 = arith.constant 0 : index
    %c0_68 = arith.constant 0 : index
    %56 = vector.load %arg14[%c0_67, %c0_68] : memref<256x1152xbf16, #tpu.memory_space<vmem>>, vector<256x128xbf16>
    tpu.vector_store %arg14[%c0_67, %c0_68], %55 {strides = array<i32>} : memref<256x1152xbf16, #tpu.memory_space<vmem>>, vector<256x128xbf16>,
    %c0_69 = arith.constant 0 : index
    %c1_70 = arith.constant 1 : index
    %c0_71 = arith.constant 0 : index
    %57 = vector.load %arg12[%c0_69, %c1_70, %c0_71] : memref<18x18x128xbf16, #tpu.memory_space<vmem>>, vector<16x16x128xbf16>
    %58 = vector.shape_cast %57 : vector<16x16x128xbf16> to vector<256x128xbf16>
    %c0_72 = arith.constant 0 : index
    %c128_73 = arith.constant 128 : index
    %59 = vector.load %arg14[%c0_72, %c128_73] : memref<256x1152xbf16, #tpu.memory_space<vmem>>, vector<256x128xbf16>
    tpu.vector_store %arg14[%c0_72, %c128_73], %58 {strides = array<i32>} : memref<256x1152xbf16, #tpu.memory_space<vmem>>, vector<256x128xbf16>,
    %c0_74 = arith.constant 0 : index
    %c2_75 = arith.constant 2 : index
    %c0_76 = arith.constant 0 : index
    %60 = vector.load %arg12[%c0_74, %c2_75, %c0_76] : memref<18x18x128xbf16, #tpu.memory_space<vmem>>, vector<16x16x128xbf16>
    %61 = vector.shape_cast %60 : vector<16x16x128xbf16> to vector<256x128xbf16>
    %c0_77 = arith.constant 0 : index
    %c256_78 = arith.constant 256 : index
    %62 = vector.load %arg14[%c0_77, %c256_78] : memref<256x1152xbf16, #tpu.memory_space<vmem>>, vector<256x128xbf16>
    tpu.vector_store %arg14[%c0_77, %c256_78], %61 {strides = array<i32>} : memref<256x1152xbf16, #tpu.memory_space<vmem>>, vector<256x128xbf16>,
    %c1_79 = arith.constant 1 : index
    %c0_80 = arith.constant 0 : index
    %c0_81 = arith.constant 0 : index
    %63 = vector.load %arg12[%c1_79, %c0_80, %c0_81] : memref<18x18x128xbf16, #tpu.memory_space<vmem>>, vector<16x16x128xbf16>
    %64 = vector.shape_cast %63 : vector<16x16x128xbf16> to vector<256x128xbf16>
    %c0_82 = arith.constant 0 : index
    %c384_83 = arith.constant 384 : index
    %65 = vector.load %arg14[%c0_82, %c384_83] : memref<256x1152xbf16, #tpu.memory_space<vmem>>, vector<256x128xbf16>
    tpu.vector_store %arg14[%c0_82, %c384_83], %64 {strides = array<i32>} : memref<256x1152xbf16, #tpu.memory_space<vmem>>, vector<256x128xbf16>,
    %c1_84 = arith.constant 1 : index
    %c1_85 = arith.constant 1 : index
    %c0_86 = arith.constant 0 : index
    %66 = vector.load %arg12[%c1_84, %c1_85, %c0_86] : memref<18x18x128xbf16, #tpu.memory_space<vmem>>, vector<16x16x128xbf16>
    %67 = vector.shape_cast %66 : vector<16x16x128xbf16> to vector<256x128xbf16>
    %c0_87 = arith.constant 0 : index
    %c512_88 = arith.constant 512 : index
    %68 = vector.load %arg14[%c0_87, %c512_88] : memref<256x1152xbf16, #tpu.memory_space<vmem>>, vector<256x128xbf16>
    tpu.vector_store %arg14[%c0_87, %c512_88], %67 {strides = array<i32>} : memref<256x1152xbf16, #tpu.memory_space<vmem>>, vector<256x128xbf16>,
    %c1_89 = arith.constant 1 : index
    %c2_90 = arith.constant 2 : index
    %c0_91 = arith.constant 0 : index
    %69 = vector.load %arg12[%c1_89, %c2_90, %c0_91] : memref<18x18x128xbf16, #tpu.memory_space<vmem>>, vector<16x16x128xbf16>
    %70 = vector.shape_cast %69 : vector<16x16x128xbf16> to vector<256x128xbf16>
    %c0_92 = arith.constant 0 : index
    %c640 = arith.constant 640 : index
    %71 = vector.load %arg14[%c0_92, %c640] : memref<256x1152xbf16, #tpu.memory_space<vmem>>, vector<256x128xbf16>
    tpu.vector_store %arg14[%c0_92, %c640], %70 {strides = array<i32>} : memref<256x1152xbf16, #tpu.memory_space<vmem>>, vector<256x128xbf16>,
    %c2_93 = arith.constant 2 : index
    %c0_94 = arith.constant 0 : index
    %c0_95 = arith.constant 0 : index
    %72 = vector.load %arg12[%c2_93, %c0_94, %c0_95] : memref<18x18x128xbf16, #tpu.memory_space<vmem>>, vector<16x16x128xbf16>
    %73 = vector.shape_cast %72 : vector<16x16x128xbf16> to vector<256x128xbf16>
    %c0_96 = arith.constant 0 : index
    %c768 = arith.constant 768 : index
    %74 = vector.load %arg14[%c0_96, %c768] : memref<256x1152xbf16, #tpu.memory_space<vmem>>, vector<256x128xbf16>
    tpu.vector_store %arg14[%c0_96, %c768], %73 {strides = array<i32>} : memref<256x1152xbf16, #tpu.memory_space<vmem>>, vector<256x128xbf16>,
    %c2_97 = arith.constant 2 : index
    %c1_98 = arith.constant 1 : index
    %c0_99 = arith.constant 0 : index
    %75 = vector.load %arg12[%c2_97, %c1_98, %c0_99] : memref<18x18x128xbf16, #tpu.memory_space<vmem>>, vector<16x16x128xbf16>
    %76 = vector.shape_cast %75 : vector<16x16x128xbf16> to vector<256x128xbf16>
    %c0_100 = arith.constant 0 : index
    %c896 = arith.constant 896 : index
    %77 = vector.load %arg14[%c0_100, %c896] : memref<256x1152xbf16, #tpu.memory_space<vmem>>, vector<256x128xbf16>
    tpu.vector_store %arg14[%c0_100, %c896], %76 {strides = array<i32>} : memref<256x1152xbf16, #tpu.memory_space<vmem>>, vector<256x128xbf16>,
    %c2_101 = arith.constant 2 : index
    %c2_102 = arith.constant 2 : index
    %c0_103 = arith.constant 0 : index
    %78 = vector.load %arg12[%c2_101, %c2_102, %c0_103] : memref<18x18x128xbf16, #tpu.memory_space<vmem>>, vector<16x16x128xbf16>
    %79 = vector.shape_cast %78 : vector<16x16x128xbf16> to vector<256x128xbf16>
    %c0_104 = arith.constant 0 : index
    %c1024 = arith.constant 1024 : index
    %80 = vector.load %arg14[%c0_104, %c1024] : memref<256x1152xbf16, #tpu.memory_space<vmem>>, vector<256x128xbf16>
    tpu.vector_store %arg14[%c0_104, %c1024], %79 {strides = array<i32>} : memref<256x1152xbf16, #tpu.memory_space<vmem>>, vector<256x128xbf16>,
    %c0_105 = arith.constant 0 : index
    %c0_106 = arith.constant 0 : index
    %81 = vector.load %arg14[%c0_105, %c0_106] : memref<256x1152xbf16, #tpu.memory_space<vmem>>, vector<256x1152xbf16>
    %c0_107 = arith.constant 0 : index
    %c0_108 = arith.constant 0 : index
    %82 = vector.load %arg6[%c0_107, %c0_108] : memref<1152x256xbf16, #tpu.memory_space<vmem>>, vector<1152x256xbf16>
    %cst_109 = arith.constant dense<0.000000e+00> : vector<256x256xf32>
    %83 = tpu.matmul %81, %82, %cst_109 {dimension_numbers = #tpu.dot_dimension_numbers<[1], [0], [0], [1], [0, 0, 1, 1], [], []>} : vector<256x1152xbf16>, vector<1152x256xbf16>, vector<256x256xf32> -> vector<256x256xf32>
    %c0_110 = arith.constant 0 : index
    %c0_111 = arith.constant 0 : index
    %84 = vector.load %arg7[%c0_110, %c0_111] : memref<1x256xf32, #tpu.memory_space<vmem>>, vector<1x256xf32>
    %85 = vector.broadcast %84 : vector<1x256xf32> to vector<256x256xf32>
    %86 = arith.addf %83, %85 : vector<256x256xf32>
    %cst_112 = arith.constant 0.000000e+00 : f32
    %87 = vector.broadcast %cst_112 : f32 to vector<256x256xf32>
    %88 = arith.maximumf %86, %87 : vector<256x256xf32>
    %89 = arith.truncf %88 : vector<256x256xf32> to vector<256x256xbf16>
    %90 = tpu.transpose %89, [1, 0] : vector<256x256xbf16> -> vector<256x256xbf16>
    %c0_113 = arith.constant 0 : index
    %c0_114 = arith.constant 0 : index
    %91 = vector.load %arg8[%c0_113, %c0_114] : memref<10x256xbf16, #tpu.memory_space<vmem>>, vector<10x256xbf16>
    %cst_115 = arith.constant dense<0.000000e+00> : vector<10x256xf32>
    %92 = tpu.matmul %91, %90, %cst_115 {dimension_numbers = #tpu.dot_dimension_numbers<[1], [0], [0], [1], [0, 0, 1, 1], [], []>} : vector<10x256xbf16>, vector<256x256xbf16>, vector<10x256xf32> -> vector<10x256xf32>
    %c0_116 = arith.constant 0 : index
    %c0_117 = arith.constant 0 : index
    %93 = vector.load %arg9[%c0_116, %c0_117] : memref<10x1xf32, #tpu.memory_space<vmem>>, vector<10x1xf32>
    %94 = vector.broadcast %93 : vector<10x1xf32> to vector<10x256xf32>
    %95 = arith.addf %92, %94 : vector<10x256xf32>
    %c0_118 = arith.constant 0 : index
    %c0_119 = arith.constant 0 : index
    %c0_120 = arith.constant 0 : index
    %96 = vector.load %arg10[%c0_118, %c0_119, %c0_120] : memref<1x10x256xf32, #tpu.memory_space<vmem>>, vector<1x10x256xf32>
    %97 = vector.shape_cast %96 : vector<1x10x256xf32> to vector<10x256xf32>
    %98 = vector.shape_cast %95 : vector<10x256xf32> to vector<1x10x256xf32>
    tpu.vector_store %arg10[%c0_118, %c0_119, %c0_120], %98 {strides = array<i32>} : memref<1x10x256xf32, #tpu.memory_space<vmem>>, vector<1x10x256xf32>,
    return
  }
  func.func @transform_0(%arg0: i32) -> (i32, i32, i32) {
    %c0_i32 = arith.constant 0 : i32
    %c0_i32_0 = arith.constant 0 : i32
    %c0_i32_1 = arith.constant 0 : i32
    return %arg0, %c0_i32, %c0_i32_0 : i32, i32, i32
  }
  func.func @transform_1(%arg0: i32) -> (i32, i32) {
    %c0_i32 = arith.constant 0 : i32
    %c0_i32_0 = arith.constant 0 : i32
    %c0_i32_1 = arith.constant 0 : i32
    return %c0_i32, %c0_i32_0 : i32, i32
  }
  func.func @transform_2(%arg0: i32) -> (i32, i32) {
    %c0_i32 = arith.constant 0 : i32
    %c0_i32_0 = arith.constant 0 : i32
    %c0_i32_1 = arith.constant 0 : i32
    return %c0_i32, %c0_i32_0 : i32, i32
  }
  func.func @transform_3(%arg0: i32) -> (i32, i32) {
    %c0_i32 = arith.constant 0 : i32
    %c0_i32_0 = arith.constant 0 : i32
    %c0_i32_1 = arith.constant 0 : i32
    return %c0_i32, %c0_i32_0 : i32, i32
  }
  func.func @transform_4(%arg0: i32) -> (i32, i32) {
    %c0_i32 = arith.constant 0 : i32
    %c0_i32_0 = arith.constant 0 : i32
    %c0_i32_1 = arith.constant 0 : i32
    return %c0_i32, %c0_i32_0 : i32, i32
  }
  func.func @transform_5(%arg0: i32) -> (i32, i32) {
    %c0_i32 = arith.constant 0 : i32
    %c0_i32_0 = arith.constant 0 : i32
    %c0_i32_1 = arith.constant 0 : i32
    return %c0_i32, %c0_i32_0 : i32, i32
  }
  func.func @transform_6(%arg0: i32) -> (i32, i32) {
    %c0_i32 = arith.constant 0 : i32
    %c0_i32_0 = arith.constant 0 : i32
    %c0_i32_1 = arith.constant 0 : i32
    return %c0_i32, %c0_i32_0 : i32, i32
  }
  func.func @transform_7(%arg0: i32) -> (i32, i32) {
    %c0_i32 = arith.constant 0 : i32
    %c0_i32_0 = arith.constant 0 : i32
    %c0_i32_1 = arith.constant 0 : i32
    return %c0_i32, %c0_i32_0 : i32, i32
  }
  func.func @transform_8(%arg0: i32) -> (i32, i32) {
    %c0_i32 = arith.constant 0 : i32
    %c0_i32_0 = arith.constant 0 : i32
    %c0_i32_1 = arith.constant 0 : i32
    return %c0_i32, %c0_i32_0 : i32, i32
  }
  func.func @transform_9(%arg0: i32) -> (i32, i32, i32) {
    %c0_i32 = arith.constant 0 : i32
    %c0_i32_0 = arith.constant 0 : i32
    %c0_i32_1 = arith.constant 0 : i32
    return %arg0, %c0_i32, %c0_i32_0 : i32, i32, i32
  }
}

</mosaic_0001>

<bundles_post_ra>
// kernel: simple_iic_net.1
= control target key start
LH: loop header
LB: loop body
LE: loop exit
PB: predicated region body
PF: predicated region fallthrough
CT: control target
= control target key end

     0   :  { %s12699_s30 = smov 0   ;;  %s15853_s0 = inlined_call_operand.vmem [shape: bf16[2,256,18], index: 0, kind: input, shape index: {}]   ;;  %s15854_s1 = inlined_call_operand.vmem [shape: bf16[18,64], index: 1, kind: input, shape index: {}]   ;;  %s15855_s2 = inlined_call_operand.vmem [shape: f32[1,64], index: 2, kind: input, shape index: {}]   ;;  %s15856_s3 = inlined_call_operand.vmem [shape: bf16[576,128], index: 3, kind: input, shape index: {}]   ;;  %s15857_s4 = inlined_call_operand.vmem [shape: f32[1,128], index: 4, kind: input, shape index: {}]   ;;  %s15858_s5 = inlined_call_operand.vmem [shape: bf16[1152,256], index: 5, kind: input, shape index: {}]   ;;  %s15859_s6 = inlined_call_operand.vmem [shape: f32[1,256], index: 6, kind: input, shape index: {}]   ;;  %s15860_s7 = inlined_call_operand.vmem [shape: bf16[10,256], index: 7, kind: input, shape index: {}]   ;;  %s15861_s8 = inlined_call_operand.vmem [shape: f32[10,1], index: 8, kind: input, shape index: {}]   ;;  %s15862_s9 = inlined_call_operand.vmem [shape: f32[2,10,256], index: 9, kind: output, shape index: {}]  }
   0x1 LB: > { %s10838_s10 = sadd.s32 4294967295, %s12645_s30   ;;  %p10842_p0 = scmp.ge.s32.totalorder %s12645_s30, 1  ;;  %s12645_s30 = sphi %s12699_s30, %s19_s30  }
   0x2   : > { %p287_p1 = scmp.lt.s32.totalorder %s12645_s30, 3 }
   0x4   : > { %p288_p2 = pnand %p10842_p0, %p287_p1 }
   0x6   : > { %291 = sbr.rel (%p288_p2) target bundleno = 1983 (0x7bf), region = 56 }
   0xd   : > { %v12268_v0 = vld [vmem:[%s15854_s1] sm:$0xff]   ;;  %v12269_v1 = vld [vmem:[%s15854_s1 + $0x8] ss:$0 sps:$4 sm:$0x11]   ;;  %vm514_vm0 = vcmask 1040384   ;;  %p323_p3 = scmp.lt.s32.totalorder %s10838_s10, 1 }
   0xe   : > { %11859 = vmatprep.subr.bf16.mxu1 %v12268_v0  ;;  %vm863_vm1 = vsmask.f32 256  ;;  %v516_v2 = vsel %vm514_vm0, %v12269_v1, 0  ;;  %v15873_v3 = vmov 0  ;;  %vm465_vm3 = vcmask 146432   ;;  %s12648_s25 = smov 64  }
   0xf   : > { %11860 = vmatpush3.bf16.msra.mxu1 %v12268_v0  ;;  %s15986_s10 = smov (!%p323_p3, %s10838_s10), 1  ;;  %vm12716_vm2 = vmand %vm514_vm0, %vm863_vm1  ;;  %vm730_vm4 = vcmask 516096   ;;  %vm727_vm5 = vcmask 519168   ;;  %v15863_v20 = vmov 0   ;;  %v12927_v32 = vld [vmem:[%s15855_s2] ss:$0 sm:$0xff] }
  0x10   : > { %12255 = vmatprep.subr.msk.bf16.mxu1 %vm514_vm0, %v12269_v1  ;;  %v15874_v3 = vsel %vm12716_vm2, 4294967295, %v15873_v3  ;;  %s11531_s15 = sshll.u32 %s15986_s10, 7  ;;  %735 = vst.msk [vmem:[#allocation2 + $0x18] sm:$0xf] %vm727_vm5, %v15863_v20  ;;  %728 = vst.msk [vmem:[#allocation2] sm:$0xf] %vm727_vm5, %v15863_v20  ;;  %12266 = vset.pattern.permute.xlu0 %v15863_v20 }
  0x11   : > { %15875 = vst [vmem:[#allocation6_spill] sm:$0xff] %v15874_v3  ;;  %s12724_s18 = scalar_lea.vmem %s15853_s0, %s11531_s15  ;;  %729 = vst.msk [vmem:[#allocation2 + $0x4] sm:$0xf] %vm727_vm5, %v15863_v20  ;;  %12267 = vset.pattern.permute.xlu1 %v15863_v20  ;;  %vm1497_vm6 = vsmask.f32 3328  ;;  %vm2093_vm14 = vcmask 1042432  }
  0x12   : > { %v12270_v4 = vld [vmem:[%s12724_s18] sm:$0xff]   ;;  %v12271_v5 = vld [vmem:[%s12724_s18 + $0x8] sm:$0xff]   ;;  %v12272_v6 = vld [vmem:[%s12724_s18 + $0x10] sm:$0xff]   ;;  %731 = vst.msk [vmem:[#allocation2 + $0x8] sm:$0x1] %vm730_vm4, %v15863_v20  ;;  %vm2094_vm15 = vcmask 1046532  }
  0x13   : > { %11862 = vmatpush3.bf16.msra.mxu1 %v516_v2  ;;  %11863 = vmatprep.mubr.msk.bf16.mxu1 %vm465_vm3, %v12270_v4  ;;  %v12273_v7 = vld [vmem:[%s12724_s18 + $0x18] sm:$0xff]   ;;  %v12274_v8 = vld [vmem:[%s12724_s18 + $0x20] sm:$0xff]   ;;  %v12275_v9 = vld [vmem:[%s12724_s18 + $0x28] sm:$0xff]   ;;  %732 = vst.msk [vmem:[#allocation2 + $0xc] sm:$0xf] %vm727_vm5, %v15863_v20  ;;  %s11532_s20 = sshll.u32 %s15986_s10, 5 }
  0x14   : > { %v12276_v10 = vld [vmem:[%s12724_s18 + $0x30] sm:$0xff]   ;;  %v12277_v11 = vld [vmem:[%s12724_s18 + $0x38] sm:$0xff]   ;;  %v12278_v12 = vld [vmem:[%s12724_s18 + $0x40] sm:$0xff]   ;;  %733 = vst.msk [vmem:[#allocation2 + $0x10] sm:$0xf] %vm727_vm5, %v15863_v20  ;;  %s332_s23 = scalar_lea.vmem %s15862_s9, %s11532_s20 }
  0x15   : > { %v12279_v13 = vld [vmem:[%s12724_s18 + $0x48] sm:$0xff]   ;;  %v12280_v14 = vld [vmem:[%s12724_s18 + $0x50] sm:$0xff]   ;;  %v12281_v15 = vld [vmem:[%s12724_s18 + $0x58] sm:$0xff]   ;;  %734 = vst.msk [vmem:[#allocation2 + $0x14] sm:$0x1] %vm730_vm4, %v15863_v20 }
  0x16   : > { %11864 = vmatmul.mubr.msk.bf16.vlgmr.msra.gmra.mrb[0].mxu1 %vm465_vm3, %v12271_v5  ;;  %v12282_v16 = vld [vmem:[%s12724_s18 + $0x60] sm:$0xff]   ;;  %v12283_v17 = vld [vmem:[%s12724_s18 + $0x68] sm:$0xff]   ;;  %v12284_v18 = vld [vmem:[%s12724_s18 + $0x70] sm:$0xff]   ;;  %736 = vst.msk [vmem:[#allocation2 + $0x1c] sm:$0xf] %vm727_vm5, %v15863_v20 }
  0x17   : > { %11867 = vmatprep.mubr.msk.bf16.mxu1 %vm465_vm3, %v12272_v6  ;;  %v12285_v19 = vld [vmem:[%s12724_s18 + $0x78] sm:$0xff]   ;;  %737 = vst.msk [vmem:[#allocation2 + $0x20] sm:$0x1] %vm730_vm4, %v15863_v20  ;;  %740 = vst.msk [vmem:[#allocation2 + $0x2c] sm:$0x1] %vm730_vm4, %v15863_v20 }
  0x18   : > { %738 = vst.msk [vmem:[#allocation2 + $0x24] sm:$0xf] %vm727_vm5, %v15863_v20  ;;  %739 = vst.msk [vmem:[#allocation2 + $0x28] sm:$0xf] %vm727_vm5, %v15863_v20  ;;  %v1449_v21 = vld [vmem:[#allocation2] sm:$0xf] }
  0x19   : > { %741 = vst.msk [vmem:[#allocation2 + $0x30] sm:$0xf] %vm727_vm5, %v15863_v20  ;;  %742 = vst.msk [vmem:[#allocation2 + $0x34] sm:$0xf] %vm727_vm5, %v15863_v20  ;;  %v1450_v22 = vld [vmem:[#allocation2 + $0x4] sm:$0xf] }
  0x1a   : > { %743 = vst.msk [vmem:[#allocation2 + $0x38] sm:$0x1] %vm730_vm4, %v15863_v20  ;;  %746 = vst.msk [vmem:[#allocation2 + $0x44] sm:$0x1] %vm730_vm4, %v15863_v20  ;;  %v1501_v23 = vshrl.u32 %v1449_v21, 16  ;;  %v1504_v24 = vshll.u32 %v1449_v21, 16 }
  0x1b   : > { %744 = vst.msk [vmem:[#allocation2 + $0x3c] sm:$0xf] %vm727_vm5, %v15863_v20  ;;  %745 = vst.msk [vmem:[#allocation2 + $0x40] sm:$0xf] %vm727_vm5, %v15863_v20  ;;  %v1510_v25 = vshll.u32 %v1450_v22, 16  ;;  %v1514_v26 = vshrl.u32 %v1450_v22, 16 }
  0x1c   : > { %747 = vst.msk [vmem:[#allocation2 + $0x48] sm:$0xf] %vm727_vm5, %v15863_v20  ;;  %748 = vst.msk [vmem:[#allocation2 + $0x4c] sm:$0xf] %vm727_vm5, %v15863_v20  ;;  %v1503_v27 = vrot.slane %v1501_v23, 4  ;;  %v1506_v28 = vrot.slane %v1504_v24, 5 }
  0x1d   : > { %749 = vst.msk [vmem:[#allocation2 + $0x50] sm:$0x1] %vm730_vm4, %v15863_v20  ;;  %752 = vst.msk [vmem:[#allocation2 + $0x5c] sm:$0x1] %vm730_vm4, %v15863_v20  ;;  %v12922_v29 = vrot.slane %v1510_v25, 5  ;;  %v1516_v30 = vrot.slane %v1514_v26, 4 }
  0x1e   : > { %11868 = vmatmul.mubr.msk.bf16.gmra.mrb[4].mxu1 %vm465_vm3, %v12273_v7  ;;  %750 = vst.msk [vmem:[#allocation2 + $0x54] sm:$0xf] %vm727_vm5, %v15863_v20  ;;  %751 = vst.msk [vmem:[#allocation2 + $0x58] sm:$0xf] %vm727_vm5, %v15863_v20  ;;  %v1451_v31 = vld [vmem:[#allocation2 + $0x8] sm:$0x1]  ;;  %v1507_v33 = vor.u32 %v1506_v28, %v1503_v27 }
  0x1f   : > { %11871 = vmatprep.mubr.msk.bf16.mxu1 %vm465_vm3, %v12274_v8  ;;  %753 = vst.msk [vmem:[#allocation2 + $0x60] sm:$0xf] %vm727_vm5, %v15863_v20  ;;  %754 = vst.msk [vmem:[#allocation2 + $0x64] sm:$0xf] %vm727_vm5, %v15863_v20  ;;  %v1517_v34 = vor.u32 %v1516_v30, %v12922_v29  ;;  %v1520_v35 = vshll.u32 %v1451_v31, 16 }
  0x20   : > { %755 = vst.msk [vmem:[#allocation2 + $0x68] sm:$0x1] %vm730_vm4, %v15863_v20  ;;  %758 = vst.msk [vmem:[#allocation2 + $0x74] sm:$0x1] %vm730_vm4, %v15863_v20  ;;  %vm1498_vm7 = vsmask.f32 7440 }
  0x21   : > { %756 = vst.msk [vmem:[#allocation2 + $0x6c] sm:$0xf] %vm727_vm5, %v15863_v20  ;;  %757 = vst.msk [vmem:[#allocation2 + $0x70] sm:$0xf] %vm727_vm5, %v15863_v20  ;;  %v12932_v41 = vrot.slane %v1507_v33, 4  ;;  %v12935_v45 = vrot.slane %v1517_v34, 4 }
  0x22   : > { %759 = vst.msk [vmem:[#allocation2 + $0x78] sm:$0xf] %vm727_vm5, %v15863_v20  ;;  %760 = vst.msk [vmem:[#allocation2 + $0x7c] sm:$0xf] %vm727_vm5, %v15863_v20  ;;  %v12937_v46 = vrot.slane %v1520_v35, 5 }
  0x23   : > { %761 = vst.msk [vmem:[#allocation2 + $0x80] sm:$0x1] %vm730_vm4, %v15863_v20  ;;  %764 = vst.msk [vmem:[#allocation2 + $0x8c] sm:$0x1] %vm730_vm4, %v15863_v20  ;;  %vm864_vm9 = vsmask.f32 4368 }
  0x24   : > { %762 = vst.msk [vmem:[#allocation2 + $0x84] sm:$0xf] %vm727_vm5, %v15863_v20  ;;  %763 = vst.msk [vmem:[#allocation2 + $0x88] sm:$0xf] %vm727_vm5, %v15863_v20  ;;  %vm1188_vm10 = vsmask.f32 7938 }
  0x25   : > { %765 = vst.msk [vmem:[#allocation2 + $0x90] sm:$0xf] %vm727_vm5, %v15863_v20  ;;  %766 = vst.msk [vmem:[#allocation2 + $0x94] sm:$0xf] %vm727_vm5, %v15863_v20  ;;  %v1199_v6 = vld [vmem:[#allocation2 + $0x18] sm:$0xf] }
  0x26   : > { %11872 = vmatmul.mubr.msk.bf16.gmra.mrb[8].mxu1 %vm465_vm3, %v12275_v9  ;;  %767 = vst.msk [vmem:[#allocation2 + $0x98] sm:$0x1] %vm730_vm4, %v15863_v20  ;;  %770 = vst.msk [vmem:[#allocation2 + $0xa4] sm:$0x1] %vm730_vm4, %v15863_v20  ;;  %v1203_v23 = vld [vmem:[#allocation2 + $0x20] sm:$0x1] }
  0x27   : > { %11875 = vmatprep.mubr.msk.bf16.mxu1 %vm465_vm3, %v12276_v10  ;;  %768 = vst.msk [vmem:[#allocation2 + $0x9c] sm:$0xf] %vm727_vm5, %v15863_v20  ;;  %769 = vst.msk [vmem:[#allocation2 + $0xa0] sm:$0xf] %vm727_vm5, %v15863_v20  ;;  %v1196_v30 = vld [vmem:[#allocation2 + $0x14] sm:$0x1] }
  0x28   : > { %771 = vst.msk [vmem:[#allocation2 + $0xa8] sm:$0xf] %vm727_vm5, %v15863_v20  ;;  %772 = vst.msk [vmem:[#allocation2 + $0xac] sm:$0xf] %vm727_vm5, %v15863_v20 }
  0x29   : > { %773 = vst.msk [vmem:[#allocation2 + $0xb0] sm:$0x1] %vm730_vm4, %v15863_v20  ;;  %776 = vst.msk [vmem:[#allocation2 + $0xbc] sm:$0x1] %vm730_vm4, %v15863_v20 }
  0x2a   : > { %774 = vst.msk [vmem:[#allocation2 + $0xb4] sm:$0xf] %vm727_vm5, %v15863_v20  ;;  %775 = vst.msk [vmem:[#allocation2 + $0xb8] sm:$0xf] %vm727_vm5, %v15863_v20 }
  0x2b   : > { %777 = vst.msk [vmem:[#allocation2 + $0xc0] sm:$0xf] %vm727_vm5, %v15863_v20  ;;  %778 = vst.msk [vmem:[#allocation2 + $0xc4] sm:$0xf] %vm727_vm5, %v15863_v20 }
  0x2c   : > { %779 = vst.msk [vmem:[#allocation2 + $0xc8] sm:$0x1] %vm730_vm4, %v15863_v20  ;;  %782 = vst.msk [vmem:[#allocation2 + $0xd4] sm:$0x1] %vm730_vm4, %v15863_v20 }
  0x2d   : > { %780 = vst.msk [vmem:[#allocation2 + $0xcc] sm:$0xf] %vm727_vm5, %v15863_v20  ;;  %781 = vst.msk [vmem:[#allocation2 + $0xd0] sm:$0xf] %vm727_vm5, %v15863_v20 }
  0x2e   : > { %11876 = vmatmul.mubr.msk.bf16.gmra.mrb[12].mxu1 %vm465_vm3, %v12277_v11  ;;  %5227 = vst [vmem:[#allocation3] sm:$0xf] %v15863_v20  ;;  %5228 = vst [vmem:[#allocation3 + $0x4] sm:$0xf] %v15863_v20 }
  0x2f   : > { %11879 = vmatprep.mubr.msk.bf16.mxu1 %vm465_vm3, %v12278_v12  ;;  %5229 = vst [vmem:[#allocation3 + $0x8] sm:$0x1] %v15863_v20  ;;  %5230 = vst [vmem:[#allocation3 + $0xc] sm:$0xf] %v15863_v20  ;;  %v15880_v12 = vmov 0 }
  0x30   : > { %5231 = vst [vmem:[#allocation3 + $0x10] sm:$0xf] %v15863_v20  ;;  %5232 = vst [vmem:[#allocation3 + $0x14] sm:$0x1] %v15863_v20 }
  0x31   : > { %5233 = vst [vmem:[#allocation3 + $0x18] sm:$0xf] %v15863_v20  ;;  %5234 = vst [vmem:[#allocation3 + $0x1c] sm:$0xf] %v15863_v20 }
  0x32   : > { %5235 = vst [vmem:[#allocation3 + $0x20] sm:$0x1] %v15863_v20  ;;  %5236 = vst [vmem:[#allocation3 + $0x24] sm:$0xf] %v15863_v20 }
  0x33   : > { %5237 = vst [vmem:[#allocation3 + $0x28] sm:$0xf] %v15863_v20  ;;  %5238 = vst [vmem:[#allocation3 + $0x2c] sm:$0x1] %v15863_v20 }
  0x34   : > { %5239 = vst [vmem:[#allocation3 + $0x30] sm:$0xf] %v15863_v20  ;;  %5240 = vst [vmem:[#allocation3 + $0x34] sm:$0xf] %v15863_v20 }
  0x35   : > { %5241 = vst [vmem:[#allocation3 + $0x38] sm:$0x1] %v15863_v20  ;;  %5242 = vst [vmem:[#allocation3 + $0x3c] sm:$0xf] %v15863_v20 }
  0x36   : > { %11880 = vmatmul.mubr.msk.bf16.gmra.mrb[16].mxu1 %vm465_vm3, %v12279_v13  ;;  %5243 = vst [vmem:[#allocation3 + $0x40] sm:$0xf] %v15863_v20  ;;  %5244 = vst [vmem:[#allocation3 + $0x44] sm:$0x1] %v15863_v20 }
  0x37   : > { %11883 = vmatprep.mubr.msk.bf16.mxu1 %vm465_vm3, %v12280_v14  ;;  %5245 = vst [vmem:[#allocation3 + $0x48] sm:$0xf] %v15863_v20  ;;  %5246 = vst [vmem:[#allocation3 + $0x4c] sm:$0xf] %v15863_v20 }
  0x38   : > { %5247 = vst [vmem:[#allocation3 + $0x50] sm:$0x1] %v15863_v20  ;;  %5248 = vst [vmem:[#allocation3 + $0x54] sm:$0xf] %v15863_v20 }
  0x39   : > { %5249 = vst [vmem:[#allocation3 + $0x58] sm:$0xf] %v15863_v20  ;;  %5250 = vst [vmem:[#allocation3 + $0x5c] sm:$0x1] %v15863_v20 }
  0x3a   : > { %5251 = vst [vmem:[#allocation3 + $0x60] sm:$0xf] %v15863_v20  ;;  %5252 = vst [vmem:[#allocation3 + $0x64] sm:$0xf] %v15863_v20 }
  0x3b   : > { %5253 = vst [vmem:[#allocation3 + $0x68] sm:$0x1] %v15863_v20  ;;  %5254 = vst [vmem:[#allocation3 + $0x6c] sm:$0xf] %v15863_v20 }
  0x3c   : > { %5255 = vst [vmem:[#allocation3 + $0x70] sm:$0xf] %v15863_v20  ;;  %5256 = vst [vmem:[#allocation3 + $0x74] sm:$0x1] %v15863_v20 }
  0x3d   : > { %5257 = vst [vmem:[#allocation3 + $0x78] sm:$0xf] %v15863_v20  ;;  %5258 = vst [vmem:[#allocation3 + $0x7c] sm:$0xf] %v15863_v20 }
  0x3e   : > { %11884 = vmatmul.mubr.msk.bf16.gmra.mrb[20].mxu1 %vm465_vm3, %v12281_v15  ;;  %5259 = vst [vmem:[#allocation3 + $0x80] sm:$0x1] %v15863_v20  ;;  %5260 = vst [vmem:[#allocation3 + $0x84] sm:$0xf] %v15863_v20  ;;  %v1190_v15 = vld [vmem:[#allocation2 + $0xc] sm:$0xf] }
  0x3f   : > { %11887 = vmatprep.mubr.msk.bf16.mxu1 %vm465_vm3, %v12282_v16  ;;  %5261 = vst [vmem:[#allocation3 + $0x88] sm:$0xf] %v15863_v20  ;;  %5262 = vst [vmem:[#allocation3 + $0x8c] sm:$0x1] %v15863_v20 }
  0x40   : > { %5263 = vst [vmem:[#allocation3 + $0x90] sm:$0xf] %v15863_v20  ;;  %5264 = vst [vmem:[#allocation3 + $0x94] sm:$0xf] %v15863_v20 }
  0x41   : > { %5265 = vst [vmem:[#allocation3 + $0x98] sm:$0x1] %v15863_v20  ;;  %5266 = vst [vmem:[#allocation3 + $0x9c] sm:$0xf] %v15863_v20 }
  0x42   : > { %5267 = vst [vmem:[#allocation3 + $0xa0] sm:$0xf] %v15863_v20  ;;  %5268 = vst [vmem:[#allocation3 + $0xa4] sm:$0x1] %v15863_v20 }
  0x43   : > { %5269 = vst [vmem:[#allocation3 + $0xa8] sm:$0xf] %v15863_v20  ;;  %5270 = vst [vmem:[#allocation3 + $0xac] sm:$0xf] %v15863_v20 }
  0x44   : > { %5271 = vst [vmem:[#allocation3 + $0xb0] sm:$0x1] %v15863_v20  ;;  %5272 = vst [vmem:[#allocation3 + $0xb4] sm:$0xf] %v15863_v20 }
  0x45   : > { %5273 = vst [vmem:[#allocation3 + $0xb8] sm:$0xf] %v15863_v20  ;;  %5274 = vst [vmem:[#allocation3 + $0xbc] sm:$0x1] %v15863_v20 }
  0x46   : > { %11888 = vmatmul.mubr.msk.bf16.gmra.mrb[24].mxu1 %vm465_vm3, %v12283_v17  ;;  %5275 = vst [vmem:[#allocation3 + $0xc0] sm:$0xf] %v15863_v20  ;;  %5276 = vst [vmem:[#allocation3 + $0xc4] sm:$0xf] %v15863_v20 }
  0x47   : > { %11891 = vmatprep.mubr.msk.bf16.mxu1 %vm465_vm3, %v12284_v18  ;;  %5277 = vst [vmem:[#allocation3 + $0xc8] sm:$0x1] %v15863_v20  ;;  %5278 = vst [vmem:[#allocation3 + $0xcc] sm:$0xf] %v15863_v20 }
  0x48   : > { %5279 = vst [vmem:[#allocation3 + $0xd0] sm:$0xf] %v15863_v20  ;;  %5280 = vst [vmem:[#allocation3 + $0xd4] sm:$0x1] %v15863_v20 }
  0x49   : > { %vm12940_vm8 = vmor %vm1497_vm6, %vm1498_vm7 }
  0x4a   : > { %v1513_v56 = vsel %vm12940_vm8, %v12932_v41, %v12922_v29  ;;  %v1523_v57 = vsel %vm12940_vm8, %v12935_v45, %v12937_v46  ;;  %vm12955_vm11 = vmand %vm727_vm5, %vm1188_vm10  ;;  %v12302_v29 = vld [vmem:[%s15856_s3 + $0x40] sm:$0xff]  }
  0x4b   : > { %vm12962_vm12 = vmor %vm863_vm1, %vm864_vm9  ;;  %v12303_v41 = vld [vmem:[%s15856_s3] sm:$0xff]   ;;  %11615 = vmatprep.subr.bf16.mxu1 %v12302_v29 }
  0x4c   : > { %v15881_v12 = vsel %vm12962_vm12, 4294967295, %v15880_v12  ;;  %vm12968_vm13 = vmand %vm730_vm4, %vm863_vm1  ;;  %11616 = vmatpush3.bf16.msra.mxu1 %v12303_v41  ;;  %vm1432_vm1 = vcmask 523264   ;;  %vm5682_vm4 = vcmask 1043456  }
  0x4d   : > { %15882 = vst [vmem:[#allocation7_spill] sm:$0xff] %v15881_v12  ;;  %vm13361_vm0 = vmor %vm2093_vm14, %vm2094_vm15 }
  0x4e   : > { %11892 = vmatmul.mubr.msk.bf16.gmra.mrb[28].mxu1 %vm465_vm3, %v12285_v19  ;;  %v12317_v19 = vld [vmem:[%s15856_s3 + $0x78] sm:$0xff]   ;;  %vm1980_vm3 = vcmask 1048064  }
  0xe9   : > { %v11865_v36 = vpop.f32.mrb[0].mxu1 }
  0xea   : > { %v561_v37 = vadd.f32 %v11865_v36, %v12927_v32  ;;  %v552_v38 = vpop.f32.mrb[1].mxu1 }
  0xeb   : > { %v553_v39 = vadd.f32 %v12927_v32, %v552_v38  ;;  %v11866_v40 = vpop.f32.mrb[2].mxu1 }
  0xec   : > { %v681_v42 = vmax.f32 %v561_v37, 0.0  ;;  %v564_v43 = vadd.f32 %v11866_v40, %v12927_v32  ;;  %v555_v44 = vpop.f32.mrb[3].mxu1 }
  0xed   : > { %v679_v47 = vmax.f32 %v553_v39, 0.0  ;;  %v556_v48 = vadd.f32 %v12927_v32, %v555_v44 }
  0xee   : > { %v11535_v50 = vpack.c.bf16 %v681_v42, %v681_v42  ;;  %v682_v51 = vmax.f32 %v564_v43, 0.0 }
  0xef   : > { %v11533_v52 = vpack.c.bf16 %v679_v47, %v679_v47  ;;  %v680_v53 = vmax.f32 %v556_v48, 0.0 }
  0xf0   : > { %v884_v54 = vshrl.u32 %v11535_v50, 16  ;;  %v11536_v55 = vpack.c.bf16 %v682_v51, %v682_v51  ;;  %v887_v58 = vshll.u32 %v11535_v50, 16 }
  0xf1   : > { %v867_v59 = vshrl.u32 %v11533_v52, 16  ;;  %v870_v60 = vshll.u32 %v11533_v52, 16  ;;  %v11534_v61 = vpack.c.bf16 %v680_v53, %v680_v53  ;;  %v11869_v62 = vpop.f32.mrb[4].mxu1 }
  0xf2   : > { %v886_v63 = vrot.slane %v884_v54, 7  ;;  %v892_v0 = vshrl.u32 %v11536_v55, 16  ;;  %v895_v1 = vshll.u32 %v11536_v55, 16  ;;  %v577_v2 = vadd.f32 %v11869_v62, %v12927_v32  ;;  %v568_v4 = vpop.f32.mrb[5].mxu1  ;;  %v1213_v55 = vld [vmem:[#allocation2 + $0x30] sm:$0xf] }
  0xf3   : > { %v869_v7 = vrot.slane %v867_v59, 7  ;;  %v875_v8 = vshrl.u32 %v11534_v61, 16  ;;  %v878_v9 = vshll.u32 %v11534_v61, 16  ;;  %v569_v10 = vadd.f32 %v12927_v32, %v568_v4  ;;  %v11870_v11 = vpop.f32.mrb[6].mxu1 }
  0xf4   : > { %v889_v13 = vor.u32 %v887_v58, %v886_v63  ;;  %v890_v14 = vrot.slane %v886_v63, 4  ;;  %v894_v16 = vrot.slane %v892_v0, 7  ;;  %v685_v17 = vmax.f32 %v577_v2, 0.0  ;;  %v571_v18 = vpop.f32.mrb[7].mxu1  ;;  %v1206_v0 = vld [vmem:[#allocation2 + $0x24] sm:$0xf] }
  0xf5   : > { %v872_v21 = vor.u32 %v870_v60, %v869_v7  ;;  %v873_v22 = vrot.slane %v869_v7, 4  ;;  %v877_v24 = vrot.slane %v875_v8, 7  ;;  %v683_v25 = vmax.f32 %v569_v10, 0.0 }
  0xf6   : > { %v1200_v26 = vsel %vm12955_vm11, %v889_v13, %v1199_v6  ;;  %v897_v27 = vor.u32 %v895_v1, %v894_v16  ;;  %v899_v28 = vrot.slane %v894_v16, 4  ;;  %v11539_v31 = vpack.c.bf16 %v685_v17, %v685_v17 }
  0xf7   : > { %1201 = vst [vmem:[#allocation2 + $0x18] sm:$0xf] %v1200_v26  ;;  %v1191_v33 = vsel %vm12955_vm11, %v872_v21, %v1190_v15  ;;  %v880_v34 = vor.u32 %v878_v9, %v877_v24  ;;  %v882_v35 = vrot.slane %v877_v24, 4  ;;  %v11537_v36 = vpack.c.bf16 %v683_v25, %v683_v25  ;;  %v1217_v21 = vld [vmem:[#allocation2 + $0x38] sm:$0x1] }
  0xf8   : > { %1192 = vst [vmem:[#allocation2 + $0xc] sm:$0xf] %v1191_v33  ;;  %v898_v37 = vsel %vm12962_vm12, %v890_v14, %v897_v27  ;;  %v1204_v38 = vsel %vm12968_vm13, %v899_v28, %v1203_v23  ;;  %v918_v39 = vshrl.u32 %v11539_v31, 16  ;;  %v921_v40 = vshll.u32 %v11539_v31, 16  ;;  %v1220_v33 = vld [vmem:[#allocation2 + $0x3c] sm:$0xf] }
  0xf9   : > { %1202 = vst.msk [vmem:[#allocation2 + $0x1c] sm:$0xf] %vm727_vm5, %v898_v37  ;;  %1205 = vst [vmem:[#allocation2 + $0x20] sm:$0x1] %v1204_v38  ;;  %v881_v42 = vsel %vm12962_vm12, %v873_v22, %v880_v34  ;;  %v1197_v43 = vsel %vm12968_vm13, %v882_v35, %v1196_v30  ;;  %v901_v44 = vshrl.u32 %v11537_v36, 16  ;;  %v904_v47 = vshll.u32 %v11537_v36, 16 }
  0xfa   : > { %v11873_v48 = vpop.f32.mrb[8].mxu1  ;;  %1193 = vst.msk [vmem:[#allocation2 + $0x10] sm:$0xf] %vm727_vm5, %v881_v42  ;;  %1198 = vst [vmem:[#allocation2 + $0x14] sm:$0x1] %v1197_v43  ;;  %v12986_v50 = vrot.slane %v918_v39, 7  ;;  %v580_v51 = vadd.f32 %v11870_v11, %v12927_v32  ;;  %v572_v52 = vadd.f32 %v12927_v32, %v571_v18  ;;  %v13004_v61 = vcombine.low %v1513_v56, %v1523_v57 }
  0xfb   : > { %v593_v53 = vadd.f32 %v11873_v48, %v12927_v32  ;;  %v584_v54 = vpop.f32.mrb[9].mxu1  ;;  %v12991_v58 = vrot.slane %v901_v44, 7  ;;  %v1210_v22 = vld [vmem:[#allocation2 + $0x2c] sm:$0x1] }
  0xfc   : > { %v585_v59 = vadd.f32 %v12927_v32, %v584_v54  ;;  %v11874_v60 = vpop.f32.mrb[10].mxu1  ;;  %v923_v62 = vor.u32 %v921_v40, %v12986_v50  ;;  %v924_v63 = vrot.slane %v12986_v50, 4  ;;  %v686_v1 = vmax.f32 %v580_v51, 0.0  ;;  %v1227_v51 = vld [vmem:[#allocation2 + $0x48] sm:$0xf] }
  0xfd   : > { %v684_v2 = vmax.f32 %v572_v52, 0.0  ;;  %v587_v4 = vpop.f32.mrb[11].mxu1  ;;  %v906_v6 = vor.u32 %v904_v47, %v12991_v58  ;;  %v907_v7 = vrot.slane %v12991_v58, 4  ;;  %v689_v45 = vmax.f32 %v593_v53, 0.0 }
  0xfe   : > { %v687_v46 = vmax.f32 %v585_v59, 0.0  ;;  %v1214_v56 = vsel %vm12955_vm11, %v923_v62, %v1213_v55  ;;  %v11540_v57 = vpack.c.bf16 %v686_v1, %v686_v1  ;;  %v596_v9 = vadd.f32 %v11874_v60, %v12927_v32 }
  0xff   : > { %v11538_v8 = vpack.c.bf16 %v684_v2, %v684_v2  ;;  %1215 = vst [vmem:[#allocation2 + $0x30] sm:$0xf] %v1214_v56  ;;  %v1207_v10 = vsel %vm12955_vm11, %v906_v6, %v1206_v0  ;;  %v11543_v11 = vpack.c.bf16 %v689_v45, %v689_v45  ;;  %v588_v14 = vadd.f32 %v12927_v32, %v587_v4 }
 0x100   : > { %v11541_v13 = vpack.c.bf16 %v687_v46, %v687_v46  ;;  %1208 = vst [vmem:[#allocation2 + $0x24] sm:$0xf] %v1207_v10  ;;  %v926_v15 = vshrl.u32 %v11540_v57, 16  ;;  %v929_v16 = vshll.u32 %v11540_v57, 16  ;;  %v12286_v28 = vld [vmem:[#allocation2 + $0x18] sm:$0xff]   ;;  %v690_v34 = vmax.f32 %v596_v9, 0.0 }
 0x101   : > { %v909_v17 = vshrl.u32 %v11538_v8, 16  ;;  %v912_v18 = vshll.u32 %v11538_v8, 16  ;;  %v952_v23 = vshrl.u32 %v11543_v11, 16  ;;  %v955_v24 = vshll.u32 %v11543_v11, 16  ;;  %v11877_v27 = vpop.f32.mrb[12].mxu1  ;;  %v12287_v37 = vld [vmem:[#allocation2 + $0xc] sm:$0xff]   ;;  %2402 = vrot.lane.b32.xlu1 %v12286_v28, %s12648_s25 }
 0x102   : > { %v935_v25 = vshrl.u32 %v11541_v13, 16  ;;  %v938_v26 = vshll.u32 %v11541_v13, 16  ;;  %v928_v30 = vrot.slane %v926_v15, 7  ;;  %v688_v35 = vmax.f32 %v588_v14, 0.0  ;;  %v600_v36 = vpop.f32.mrb[13].mxu1  ;;  %2400 = vrot.lane.b32.xlu0 %v12287_v37, %s12648_s25 }
 0x103   : > { %v911_v31 = vrot.slane %v909_v17, 7  ;;  %v13022_v38 = vrot.slane %v952_v23, 7  ;;  %v609_v40 = vadd.f32 %v11877_v27, %v12927_v32  ;;  %v601_v42 = vadd.f32 %v12927_v32, %v600_v36  ;;  %v11878_v43 = vpop.f32.mrb[14].mxu1  ;;  %v1231_v17 = vld [vmem:[#allocation2 + $0x50] sm:$0x1]  ;;  %v12304_v23 = vld [vmem:[%s15856_s3 + $0x48] sm:$0xff]  }
 0x104   : > { %v13024_v39 = vrot.slane %v935_v25, 7  ;;  %v931_v44 = vor.u32 %v929_v16, %v928_v30  ;;  %v933_v47 = vrot.slane %v928_v30, 4  ;;  %v603_v52 = vpop.f32.mrb[15].mxu1  ;;  %v11544_v4 = vpack.c.bf16 %v690_v34, %v690_v34  ;;  %v12305_v30 = vld [vmem:[%s15856_s3 + $0x8] sm:$0xff]   ;;  %v1224_v36 = vld [vmem:[#allocation2 + $0x44] sm:$0x1]  ;;  %11617 = vmatprep.subr.bf16.mxu1 %v12304_v23 }
 0x105   : > { %v914_v48 = vor.u32 %v912_v18, %v911_v31  ;;  %v916_v50 = vrot.slane %v911_v31, 4  ;;  %v957_v53 = vor.u32 %v955_v24, %v13022_v38  ;;  %v958_v54 = vrot.slane %v13022_v38, 4  ;;  %v1241_v37 = vld [vmem:[#allocation2 + $0x60] sm:$0xf]  ;;  %11618 = vmatpush3.bf16.msra.mxu1 %v12305_v30  ;;  %v13569_v3 = vld [vmem:[#allocation2 + $0x14] sm:$0x1] }
 0x106   : > { %v940_v55 = vor.u32 %v938_v26, %v13024_v39  ;;  %v941_v58 = vrot.slane %v13024_v39, 4  ;;  %v932_v59 = vsel %vm12962_vm12, %v924_v63, %v931_v44  ;;  %v1218_v60 = vsel %vm12968_vm13, %v933_v47, %v1217_v21  ;;  %1932 = vrot.lane.b32.xlu0 %v13004_v61, %s12648_s25  ;;  %v1234_v47 = vld [vmem:[#allocation2 + $0x54] sm:$0xf] }
 0x107   : > { %v915_v62 = vsel %vm12962_vm12, %v907_v7, %v914_v48  ;;  %v1211_v0 = vsel %vm12968_vm13, %v916_v50, %v1210_v22  ;;  %v13042_v1 = vld [vmem:[#allocation2 + $0x24] sm:$0xe]  ;;  %1216 = vst.msk [vmem:[#allocation2 + $0x34] sm:$0xf] %vm727_vm5, %v932_v59  ;;  %1219 = vst [vmem:[#allocation2 + $0x38] sm:$0x1] %v1218_v60  ;;  %v1228_v63 = vsel %vm12955_vm11, %v957_v53, %v1227_v51 }
 0x108   : > { %15885 = vst [vmem:[#allocation8_spill] sm:$0xff] %v13042_v1  ;;  %1209 = vst.msk [vmem:[#allocation2 + $0x28] sm:$0xf] %vm727_vm5, %v915_v62  ;;  %v1221_v2 = vsel %vm12955_vm11, %v940_v55, %v1220_v33  ;;  %v11542_v6 = vpack.c.bf16 %v688_v35, %v688_v35  ;;  %v693_v45 = vmax.f32 %v609_v40, 0.0  ;;  %v691_v46 = vmax.f32 %v601_v42, 0.0 }
 0x109   : > { %1212 = vst [vmem:[#allocation2 + $0x2c] sm:$0x1] %v1211_v0  ;;  %1229 = vst [vmem:[#allocation2 + $0x48] sm:$0xf] %v1228_v63  ;;  %v612_v29 = vadd.f32 %v11878_v43, %v12927_v32  ;;  %v960_v41 = vshrl.u32 %v11544_v4, 16  ;;  %v963_v56 = vshll.u32 %v11544_v4, 16  ;;  %v13055_v14 = vadd.f32 %v12927_v32, %v603_v52 }
 0x10a   : > { %1222 = vst [vmem:[#allocation2 + $0x3c] sm:$0xf] %v1221_v2  ;;  %v943_v57 = vshrl.u32 %v11542_v6, 16  ;;  %v946_v8 = vshll.u32 %v11542_v6, 16  ;;  %v11881_v9 = vpop.f32.mrb[16].mxu1  ;;  %v11547_v10 = vpack.c.bf16 %v693_v45, %v693_v45  ;;  %v11545_v11 = vpack.c.bf16 %v691_v46, %v691_v46 }
 0x10b   : > { %v694_v13 = vmax.f32 %v612_v29, 0.0  ;;  %v616_v15 = vpop.f32.mrb[17].mxu1  ;;  %v962_v16 = vrot.slane %v960_v41, 7  ;;  %v625_v21 = vadd.f32 %v11881_v9, %v12927_v32  ;;  %v13082_v60 = vld [vmem:[#allocation2 + $0xc] sm:$0xf]  ;;  %v692_v29 = vmax.f32 %v13055_v14, 0.0 }
 0x10c   : > { %v945_v18 = vrot.slane %v943_v57, 7  ;;  %v13059_v22 = vadd.f32 %v12927_v32, %v616_v15  ;;  %v11882_v61 = vpop.f32.mrb[18].mxu1  ;;  %v986_v24 = vshrl.u32 %v11547_v10, 16  ;;  %v989_v25 = vshll.u32 %v11547_v10, 16 }
 0x10d   : > { %v969_v26 = vshrl.u32 %v11545_v11, 16  ;;  %v972_v27 = vshll.u32 %v11545_v11, 16  ;;  %v619_v28 = vpop.f32.mrb[19].mxu1  ;;  %v965_v31 = vor.u32 %v963_v56, %v962_v16  ;;  %v967_v33 = vrot.slane %v962_v16, 4 }
 0x10e   : > { %v948_v34 = vor.u32 %v946_v8, %v945_v18  ;;  %v950_v35 = vrot.slane %v945_v18, 4  ;;  %v988_v43 = vrot.slane %v986_v24, 7  ;;  %v11548_v48 = vpack.c.bf16 %v694_v13, %v694_v13  ;;  %v1245_v13 = vld [vmem:[#allocation2 + $0x68] sm:$0x1] }
 0x10f   : > { %v13067_v40 = vld [vmem:[#allocation2 + $0x28] sm:$0xf]  ;;  %v13071_v44 = vrot.slane %v969_v26, 7  ;;  %v628_v50 = vadd.f32 %v11882_v61, %v12927_v32  ;;  %v966_v53 = vsel %vm12962_vm12, %v958_v54, %v965_v31  ;;  %v1232_v55 = vsel %vm12968_vm13, %v967_v33, %v1231_v17  ;;  %v1238_v33 = vld [vmem:[#allocation2 + $0x5c] sm:$0x1] }
 0x110   : > { %15886 = vst [vmem:[#allocation9_spill] sm:$0xff] %v13067_v40  ;;  %v13069_v42 = vld [vmem:[#allocation2 + $0x2c] sm:$0x1]  ;;  %v15865_v51 = vrot.slane %v13067_v40, 5  ;;  %v12288_v59 = vld [vmem:[#allocation2 + $0x24] sm:$0xff]   ;;  %v949_v62 = vsel %vm12962_vm12, %v941_v58, %v948_v34  ;;  %v1225_v38 = vsel %vm12968_vm13, %v950_v35, %v1224_v36  ;;  %v991_v0 = vor.u32 %v989_v25, %v988_v43  ;;  %v12289_v58 = vld [vmem:[#allocation2 + $0x30] sm:$0xff]  }
 0x111   : > { %15887 = vst [vmem:[#allocation10_spill] sm:$0xff] %v13069_v42  ;;  %1230 = vst.msk [vmem:[#allocation2 + $0x4c] sm:$0xf] %vm727_vm5, %v966_v53  ;;  %v992_v63 = vrot.slane %v988_v43, 4  ;;  %v974_v2 = vor.u32 %v972_v27, %v13071_v44  ;;  %v975_v4 = vrot.slane %v13071_v44, 4  ;;  %v994_v39 = vshrl.u32 %v11548_v48, 16  ;;  %2404 = vrot.lane.b32.xlu0 %v12288_v59, %s12648_s25 }
 0x112   : > { %1233 = vst [vmem:[#allocation2 + $0x50] sm:$0x1] %v1232_v55  ;;  %v13093_v54 = vrot.slane %v15865_v51, 4  ;;  %1223 = vst.msk [vmem:[#allocation2 + $0x40] sm:$0xf] %vm727_vm5, %v949_v62  ;;  %v13099_v6 = vpop.f32.mrb[20].mxu1  ;;  %v1242_v45 = vsel %vm12955_vm11, %v991_v0, %v1241_v37  ;;  %v11546_v15 = vpack.c.bf16 %v692_v29, %v692_v29  ;;  %v620_v17 = vadd.f32 %v12927_v32, %v619_v28 }
 0x113   : > { %1226 = vst [vmem:[#allocation2 + $0x44] sm:$0x1] %v1225_v38  ;;  %v997_v46 = vshll.u32 %v11548_v48, 16  ;;  %v697_v41 = vmax.f32 %v625_v21, 0.0  ;;  %v13104_v56 = vpop.f32.mrb[21].mxu1  ;;  %v1235_v57 = vsel %vm12955_vm11, %v974_v2, %v1234_v47  ;;  %v996_v8 = vrot.slane %v994_v39, 7 }
 0x114   : > { %15888 = vst [vmem:[#allocation11_spill] sm:$0xff] %v13093_v54  ;;  %1243 = vst [vmem:[#allocation2 + $0x60] sm:$0xf] %v1242_v45  ;;  %v695_v9 = vmax.f32 %v13059_v22, 0.0  ;;  %v698_v10 = vmax.f32 %v628_v50, 0.0  ;;  %v13109_v11 = vpop.f32.mrb[22].mxu1 }
 0x115   : > { %1236 = vst [vmem:[#allocation2 + $0x54] sm:$0xf] %v1235_v57  ;;  %v11551_v16 = vpack.c.bf16 %v697_v41, %v697_v41  ;;  %v1525_v14 = vshrl.u32 %v13082_v60, 16  ;;  %v13113_v18 = vpop.f32.mrb[23].mxu1  ;;  %v999_v21 = vor.u32 %v997_v46, %v996_v8  ;;  %v1001_v61 = vrot.slane %v996_v8, 4  ;;  %2406 = vrot.lane.b32.xlu0 %v12289_v58, %s12648_s25  ;;  %v12306_v22 = vld [vmem:[%s15856_s3 + $0x50] sm:$0xff]  }
 0x116   : > { %v11549_v23 = vpack.c.bf16 %v695_v9, %v695_v9  ;;  %v11552_v24 = vpack.c.bf16 %v698_v10, %v698_v10  ;;  %v977_v25 = vshrl.u32 %v11546_v15, 16  ;;  %v980_v26 = vshll.u32 %v11546_v15, 16  ;;  %v1255_v34 = vld [vmem:[#allocation2 + $0x78] sm:$0xf]  ;;  %11619 = vmatprep.subr.bf16.mxu1 %v12306_v22  ;;  %v12307_v37 = vld [vmem:[%s15856_s3 + $0x10] sm:$0xff]  }
 0x117   : > { %v1020_v27 = vshrl.u32 %v11551_v16, 16  ;;  %v1023_v30 = vshll.u32 %v11551_v16, 16  ;;  %v1000_v28 = vsel %vm12962_vm12, %v992_v63, %v999_v21  ;;  %v1246_v31 = vsel %vm12968_vm13, %v1001_v61, %v1245_v13  ;;  %v1248_v48 = vld [vmem:[#allocation2 + $0x6c] sm:$0xf]  ;;  %11620 = vmatpush3.bf16.msra.mxu1 %v12307_v37  ;;  %v1259_v46 = vld [vmem:[#allocation2 + $0x80] sm:$0x1] }
 0x118   : > { %v1003_v35 = vshrl.u32 %v11549_v23, 16  ;;  %v1006_v36 = vshll.u32 %v11549_v23, 16  ;;  %1244 = vst.msk [vmem:[#allocation2 + $0x64] sm:$0xf] %vm727_vm5, %v1000_v28  ;;  %1247 = vst [vmem:[#allocation2 + $0x68] sm:$0x1] %v1246_v31 }
 0x119   : > { %v979_v43 = vrot.slane %v977_v25, 7  ;;  %v1022_v47 = vrot.slane %v1020_v27, 7  ;;  %v1028_v50 = vshrl.u32 %v11552_v24, 16  ;;  %v1031_v53 = vshll.u32 %v11552_v24, 16  ;;  %v12290_v0 = vld [vmem:[#allocation2 + $0x3c] sm:$0xff]   ;;  %v13130_v63 = vpop.f32.mrb[24].mxu1 }
 0x11a   : > { %v13127_v55 = vrot.slane %v1003_v35, 7  ;;  %v696_v59 = vmax.f32 %v620_v17, 0.0  ;;  %v1527_v62 = vrot.slane %v1525_v14, 4  ;;  %v1528_v38 = vshll.u32 %v13082_v60, 16  ;;  %v1453_v29 = vld [vmem:[#allocation2 + $0x10] sm:$0xf]  ;;  %2408 = vrot.lane.b32.xlu0 %v12290_v0, %s12648_s25 }
 0x11b   : > { %v982_v2 = vor.u32 %v980_v26, %v979_v43  ;;  %v984_v39 = vrot.slane %v979_v43, 4  ;;  %v1025_v58 = vor.u32 %v1023_v30, %v1022_v47  ;;  %v1026_v45 = vrot.slane %v1022_v47, 4  ;;  %v13132_v41 = vpop.f32.mrb[25].mxu1  ;;  %v12291_v60 = vld [vmem:[#allocation2 + $0x48] sm:$0xff]   ;;  %v1454_v14 = vld [vmem:[#allocation2 + $0x14] sm:$0x1] }
 0x11c   : > { %v1008_v57 = vor.u32 %v1006_v36, %v13127_v55  ;;  %v1009_v8 = vrot.slane %v13127_v55, 4  ;;  %v1030_v9 = vrot.slane %v1028_v50, 7  ;;  %v11550_v10 = vpack.c.bf16 %v696_v59, %v696_v59  ;;  %v13137_v13 = vpop.f32.mrb[26].mxu1  ;;  %v1455_v30 = vld [vmem:[#allocation2 + $0x18] sm:$0xf] }
 0x11d   : > { %v983_v15 = vsel %vm12962_vm12, %v975_v4, %v982_v2  ;;  %v1239_v16 = vsel %vm12968_vm13, %v984_v39, %v1238_v33  ;;  %v1256_v17 = vsel %vm12955_vm11, %v1025_v58, %v1255_v34  ;;  %v1530_v21 = vrot.slane %v1528_v38, 5  ;;  %v13147_v61 = vpop.f32.mrb[27].mxu1  ;;  %v1252_v34 = vld [vmem:[#allocation2 + $0x74] sm:$0x1]  ;;  %v1457_v39 = vld [vmem:[#allocation2 + $0x20] sm:$0x1] }
 0x11e   : > { %1237 = vst.msk [vmem:[#allocation2 + $0x58] sm:$0xf] %vm727_vm5, %v983_v15  ;;  %1240 = vst [vmem:[#allocation2 + $0x5c] sm:$0x1] %v1239_v16  ;;  %v1249_v44 = vsel %vm12955_vm11, %v1008_v57, %v1248_v48  ;;  %v1033_v23 = vor.u32 %v1031_v53, %v1030_v9  ;;  %v1035_v24 = vrot.slane %v1030_v9, 4  ;;  %v1011_v4 = vshrl.u32 %v11550_v10, 16  ;;  %2410 = vrot.lane.b32.xlu0 %v12291_v60, %s12648_s25 }
 0x11f   : > { %1257 = vst [vmem:[#allocation2 + $0x78] sm:$0xf] %v1256_v17  ;;  %1250 = vst [vmem:[#allocation2 + $0x6c] sm:$0xf] %v1249_v44  ;;  %v1014_v22 = vshll.u32 %v11550_v10, 16  ;;  %v1531_v25 = vor.u32 %v1530_v21, %v1527_v62  ;;  %v1534_v26 = vshll.u32 %v1453_v29, 16  ;;  %v641_v47 = vadd.f32 %v13099_v6, %v12927_v32 }
 0x120   : > { %v1538_v27 = vshrl.u32 %v1453_v29, 16  ;;  %v1034_v28 = vsel %vm12962_vm12, %v1026_v45, %v1033_v23  ;;  %v1260_v31 = vsel %vm12968_vm13, %v1035_v24, %v1259_v46  ;;  %v1013_v33 = vrot.slane %v1011_v4, 7  ;;  %v1456_v48 = vld [vmem:[#allocation2 + $0x1c] sm:$0xf]  ;;  %v13567_v51 = vld [vmem:[#allocation2 + $0x10] sm:$0xf] }
 0x121   : > { %v1544_v35 = vshll.u32 %v1454_v14, 16  ;;  %1258 = vst.msk [vmem:[#allocation2 + $0x7c] sm:$0xf] %vm727_vm5, %v1034_v28  ;;  %1261 = vst [vmem:[#allocation2 + $0x80] sm:$0x1] %v1260_v31  ;;  %v1532_v36 = vrot.slane %v1531_v25, 4  ;;  %v633_v23 = vadd.f32 %v12927_v32, %v13104_v56  ;;  %v644_v24 = vadd.f32 %v13109_v11, %v12927_v32 }
 0x122   : > { %v1536_v37 = vrot.slane %v1534_v26, 5  ;;  %v1540_v43 = vrot.slane %v1538_v27, 4  ;;  %v1016_v50 = vor.u32 %v1014_v22, %v1013_v33  ;;  %v1018_v53 = vrot.slane %v1013_v33, 4  ;;  %v13160_v62 = vpop.f32.mrb[28].mxu1  ;;  %v12308_v6 = vld [vmem:[%s15856_s3 + $0x58] sm:$0xff]   ;;  %v12293_v28 = vld [vmem:[#allocation2 + $0x60] sm:$0xff]  }
 0x123   : > { %v1546_v55 = vrot.slane %v1544_v35, 5  ;;  %v1549_v59 = vshrl.u32 %v1455_v30, 16  ;;  %v701_v2 = vmax.f32 %v641_v47, 0.0  ;;  %v1552_v58 = vshll.u32 %v1455_v30, 16  ;;  %v13164_v45 = vpop.f32.mrb[29].mxu1  ;;  %v12309_v60 = vld [vmem:[%s15856_s3 + $0x18] sm:$0xff]   ;;  %11621 = vmatprep.subr.bf16.mxu1 %v12308_v6 }
 0x124   : > { %v1537_v38 = vsel %vm12940_vm8, %v1532_v36, %v1536_v37  ;;  %v1541_v0 = vor.u32 %v1540_v43, %v1536_v37  ;;  %v1017_v46 = vsel %vm12962_vm12, %v1009_v8, %v1016_v50  ;;  %v1253_v29 = vsel %vm12968_vm13, %v1018_v53, %v1252_v34  ;;  %v13173_v10 = vpop.f32.mrb[30].mxu1  ;;  %11622 = vmatpush3.bf16.msra.mxu1 %v12309_v60  ;;  %v1458_v30 = vld [vmem:[#allocation2 + $0x24] sm:$0xf]  ;;  %v1269_v43 = vld [vmem:[#allocation2 + $0x90] sm:$0xf] }
 0x125   : > { %v1551_v57 = vrot.slane %v1549_v59, 4  ;;  %v1558_v9 = vshll.u32 %v1456_v48, 16  ;;  %1251 = vst.msk [vmem:[#allocation2 + $0x70] sm:$0xf] %vm727_vm5, %v1017_v46  ;;  %1254 = vst [vmem:[#allocation2 + $0x74] sm:$0x1] %v1253_v29  ;;  %v11555_v16 = vpack.c.bf16 %v701_v2, %v701_v2  ;;  %v636_v37 = vadd.f32 %v12927_v32, %v13113_v18 }
 0x126   : > { %v1542_v15 = vrot.slane %v1541_v0, 4  ;;  %v1554_v17 = vrot.slane %v1552_v58, 5  ;;  %v1562_v14 = vshrl.u32 %v1456_v48, 16  ;;  %v12292_v21 = vld [vmem:[#allocation2 + $0x54] sm:$0xff]   ;;  %v1568_v44 = vshll.u32 %v1457_v39, 16  ;;  %v13183_v4 = vpop.f32.mrb[31].mxu1 }
 0x127   : > { %v1560_v8 = vrot.slane %v1558_v9, 5  ;;  %v1054_v25 = vshrl.u32 %v11555_v16, 16  ;;  %v1057_v26 = vshll.u32 %v11555_v16, 16  ;;  %2412 = vrot.lane.b32.xlu0 %v12292_v21, %s12648_s25  ;;  %v699_v56 = vmax.f32 %v633_v23, 0.0  ;;  %v1459_v2 = vld [vmem:[#allocation2 + $0x28] sm:$0xf] }
 0x128   : > { %v1547_v22 = vsel %vm12940_vm8, %v1542_v15, %v1546_v55  ;;  %v1555_v27 = vor.u32 %v1554_v17, %v1551_v57  ;;  %v1564_v33 = vrot.slane %v1562_v14, 4  ;;  %v1570_v34 = vrot.slane %v1568_v44, 5  ;;  %v1262_v17 = vld [vmem:[#allocation2 + $0x84] sm:$0xf]  ;;  %v1460_v21 = vld [vmem:[#allocation2 + $0x2c] sm:$0x1] }
 0x129   : > { %v10931_v31 = vcombine.low %v1537_v38, %v1547_v22  ;;  %v1056_v35 = vrot.slane %v1054_v25, 7  ;;  %v702_v11 = vmax.f32 %v644_v24, 0.0  ;;  %v11553_v48 = vpack.c.bf16 %v699_v56, %v699_v56  ;;  %v12295_v25 = vld [vmem:[#allocation2 + $0x78] sm:$0xff]  }
 0x12a   : > { %v1556_v36 = vrot.slane %v1555_v27, 4  ;;  %v1565_v47 = vor.u32 %v1564_v33, %v1560_v8  ;;  %v1573_v50 = vshrl.u32 %v1458_v30, 16  ;;  %v1576_v53 = vshll.u32 %v1458_v30, 16  ;;  %v12354_v12 = vld [vmem:[#allocation2 + $0x78] sm:$0xff]  }
 0x12b   : > { %1934 = vrot.lane.b32.xlu1 %v10931_v31, %s12648_s25  ;;  %v1059_v55 = vor.u32 %v1057_v26, %v1056_v35  ;;  %v1060_v59 = vrot.slane %v1056_v35, 4  ;;  %v11556_v0 = vpack.c.bf16 %v702_v11, %v702_v11  ;;  %2414 = vrot.lane.b32.xlu0 %v12293_v28, %s12648_s25  ;;  %v1037_v58 = vshrl.u32 %v11553_v48, 16  ;;  %v12310_v26 = vld [vmem:[%s15856_s3 + $0x60] sm:$0xff]   ;;  %v1273_v28 = vld [vmem:[#allocation2 + $0x98] sm:$0x1]  ;;  %3433 = vst.msk [vmem:[#allocation4 + $0x158] sm:$0xff] %vm1432_vm1, %v12354_v12 }
 0x12c   : > { %v1561_v38 = vsel %vm12940_vm8, %v1556_v36, %v1560_v8  ;;  %v1566_v39 = vrot.slane %v1565_v47, 4  ;;  %v1040_v6 = vshll.u32 %v11553_v48, 16  ;;  %v700_v18 = vmax.f32 %v636_v37, 0.0  ;;  %v12294_v60 = vld [vmem:[#allocation2 + $0x6c] sm:$0xff]   ;;  %11623 = vmatprep.subr.bf16.mxu1 %v12310_v26  ;;  %v1464_v26 = vld [vmem:[#allocation2 + $0x3c] sm:$0xf] }
 0x12d   : > { %v1270_v46 = vsel %vm12955_vm11, %v1059_v55, %v1269_v43  ;;  %v1062_v29 = vshrl.u32 %v11556_v0, 16  ;;  %v1065_v57 = vshll.u32 %v11556_v0, 16  ;;  %v1575_v9 = vrot.slane %v1573_v50, 4  ;;  %v1461_v50 = vld [vmem:[#allocation2 + $0x30] sm:$0xf] }
 0x12e   : > { %1271 = vst [vmem:[#allocation2 + $0x90] sm:$0xf] %v1270_v46  ;;  %v1571_v15 = vsel %vm12940_vm8, %v1566_v39, %v1570_v34  ;;  %v1039_v16 = vrot.slane %v1037_v58, 7  ;;  %v11554_v14 = vpack.c.bf16 %v700_v18, %v700_v18  ;;  %v1578_v8 = vrot.slane %v1576_v53, 5  ;;  %v12311_v34 = vld [vmem:[%s15856_s3 + $0x20] sm:$0xff]  }
 0x12f   : > { %v10932_v44 = vcombine.low %v1561_v38, %v1571_v15  ;;  %v1064_v23 = vrot.slane %v1062_v29, 7  ;;  %v1582_v24 = vshll.u32 %v1459_v2, 16  ;;  %v1586_v22 = vshrl.u32 %v1459_v2, 16  ;;  %2416 = vrot.lane.b32.xlu0 %v12294_v60, %s12648_s25  ;;  %11624 = vmatpush3.bf16.msra.mxu1 %v12311_v34  ;;  %v1266_v38 = vld [vmem:[#allocation2 + $0x8c] sm:$0x1] }
 0x130   : > { %v1042_v27 = vor.u32 %v1040_v6, %v1039_v16  ;;  %v1043_v30 = vrot.slane %v1039_v16, 4  ;;  %v1045_v31 = vshrl.u32 %v11554_v14, 16  ;;  %v1048_v33 = vshll.u32 %v11554_v14, 16  ;;  %v1462_v39 = vld [vmem:[#allocation2 + $0x34] sm:$0xf] }
 0x131   : > { %1936 = vrot.lane.b32.xlu1 %v10932_v44, %s12648_s25  ;;  %v1067_v56 = vor.u32 %v1065_v57, %v1064_v23  ;;  %v1069_v35 = vrot.slane %v1064_v23, 4  ;;  %v1579_v36 = vor.u32 %v1578_v8, %v1575_v9  ;;  %v1584_v11 = vrot.slane %v1582_v24, 5  ;;  %v1463_v29 = vld [vmem:[#allocation2 + $0x38] sm:$0x1] }
 0x132   : > { %v1263_v37 = vsel %vm12955_vm11, %v1042_v27, %v1262_v17  ;;  %v1047_v43 = vrot.slane %v1045_v31, 7  ;;  %v1588_v47 = vrot.slane %v1586_v22, 4  ;;  %v1592_v48 = vshll.u32 %v1460_v21, 16 }
 0x133   : > { %1264 = vst [vmem:[#allocation2 + $0x84] sm:$0xf] %v1263_v37  ;;  %v1068_v53 = vsel %vm12962_vm12, %v1060_v59, %v1067_v56  ;;  %v1274_v55 = vsel %vm12968_vm13, %v1069_v35, %v1273_v28  ;;  %v1580_v0 = vrot.slane %v1579_v36, 4  ;;  %v657_v2 = vadd.f32 %v13130_v63, %v12927_v32  ;;  %2418 = vrot.lane.b32.xlu0 %v12295_v25, %s12648_s25  ;;  %v12312_v36 = vld [vmem:[%s15856_s3 + $0x68] sm:$0xff]  }
 0x134   : > { %1272 = vst.msk [vmem:[#allocation2 + $0x94] sm:$0xf] %vm727_vm5, %v1068_v53  ;;  %1275 = vst [vmem:[#allocation2 + $0x98] sm:$0x1] %v1274_v55  ;;  %v1050_v58 = vor.u32 %v1048_v33, %v1047_v43  ;;  %v1052_v6 = vrot.slane %v1047_v43, 4  ;;  %v1589_v18 = vor.u32 %v1588_v47, %v1584_v11  ;;  %v1594_v46 = vrot.slane %v1592_v48, 5  ;;  %11625 = vmatprep.subr.bf16.mxu1 %v12312_v36 }
 0x135   : > { %v1585_v59 = vsel %vm12940_vm8, %v1580_v0, %v1584_v11  ;;  %v705_v57 = vmax.f32 %v657_v2, 0.0  ;;  %v1597_v9 = vshrl.u32 %v1461_v50, 16  ;;  %v1600_v60 = vshll.u32 %v1461_v50, 16  ;;  %v1283_v47 = vld [vmem:[#allocation2 + $0xa8] sm:$0xf] }
 0x136   : > { %v1051_v63 = vsel %vm12962_vm12, %v1043_v30, %v1050_v58  ;;  %v1267_v15 = vsel %vm12968_vm13, %v1052_v6, %v1266_v38  ;;  %v1590_v16 = vrot.slane %v1589_v18, 4  ;;  %v1606_v17 = vshll.u32 %v1462_v39, 16 }
 0x137   : > { %1265 = vst.msk [vmem:[#allocation2 + $0x88] sm:$0xf] %vm727_vm5, %v1051_v63  ;;  %1268 = vst [vmem:[#allocation2 + $0x8c] sm:$0x1] %v1267_v15  ;;  %v11559_v14 = vpack.c.bf16 %v705_v57, %v705_v57  ;;  %v1599_v21 = vrot.slane %v1597_v9, 4  ;;  %v1602_v8 = vrot.slane %v1600_v60, 5  ;;  %v649_v25 = vadd.f32 %v12927_v32, %v13132_v41 }
 0x138   : > { %v1610_v44 = vshrl.u32 %v1462_v39, 16  ;;  %v1595_v23 = vsel %vm12940_vm8, %v1590_v16, %v1594_v46  ;;  %v1608_v24 = vrot.slane %v1606_v17, 5  ;;  %v1616_v22 = vshll.u32 %v1463_v29, 16  ;;  %v1465_v29 = vld [vmem:[#allocation2 + $0x40] sm:$0xf] }
 0x139   : > { %v10933_v27 = vcombine.low %v1585_v59, %v1595_v23  ;;  %v1088_v30 = vshrl.u32 %v11559_v14, 16  ;;  %v1091_v28 = vshll.u32 %v11559_v14, 16  ;;  %v1603_v31 = vor.u32 %v1602_v8, %v1599_v21  ;;  %v1466_v59 = vld [vmem:[#allocation2 + $0x44] sm:$0x1]  ;;  %v12313_v14 = vld [vmem:[%s15856_s3 + $0x28] sm:$0xff]  }
 0x13a   : > { %v1612_v33 = vrot.slane %v1610_v44, 4  ;;  %v1618_v34 = vrot.slane %v1616_v22, 5  ;;  %v703_v56 = vmax.f32 %v649_v25, 0.0  ;;  %v660_v35 = vadd.f32 %v13137_v13, %v12927_v32  ;;  %v1276_v8 = vld [vmem:[#allocation2 + $0x9c] sm:$0xf]  ;;  %11626 = vmatpush3.bf16.msra.mxu1 %v12313_v14 }
 0x13b   : > { %1938 = vrot.lane.b32.xlu1 %v10933_v27, %s12648_s25  ;;  %v13233_v11 = vrot.slane %v1088_v30, 7  ;;  %v1604_v41 = vrot.slane %v1603_v31, 4  ;;  %v652_v37 = vadd.f32 %v12927_v32, %v13147_v61  ;;  %v1621_v43 = vshrl.u32 %v1464_v26, 16  ;;  %v12297_v17 = vld [vmem:[#allocation2 + $0x90] sm:$0xff]  }
 0x13c   : > { %v1613_v48 = vor.u32 %v1612_v33, %v1608_v24  ;;  %v11557_v50 = vpack.c.bf16 %v703_v56, %v703_v56  ;;  %v706_v53 = vmax.f32 %v660_v35, 0.0  ;;  %v1624_v55 = vshll.u32 %v1464_v26, 16  ;;  %v1287_v30 = vld [vmem:[#allocation2 + $0xb0] sm:$0x1] }
 0x13d   : > { %v1093_v13 = vor.u32 %v1091_v28, %v13233_v11  ;;  %v1094_v38 = vrot.slane %v13233_v11, 4  ;;  %v1609_v0 = vsel %vm12940_vm8, %v1604_v41, %v1608_v24  ;;  %v704_v2 = vmax.f32 %v652_v37, 0.0  ;;  %v1280_v11 = vld [vmem:[#allocation2 + $0xa4] sm:$0x1]  ;;  %v1467_v37 = vld [vmem:[#allocation2 + $0x48] sm:$0xf] }
 0x13e   : > { %v1614_v39 = vrot.slane %v1613_v48, 4  ;;  %v1071_v58 = vshrl.u32 %v11557_v50, 16  ;;  %v1074_v6 = vshll.u32 %v11557_v50, 16  ;;  %v11560_v18 = vpack.c.bf16 %v706_v53, %v706_v53  ;;  %v12296_v32 = vld [vmem:[#allocation2 + $0x84] sm:$0xff]   ;;  %v1468_v53 = vld [vmem:[#allocation2 + $0x4c] sm:$0xf] }
 0x13f   : > { %v1284_v61 = vsel %vm12955_vm11, %v1093_v13, %v1283_v47  ;;  %v11558_v46 = vpack.c.bf16 %v704_v2, %v704_v2  ;;  %v1623_v57 = vrot.slane %v1621_v43, 4  ;;  %v1626_v9 = vrot.slane %v1624_v55, 5  ;;  %2420 = vrot.lane.b32.xlu0 %v12296_v32, %s12648_s25  ;;  %v12637_v2 = vld [vmem:[%s15855_s2] ss:$0 sm:$0xff]  ;;  %v12355_v54 = vld [vmem:[#allocation2 + $0x84] sm:$0xff]   ;;  %v12356_v42 = vld [vmem:[#allocation2 + $0x90] sm:$0xff]  }
 0x140   : > { %1285 = vst [vmem:[#allocation2 + $0xa8] sm:$0xf] %v1284_v61  ;;  %v1619_v60 = vsel %vm12940_vm8, %v1614_v39, %v1618_v34  ;;  %v1073_v63 = vrot.slane %v1071_v58, 7  ;;  %v1096_v15 = vshrl.u32 %v11560_v18, 16  ;;  %v1099_v16 = vshll.u32 %v11560_v18, 16  ;;  %v12314_v61 = vld [vmem:[%s15856_s3 + $0x70] sm:$0xff]  }
 0x141   : > { %v10934_v21 = vcombine.low %v1609_v0, %v1619_v60  ;;  %v1079_v44 = vshrl.u32 %v11558_v46, 16  ;;  %v1082_v23 = vshll.u32 %v11558_v46, 16  ;;  %v1627_v24 = vor.u32 %v1626_v9, %v1623_v57  ;;  %v1469_v58 = vld [vmem:[#allocation2 + $0x50] sm:$0x1]  ;;  %11627 = vmatprep.subr.bf16.mxu1 %v12314_v61  ;;  %3434 = vst.msk [vmem:[#allocation4 + $0x180] sm:$0xff] %vm1432_vm1, %v12355_v54  ;;  %3435 = vst.msk [vmem:[#allocation4 + $0x1a8] sm:$0xff] %vm1432_vm1, %v12356_v42 }
 0x142   : > { %v1076_v22 = vor.u32 %v1074_v6, %v1073_v63  ;;  %v1077_v25 = vrot.slane %v1073_v63, 4  ;;  %v1098_v26 = vrot.slane %v1096_v15, 7  ;;  %v1630_v27 = vshll.u32 %v1465_v29, 16  ;;  %v12315_v15 = vld [vmem:[%s15856_s3 + $0x30] sm:$0xff]  }
 0x143   : > { %1940 = vrot.lane.b32.xlu1 %v10934_v21, %s12648_s25  ;;  %v1081_v28 = vrot.slane %v1079_v44, 7  ;;  %v1628_v31 = vrot.slane %v1627_v24, 4  ;;  %v1634_v33 = vshrl.u32 %v1465_v29, 16  ;;  %v1640_v34 = vshll.u32 %v1466_v59, 16  ;;  %2422 = vrot.lane.b32.xlu0 %v12297_v17, %s12648_s25 }
 0x144   : > { %v1277_v56 = vsel %vm12955_vm11, %v1076_v22, %v1276_v8  ;;  %v1101_v35 = vor.u32 %v1099_v16, %v1098_v26  ;;  %v1103_v36 = vrot.slane %v1098_v26, 4  ;;  %v1632_v41 = vrot.slane %v1630_v27, 5  ;;  %v1470_v22 = vld [vmem:[#allocation2 + $0x54] sm:$0xf]  ;;  %11628 = vmatpush3.bf16.msra.mxu1 %v12315_v15 }
 0x145   : > { %1278 = vst [vmem:[#allocation2 + $0x9c] sm:$0xf] %v1277_v56  ;;  %v1084_v43 = vor.u32 %v1082_v23, %v1081_v28  ;;  %v1086_v47 = vrot.slane %v1081_v28, 4  ;;  %v1636_v48 = vrot.slane %v1634_v33, 4  ;;  %v1642_v50 = vrot.slane %v1640_v34, 5  ;;  %11629 = vmatprep.subr.bf16.mxu1 %v12317_v19 }
 0x146   : > { %v1102_v55 = vsel %vm12962_vm12, %v1094_v38, %v1101_v35  ;;  %v1288_v13 = vsel %vm12968_vm13, %v1103_v36, %v1287_v30  ;;  %v1633_v0 = vsel %vm12940_vm8, %v1628_v31, %v1632_v41  ;;  %v673_v39 = vadd.f32 %v12637_v2, %v13160_v62  ;;  %v1297_v30 = vld [vmem:[#allocation2 + $0xc0] sm:$0xf] }
 0x147   : > { %1286 = vst.msk [vmem:[#allocation2 + $0xac] sm:$0xf] %vm727_vm5, %v1102_v55  ;;  %1289 = vst [vmem:[#allocation2 + $0xb0] sm:$0x1] %v1288_v13  ;;  %v1085_v6 = vsel %vm12962_vm12, %v1077_v25, %v1084_v43  ;;  %v1281_v38 = vsel %vm12968_vm13, %v1086_v47, %v1280_v11  ;;  %v1637_v18 = vor.u32 %v1636_v48, %v1632_v41  ;;  %v1645_v32 = vshrl.u32 %v1467_v37, 16 }
 0x148   : > { %1279 = vst.msk [vmem:[#allocation2 + $0xa0] sm:$0xf] %vm727_vm5, %v1085_v6  ;;  %1282 = vst [vmem:[#allocation2 + $0xa4] sm:$0x1] %v1281_v38  ;;  %v709_v62 = vmax.f32 %v673_v39, 0.0  ;;  %v1648_v46 = vshll.u32 %v1467_v37, 16  ;;  %v665_v63 = vadd.f32 %v12637_v2, %v13164_v45  ;;  %v676_v24 = vadd.f32 %v12637_v2, %v13173_v10 }
 0x149   : > { %v1654_v29 = vshll.u32 %v1468_v53, 16  ;;  %v1658_v59 = vshrl.u32 %v1468_v53, 16  ;;  %v1638_v57 = vrot.slane %v1637_v18, 4  ;;  %v1647_v9 = vrot.slane %v1645_v32, 4  ;;  %v1471_v39 = vld [vmem:[#allocation2 + $0x58] sm:$0xf] }
 0x14a   : > { %v1664_v60 = vshll.u32 %v1469_v58, 16  ;;  %v11563_v16 = vpack.c.bf16 %v709_v62, %v709_v62  ;;  %v1650_v17 = vrot.slane %v1648_v46, 5  ;;  %v707_v23 = vmax.f32 %v665_v63, 0.0  ;;  %v1290_v18 = vld [vmem:[#allocation2 + $0xb4] sm:$0xf] }
 0x14b   : > { %v1656_v14 = vrot.slane %v1654_v29, 5  ;;  %v1660_v21 = vrot.slane %v1658_v59, 4  ;;  %v1643_v8 = vsel %vm12940_vm8, %v1638_v57, %v1642_v50  ;;  %v710_v33 = vmax.f32 %v676_v24, 0.0  ;;  %v1301_v32 = vld [vmem:[#allocation2 + $0xc8] sm:$0x1] }
 0x14c   : > { %v1666_v44 = vrot.slane %v1664_v60, 5  ;;  %v10935_v25 = vcombine.low %v1633_v0, %v1643_v8  ;;  %v1122_v45 = vshrl.u32 %v11563_v16, 16  ;;  %v1125_v26 = vshll.u32 %v11563_v16, 16  ;;  %v1472_v57 = vld [vmem:[#allocation2 + $0x5c] sm:$0x1] }
 0x14d   : > { %v1651_v27 = vor.u32 %v1650_v17, %v1647_v9  ;;  %v1661_v28 = vor.u32 %v1660_v21, %v1656_v14  ;;  %v11561_v31 = vpack.c.bf16 %v707_v23, %v707_v23  ;;  %v668_v34 = vadd.f32 %v12637_v2, %v13183_v4  ;;  %v1473_v17 = vld [vmem:[#allocation2 + $0x60] sm:$0xf] }
 0x14e   : > { %1942 = vrot.lane.b32.xlu1 %v10935_v25, %s12648_s25  ;;  %v1124_v56 = vrot.slane %v1122_v45, 7  ;;  %v1669_v36 = vshrl.u32 %v1470_v22, 16  ;;  %v1672_v11 = vshll.u32 %v1470_v22, 16  ;;  %v11564_v43 = vpack.c.bf16 %v710_v33, %v710_v33  ;;  %v12299_v58 = vld [vmem:[#allocation2 + $0xa8] sm:$0xff]   ;;  %v1474_v45 = vld [vmem:[#allocation2 + $0x64] sm:$0xf] }
 0x14f   : > { %v1652_v35 = vrot.slane %v1651_v27, 4  ;;  %v1662_v41 = vrot.slane %v1661_v28, 4  ;;  %v1105_v10 = vshrl.u32 %v11561_v31, 16  ;;  %v1108_v37 = vshll.u32 %v11561_v31, 16  ;;  %v12298_v47 = vld [vmem:[#allocation2 + $0x9c] sm:$0xff]  }
 0x150   : > { %v1127_v48 = vor.u32 %v1125_v26, %v1124_v56  ;;  %v1128_v50 = vrot.slane %v1124_v56, 4  ;;  %v708_v55 = vmax.f32 %v668_v34, 0.0  ;;  %v1130_v0 = vshrl.u32 %v11564_v43, 16  ;;  %2424 = vrot.lane.b32.xlu0 %v12298_v47, %s12648_s25 }
 0x151   : > { %v1657_v53 = vsel %vm12940_vm8, %v1652_v35, %v1656_v14  ;;  %v1667_v4 = vsel %vm12940_vm8, %v1662_v41, %v1666_v44  ;;  %v1107_v13 = vrot.slane %v1105_v10, 7  ;;  %v1133_v2 = vshll.u32 %v11564_v43, 16  ;;  %v1475_v35 = vld [vmem:[#allocation2 + $0x68] sm:$0x1]  ;;  %v1477_v43 = vld [vmem:[#allocation2 + $0x70] sm:$0xf] }
 0x152   : > { %v1298_v6 = vsel %vm12955_vm11, %v1127_v48, %v1297_v30  ;;  %v10936_v38 = vcombine.low %v1657_v53, %v1667_v4  ;;  %v11562_v61 = vpack.c.bf16 %v708_v55, %v708_v55  ;;  %v1671_v62 = vrot.slane %v1669_v36, 4  ;;  %v1294_v30 = vld [vmem:[#allocation2 + $0xbc] sm:$0x1]  ;;  %v1476_v36 = vld [vmem:[#allocation2 + $0x6c] sm:$0xf] }
 0x153   : > { %1299 = vst [vmem:[#allocation2 + $0xc0] sm:$0xf] %v1298_v6  ;;  %v1110_v46 = vor.u32 %v1108_v37, %v1107_v13  ;;  %v1111_v29 = vrot.slane %v1107_v13, 4  ;;  %v1132_v59 = vrot.slane %v1130_v0, 7  ;;  %v1674_v9 = vrot.slane %v1672_v11, 5 }
 0x154   : > { %1944 = vrot.lane.b32.xlu1 %v10936_v38, %s12648_s25  ;;  %v1113_v60 = vshrl.u32 %v11562_v61, 16  ;;  %v1116_v63 = vshll.u32 %v11562_v61, 16  ;;  %v1678_v15 = vshll.u32 %v1471_v39, 16  ;;  %v1682_v16 = vshrl.u32 %v1471_v39, 16  ;;  %2426 = vrot.lane.b32.xlu0 %v12299_v58, %s12648_s25  ;;  %v1478_v6 = vld [vmem:[#allocation2 + $0x74] sm:$0x1] }
 0x155   : > { %v1291_v14 = vsel %vm12955_vm11, %v1110_v46, %v1290_v18  ;;  %v1135_v21 = vor.u32 %v1133_v2, %v1132_v59  ;;  %v1137_v8 = vrot.slane %v1132_v59, 4  ;;  %v1675_v44 = vor.u32 %v1674_v9, %v1671_v62  ;;  %v1479_v2 = vld [vmem:[#allocation2 + $0x78] sm:$0xf] }
 0x156   : > { %1292 = vst [vmem:[#allocation2 + $0xb4] sm:$0xf] %v1291_v14  ;;  %v1115_v23 = vrot.slane %v1113_v60, 7  ;;  %v1680_v24 = vrot.slane %v1678_v15, 5  ;;  %v1684_v22 = vrot.slane %v1682_v16, 4  ;;  %v1688_v25 = vshll.u32 %v1472_v57, 16 }
 0x157   : > { %v1136_v26 = vsel %vm12962_vm12, %v1128_v50, %v1135_v21  ;;  %v1302_v27 = vsel %vm12968_vm13, %v1137_v8, %v1301_v32  ;;  %v1676_v5 = vrot.slane %v1675_v44, 4  ;;  %v1693_v28 = vshrl.u32 %v1473_v17, 16  ;;  %v12318_v15 = vld [vmem:[%s15856_s3 + $0x38] sm:$0xff]  }
 0x158   : > { %1300 = vst.msk [vmem:[#allocation2 + $0xc4] sm:$0xf] %vm727_vm5, %v1136_v26  ;;  %1303 = vst [vmem:[#allocation2 + $0xc8] sm:$0x1] %v1302_v27  ;;  %v1118_v31 = vor.u32 %v1116_v63, %v1115_v23  ;;  %v1120_v33 = vrot.slane %v1115_v23, 4  ;;  %v1685_v34 = vor.u32 %v1684_v22, %v1680_v24  ;;  %v1690_v56 = vrot.slane %v1688_v25, 5  ;;  %11630 = vmatpush3.bf16.msra.mxu1 %v12318_v15 }
 0x159   : > { %v1681_v11 = vsel %vm12940_vm8, %v1676_v5, %v1680_v24  ;;  %v1695_v41 = vrot.slane %v1693_v28, 4  ;;  %v1696_v10 = vshll.u32 %v1473_v17, 16  ;;  %v1702_v37 = vshll.u32 %v1474_v45, 16  ;;  %v1481_v63 = vld [vmem:[#allocation2 + $0x80] sm:$0x1] }
 0x15a   : > { %v1119_v47 = vsel %vm12962_vm12, %v1111_v29, %v1118_v31  ;;  %v1295_v48 = vsel %vm12968_vm13, %v1120_v33, %v1294_v30  ;;  %v1686_v50 = vrot.slane %v1685_v34, 4  ;;  %v1706_v53 = vshrl.u32 %v1474_v45, 16  ;;  %v1480_v29 = vld [vmem:[#allocation2 + $0x7c] sm:$0xf]  ;;  %v1482_v22 = vld [vmem:[#allocation2 + $0x84] sm:$0xf] }
 0x15b   : > { %1293 = vst.msk [vmem:[#allocation2 + $0xb8] sm:$0xf] %vm727_vm5, %v1119_v47  ;;  %1296 = vst [vmem:[#allocation2 + $0xbc] sm:$0x1] %v1295_v48  ;;  %v1698_v55 = vrot.slane %v1696_v10, 5  ;;  %v1704_v4 = vrot.slane %v1702_v37, 5 }
 0x15c   : > { %v1712_v13 = vshll.u32 %v1475_v35, 16  ;;  %v1717_v0 = vshrl.u32 %v1476_v36, 16  ;;  %v1691_v39 = vsel %vm12940_vm8, %v1686_v50, %v1690_v56  ;;  %v1708_v58 = vrot.slane %v1706_v53, 4  ;;  %v1483_v30 = vld [vmem:[#allocation2 + $0x88] sm:$0xf]  ;;  %v12320_v50 = vld [vmem:[%s15856_s3 + $0xc0] sm:$0xff]   ;;  %vm14586_vm5 = vmand %vm5682_vm4, %vm1188_vm10 }
 0x15d   : > { %v1720_v38 = vshll.u32 %v1476_v36, 16  ;;  %v1726_v18 = vshll.u32 %v1477_v43, 16  ;;  %v10937_v32 = vcombine.low %v1681_v11, %v1691_v39  ;;  %v1699_v61 = vor.u32 %v1698_v55, %v1695_v41  ;;  %v1485_v41 = vld [vmem:[#allocation2 + $0x90] sm:$0xf]  ;;  %11727 = vmatprep.subr.bf16.mxu1 %v12320_v50 }
 0x15e   : > { %v1714_v62 = vrot.slane %v1712_v13, 5  ;;  %v1719_v46 = vrot.slane %v1717_v0, 4  ;;  %v1709_v59 = vor.u32 %v1708_v58, %v1704_v4  ;;  %v1730_v60 = vshrl.u32 %v1477_v43, 16  ;;  %v1484_v13 = vld [vmem:[#allocation2 + $0x8c] sm:$0x1] }
 0x15f   : > { %v1722_v57 = vrot.slane %v1720_v38, 5  ;;  %v1728_v9 = vrot.slane %v1726_v18, 5  ;;  %1946 = vrot.lane.b32.xlu1 %v10937_v32, %s12648_s25  ;;  %v1700_v16 = vrot.slane %v1699_v61, 4  ;;  %v1736_v17 = vshll.u32 %v1478_v6, 16  ;;  %v12301_v48 = vld [vmem:[#allocation2 + $0xc0] sm:$0xff]  }
 0x160   : > { %v1741_v14 = vshrl.u32 %v1479_v2, 16  ;;  %v1744_v21 = vshll.u32 %v1479_v2, 16  ;;  %v1710_v8 = vrot.slane %v1709_v59, 4  ;;  %v1732_v23 = vrot.slane %v1730_v60, 4  ;;  %v1486_v38 = vld [vmem:[#allocation2 + $0x94] sm:$0xf] }
 0x161   : > { %v1723_v44 = vor.u32 %v1722_v57, %v1719_v46  ;;  %v1750_v24 = vshll.u32 %v1480_v29, 16  ;;  %v1705_v25 = vsel %vm12940_vm8, %v1700_v16, %v1704_v4  ;;  %v1738_v45 = vrot.slane %v1736_v17, 5 }
 0x162   : > { %v1743_v26 = vrot.slane %v1741_v14, 4  ;;  %v1746_v27 = vrot.slane %v1744_v21, 5  ;;  %v1715_v5 = vsel %vm12940_vm8, %v1710_v8, %v1714_v62  ;;  %v1733_v31 = vor.u32 %v1732_v23, %v1728_v9  ;;  %v12300_v34 = vld [vmem:[#allocation2 + $0xb4] sm:$0xff]   ;;  %v1488_v8 = vld [vmem:[#allocation2 + $0x9c] sm:$0xf] }
 0x163   : > { %v1724_v28 = vrot.slane %v1723_v44, 4  ;;  %v1752_v33 = vrot.slane %v1750_v24, 5  ;;  %v10938_v56 = vcombine.low %v1705_v25, %v1715_v5  ;;  %v1754_v36 = vshrl.u32 %v1480_v29, 16  ;;  %2428 = vrot.lane.b32.xlu0 %v12300_v34, %s12648_s25  ;;  %v1489_v25 = vld [vmem:[#allocation2 + $0xa0] sm:$0xf] }
 0x164   : > { %v1747_v35 = vor.u32 %v1746_v27, %v1743_v26  ;;  %v1760_v11 = vshll.u32 %v1481_v63, 16  ;;  %v1734_v37 = vrot.slane %v1733_v31, 4  ;;  %v1765_v43 = vshrl.u32 %v1482_v22, 16  ;;  %v1490_v31 = vld [vmem:[#allocation2 + $0xa4] sm:$0x1] }
 0x165   : > { %v1729_v10 = vsel %vm12940_vm8, %v1724_v28, %v1728_v9  ;;  %v1768_v47 = vshll.u32 %v1482_v22, 16  ;;  %1948 = vrot.lane.b32.xlu1 %v10938_v56, %s12648_s25  ;;  %v1756_v55 = vrot.slane %v1754_v36, 4  ;;  %v1774_v0 = vshll.u32 %v1483_v30, 16  ;;  %v1487_v9 = vld [vmem:[#allocation2 + $0x98] sm:$0x1] }
 0x166   : > { %v1748_v53 = vrot.slane %v1747_v35, 4  ;;  %v1762_v4 = vrot.slane %v1760_v11, 5  ;;  %v1739_v2 = vsel %vm12940_vm8, %v1734_v37, %v1738_v45  ;;  %v1767_v39 = vrot.slane %v1765_v43, 4 }
 0x167   : > { %v1770_v58 = vrot.slane %v1768_v47, 5  ;;  %v1778_v6 = vshrl.u32 %v1483_v30, 16  ;;  %v10939_v18 = vcombine.low %v1729_v10, %v1739_v2  ;;  %v1757_v32 = vor.u32 %v1756_v55, %v1752_v33  ;;  %2430 = vrot.lane.b32.xlu0 %v12301_v48, %s12648_s25  ;;  %v1493_v2 = vld [vmem:[#allocation2 + $0xb0] sm:$0x1] }
 0x168   : > { %v1753_v19 = vsel %vm12940_vm8, %v1748_v53, %v1752_v33  ;;  %v1776_v61 = vrot.slane %v1774_v0, 5  ;;  %v1784_v29 = vshll.u32 %v1484_v13, 16  ;;  %v1789_v59 = vshrl.u32 %v1485_v41, 16 }
 0x169   : > { %v1771_v62 = vor.u32 %v1770_v58, %v1767_v39  ;;  %v1780_v46 = vrot.slane %v1778_v6, 4  ;;  %1950 = vrot.lane.b32.xlu1 %v10939_v18, %s12648_s25  ;;  %v1758_v57 = vrot.slane %v1757_v32, 4  ;;  %v1792_v60 = vshll.u32 %v1485_v41, 16  ;;  %v1491_v41 = vld [vmem:[#allocation2 + $0xa8] sm:$0xf] }
 0x16a   : > { %v1798_v63 = vshll.u32 %v1486_v38, 16  ;;  %v1802_v15 = vshrl.u32 %v1486_v38, 16  ;;  %v1786_v14 = vrot.slane %v1784_v29, 5  ;;  %v1791_v21 = vrot.slane %v1789_v59, 4  ;;  %v3441_v6 = vld [vmem:[#allocation2 + $0x18] sm:$0xf] }
 0x16b   : > { %v1772_v16 = vrot.slane %v1771_v62, 4  ;;  %v1781_v17 = vor.u32 %v1780_v46, %v1776_v61  ;;  %v1763_v44 = vsel %vm12940_vm8, %v1758_v57, %v1762_v4  ;;  %v1794_v23 = vrot.slane %v1792_v60, 5  ;;  %v1492_v4 = vld [vmem:[#allocation2 + $0xac] sm:$0xf]  ;;  %v3442_v59 = vld [vmem:[#allocation2 + $0x1c] sm:$0xf] }
 0x16c   : > { %v1800_v24 = vrot.slane %v1798_v63, 5  ;;  %v1804_v22 = vrot.slane %v1802_v15, 4  ;;  %v10940_v45 = vcombine.low %v1753_v19, %v1763_v44  ;;  %v1808_v30 = vshll.u32 %v1487_v9, 16  ;;  %v3443_v63 = vld [vmem:[#allocation2 + $0x20] sm:$0x1] }
 0x16d   : > { %v1777_v26 = vsel %vm12940_vm8, %v1772_v16, %v1776_v61  ;;  %v1782_v27 = vrot.slane %v1781_v17, 4  ;;  %v1795_v5 = vor.u32 %v1794_v23, %v1791_v21  ;;  %v1813_v33 = vshrl.u32 %v1488_v8, 16 }
 0x16e   : > { %v1805_v28 = vor.u32 %v1804_v22, %v1800_v24  ;;  %v1816_v34 = vshll.u32 %v1488_v8, 16  ;;  %1952 = vrot.lane.b32.xlu1 %v10940_v45, %s12648_s25  ;;  %v1810_v35 = vrot.slane %v1808_v30, 5  ;;  %v1822_v36 = vshll.u32 %v1489_v25, 16  ;;  %v1494_v8 = vld [vmem:[#allocation2 + $0xb4] sm:$0xf] }
 0x16f   : > { %v1787_v56 = vsel %vm12940_vm8, %v1782_v27, %v1786_v14  ;;  %v1826_v11 = vshrl.u32 %v1489_v25, 16  ;;  %v1796_v37 = vrot.slane %v1795_v5, 4  ;;  %v1815_v47 = vrot.slane %v1813_v33, 4 }
 0x170   : > { %v10941_v10 = vcombine.low %v1777_v26, %v1787_v56  ;;  %v1806_v43 = vrot.slane %v1805_v28, 4  ;;  %v1818_v48 = vrot.slane %v1816_v34, 5  ;;  %v1824_v50 = vrot.slane %v1822_v36, 5  ;;  %v1496_v36 = vld [vmem:[#allocation2 + $0xbc] sm:$0x1] }
 0x171   : > { %v1828_v53 = vrot.slane %v1826_v11, 4  ;;  %v1832_v55 = vshll.u32 %v1490_v31, 16  ;;  %v1801_v13 = vsel %vm12940_vm8, %v1796_v37, %v1800_v24  ;;  %v1837_v39 = vshrl.u32 %v1491_v41, 16  ;;  %v1495_v31 = vld [vmem:[#allocation2 + $0xb8] sm:$0xf] }
 0x172   : > { %v1811_v0 = vsel %vm12940_vm8, %v1806_v43, %v1810_v35  ;;  %v1840_v58 = vshll.u32 %v1491_v41, 16  ;;  %1954 = vrot.lane.b32.xlu1 %v10941_v10, %s12648_s25  ;;  %v1819_v18 = vor.u32 %v1818_v48, %v1815_v47  ;;  %v1846_v46 = vshll.u32 %v1492_v4, 16  ;;  %v3444_v47 = vld [vmem:[#allocation2 + $0x24] sm:$0xf] }
 0x173   : > { %v10942_v38 = vcombine.low %v1801_v13, %v1811_v0  ;;  %v1829_v19 = vor.u32 %v1828_v53, %v1824_v50  ;;  %v1834_v32 = vrot.slane %v1832_v55, 5  ;;  %v1839_v61 = vrot.slane %v1837_v39, 4  ;;  %v3445_v39 = vld [vmem:[#allocation2 + $0x28] sm:$0xf] }
 0x174   : > { %v1842_v62 = vrot.slane %v1840_v58, 5  ;;  %v1850_v29 = vshrl.u32 %v1492_v4, 16  ;;  %v1820_v57 = vrot.slane %v1819_v18, 4  ;;  %v1856_v60 = vshll.u32 %v1493_v2, 16  ;;  %v3446_v18 = vld [vmem:[#allocation2 + $0x2c] sm:$0x1] }
 0x175   : > { %v1830_v9 = vrot.slane %v1829_v19, 4  ;;  %v3490_v15 = vshrl.u32 %v3441_v6, 16  ;;  %v1848_v17 = vrot.slane %v1846_v46, 5  ;;  %v3493_v21 = vshll.u32 %v3441_v6, 16 }
 0x176   : > { %v1843_v16 = vor.u32 %v1842_v62, %v1839_v61  ;;  %v1852_v14 = vrot.slane %v1850_v29, 4  ;;  %1956 = vrot.lane.b32.xlu1 %v10942_v38, %s12648_s25  ;;  %v1825_v44 = vsel %vm12940_vm8, %v1820_v57, %v1824_v50  ;;  %v1858_v24 = vrot.slane %v1856_v60, 5 }
 0x177   : > { %v1835_v23 = vsel %vm12940_vm8, %v1830_v9, %v1834_v32  ;;  %v3492_v22 = vrot.slane %v3490_v15, 4  ;;  %v3495_v27 = vrot.slane %v3493_v21, 5  ;;  %v3499_v30 = vshll.u32 %v3442_v59, 16  ;;  %v2976_v32 = vld [vmem:[#allocation2 + $0xc] sm:$0xe] }
 0x178   : > { %v10943_v25 = vcombine.low %v1825_v44, %v1835_v23  ;;  %v1844_v45 = vrot.slane %v1843_v16, 4  ;;  %v1853_v26 = vor.u32 %v1852_v14, %v1848_v17  ;;  %v3503_v5 = vshrl.u32 %v3442_v59, 16  ;;  %v2978_v21 = vld [vmem:[#allocation2 + $0x14] sm:$0x1] }
 0x179   : > { %v3509_v28 = vshll.u32 %v3443_v63, 16  ;;  %v1861_v33 = vshrl.u32 %v1494_v8, 16  ;;  %v3496_v35 = vor.u32 %v3495_v27, %v3492_v22  ;;  %v1864_v11 = vshll.u32 %v1494_v8, 16  ;;  %v2977_v63 = vld [vmem:[#allocation2 + $0x10] sm:$0xf] }
 0x17a   : > { %v1849_v34 = vsel %vm12940_vm8, %v1844_v45, %v1848_v17  ;;  %v1854_v56 = vrot.slane %v1853_v26, 4  ;;  %1958 = vrot.lane.b32.xlu1 %v10943_v25, %s12648_s25  ;;  %v3501_v41 = vrot.slane %v3499_v30, 5  ;;  %v3505_v10 = vrot.slane %v3503_v5, 4  ;;  %v3447_v8 = vld [vmem:[#allocation2 + $0x30] sm:$0xf] }
 0x17b   : > { %v3511_v37 = vrot.slane %v3509_v28, 5  ;;  %v1863_v43 = vrot.slane %v1861_v33, 4  ;;  %v3497_v50 = vrot.slane %v3496_v35, 4  ;;  %v1866_v53 = vrot.slane %v1864_v11, 5  ;;  %v3448_v25 = vld [vmem:[#allocation2 + $0x34] sm:$0xf] }
 0x17c   : > { %v1859_v48 = vsel %vm12940_vm8, %v1854_v56, %v1858_v24  ;;  %v1870_v55 = vshll.u32 %v1495_v31, 16  ;;  %v3506_v13 = vor.u32 %v3505_v10, %v3501_v41  ;;  %v1874_v0 = vshrl.u32 %v1495_v31, 16  ;;  %v3449_v28 = vld [vmem:[#allocation2 + $0x38] sm:$0x1] }
 0x17d   : > { %v10944_v4 = vcombine.low %v1849_v34, %v1859_v48  ;;  %v1880_v2 = vshll.u32 %v1496_v36, 16  ;;  %v3502_v58 = vsel %vm12940_vm8, %v3497_v50, %v3501_v41  ;;  %v1867_v6 = vor.u32 %v1866_v53, %v1863_v43  ;;  %v2979_v48 = vld [vmem:[#allocation2 + $0x18] sm:$0xe]  ;;  %v2980_v50 = vld [vmem:[#allocation2 + $0x1c] sm:$0xf] }
 0x17e   : > { %v1872_v38 = vrot.slane %v1870_v55, 5  ;;  %v3514_v19 = vshrl.u32 %v3444_v47, 16  ;;  %v3507_v61 = vrot.slane %v3506_v13, 4  ;;  %v1876_v62 = vrot.slane %v1874_v0, 4  ;;  %v2981_v0 = vld [vmem:[#allocation2 + $0x20] sm:$0x1] }
 0x17f   : > { %1960 = vrot.lane.b32.xlu1 %v10944_v4, %s12648_s25  ;;  %v1882_v46 = vrot.slane %v1880_v2, 5  ;;  %v3517_v29 = vshll.u32 %v3444_v47, 16  ;;  %v1868_v59 = vrot.slane %v1867_v6, 4  ;;  %v3523_v9 = vshll.u32 %v3445_v39, 16 }
 0x180   : > { %v3516_v57 = vrot.slane %v3514_v19, 4  ;;  %v3527_v60 = vshrl.u32 %v3445_v39, 16  ;;  %v3512_v15 = vsel %vm12940_vm8, %v3507_v61, %v3511_v37  ;;  %v1877_v16 = vor.u32 %v1876_v62, %v1872_v38 }
 0x181   : > { %v3519_v17 = vrot.slane %v3517_v29, 5  ;;  %v3533_v14 = vshll.u32 %v3446_v18, 16  ;;  %v11058_v44 = vcombine.low %v3502_v58, %v3512_v15  ;;  %v1873_v23 = vsel %vm12940_vm8, %v1868_v59, %v1872_v38  ;;  %v3450_v38 = vld [vmem:[#allocation2 + $0x3c] sm:$0xf]  ;;  %v3451_v18 = vld [vmem:[#allocation2 + $0x40] sm:$0xf] }
 0x182   : > { %v3525_v24 = vrot.slane %v3523_v9, 5  ;;  %v3529_v22 = vrot.slane %v3527_v60, 4  ;;  %v1878_v45 = vrot.slane %v1877_v16, 4  ;;  %v11010_v5 = vrot.slane %v2976_v32, 9 }
 0x183   : > { %v3520_v26 = vor.u32 %v3519_v17, %v3516_v57  ;;  %v3535_v27 = vrot.slane %v3533_v14, 5  ;;  %3921 = vrot.lane.b32.xlu0 %v11058_v44, %s12648_s25  ;;  %v3074_v33 = vrot.slane %v2977_v63, 5  ;;  %v3077_v34 = vrot.slane %v2978_v21, 5  ;;  %v2982_v17 = vld [vmem:[#allocation2 + $0x24] sm:$0xe] }
 0x184   : > { %v3530_v31 = vor.u32 %v3529_v22, %v3525_v24  ;;  %v3538_v56 = vshrl.u32 %v3447_v8, 16  ;;  %v1883_v35 = vsel %vm12940_vm8, %v1878_v45, %v1882_v46  ;;  %v3541_v11 = vshll.u32 %v3447_v8, 16  ;;  %v3452_v46 = vld [vmem:[#allocation2 + $0x44] sm:$0x1] }
 0x185   : > { %v3521_v36 = vrot.slane %v3520_v26, 4  ;;  %v3547_v41 = vshll.u32 %v3448_v25, 16  ;;  %v10945_v10 = vcombine.low %v1873_v23, %v1883_v35  ;;  %v3075_v43 = vsel %vm13361_vm0, %v11010_v5, %v3074_v33  ;;  %v2983_v23 = vld [vmem:[#allocation2 + $0x28] sm:$0xf] }
 0x186   : > { %v3531_v37 = vrot.slane %v3530_v31, 4  ;;  %v3076_v47 = vrot.slane %v3074_v33, 4  ;;  %v3540_v55 = vrot.slane %v3538_v56, 4  ;;  %v3543_v4 = vrot.slane %v3541_v11, 5  ;;  %v3454_v11 = vld [vmem:[#allocation2 + $0x4c] sm:$0xf] }
 0x187   : > { %v3526_v53 = vsel %vm12940_vm8, %v3521_v36, %v3525_v24  ;;  %v3549_v13 = vrot.slane %v3547_v41, 5  ;;  %1962 = vrot.lane.b32.xlu1 %v10945_v10, %s12648_s25  ;;  %v3551_v58 = vshrl.u32 %v3448_v25, 16  ;;  %v3557_v6 = vshll.u32 %v3449_v28, 16  ;;  %v2984_v24 = vld [vmem:[#allocation2 + $0x2c] sm:$0x1] }
 0x188   : > { %v3536_v2 = vsel %vm12940_vm8, %v3531_v37, %v3535_v27  ;;  %v3078_v39 = vsel %vm13361_vm0, %v3076_v47, %v3077_v34  ;;  %v3544_v61 = vor.u32 %v3543_v4, %v3540_v55  ;;  %v11011_v62 = vrot.slane %v2979_v48, 9  ;;  %v3453_v36 = vld [vmem:[#allocation2 + $0x48] sm:$0xf]  ;;  %v3455_v47 = vld [vmem:[#allocation2 + $0x50] sm:$0x1] }
 0x189   : > { %v11059_v19 = vcombine.low %v3526_v53, %v3536_v2  ;;  %v11026_v32 = vcombine.low %v3075_v43, %v3078_v39  ;;  %v3553_v29 = vrot.slane %v3551_v58, 4  ;;  %v3559_v59 = vrot.slane %v3557_v6, 5  ;;  %v2985_v4 = vld [vmem:[#allocation2 + $0x30] sm:$0xe]  ;;  %v2987_v6 = vld [vmem:[#allocation2 + $0x38] sm:$0x1] }
 0x18a   : > { %v3081_v57 = vrot.slane %v2980_v50, 5  ;;  %v3084_v9 = vrot.slane %v2981_v0, 5  ;;  %v3545_v60 = vrot.slane %v3544_v61, 4  ;;  %v3562_v63 = vshrl.u32 %v3450_v38, 16  ;;  %v3456_v61 = vld [vmem:[#allocation2 + $0x54] sm:$0xf] }
 0x18b   : > { %3923 = vrot.lane.b32.xlu0 %v11059_v19, %s12648_s25  ;;  %v3565_v15 = vshll.u32 %v3450_v38, 16  ;;  %v3571_v16 = vshll.u32 %v3451_v18, 16  ;;  %3232 = vrot.lane.b32.xlu1 %v11026_v32, %s12648_s25  ;;  %v3554_v14 = vor.u32 %v3553_v29, %v3549_v13  ;;  %v3575_v44 = vshrl.u32 %v3451_v18, 16 }
 0x18c   : > { %v3082_v21 = vsel %vm13361_vm0, %v11011_v62, %v3081_v57  ;;  %v3083_v8 = vrot.slane %v3081_v57, 4  ;;  %v3550_v22 = vsel %vm12940_vm8, %v3545_v60, %v3549_v13  ;;  %v3564_v25 = vrot.slane %v3562_v63, 4  ;;  %v2986_v13 = vld [vmem:[#allocation2 + $0x34] sm:$0xf]  ;;  %v3457_v57 = vld [vmem:[#allocation2 + $0x58] sm:$0xf] }
 0x18d   : > { %v3567_v45 = vrot.slane %v3565_v15, 5  ;;  %v3573_v26 = vrot.slane %v3571_v16, 5  ;;  %v3555_v27 = vrot.slane %v3554_v14, 4  ;;  %v3577_v28 = vrot.slane %v3575_v44, 4  ;;  %v3458_v16 = vld [vmem:[#allocation2 + $0x5c] sm:$0x1] }
 0x18e   : > { %v3085_v5 = vsel %vm13361_vm0, %v3083_v8, %v3084_v9  ;;  %v3581_v31 = vshll.u32 %v3452_v46, 16  ;;  %v11012_v56 = vrot.slane %v2982_v17, 9  ;;  %v3088_v35 = vrot.slane %v2983_v23, 5  ;;  %v2988_v44 = vld [vmem:[#allocation2 + $0x3c] sm:$0xe]  ;;  %v13398_v23 = vpop.permute.xlu0 %2400 }
 0x18f   : > { %v11027_v33 = vcombine.low %v3082_v21, %v3085_v5  ;;  %v3568_v34 = vor.u32 %v3567_v45, %v3564_v25  ;;  %v3560_v41 = vsel %vm12940_vm8, %v3555_v27, %v3559_v59  ;;  %v3578_v10 = vor.u32 %v3577_v28, %v3573_v26  ;;  %15891 = vst [vmem:[#allocation12_spill] sm:$0xff] %v13398_v23 }
 0x190   : > { %v3583_v37 = vrot.slane %v3581_v31, 5  ;;  %v3091_v43 = vrot.slane %v2984_v24, 5  ;;  %v11060_v48 = vcombine.low %v3550_v22, %v3560_v41  ;;  %v3089_v53 = vsel %vm13361_vm0, %v11012_v56, %v3088_v35 }
 0x191   : > { %3234 = vrot.lane.b32.xlu1 %v11027_v33, %s12648_s25  ;;  %v3569_v50 = vrot.slane %v3568_v34, 4  ;;  %v3090_v55 = vrot.slane %v3088_v35, 4  ;;  %v3579_v0 = vrot.slane %v3578_v10, 4  ;;  %v3586_v2 = vshrl.u32 %v3453_v36, 16 }
 0x192   : > { %v3589_v39 = vshll.u32 %v3453_v36, 16  ;;  %v3595_v58 = vshll.u32 %v3454_v11, 16  ;;  %3925 = vrot.lane.b32.xlu0 %v11060_v48, %s12648_s25  ;;  %v3599_v19 = vshrl.u32 %v3454_v11, 16  ;;  %v3605_v32 = vshll.u32 %v3455_v47, 16  ;;  %v2990_v36 = vld [vmem:[#allocation2 + $0x44] sm:$0x1] }
 0x193   : > { %v3574_v38 = vsel %vm12940_vm8, %v3569_v50, %v3573_v26  ;;  %v3092_v18 = vsel %vm13361_vm0, %v3090_v55, %v3091_v43  ;;  %v3584_v62 = vsel %vm12940_vm8, %v3579_v0, %v3583_v37  ;;  %v3588_v29 = vrot.slane %v3586_v2, 4  ;;  %v2989_v26 = vld [vmem:[#allocation2 + $0x40] sm:$0xf]  ;;  %v3460_v47 = vld [vmem:[#allocation2 + $0x64] sm:$0xf] }
 0x194   : > { %v11028_v46 = vcombine.low %v3089_v53, %v3092_v18  ;;  %v3591_v59 = vrot.slane %v3589_v39, 5  ;;  %v11061_v9 = vcombine.low %v3574_v38, %v3584_v62  ;;  %v3597_v60 = vrot.slane %v3595_v58, 5  ;;  %v3459_v43 = vld [vmem:[#allocation2 + $0x60] sm:$0xf]  ;;  %v3461_v39 = vld [vmem:[#allocation2 + $0x68] sm:$0x1]  ;;  %v13409_v58 = vpop.permute.xlu0 %1932 }
 0x195   : > { %v3601_v63 = vrot.slane %v3599_v19, 4  ;;  %v3607_v15 = vrot.slane %v3605_v32, 5  ;;  %v11013_v14 = vrot.slane %v2985_v4, 9  ;;  %v3095_v21 = vrot.slane %v2986_v13, 5  ;;  %v2991_v32 = vld [vmem:[#allocation2 + $0x48] sm:$0xe] }
 0x196   : > { %3236 = vrot.lane.b32.xlu1 %v11028_v46, %s12648_s25  ;;  %v3592_v17 = vor.u32 %v3591_v59, %v3588_v29  ;;  %v3098_v8 = vrot.slane %v2987_v6, 5  ;;  %3927 = vrot.lane.b32.xlu0 %v11061_v9, %s12648_s25  ;;  %v3610_v22 = vshrl.u32 %v3456_v61, 16  ;;  %v3613_v25 = vshll.u32 %v3456_v61, 16  ;;  %v2992_v61 = vld [vmem:[#allocation2 + $0x4c] sm:$0xf] }
 0x197   : > { %v3602_v24 = vor.u32 %v3601_v63, %v3597_v60  ;;  %v3619_v45 = vshll.u32 %v3457_v57, 16  ;;  %v3096_v5 = vsel %vm13361_vm0, %v11013_v14, %v3095_v21  ;;  %v3097_v28 = vrot.slane %v3095_v21, 4  ;;  %v2993_v62 = vld [vmem:[#allocation2 + $0x50] sm:$0x1] }
 0x198   : > { %v3593_v27 = vrot.slane %v3592_v17, 4  ;;  %v3623_v31 = vshrl.u32 %v3457_v57, 16  ;;  %v3612_v34 = vrot.slane %v3610_v22, 4  ;;  %v3615_v56 = vrot.slane %v3613_v25, 5 }
 0x199   : > { %v3603_v33 = vrot.slane %v3602_v24, 4  ;;  %v3621_v35 = vrot.slane %v3619_v45, 5  ;;  %v3099_v41 = vsel %vm13361_vm0, %v3097_v28, %v3098_v8  ;;  %v3629_v37 = vshll.u32 %v3458_v16, 16  ;;  %v3462_v8 = vld [vmem:[#allocation2 + $0x6c] sm:$0xf] }
 0x19a   : > { %v3598_v11 = vsel %vm12940_vm8, %v3593_v27, %v3597_v60  ;;  %v3625_v10 = vrot.slane %v3623_v31, 4  ;;  %v11029_v50 = vcombine.low %v3096_v5, %v3099_v41  ;;  %v3616_v53 = vor.u32 %v3615_v56, %v3612_v34  ;;  %v13421_v34 = vpop.permute.xlu0 %2404  ;;  %v2995_v41 = vld [vmem:[#allocation2 + $0x58] sm:$0xf] }
 0x19b   : > { %v3608_v48 = vsel %vm12940_vm8, %v3603_v33, %v3607_v15  ;;  %v11014_v55 = vrot.slane %v2988_v44, 9  ;;  %v3631_v0 = vrot.slane %v3629_v37, 5  ;;  %v3102_v2 = vrot.slane %v2989_v26, 5  ;;  %v3463_v44 = vld [vmem:[#allocation2 + $0x70] sm:$0xf]  ;;  %15892 = vst [vmem:[#allocation13_spill] sm:$0xff] %v13421_v34 }
 0x19c   : > { %v11062_v4 = vcombine.low %v3598_v11, %v3608_v48  ;;  %v3626_v13 = vor.u32 %v3625_v10, %v3621_v35  ;;  %3238 = vrot.lane.b32.xlu1 %v11029_v50, %s12648_s25  ;;  %v3617_v6 = vrot.slane %v3616_v53, 4  ;;  %v3105_v38 = vrot.slane %v2990_v36, 5  ;;  %v3464_v26 = vld [vmem:[#allocation2 + $0x74] sm:$0x1]  ;;  %v2994_v33 = vld [vmem:[#allocation2 + $0x54] sm:$0xe] }
 0x19d   : > { %v3634_v18 = vshrl.u32 %v3459_v43, 16  ;;  %v3637_v19 = vshll.u32 %v3459_v43, 16  ;;  %v3103_v29 = vsel %vm13361_vm0, %v11014_v55, %v3102_v2  ;;  %v3104_v59 = vrot.slane %v3102_v2, 4  ;;  %v2996_v48 = vld [vmem:[#allocation2 + $0x5c] sm:$0x1] }
 0x19e   : > { %3929 = vrot.lane.b32.xlu0 %v11062_v4, %s12648_s25  ;;  %v3627_v46 = vrot.slane %v3626_v13, 4  ;;  %v3643_v57 = vshll.u32 %v3460_v47, 16  ;;  %v3622_v9 = vsel %vm12940_vm8, %v3617_v6, %v3621_v35  ;;  %v3647_v15 = vshrl.u32 %v3460_v47, 16  ;;  %v3465_v13 = vld [vmem:[#allocation2 + $0x78] sm:$0xf] }
 0x19f   : > { %v3636_v60 = vrot.slane %v3634_v18, 4  ;;  %v3639_v63 = vrot.slane %v3637_v19, 5  ;;  %v3106_v17 = vsel %vm13361_vm0, %v3104_v59, %v3105_v38  ;;  %v3653_v21 = vshll.u32 %v3461_v39, 16 }
 0x1a0   : > { %v3632_v16 = vsel %vm12940_vm8, %v3627_v46, %v3631_v0  ;;  %v3645_v14 = vrot.slane %v3643_v57, 5  ;;  %v11030_v22 = vcombine.low %v3103_v29, %v3106_v17  ;;  %v3649_v45 = vrot.slane %v3647_v15, 4  ;;  %v13429_v0 = vpop.permute.xlu1 %2402 }
 0x1a1   : > { %v11063_v24 = vcombine.low %v3622_v9, %v3632_v16  ;;  %v3640_v25 = vor.u32 %v3639_v63, %v3636_v60  ;;  %v3655_v27 = vrot.slane %v3653_v21, 5  ;;  %v11015_v5 = vrot.slane %v2991_v32, 9  ;;  %15893 = vst [vmem:[#allocation14_spill] sm:$0xff] %v13429_v0  ;;  %v3467_v9 = vld [vmem:[#allocation2 + $0x80] sm:$0x1]  ;;  %v13435_v60 = vpop.permute.xlu0 %2406 }
 0x1a2   : > { %v3109_v28 = vrot.slane %v2992_v61, 5  ;;  %v3112_v31 = vrot.slane %v2993_v62, 5  ;;  %3240 = vrot.lane.b32.xlu1 %v11030_v22, %s12648_s25  ;;  %v3650_v35 = vor.u32 %v3649_v45, %v3645_v14  ;;  %v3658_v36 = vshrl.u32 %v3462_v8, 16  ;;  %v3466_v62 = vld [vmem:[#allocation2 + $0x7c] sm:$0xf]  ;;  %15894 = vst [vmem:[#allocation15_spill] sm:$0xff] %v13435_v60 }
 0x1a3   : > { %3931 = vrot.lane.b32.xlu0 %v11063_v24, %s12648_s25  ;;  %v3641_v56 = vrot.slane %v3640_v25, 4  ;;  %v3661_v11 = vshll.u32 %v3462_v8, 16  ;;  %v3667_v43 = vshll.u32 %v3463_v44, 16  ;;  %v3671_v47 = vshrl.u32 %v3463_v44, 16  ;;  %v2998_v21 = vld [vmem:[#allocation2 + $0x64] sm:$0xf] }
 0x1a4   : > { %v3110_v10 = vsel %vm13361_vm0, %v11015_v5, %v3109_v28  ;;  %v3111_v37 = vrot.slane %v3109_v28, 4  ;;  %v3651_v53 = vrot.slane %v3650_v35, 4  ;;  %v3660_v55 = vrot.slane %v3658_v36, 4  ;;  %v13438_v8 = vpop.permute.xlu1 %1934  ;;  %v2999_v28 = vld [vmem:[#allocation2 + $0x68] sm:$0x1] }
 0x1a5   : > { %v3646_v50 = vsel %vm12940_vm8, %v3641_v56, %v3645_v14  ;;  %v3663_v4 = vrot.slane %v3661_v11, 5  ;;  %v3669_v39 = vrot.slane %v3667_v43, 5  ;;  %v3673_v6 = vrot.slane %v3671_v47, 4  ;;  %v2997_v14 = vld [vmem:[#allocation2 + $0x60] sm:$0xe] }
 0x1a6   : > { %v3113_v2 = vsel %vm13361_vm0, %v3111_v37, %v3112_v31  ;;  %v3677_v38 = vshll.u32 %v3464_v26, 16  ;;  %v3656_v18 = vsel %vm12940_vm8, %v3651_v53, %v3655_v27  ;;  %v11016_v61 = vrot.slane %v2994_v33, 9  ;;  %v3468_v36 = vld [vmem:[#allocation2 + $0x84] sm:$0xf]  ;;  %v3469_v11 = vld [vmem:[#allocation2 + $0x88] sm:$0xf] }
 0x1a7   : > { %v11031_v19 = vcombine.low %v3110_v10, %v3113_v2  ;;  %v3664_v32 = vor.u32 %v3663_v4, %v3660_v55  ;;  %v11064_v46 = vcombine.low %v3646_v50, %v3656_v18  ;;  %v3674_v29 = vor.u32 %v3673_v6, %v3669_v39  ;;  %v3470_v47 = vld [vmem:[#allocation2 + $0x8c] sm:$0x1]  ;;  %v3000_v4 = vld [vmem:[#allocation2 + $0x6c] sm:$0xe]  ;;  %v3001_v18 = vld [vmem:[#allocation2 + $0x70] sm:$0xf] }
 0x1a8   : > { %v3679_v59 = vrot.slane %v3677_v38, 5  ;;  %v3116_v57 = vrot.slane %v2995_v41, 5  ;;  %v3119_v15 = vrot.slane %v2996_v48, 5  ;;  %v3682_v16 = vshrl.u32 %v3465_v13, 16 }
 0x1a9   : > { %3242 = vrot.lane.b32.xlu1 %v11031_v19, %s12648_s25  ;;  %v3665_v63 = vrot.slane %v3664_v32, 4  ;;  %v3685_v17 = vshll.u32 %v3465_v13, 16  ;;  %3933 = vrot.lane.b32.xlu0 %v11064_v46, %s12648_s25  ;;  %v3675_v44 = vrot.slane %v3674_v29, 4  ;;  %v3691_v25 = vshll.u32 %v3466_v62, 16  ;;  %v13449_v13 = vpop.permute.xlu0 %2408  ;;  %v13453_v19 = vpop.permute.xlu1 %1936  ;;  %v3002_v29 = vld [vmem:[#allocation2 + $0x74] sm:$0x1] }
 0x1aa   : > { %v3117_v24 = vsel %vm13361_vm0, %v11016_v61, %v3116_v57  ;;  %v3118_v22 = vrot.slane %v3116_v57, 4  ;;  %v3684_v26 = vrot.slane %v3682_v16, 4  ;;  %v3695_v5 = vshrl.u32 %v3466_v62, 16  ;;  %15895 = vst [vmem:[#allocation16_spill] sm:$0xff] %v13449_v13  ;;  %v3472_v16 = vld [vmem:[#allocation2 + $0x94] sm:$0xf] }
 0x1ab   : > { %v3670_v45 = vsel %vm12940_vm8, %v3665_v63, %v3669_v39  ;;  %v3687_v27 = vrot.slane %v3685_v17, 5  ;;  %v3680_v31 = vsel %vm12940_vm8, %v3675_v44, %v3679_v59  ;;  %v3693_v56 = vrot.slane %v3691_v25, 5  ;;  %v3471_v59 = vld [vmem:[#allocation2 + $0x90] sm:$0xf]  ;;  %v12361_v13 = vld [vmem:[#allocation2 + $0xb4] sm:$0xff]  }
 0x1ac   : > { %v3120_v33 = vsel %vm13361_vm0, %v3118_v22, %v3119_v15  ;;  %v3701_v35 = vshll.u32 %v3467_v9, 16  ;;  %v11065_v41 = vcombine.low %v3670_v45, %v3680_v31  ;;  %v3697_v43 = vrot.slane %v3695_v5, 4  ;;  %3438 = vst.msk [vmem:[#allocation4 + $0x220] sm:$0xff] %vm1432_vm1, %v12361_v13 }
 0x1ad   : > { %v11032_v10 = vcombine.low %v3117_v24, %v3120_v33  ;;  %v3688_v37 = vor.u32 %v3687_v27, %v3684_v26  ;;  %v11017_v50 = vrot.slane %v2997_v14, 9  ;;  %v3123_v53 = vrot.slane %v2998_v21, 5  ;;  %v3473_v26 = vld [vmem:[#allocation2 + $0x98] sm:$0x1]  ;;  %v13463_v33 = vpop.permute.xlu0 %2410 }
 0x1ae   : > { %v3703_v48 = vrot.slane %v3701_v35, 5  ;;  %v3126_v55 = vrot.slane %v2999_v28, 5  ;;  %3935 = vrot.lane.b32.xlu0 %v11065_v41, %s12648_s25  ;;  %v3698_v39 = vor.u32 %v3697_v43, %v3693_v56  ;;  %v3706_v6 = vshrl.u32 %v3468_v36, 16  ;;  %15896 = vst [vmem:[#allocation17_spill] sm:$0xff] %v13463_v33  ;;  %v3003_v41 = vld [vmem:[#allocation2 + $0x78] sm:$0xe] }
 0x1af   : > { %3244 = vrot.lane.b32.xlu1 %v11032_v10, %s12648_s25  ;;  %v3689_v2 = vrot.slane %v3688_v37, 4  ;;  %v3709_v38 = vshll.u32 %v3468_v36, 16  ;;  %v3124_v32 = vsel %vm13361_vm0, %v11017_v50, %v3123_v53  ;;  %v3125_v61 = vrot.slane %v3123_v53, 4  ;;  %v3004_v10 = vld [vmem:[#allocation2 + $0x7c] sm:$0xf]  ;;  %v13466_v37 = vpop.permute.xlu1 %1938  ;;  %v12360_v33 = vld [vmem:[#allocation2 + $0xa8] sm:$0xff]  }
 0x1b0   : > { %v3715_v62 = vshll.u32 %v3469_v11, 16  ;;  %v3719_v46 = vshrl.u32 %v3469_v11, 16  ;;  %v3699_v9 = vrot.slane %v3698_v39, 4  ;;  %v3708_v63 = vrot.slane %v3706_v6, 4  ;;  %v3005_v39 = vld [vmem:[#allocation2 + $0x80] sm:$0x1] }
 0x1b1   : > { %v3694_v57 = vsel %vm12940_vm8, %v3689_v2, %v3693_v56  ;;  %v3711_v15 = vrot.slane %v3709_v38, 5  ;;  %v3127_v17 = vsel %vm13361_vm0, %v3125_v61, %v3126_v55  ;;  %v3725_v44 = vshll.u32 %v3470_v47, 16  ;;  %v3474_v61 = vld [vmem:[#allocation2 + $0x9c] sm:$0xf]  ;;  %3437 = vst.msk [vmem:[#allocation4 + $0x1f8] sm:$0xff] %vm1432_vm1, %v12360_v33 }
 0x1b2   : > { %v3717_v14 = vrot.slane %v3715_v62, 5  ;;  %v3721_v21 = vrot.slane %v3719_v46, 4  ;;  %v3704_v24 = vsel %vm12940_vm8, %v3699_v9, %v3703_v48  ;;  %v11033_v22 = vcombine.low %v3124_v32, %v3127_v17  ;;  %v3475_v62 = vld [vmem:[#allocation2 + $0xa0] sm:$0xf]  ;;  %v3476_v9 = vld [vmem:[#allocation2 + $0xa4] sm:$0x1] }
 0x1b3   : > { %v3712_v25 = vor.u32 %v3711_v15, %v3708_v63  ;;  %v11018_v45 = vrot.slane %v3000_v4, 9  ;;  %v11066_v27 = vcombine.low %v3694_v57, %v3704_v24  ;;  %v3727_v28 = vrot.slane %v3725_v44, 5 }
 0x1b4   : > { %v3722_v5 = vor.u32 %v3721_v21, %v3717_v14  ;;  %v3130_v31 = vrot.slane %v3001_v18, 5  ;;  %3246 = vrot.lane.b32.xlu1 %v11033_v22, %s12648_s25  ;;  %v3133_v35 = vrot.slane %v3002_v29, 5  ;;  %v3730_v36 = vshrl.u32 %v3471_v59, 16  ;;  %v13479_v21 = vpop.permute.xlu0 %2412 }
 0x1b5   : > { %v3713_v56 = vrot.slane %v3712_v25, 4  ;;  %v3733_v11 = vshll.u32 %v3471_v59, 16  ;;  %3937 = vrot.lane.b32.xlu0 %v11066_v27, %s12648_s25  ;;  %v3739_v50 = vshll.u32 %v3472_v16, 16  ;;  %v3743_v2 = vshrl.u32 %v3472_v16, 16  ;;  %15897 = vst [vmem:[#allocation18_spill] sm:$0xff] %v13479_v21  ;;  %v12357_v21 = vld [vmem:[#allocation2 + $0x9c] sm:$0xff]  }
 0x1b6   : > { %v3723_v43 = vrot.slane %v3722_v5, 4  ;;  %v3131_v47 = vsel %vm13361_vm0, %v11018_v45, %v3130_v31  ;;  %v3132_v48 = vrot.slane %v3130_v31, 4  ;;  %v3732_v55 = vrot.slane %v3730_v36, 4  ;;  %v3007_v45 = vld [vmem:[#allocation2 + $0x88] sm:$0xf]  ;;  %3436 = vst.msk [vmem:[#allocation4 + $0x1d0] sm:$0xff] %vm1432_vm1, %v12357_v21 }
 0x1b7   : > { %v3718_v53 = vsel %vm12940_vm8, %v3713_v56, %v3717_v14  ;;  %v3735_v4 = vrot.slane %v3733_v11, 5  ;;  %v3741_v18 = vrot.slane %v3739_v50, 5  ;;  %v3749_v32 = vshll.u32 %v3473_v26, 16  ;;  %v13477_v14 = vld [vmem:[#allocation2 + $0x84] sm:$0xe]  ;;  %v13483_v26 = vpop.permute.xlu1 %1940 }
 0x1b8   : > { %v3728_v6 = vsel %vm12940_vm8, %v3723_v43, %v3727_v28  ;;  %v3134_v38 = vsel %vm13361_vm0, %v3132_v48, %v3133_v35  ;;  %v3745_v57 = vrot.slane %v3743_v2, 4  ;;  %v11019_v15 = vrot.slane %v3003_v41, 9  ;;  %15898 = vst [vmem:[#allocation19_spill] sm:$0xff] %v13483_v26  ;;  %v13487_v56 = vld [vmem:[#allocation2 + $0x8c] sm:$0x1] }
 0x1b9   : > { %v11067_v46 = vcombine.low %v3718_v53, %v3728_v6  ;;  %v11034_v29 = vcombine.low %v3131_v47, %v3134_v38  ;;  %v3736_v59 = vor.u32 %v3735_v4, %v3732_v55  ;;  %v3751_v63 = vrot.slane %v3749_v32, 5  ;;  %v13489_v35 = vld [vmem:[#allocation2 + $0xa8] sm:$0xf] }
 0x1ba   : > { %v3137_v17 = vrot.slane %v3004_v10, 5  ;;  %v3140_v16 = vrot.slane %v3005_v39, 5  ;;  %v3746_v24 = vor.u32 %v3745_v57, %v3741_v18  ;;  %v3754_v22 = vshrl.u32 %v3474_v61, 16  ;;  %v13500_v39 = vld [vmem:[#allocation2 + $0xac] sm:$0xf] }
 0x1bb   : > { %3939 = vrot.lane.b32.xlu0 %v11067_v46, %s12648_s25  ;;  %3248 = vrot.lane.b32.xlu1 %v11034_v29, %s12648_s25  ;;  %v3737_v44 = vrot.slane %v3736_v59, 4  ;;  %v3757_v25 = vshll.u32 %v3474_v61, 16  ;;  %v3763_v28 = vshll.u32 %v3475_v62, 16  ;;  %v3767_v31 = vshrl.u32 %v3475_v62, 16  ;;  %v13503_v61 = vld [vmem:[#allocation2 + $0xb0] sm:$0x1]  ;;  %v13505_v62 = vpop.permute.xlu0 %2414 }
 0x1bc   : > { %v3138_v27 = vsel %vm13361_vm0, %v11019_v15, %v3137_v17  ;;  %v3139_v5 = vrot.slane %v3137_v17, 4  ;;  %v3747_v11 = vrot.slane %v3746_v24, 4  ;;  %v3756_v41 = vrot.slane %v3754_v22, 4  ;;  %15899 = vst [vmem:[#allocation20_spill] sm:$0xff] %v13505_v62  ;;  %v13515_v15 = vld [vmem:[#allocation2 + $0xc] sm:$0xff]   ;;  %v13517_v17 = vld [vmem:[#allocation2 + $0x18] sm:$0xff]  }
 0x1bd   : > { %v3742_v36 = vsel %vm12940_vm8, %v3737_v44, %v3741_v18  ;;  %v3759_v10 = vrot.slane %v3757_v25, 5  ;;  %v13495_v47 = vrot.slane %v3763_v28, 5  ;;  %v3769_v48 = vrot.slane %v3767_v31, 4  ;;  %v13523_v44 = vld [vmem:[#allocation2 + $0x3c] sm:$0xff]   ;;  %v13527_v22 = vld [vmem:[#allocation2 + $0x48] sm:$0xff]   ;;  %v13529_v25 = vld [vmem:[#allocation2 + $0x54] sm:$0xff]  }
 0x1be   : > { %v3141_v43 = vsel %vm13361_vm0, %v3139_v5, %v3140_v16  ;;  %v3773_v50 = vshll.u32 %v3476_v9, 16  ;;  %v3752_v53 = vsel %vm12940_vm8, %v3747_v11, %v3751_v63  ;;  %v11020_v2 = vrot.slane %v13477_v14, 9  ;;  %v13511_v9 = vld [vmem:[#allocation2 + $0xc] sm:$0xe]  ;;  %v13513_v63 = vld [vmem:[#allocation2] sm:$0xff]   ;;  %v13521_v14 = vld [vmem:[#allocation2 + $0x30] sm:$0xff]  }
 0x1bf   : > { %v11035_v55 = vcombine.low %v3138_v27, %v3141_v43  ;;  %v3760_v4 = vor.u32 %v3759_v10, %v3756_v41  ;;  %v11068_v6 = vcombine.low %v3742_v36, %v3752_v53  ;;  %v3770_v38 = vor.u32 %v3769_v48, %v13495_v47  ;;  %v13519_v16 = vld [vmem:[#allocation2 + $0x24] sm:$0xff]   ;;  %v13533_v27 = vld [vmem:[#allocation2 + $0x6c] sm:$0xff]   ;;  %v13535_v5 = vld [vmem:[#allocation2 + $0x78] sm:$0xff]   ;;  %1433 = vst.msk [vmem:[#allocation4] sm:$0xff] %vm1432_vm1, %v13513_v63 }
 0x1c0   : > { %v3775_v18 = vrot.slane %v3773_v50, 5  ;;  %v3144_v32 = vrot.slane %v3007_v45, 5  ;;  %v3147_v29 = vrot.slane %v13487_v56, 5  ;;  %v3778_v59 = vshrl.u32 %v13489_v35, 16  ;;  %v13525_v24 = vpop.permute.xlu1 %1942  ;;  %v13531_v45 = vld [vmem:[#allocation2 + $0x60] sm:$0xff]   ;;  %v13539_v31 = vld [vmem:[#allocation2 + $0x90] sm:$0xff]  }
 0x1c1   : > { %3250 = vrot.lane.b32.xlu1 %v11035_v55, %s12648_s25  ;;  %v3761_v46 = vrot.slane %v3760_v4, 4  ;;  %v3781_v57 = vshll.u32 %v13489_v35, 16  ;;  %15900 = vst [vmem:[#allocation21_spill] sm:$0xff] %v13525_v24  ;;  %v13537_v28 = vld [vmem:[#allocation2 + $0x84] sm:$0xff]   ;;  %v13541_v56 = vld [vmem:[#allocation2 + $0x9c] sm:$0xff]   ;;  %v13547_v11 = vld [vmem:[#allocation2 + $0xb4] sm:$0xff]   ;;  %3941 = vrot.lane.b32.xlu0 %v11068_v6, %s12648_s25 }
 0x1c2   : > { %v13543_v35 = vld [vmem:[#allocation2 + $0xa8] sm:$0xff]   ;;  %v13545_v36 = vld [vmem:[#allocation2 + $0x18] sm:$0xff]   ;;  %v13551_v10 = vld [vmem:[#allocation2 + $0x30] sm:$0xff]   ;;  %v3771_v4 = vrot.slane %v3770_v38, 4  ;;  %v3145_v20 = vsel %vm13361_vm0, %v11020_v2, %v3144_v32  ;;  %v3146_v52 = vrot.slane %v3144_v32, 4  ;;  %v3787_v7 = vshll.u32 %v13500_v39, 16 }
 0x1c3   : > { %v13549_v41 = vld [vmem:[#allocation2 + $0x24] sm:$0xff]   ;;  %v13553_v43 = vld [vmem:[#allocation2 + $0x3c] sm:$0xff]   ;;  %v13557_v50 = vld [vmem:[#allocation2 + $0x54] sm:$0xff]   ;;  %v3766_v1 = vsel %vm12940_vm8, %v3761_v46, %v13495_v47  ;;  %v3780_v40 = vrot.slane %v3778_v59, 4  ;;  %v3783_v6 = vrot.slane %v3781_v57, 5  ;;  %v3791_v38 = vshrl.u32 %v13500_v39, 16 }
 0x1c4   : > { %v13555_v48 = vld [vmem:[#allocation2 + $0x48] sm:$0xff]   ;;  %v13559_v53 = vld [vmem:[#allocation2 + $0x60] sm:$0xff]   ;;  %v13575_v62 = vld [vmem:[#allocation2 + $0x90] sm:$0xe]  ;;  %v3776_v60 = vsel %vm12940_vm8, %v3771_v4, %v3775_v18  ;;  %v3148_v34 = vsel %vm13361_vm0, %v3146_v52, %v3147_v29  ;;  %v13585_v47 = vrot.slane %v3787_v7, 5  ;;  %v3797_v46 = vshll.u32 %v13503_v61, 16  ;;  %v13597_v7 = vpop.permute.xlu0 %2416 }
 0x1c5   : > { %v13561_v55 = vld [vmem:[#allocation2 + $0x6c] sm:$0xff]   ;;  %v13577_v2 = vld [vmem:[#allocation2 + $0x94] sm:$0xf]  ;;  %v13579_v32 = vld [vmem:[#allocation2 + $0x98] sm:$0x1]  ;;  %v11069_v59 = vcombine.low %v3766_v1, %v3776_v60  ;;  %v11036_v57 = vcombine.low %v3145_v20, %v3148_v34  ;;  %v3784_v23 = vor.u32 %v3783_v6, %v3780_v40  ;;  %v3793_v0 = vrot.slane %v3791_v38, 4 }
 0x1c6   : > { %v13588_v39 = vld [vmem:[#allocation2] sm:$0xe]  ;;  %v13590_v24 = vld [vmem:[#allocation2 + $0x4] sm:$0xf]  ;;  %v13592_v26 = vrot.slane %v3797_v46, 5  ;;  %v10947_v18 = vrot.slane %v13511_v9, 9 }
 0x1c7   : > { %v13595_v4 = vld [vmem:[#allocation2 + $0x8] sm:$0x1]  ;;  %3943 = vrot.lane.b32.xlu0 %v11069_v59, %s12648_s25  ;;  %3252 = vrot.lane.b32.xlu1 %v11036_v57, %s12648_s25  ;;  %v13601_v1 = vrot.slane %v3784_v23, 4  ;;  %v3794_v20 = vor.u32 %v3793_v0, %v13585_v47  ;;  %v2105_v40 = vrot.slane %v13567_v51, 5  ;;  %v2108_v52 = vrot.slane %v13569_v3, 5  ;;  %1434 = vst.msk [vmem:[#allocation4 + $0x28] sm:$0xff] %vm1432_vm1, %v13515_v15  ;;  %v1945_v3 = vpop.permute.xlu1 %1944 }
 0x1c8   : > { %v13606_v34 = vld [vmem:[#allocation2 + $0xb4] sm:$0xf]  ;;  %1435 = vst.msk [vmem:[#allocation4 + $0x50] sm:$0xff] %vm1432_vm1, %v13517_v17  ;;  %1436 = vst.msk [vmem:[#allocation4 + $0x78] sm:$0xff] %vm1432_vm1, %v13519_v16  ;;  %v11021_v51 = vrot.slane %v13575_v62, 9  ;;  %v3151_v23 = vrot.slane %v13577_v2, 5 }
 0x1c9   : > { %1437 = vst.msk [vmem:[#allocation4 + $0xa0] sm:$0xff] %vm1432_vm1, %v13521_v14  ;;  %1438 = vst.msk [vmem:[#allocation4 + $0xc8] sm:$0xff] %vm1432_vm1, %v13523_v44  ;;  %v3154_v0 = vrot.slane %v13579_v32, 5  ;;  %v10946_v60 = vrot.slane %v13588_v39, 9  ;;  %v15901_v12 = vld [vmem:[#allocation19_spill] sm:$0xff]  ;;  %v15902_v42 = vld [vmem:[#allocation21_spill] sm:$0xff]  ;;  %v3790_v54 = vsel %vm12940_vm8, %v13601_v1, %v13585_v47 }
 0x1ca   : > { %1439 = vst.msk [vmem:[#allocation4 + $0xf0] sm:$0xff] %vm1432_vm1, %v13527_v22  ;;  %1440 = vst.msk [vmem:[#allocation4 + $0x118] sm:$0xff] %vm1432_vm1, %v13529_v25  ;;  %v2107_v13 = vrot.slane %v2105_v40, 4  ;;  %v3152_v33 = vsel %vm13361_vm0, %v11021_v51, %v3151_v23  ;;  %v2098_v21 = vrot.slane %v13590_v24, 5  ;;  %v2101_v61 = vrot.slane %v13595_v4, 5 }
 0x1cb   : > { %1441 = vst.msk [vmem:[#allocation4 + $0x140] sm:$0xff] %vm1432_vm1, %v13531_v45  ;;  %1442 = vst.msk [vmem:[#allocation4 + $0x168] sm:$0xff] %vm1432_vm1, %v13533_v27  ;;  %v3482_v62 = vld [vmem:[#allocation2 + $0xbc] sm:$0x1]  ;;  %v3802_v63 = vshrl.u32 %v13606_v34, 16  ;;  %v3805_v15 = vshll.u32 %v13606_v34, 16  ;;  %v13700_v45 = vpop.permute.xlu0 %2418 }
 0x1cc   : > { %1443 = vst.msk [vmem:[#allocation4 + $0x190] sm:$0xff] %vm1432_vm1, %v13535_v5  ;;  %1444 = vst.msk [vmem:[#allocation4 + $0x1b8] sm:$0xff] %vm1432_vm1, %v13537_v28  ;;  %v2109_v9 = vsel %vm13361_vm0, %v2107_v13, %v2108_v52  ;;  %v3012_v17 = vld [vmem:[#allocation2 + $0x9c] sm:$0xe]  ;;  %v2099_v24 = vsel %vm13361_vm0, %v10946_v60, %v2098_v21  ;;  %v3013_v22 = vld [vmem:[#allocation2 + $0xa0] sm:$0xf] }
 0x1cd   : > { %1445 = vst.msk [vmem:[#allocation4 + $0x1e0] sm:$0xff] %vm1432_vm1, %v13539_v31  ;;  %1446 = vst.msk [vmem:[#allocation4 + $0x208] sm:$0xff] %vm1432_vm1, %v13541_v56  ;;  %v3014_v25 = vld [vmem:[#allocation2 + $0xa4] sm:$0x1]  ;;  %v2100_v27 = vrot.slane %v2098_v21, 4  ;;  %v3804_v5 = vrot.slane %v3802_v63, 4 }
 0x1ce   : > { %1447 = vst.msk [vmem:[#allocation4 + $0x230] sm:$0xff] %vm1432_vm1, %v13543_v35  ;;  %3425 = vst.msk [vmem:[#allocation4 + $0x18] sm:$0xff] %vm1432_vm1, %v13545_v36  ;;  %v3807_v28 = vrot.slane %v3805_v15, 5  ;;  %v3483_v31 = vld [vmem:[#allocation2 + $0xc0] sm:$0xf] }
 0x1cf   : > { %1448 = vst.msk [vmem:[#allocation4 + $0x258] sm:$0xff] %vm1432_vm1, %v13547_v11  ;;  %3426 = vst.msk [vmem:[#allocation4 + $0x40] sm:$0xff] %vm1432_vm1, %v13549_v41  ;;  %v12362_v56 = vld [vmem:[#allocation2 + $0xc0] sm:$0xff]   ;;  %v3821_v11 = vshll.u32 %v3482_v62, 16  ;;  %v11022_v41 = vrot.slane %v3012_v17, 9  ;;  %v3826_v4 = vshrl.u32 %v3483_v31, 16 }
 0x1d0   : > { %3427 = vst.msk [vmem:[#allocation4 + $0x68] sm:$0xff] %vm1432_vm1, %v13551_v10  ;;  %3428 = vst.msk [vmem:[#allocation4 + $0x90] sm:$0xff] %vm1432_vm1, %v13553_v43  ;;  %v15903_v10 = vld [vmem:[#allocation14_spill] sm:$0xff]  ;;  %v2102_v43 = vsel %vm13361_vm0, %v2100_v27, %v2101_v61  ;;  %v3485_v6 = vld [vmem:[#allocation2 + $0xc8] sm:$0x1] }
 0x1d1   : > { %3429 = vst.msk [vmem:[#allocation4 + $0xb8] sm:$0xff] %vm1432_vm1, %v13555_v48  ;;  %3430 = vst.msk [vmem:[#allocation4 + $0xe0] sm:$0xff] %vm1432_vm1, %v13557_v50  ;;  %v3808_v48 = vor.u32 %v3807_v28, %v3804_v5  ;;  %v3158_v50 = vrot.slane %v3013_v22, 5  ;;  %v10962_v38 = vcombine.low %v2099_v24, %v2102_v43  ;;  %v3823_v47 = vrot.slane %v3821_v11, 5  ;;  %v3015_v46 = vld [vmem:[#allocation2 + $0xa8] sm:$0xe]  ;;  %v1947_v51 = vpop.permute.xlu1 %1946 }
 0x1d2   : > { %3431 = vst.msk [vmem:[#allocation4 + $0x108] sm:$0xff] %vm1432_vm1, %v13559_v53  ;;  %3432 = vst.msk [vmem:[#allocation4 + $0x130] sm:$0xff] %vm1432_vm1, %v13561_v55  ;;  %v3161_v53 = vrot.slane %v3014_v25, 5  ;;  %v3484_v55 = vld [vmem:[#allocation2 + $0xc4] sm:$0xf]  ;;  %v12326_v43 = vld [vmem:[%s15856_s3 + $0xc8] sm:$0xff]  }
 0x1d3   : > { %1981 = vst.msk [vmem:[#allocation4] sm:$0xff] %vm1980_vm3, %v13409_v58  ;;  %1982 = vst.msk [vmem:[#allocation4 + $0x28] sm:$0xff] %vm1980_vm3, %v13438_v8  ;;  %v3795_v58 = vrot.slane %v3794_v20, 4  ;;  %v2106_v8 = vsel %vm13361_vm0, %v10947_v18, %v2105_v40  ;;  %v3016_v39 = vld [vmem:[#allocation2 + $0xac] sm:$0xf]  ;;  %v3809_v59 = vrot.slane %v3808_v48, 4  ;;  %v3159_v57 = vsel %vm13361_vm0, %v11022_v41, %v3158_v50 }
 0x1d4   : > { %1983 = vst.msk [vmem:[#allocation4 + $0x50] sm:$0xff] %vm1980_vm3, %v13453_v19  ;;  %1984 = vst.msk [vmem:[#allocation4 + $0x78] sm:$0xff] %vm1980_vm3, %v13466_v37  ;;  %v3481_v19 = vld [vmem:[#allocation2 + $0xb8] sm:$0xf]  ;;  %v3153_v37 = vrot.slane %v3151_v23, 4  ;;  %v10963_v14 = vcombine.low %v2106_v8, %v2109_v9  ;;  %v3160_v18 = vrot.slane %v3158_v50, 4  ;;  %v13713_v23 = vpop.permute.xlu0 %2420 }
 0x1d5   : > { %1985 = vst.msk [vmem:[#allocation4 + $0xa0] sm:$0xff] %vm1980_vm3, %v15901_v12  ;;  %1986 = vst.msk [vmem:[#allocation4 + $0xc8] sm:$0xff] %vm1980_vm3, %v15902_v42  ;;  %v3800_v29 = vsel %vm12940_vm8, %v3795_v58, %v13592_v26  ;;  %v3811_v35 = vshll.u32 %v3481_v19, 16  ;;  %v3815_v36 = vshrl.u32 %v3481_v19, 16  ;;  %v3017_v1 = vld [vmem:[#allocation2 + $0xb0] sm:$0x1] }
 0x1d6   : > { %1987 = vst.msk [vmem:[#allocation4 + $0xf0] sm:$0xff] %vm1980_vm3, %v1945_v3  ;;  %v11070_v16 = vcombine.low %v3790_v54, %v3800_v29  ;;  %v3155_v44 = vsel %vm13361_vm0, %v3153_v37, %v3154_v0  ;;  %v3829_v40 = vshll.u32 %v3483_v31, 16  ;;  %v3835_v52 = vshll.u32 %v3484_v55, 16  ;;  %v2003_v3 = vld [vmem:[#allocation2 + $0x18] sm:$0xe]  ;;  %v15904_v0 = vld [vmem:[#allocation12_spill] sm:$0xff] }
 0x1d7   : > { %v11037_v26 = vcombine.low %v3152_v33, %v3155_v44  ;;  %2273 = vst.msk [vmem:[#allocation4 + $0x30] sm:$0xff] %vm1432_vm1, %v10963_v14  ;;  %3439 = vst.msk [vmem:[#allocation4 + $0x248] sm:$0xff] %vm1432_vm1, %v12362_v56  ;;  %v3813_v2 = vrot.slane %v3811_v35, 5  ;;  %v3817_v32 = vrot.slane %v3815_v36, 4  ;;  %v3839_v34 = vshrl.u32 %v3484_v55, 16  ;;  %v12322_v31 = vld [vmem:[%s15856_s3 + $0x80] sm:$0xff]   ;;  %v1949_v48 = vpop.permute.xlu1 %1948 }
 0x1d8   : > { %3945 = vrot.lane.b32.xlu0 %v11070_v16, %s12648_s25  ;;  %2449 = vst.msk [vmem:[#allocation4 + $0x30] sm:$0xff] %vm1980_vm3, %v15903_v10  ;;  %v3162_v12 = vsel %vm13361_vm0, %v3160_v18, %v3161_v53  ;;  %v3828_v42 = vrot.slane %v3826_v4, 4  ;;  %v3845_v54 = vshll.u32 %v3485_v6, 16  ;;  %v2004_v58 = vld [vmem:[#allocation2 + $0x1c] sm:$0xf]  ;;  %1988 = vst.msk [vmem:[#allocation4 + $0x118] sm:$0xff] %vm1980_vm3, %v1947_v51  ;;  %v13738_v50 = vpop.permute.xlu0 %2422 }
 0x1d9   : > { %3254 = vrot.lane.b32.xlu1 %v11037_v26, %s12648_s25  ;;  %2272 = vst.msk [vmem:[#allocation4 + $0x8] sm:$0xff] %vm1432_vm1, %v10962_v38  ;;  %v3818_v20 = vor.u32 %v3817_v32, %v3813_v2  ;;  %v3814_v60 = vsel %vm12940_vm8, %v3809_v59, %v3813_v2  ;;  %v13721_v8 = vld [vmem:[#allocation2 + $0x20] sm:$0x1]  ;;  %v3018_v13 = vld [vmem:[#allocation2 + $0xb4] sm:$0xe]  ;;  %v11038_v33 = vcombine.low %v3159_v57, %v3162_v12  ;;  %v3831_v37 = vrot.slane %v3829_v40, 5 }
 0x1da   : > { %2448 = vst.msk [vmem:[#allocation4 + $0x8] sm:$0xff] %vm1980_vm3, %v15904_v0  ;;  %v3837_v21 = vrot.slane %v3835_v52, 5  ;;  %v3019_v61 = vld [vmem:[#allocation2 + $0xb8] sm:$0xf]  ;;  %v3841_v62 = vrot.slane %v3839_v34, 4  ;;  %v3847_v29 = vrot.slane %v3845_v54, 5 }
 0x1db   : > { %v3819_v19 = vrot.slane %v3818_v20, 4  ;;  %v11023_v9 = vrot.slane %v3015_v46, 9  ;;  %v3165_v63 = vrot.slane %v3016_v39, 5  ;;  %v3832_v17 = vor.u32 %v3831_v37, %v3828_v42  ;;  %v3020_v44 = vld [vmem:[#allocation2 + $0xbc] sm:$0x1]  ;;  %v4273_v2 = vld [vmem:[#allocation4] sm:$0xff] }
 0x1dc   : > { %v3168_v16 = vrot.slane %v3017_v1, 5  ;;  %v10948_v14 = vrot.slane %v2003_v3, 9  ;;  %v2006_v24 = vld [vmem:[#allocation2 + $0x24] sm:$0xe]  ;;  %v3842_v25 = vor.u32 %v3841_v62, %v3837_v21  ;;  %v2007_v5 = vld [vmem:[#allocation2 + $0x28] sm:$0xf] }
 0x1dd   : > { %v3824_v15 = vsel %vm12940_vm8, %v3819_v19, %v3823_v47  ;;  %3256 = vrot.lane.b32.xlu1 %v11038_v33, %s12648_s25  ;;  %v3166_v26 = vsel %vm13361_vm0, %v11023_v9, %v3165_v63  ;;  %v3167_v27 = vrot.slane %v3165_v63, 4  ;;  %v13729_v28 = vld [vmem:[#allocation2 + $0x2c] sm:$0x1]  ;;  %v3833_v56 = vrot.slane %v3832_v17, 4  ;;  %v3021_v41 = vld [vmem:[#allocation2 + $0xc0] sm:$0xe] }
 0x1de   : > { %v11071_v22 = vcombine.low %v3814_v60, %v3824_v15  ;;  %v2112_v35 = vrot.slane %v2004_v58, 5  ;;  %v2115_v36 = vrot.slane %v13721_v8, 5  ;;  %v11024_v11 = vrot.slane %v3018_v13, 9  ;;  %v3022_v10 = vld [vmem:[#allocation2 + $0xc4] sm:$0xf]  ;;  %1989 = vst.msk [vmem:[#allocation4 + $0x140] sm:$0xff] %vm1980_vm3, %v1949_v48  ;;  %v1951_v58 = vpop.permute.xlu1 %1950 }
 0x1df   : > { %v3843_v53 = vrot.slane %v3842_v25, 4  ;;  %v3169_v55 = vsel %vm13361_vm0, %v3167_v27, %v3168_v16  ;;  %v3172_v6 = vrot.slane %v3019_v61, 5  ;;  %v3175_v38 = vrot.slane %v3020_v44, 5  ;;  %v13743_v32 = vld [vmem:[#allocation2 + $0xc8] sm:$0x1]  ;;  %v4279_v34 = vld [vmem:[#allocation4 + $0x30] sm:$0xff] }
 0x1e0   : > { %3947 = vrot.lane.b32.xlu0 %v11071_v22, %s12648_s25  ;;  %v3838_v47 = vsel %vm12940_vm8, %v3833_v56, %v3837_v21  ;;  %v11039_v46 = vcombine.low %v3166_v26, %v3169_v55  ;;  %v2113_v39 = vsel %vm13361_vm0, %v10948_v14, %v2112_v35  ;;  %v2114_v59 = vrot.slane %v2112_v35, 4  ;;  %v2009_v18 = vld [vmem:[#allocation2 + $0x30] sm:$0xe]  ;;  %v2010_v4 = vld [vmem:[#allocation2 + $0x34] sm:$0xf]  ;;  %v12328_v0 = vld [vmem:[%s15856_s3 + $0x88] sm:$0xff]   ;;  %v13775_v14 = vpop.permute.xlu0 %2424 }
 0x1e1   : > { %v4274_v57 = vld [vmem:[#allocation4 + $0x8] sm:$0xff]  ;;  %v3848_v1 = vsel %vm12940_vm8, %v3843_v53, %v3847_v29  ;;  %v3173_v20 = vsel %vm13361_vm0, %v11024_v11, %v3172_v6  ;;  %v3174_v40 = vrot.slane %v3172_v6, 4  ;;  %v10949_v52 = vrot.slane %v2006_v24, 9  ;;  %v12332_v8 = vld [vmem:[%s15856_s3 + $0xd0] sm:$0xff]   ;;  %v2013_v21 = vld [vmem:[#allocation2 + $0x40] sm:$0xf] }
 0x1e2   : > { %4728 = vmatprep.mubr.bf16.mxu1 %v4274_v57  ;;  %v13754_v3 = vld [vmem:[#allocation2 + $0x38] sm:$0x1]  ;;  %v2012_v51 = vld [vmem:[#allocation2 + $0x3c] sm:$0xe]  ;;  %v11072_v60 = vcombine.low %v3838_v47, %v3848_v1  ;;  %3258 = vrot.lane.b32.xlu1 %v11039_v46, %s12648_s25  ;;  %v2116_v12 = vsel %vm13361_vm0, %v2114_v59, %v2115_v36  ;;  %v2119_v42 = vrot.slane %v2007_v5, 5  ;;  %v2122_v54 = vrot.slane %v13729_v28, 5  ;;  %v1953_v6 = vpop.permute.xlu1 %1952 }
 0x1e3   : > { %4729 = vmatmul.mubr.bf16.vlgmr.msra.gmra.mrb[32].mxu1 %v4273_v2  ;;  %v10964_v13 = vcombine.low %v2113_v39, %v2116_v12  ;;  %v3176_v19 = vsel %vm13361_vm0, %v3174_v40, %v3175_v38  ;;  %v11025_v33 = vrot.slane %v3021_v41, 9  ;;  %v3179_v37 = vrot.slane %v3022_v10, 5  ;;  %v2014_v61 = vld [vmem:[#allocation2 + $0x44] sm:$0x1]  ;;  %1990 = vst.msk [vmem:[#allocation4 + $0x168] sm:$0xff] %vm1980_vm3, %v1951_v58  ;;  %v15905_v5 = vld [vmem:[#allocation13_spill] sm:$0xff] }
 0x1e4   : > { %4736 = vmatprep.mubr.bf16.mxu1 %v4279_v34  ;;  %11728 = vmatpush3.bf16.msra.mxu1 %v12322_v31  ;;  %v11040_v62 = vcombine.low %v3173_v20, %v3176_v19  ;;  %v2120_v29 = vsel %vm13361_vm0, %v10949_v52, %v2119_v42  ;;  %v2121_v9 = vrot.slane %v2119_v42, 4  ;;  %v3182_v63 = vrot.slane %v13743_v32, 5  ;;  %v2015_v15 = vld [vmem:[#allocation2 + $0x48] sm:$0xe]  ;;  %v2016_v17 = vld [vmem:[#allocation2 + $0x4c] sm:$0xf]  ;;  %v13815_v42 = vpop.permute.xlu0 %2426 }
 0x1e5   : > { %3949 = vrot.lane.b32.xlu0 %v11072_v60, %s12648_s25  ;;  %v13773_v16 = vld [vmem:[#allocation2 + $0x50] sm:$0x1]  ;;  %11729 = vmatprep.subr.bf16.mxu1 %v12326_v43  ;;  %2274 = vst.msk [vmem:[#allocation4 + $0x58] sm:$0xff] %vm1432_vm1, %v10964_v13  ;;  %v3180_v44 = vsel %vm13361_vm0, %v11025_v33, %v3179_v37  ;;  %v3181_v24 = vrot.slane %v3179_v37, 4  ;;  %v10950_v22 = vrot.slane %v2009_v18, 9  ;;  %v2126_v25 = vrot.slane %v2010_v4, 5 }
 0x1e6   : > { %v2018_v26 = vld [vmem:[#allocation2 + $0x54] sm:$0xe]  ;;  %v2019_v27 = vld [vmem:[#allocation2 + $0x58] sm:$0xf]  ;;  %2450 = vst.msk [vmem:[#allocation4 + $0x58] sm:$0xff] %vm1980_vm3, %v15905_v5  ;;  %3260 = vrot.lane.b32.xlu1 %v11040_v62, %s12648_s25  ;;  %v2123_v28 = vsel %vm13361_vm0, %v2121_v9, %v2122_v54  ;;  %v2129_v31 = vrot.slane %v13754_v3, 5 }
 0x1e7   : > { %v10951_v56 = vrot.slane %v2012_v51, 9  ;;  %v2133_v35 = vrot.slane %v2013_v21, 5  ;;  %v13786_v36 = vld [vmem:[#allocation2 + $0x5c] sm:$0x1]  ;;  %v12334_v11 = vld [vmem:[%s15856_s3 + $0x90] sm:$0xff]   ;;  %v10965_v41 = vcombine.low %v2120_v29, %v2123_v28  ;;  %v3183_v10 = vsel %vm13361_vm0, %v3181_v24, %v3182_v63  ;;  %1991 = vst.msk [vmem:[#allocation4 + $0x190] sm:$0xff] %vm1980_vm3, %v1953_v6  ;;  %v1955_v21 = vpop.permute.xlu1 %1954 }
 0x1e8   : > { %v2127_v43 = vsel %vm13361_vm0, %v10950_v22, %v2126_v25  ;;  %v2128_v48 = vrot.slane %v2126_v25, 4  ;;  %11730 = vmatpush3.bf16.msra.mxu1 %v12328_v0  ;;  %v2021_v53 = vld [vmem:[#allocation2 + $0x60] sm:$0xe]  ;;  %v2022_v55 = vld [vmem:[#allocation2 + $0x64] sm:$0xf]  ;;  %v12338_v38 = vld [vmem:[%s15856_s3 + $0xd8] sm:$0xff]   ;;  %v11041_v2 = vcombine.low %v3180_v44, %v3183_v10 }
 0x1e9   : > { %v2134_v32 = vsel %vm13361_vm0, %v10951_v56, %v2133_v35  ;;  %v2135_v47 = vrot.slane %v2133_v35, 4  ;;  %v2136_v46 = vrot.slane %v2014_v61, 5  ;;  %v13800_v39 = vld [vmem:[#allocation2 + $0x68] sm:$0x1]  ;;  %11731 = vmatprep.subr.bf16.mxu1 %v12332_v8  ;;  %2275 = vst.msk [vmem:[#allocation4 + $0x80] sm:$0xff] %vm1432_vm1, %v10965_v41  ;;  %v4278_v57 = vld [vmem:[#allocation4 + $0x28] sm:$0xff] }
 0x1ea   : > { %v2130_v59 = vsel %vm13361_vm0, %v2128_v48, %v2129_v31  ;;  %v10952_v18 = vrot.slane %v2015_v15, 9  ;;  %v2140_v4 = vrot.slane %v2016_v17, 5  ;;  %v2143_v1 = vrot.slane %v13773_v16, 5  ;;  %v2024_v20 = vld [vmem:[#allocation2 + $0x6c] sm:$0xe]  ;;  %v12340_v40 = vld [vmem:[%s15856_s3 + $0x98] sm:$0xff]   ;;  %3262 = vrot.lane.b32.xlu1 %v11041_v2, %s12648_s25 }
 0x1eb   : > { %v15906_v52 = vld [vmem:[#allocation15_spill] sm:$0xff]  ;;  %v10966_v34 = vcombine.low %v2127_v43, %v2130_v59  ;;  %v2137_v3 = vsel %vm13361_vm0, %v2135_v47, %v2136_v46  ;;  %4737 = vmatmul.mubr.bf16.gmra.mrb[36].mxu1 %v4278_v57  ;;  %v10953_v51 = vrot.slane %v2018_v26, 9  ;;  %v2147_v0 = vrot.slane %v2019_v27, 5  ;;  %v2025_v60 = vld [vmem:[#allocation2 + $0x70] sm:$0xf]  ;;  %1992 = vst.msk [vmem:[#allocation4 + $0x1b8] sm:$0xff] %vm1980_vm3, %v1955_v21  ;;  %v13861_v59 = vpop.permute.xlu0 %2428 }
 0x1ec   : > { %2451 = vst.msk [vmem:[#allocation4 + $0x80] sm:$0xff] %vm1980_vm3, %v15906_v52  ;;  %v2026_v12 = vld [vmem:[#allocation2 + $0x74] sm:$0x1]  ;;  %v10967_v54 = vcombine.low %v2134_v32, %v2137_v3  ;;  %v2141_v58 = vsel %vm13361_vm0, %v10952_v18, %v2140_v4  ;;  %v2142_v8 = vrot.slane %v2140_v4, 4  ;;  %v2150_v13 = vrot.slane %v13786_v36, 5  ;;  %11732 = vmatpush3.bf16.msra.mxu1 %v12334_v11  ;;  %v12346_v17 = vld [vmem:[%s15856_s3 + $0xe0] sm:$0xff]  }
 0x1ed   : > { %v13820_v19 = vld [vmem:[#allocation2 + $0x78] sm:$0xe]  ;;  %v13822_v33 = vld [vmem:[#allocation2 + $0x7c] sm:$0xf]  ;;  %v13824_v37 = vld [vmem:[#allocation2 + $0x80] sm:$0x1]  ;;  %v2148_v61 = vsel %vm13361_vm0, %v10953_v51, %v2147_v0  ;;  %11733 = vmatprep.subr.bf16.mxu1 %v12338_v38  ;;  %v1957_v38 = vpop.permute.xlu1 %1956 }
 0x1ee   : > { %2276 = vst.msk [vmem:[#allocation4 + $0xa8] sm:$0xff] %vm1432_vm1, %v10966_v34  ;;  %v2149_v62 = vrot.slane %v2147_v0, 4  ;;  %v10954_v29 = vrot.slane %v2021_v53, 9  ;;  %v2154_v9 = vrot.slane %v2022_v55, 5  ;;  %v2030_v63 = vld [vmem:[#allocation2 + $0x84] sm:$0xe]  ;;  %v2144_v24 = vsel %vm13361_vm0, %v2142_v8, %v2143_v1 }
 0x1ef   : > { %v2031_v15 = vld [vmem:[#allocation2 + $0x88] sm:$0xf]  ;;  %v15907_v16 = vld [vmem:[#allocation16_spill] sm:$0xff]  ;;  %2277 = vst.msk [vmem:[#allocation4 + $0xd0] sm:$0xff] %vm1432_vm1, %v10967_v54  ;;  %v2157_v22 = vrot.slane %v13800_v39, 5  ;;  %v10955_v25 = vrot.slane %v2024_v20, 9  ;;  %v10968_v28 = vcombine.low %v2141_v58, %v2144_v24 }
 0x1f0   : > { %2452 = vst.msk [vmem:[#allocation4 + $0xa8] sm:$0xff] %vm1980_vm3, %v15907_v16  ;;  %v4284_v44 = vld [vmem:[#allocation4 + $0x58] sm:$0xff]  ;;  %v2161_v26 = vrot.slane %v2025_v60, 5  ;;  %v2151_v31 = vsel %vm13361_vm0, %v2149_v62, %v2150_v13  ;;  %v2155_v56 = vsel %vm13361_vm0, %v10954_v29, %v2154_v9  ;;  %v2156_v35 = vrot.slane %v2154_v9, 4  ;;  %v2033_v36 = vld [vmem:[#allocation2 + $0x90] sm:$0xe]  ;;  %11734 = vmatpush3.bf16.msra.mxu1 %v12340_v40 }
 0x1f1   : > { %v13839_v27 = vld [vmem:[#allocation2 + $0x8c] sm:$0x1]  ;;  %4744 = vmatprep.mubr.bf16.mxu1 %v4284_v44  ;;  %v2034_v11 = vld [vmem:[#allocation2 + $0x94] sm:$0xf]  ;;  %v12347_v41 = vld [vmem:[%s15856_s3 + $0xa0] sm:$0xff]   ;;  %v10969_v10 = vcombine.low %v2148_v61, %v2151_v31  ;;  %v2164_v53 = vrot.slane %v2026_v12, 5  ;;  %11735 = vmatprep.subr.bf16.mxu1 %v12346_v17  ;;  %v1959_v21 = vpop.permute.xlu1 %1958 }
 0x1f2   : > { %v15908_v5 = vld [vmem:[#allocation17_spill] sm:$0xff]  ;;  %v2162_v43 = vsel %vm13361_vm0, %v10955_v25, %v2161_v26  ;;  %v2163_v48 = vrot.slane %v2161_v26, 4  ;;  %v13852_v55 = vld [vmem:[#allocation2 + $0x98] sm:$0x1]  ;;  %v2036_v6 = vld [vmem:[#allocation2 + $0x9c] sm:$0xe]  ;;  %v2158_v2 = vsel %vm13361_vm0, %v2156_v35, %v2157_v22 }
 0x1f3   : > { %2453 = vst.msk [vmem:[#allocation4 + $0xd0] sm:$0xff] %vm1980_vm3, %v15908_v5  ;;  %v10956_v32 = vrot.slane %v13820_v19, 9  ;;  %v2168_v47 = vrot.slane %v13822_v33, 5  ;;  %v2171_v46 = vrot.slane %v13824_v37, 5  ;;  %v2037_v39 = vld [vmem:[#allocation2 + $0xa0] sm:$0xf]  ;;  %v10970_v1 = vcombine.low %v2155_v56, %v2158_v2  ;;  %v13900_v56 = vpop.permute.xlu0 %2430 }
 0x1f4   : > { %2278 = vst.msk [vmem:[#allocation4 + $0xf8] sm:$0xff] %vm1432_vm1, %v10968_v28  ;;  %v12352_v57 = vld [vmem:[%s15856_s3 + $0xe8] sm:$0xff]   ;;  %v15909_v18 = vld [vmem:[#allocation18_spill] sm:$0xff]  ;;  %2279 = vst.msk [vmem:[#allocation4 + $0x120] sm:$0xff] %vm1432_vm1, %v10969_v10  ;;  %v2165_v20 = vsel %vm13361_vm0, %v2163_v48, %v2164_v53  ;;  %v10957_v40 = vrot.slane %v2030_v63, 9  ;;  %v2175_v52 = vrot.slane %v2031_v15, 5  ;;  %11736 = vmatpush3.bf16.msra.mxu1 %v12347_v41 }
 0x1f5   : > { %1993 = vst.msk [vmem:[#allocation4 + $0x1e0] sm:$0xff] %vm1980_vm3, %v1957_v38  ;;  %2454 = vst.msk [vmem:[#allocation4 + $0xf8] sm:$0xff] %vm1980_vm3, %v15909_v18  ;;  %v4283_v4 = vld [vmem:[#allocation4 + $0x50] sm:$0xff]  ;;  %v4289_v51 = vld [vmem:[#allocation4 + $0x80] sm:$0xff]  ;;  %v10971_v0 = vcombine.low %v2162_v43, %v2165_v20  ;;  %v2169_v60 = vsel %vm13361_vm0, %v10956_v32, %v2168_v47  ;;  %v2170_v12 = vrot.slane %v2168_v47, 4  ;;  %v2178_v54 = vrot.slane %v13839_v27, 5  ;;  %11737 = vmatprep.subr.bf16.mxu1 %v12352_v57  ;;  %v1961_v10 = vpop.permute.xlu1 %1960 }
 0x1f6   : > { %v2038_v34 = vld [vmem:[#allocation2 + $0xa4] sm:$0x1]  ;;  %4745 = vmatmul.mubr.bf16.gmra.mrb[40].mxu1 %v4283_v4  ;;  %v2039_v58 = vld [vmem:[#allocation2 + $0xa8] sm:$0xe]  ;;  %2280 = vst.msk [vmem:[#allocation4 + $0x148] sm:$0xff] %vm1432_vm1, %v10970_v1  ;;  %v2176_v8 = vsel %vm13361_vm0, %v10957_v40, %v2175_v52  ;;  %v2177_v13 = vrot.slane %v2175_v52, 4 }
 0x1f7   : > { %v15910_v3 = vld [vmem:[#allocation20_spill] sm:$0xff]  ;;  %4752 = vmatprep.mubr.bf16.mxu1 %v4289_v51  ;;  %v10958_v19 = vrot.slane %v2033_v36, 9  ;;  %v2182_v33 = vrot.slane %v2034_v11, 5  ;;  %v2040_v37 = vld [vmem:[#allocation2 + $0xac] sm:$0xf]  ;;  %2456 = vst.msk [vmem:[#allocation4 + $0x148] sm:$0xff] %vm1980_vm3, %v13597_v7  ;;  %v2172_v62 = vsel %vm13361_vm0, %v2170_v12, %v2171_v46 }
 0x1f8   : > { %2455 = vst.msk [vmem:[#allocation4 + $0x120] sm:$0xff] %vm1980_vm3, %v15910_v3  ;;  %v12353_v61 = vld [vmem:[%s15856_s3 + $0xa8] sm:$0xff]   ;;  %v2185_v29 = vrot.slane %v13852_v55, 5  ;;  %v10959_v9 = vrot.slane %v2036_v6, 9  ;;  %v2189_v63 = vrot.slane %v2037_v39, 5  ;;  %1994 = vst.msk [vmem:[#allocation4 + $0x208] sm:$0xff] %vm1980_vm3, %v1959_v21  ;;  %v10972_v7 = vcombine.low %v2169_v60, %v2172_v62 }
 0x1f9   : > { %2281 = vst.msk [vmem:[#allocation4 + $0x170] sm:$0xff] %vm1432_vm1, %v10971_v0  ;;  %v2041_v15 = vld [vmem:[#allocation2 + $0xb0] sm:$0x1]  ;;  %v2179_v16 = vsel %vm13361_vm0, %v2177_v13, %v2178_v54  ;;  %v2183_v44 = vsel %vm13361_vm0, %v10958_v19, %v2182_v33  ;;  %v2184_v24 = vrot.slane %v2182_v33, 4  ;;  %v2042_v22 = vld [vmem:[#allocation2 + $0xb4] sm:$0xe]  ;;  %11738 = vmatpush3.bf16.msra.mxu1 %v12353_v61 }
 0x1fa   : > { %v12358_v17 = vld [vmem:[%s15856_s3 + $0xf0] sm:$0xff]   ;;  %2457 = vst.msk [vmem:[#allocation4 + $0x170] sm:$0xff] %vm1980_vm3, %v13700_v45  ;;  %v2043_v25 = vld [vmem:[#allocation2 + $0xb8] sm:$0xf]  ;;  %v10973_v26 = vcombine.low %v2176_v8, %v2179_v16  ;;  %v2190_v27 = vsel %vm13361_vm0, %v10959_v9, %v2189_v63  ;;  %v2191_v5 = vrot.slane %v2189_v63, 4  ;;  %v2192_v28 = vrot.slane %v2038_v34, 5 }
 0x1fb   : > { %v2044_v31 = vld [vmem:[#allocation2 + $0xbc] sm:$0x1]  ;;  %v2464_v45 = vld [vmem:[#allocation2 + $0xc] sm:$0xf]  ;;  %2282 = vst.msk [vmem:[#allocation4 + $0x198] sm:$0xff] %vm1432_vm1, %v10972_v7  ;;  %v2186_v35 = vsel %vm13361_vm0, %v2184_v24, %v2185_v29  ;;  %v10960_v36 = vrot.slane %v2039_v58, 9  ;;  %11739 = vmatprep.subr.bf16.mxu1 %v12358_v17  ;;  %v3922_v58 = vpop.permute.xlu0 %3921  ;;  %v1963_v24 = vpop.permute.xlu1 %1962 }
 0x1fc   : > { %v2196_v11 = vrot.slane %v2040_v37, 5  ;;  %v2199_v41 = vrot.slane %v2041_v15, 5  ;;  %v2465_v43 = vld [vmem:[#allocation2 + $0x10] sm:$0xf]  ;;  %v4294_v53 = vld [vmem:[#allocation4 + $0xa8] sm:$0xff]  ;;  %2458 = vst.msk [vmem:[#allocation4 + $0x198] sm:$0xff] %vm1980_vm3, %v13713_v23  ;;  %v10974_v55 = vcombine.low %v2183_v44, %v2186_v35  ;;  %v2193_v6 = vsel %vm13361_vm0, %v2191_v5, %v2192_v28 }
 0x1fd   : > { %v12359_v48 = vld [vmem:[%s15856_s3 + $0xb0] sm:$0xff]   ;;  %2283 = vst.msk [vmem:[#allocation4 + $0x1c0] sm:$0xff] %vm1432_vm1, %v10973_v26  ;;  %v10961_v38 = vrot.slane %v2042_v22, 9  ;;  %v2203_v2 = vrot.slane %v2043_v25, 5  ;;  %v12363_v47 = vld [vmem:[%s15856_s3 + $0xf8] sm:$0xff]   ;;  %v4288_v46 = vld [vmem:[#allocation4 + $0x78] sm:$0xff]  ;;  %v10975_v23 = vcombine.low %v2190_v27, %v2193_v6 }
 0x1fe   : > { %1995 = vst.msk [vmem:[#allocation4 + $0x230] sm:$0xff] %vm1980_vm3, %v1961_v10  ;;  %v2466_v32 = vld [vmem:[#allocation2 + $0x14] sm:$0x1]  ;;  %2459 = vst.msk [vmem:[#allocation4 + $0x1c0] sm:$0xff] %vm1980_vm3, %v13738_v50  ;;  %v2197_v39 = vsel %vm13361_vm0, %v10960_v36, %v2196_v11  ;;  %v2198_v57 = vrot.slane %v2196_v11, 4  ;;  %v2206_v18 = vrot.slane %v2044_v31, 5  ;;  %4753 = vmatmul.mubr.bf16.gmra.mrb[44].mxu1 %v4288_v46 }
 0x1ff   : > { %v2467_v4 = vld [vmem:[#allocation2 + $0x18] sm:$0xf]  ;;  %2284 = vst.msk [vmem:[#allocation4 + $0x1e8] sm:$0xff] %vm1432_vm1, %v10974_v55  ;;  %v2204_v1 = vsel %vm13361_vm0, %v10961_v38, %v2203_v2  ;;  %v2205_v20 = vrot.slane %v2203_v2, 4  ;;  %v2513_v40 = vshrl.u32 %v2464_v45, 16  ;;  %v2516_v52 = vshll.u32 %v2464_v45, 16  ;;  %4760 = vmatprep.mubr.bf16.mxu1 %v4294_v53  ;;  %11740 = vmatpush3.bf16.msra.mxu1 %v12359_v48  ;;  %v3924_v48 = vpop.permute.xlu0 %3923 }
 0x200   : > { %v2468_v34 = vld [vmem:[#allocation2 + $0x1c] sm:$0xf]  ;;  %2460 = vst.msk [vmem:[#allocation4 + $0x1e8] sm:$0xff] %vm1980_vm3, %v13775_v14  ;;  %v2200_v50 = vsel %vm13361_vm0, %v2198_v57, %v2199_v41  ;;  %v2522_v3 = vshll.u32 %v2465_v43, 16  ;;  %v2526_v51 = vshrl.u32 %v2465_v43, 16  ;;  %v2532_v0 = vshll.u32 %v2466_v32, 16  ;;  %11741 = vmatprep.subr.bf16.mxu1 %v12363_v47  ;;  %v3233_v47 = vpop.permute.xlu1 %3232 }
 0x201   : > { %2285 = vst.msk [vmem:[#allocation4 + $0x210] sm:$0xff] %vm1432_vm1, %v10975_v23  ;;  %v2469_v60 = vld [vmem:[#allocation2 + $0x20] sm:$0x1]  ;;  %v12364_v12 = vld [vmem:[%s15856_s3 + $0xb8] sm:$0xff]   ;;  %v10976_v54 = vcombine.low %v2197_v39, %v2200_v50  ;;  %v2207_v14 = vsel %vm13361_vm0, %v2205_v20, %v2206_v18  ;;  %v2515_v8 = vrot.slane %v2513_v40, 4  ;;  %v2518_v13 = vrot.slane %v2516_v52, 5 }
 0x202   : > { %2461 = vst.msk [vmem:[#allocation4 + $0x210] sm:$0xff] %vm1980_vm3, %v13815_v42  ;;  %v2470_v19 = vld [vmem:[#allocation2 + $0x24] sm:$0xf]  ;;  %v10977_v37 = vcombine.low %v2204_v1, %v2207_v14  ;;  %3969 = vst.msk [vmem:[#allocation4 + $0x18] sm:$0xff] %vm1980_vm3, %v3922_v58  ;;  %v2524_v21 = vrot.slane %v2522_v3, 5  ;;  %v2528_v61 = vrot.slane %v2526_v51, 4 }
 0x203   : > { %v12365_v33 = vld [vmem:[%s15856_s3 + $0x100] sm:$0xff]   ;;  %v2534_v62 = vrot.slane %v2532_v0, 5  ;;  %2286 = vst.msk [vmem:[#allocation4 + $0x238] sm:$0xff] %vm1432_vm1, %v10976_v54  ;;  %v2519_v42 = vor.u32 %v2518_v13, %v2515_v8  ;;  %v2537_v29 = vshrl.u32 %v2467_v4, 16  ;;  %v2540_v9 = vshll.u32 %v2467_v4, 16  ;;  %11742 = vmatpush3.bf16.msra.mxu1 %v12364_v12  ;;  %v4293_v28 = vld [vmem:[#allocation4 + $0xa0] sm:$0xff] }
 0x204   : > { %v2546_v63 = vshll.u32 %v2468_v34, 16  ;;  %2462 = vst.msk [vmem:[#allocation4 + $0x238] sm:$0xff] %vm1980_vm3, %v13861_v59  ;;  %v2529_v15 = vor.u32 %v2528_v61, %v2524_v21  ;;  %v2550_v17 = vshrl.u32 %v2468_v34, 16  ;;  %v2556_v7 = vshll.u32 %v2469_v60, 16  ;;  %v2471_v16 = vld [vmem:[#allocation2 + $0x28] sm:$0xf]  ;;  %11895 = vmatprep.subr.bf16.mxu1 %v12365_v33 }
 0x205   : > { %2287 = vst.msk [vmem:[#allocation4 + $0x260] sm:$0xff] %vm1432_vm1, %v10977_v37  ;;  %v2561_v44 = vshrl.u32 %v2470_v19, 16  ;;  %v2520_v22 = vrot.slane %v2519_v42, 4  ;;  %v2539_v25 = vrot.slane %v2537_v29, 4  ;;  %v2542_v26 = vrot.slane %v2540_v9, 5  ;;  %v4299_v36 = vld [vmem:[#allocation4 + $0xd0] sm:$0xff]  ;;  %v3235_v37 = vpop.permute.xlu1 %3234 }
 0x206   : > { %2463 = vst.msk [vmem:[#allocation4 + $0x260] sm:$0xff] %vm1980_vm3, %v13900_v56  ;;  %v2548_v27 = vrot.slane %v2546_v63, 5  ;;  %v2472_v5 = vld [vmem:[#allocation2 + $0x2c] sm:$0x1]  ;;  %1996 = vst.msk [vmem:[#allocation4 + $0x258] sm:$0xff] %vm1980_vm3, %v1963_v24  ;;  %v2530_v59 = vrot.slane %v2529_v15, 4  ;;  %4761 = vmatmul.mubr.bf16.gmra.mrb[48].mxu1 %v4293_v28 }
 0x207   : > { %v2552_v31 = vrot.slane %v2550_v17, 4  ;;  %v2558_v45 = vrot.slane %v2556_v7, 5  ;;  %v2563_v35 = vrot.slane %v2561_v44, 4  ;;  %v2525_v11 = vsel %vm12940_vm8, %v2520_v22, %v2524_v21  ;;  %v2473_v43 = vld [vmem:[#allocation2 + $0x30] sm:$0xf]  ;;  %4768 = vmatprep.mubr.bf16.mxu1 %v4299_v36  ;;  %3970 = vst.msk [vmem:[#allocation4 + $0x40] sm:$0xff] %vm1980_vm3, %v3924_v48 }
 0x208   : > { %v2543_v56 = vor.u32 %v2542_v26, %v2539_v25  ;;  %v2564_v41 = vshll.u32 %v2470_v19, 16  ;;  %v2570_v10 = vshll.u32 %v2471_v16, 16  ;;  %v2535_v53 = vsel %vm12940_vm8, %v2530_v59, %v2534_v62  ;;  %v2474_v2 = vld [vmem:[#allocation2 + $0x34] sm:$0xf]  ;;  %v2475_v52 = vld [vmem:[#allocation2 + $0x38] sm:$0x1] }
 0x209   : > { %v2553_v55 = vor.u32 %v2552_v31, %v2548_v27  ;;  %v2574_v6 = vshrl.u32 %v2471_v16, 16  ;;  %v2580_v38 = vshll.u32 %v2472_v5, 16  ;;  %v10994_v32 = vcombine.low %v2525_v11, %v2535_v53  ;;  %v2476_v3 = vld [vmem:[#allocation2 + $0x3c] sm:$0xf]  ;;  %v2477_v54 = vld [vmem:[#allocation2 + $0x40] sm:$0xf]  ;;  %v3926_v16 = vpop.permute.xlu0 %3925  ;;  %v3237_v11 = vpop.permute.xlu1 %3236 }
 0x20a   : > { %v2544_v46 = vrot.slane %v2543_v56, 4  ;;  %v2566_v23 = vrot.slane %v2564_v41, 5  ;;  %v2572_v39 = vrot.slane %v2570_v10, 5  ;;  %v2585_v1 = vshrl.u32 %v2473_v43, 16  ;;  %v4304_v14 = vld [vmem:[#allocation4 + $0xf8] sm:$0xff]  ;;  %v4298_v33 = vld [vmem:[#allocation4 + $0xc8] sm:$0xff] }
 0x20b   : > { %v2554_v57 = vrot.slane %v2553_v55, 4  ;;  %v2576_v18 = vrot.slane %v2574_v6, 4  ;;  %v2582_v4 = vrot.slane %v2580_v38, 5  ;;  %2960 = vst.msk [vmem:[#allocation4 + $0x10] sm:$0xff] %vm1432_vm1, %v10994_v32  ;;  %v2588_v34 = vshll.u32 %v2473_v43, 16 }
 0x20c   : > { %v2549_v20 = vsel %vm12940_vm8, %v2544_v46, %v2548_v27  ;;  %v2567_v40 = vor.u32 %v2566_v23, %v2563_v35  ;;  %v2594_v50 = vshll.u32 %v2474_v2, 16  ;;  %3280 = vst.msk [vmem:[#allocation4 + $0x10] sm:$0xff] %vm1980_vm3, %v3233_v47  ;;  %v2587_v60 = vrot.slane %v2585_v1, 4  ;;  %v2478_v63 = vld [vmem:[#allocation2 + $0x44] sm:$0x1]  ;;  %3971 = vst.msk [vmem:[#allocation4 + $0x68] sm:$0xff] %vm1980_vm3, %v3926_v16 }
 0x20d   : > { %v2559_v51 = vsel %vm12940_vm8, %v2554_v57, %v2558_v45  ;;  %v2577_v0 = vor.u32 %v2576_v18, %v2572_v39  ;;  %v2598_v12 = vshrl.u32 %v2474_v2, 16  ;;  %v2590_v13 = vrot.slane %v2588_v34, 5  ;;  %v2479_v7 = vld [vmem:[#allocation2 + $0x48] sm:$0xf]  ;;  %v2480_v26 = vld [vmem:[#allocation2 + $0x4c] sm:$0xf]  ;;  %v3928_v55 = vpop.permute.xlu0 %3927 }
 0x20e   : > { %v10995_v58 = vcombine.low %v2549_v20, %v2559_v51  ;;  %v2568_v8 = vrot.slane %v2567_v40, 4  ;;  %v2596_v19 = vrot.slane %v2594_v50, 5  ;;  %v2604_v62 = vshll.u32 %v2475_v52, 16  ;;  %4769 = vmatmul.mubr.bf16.gmra.mrb[52].mxu1 %v4298_v33  ;;  %v2481_v10 = vld [vmem:[#allocation2 + $0x50] sm:$0x1]  ;;  %3972 = vst.msk [vmem:[#allocation4 + $0x90] sm:$0xff] %vm1980_vm3, %v3928_v55 }
 0x20f   : > { %v2578_v21 = vrot.slane %v2577_v0, 4  ;;  %v2600_v61 = vrot.slane %v2598_v12, 4  ;;  %v2609_v42 = vshrl.u32 %v2476_v3, 16  ;;  %v2591_v9 = vor.u32 %v2590_v13, %v2587_v60  ;;  %4776 = vmatprep.mubr.bf16.mxu1 %v4304_v14  ;;  %v2482_v53 = vld [vmem:[#allocation2 + $0x54] sm:$0xf]  ;;  %v4303_v18 = vld [vmem:[#allocation4 + $0xf0] sm:$0xff] }
 0x210   : > { %2961 = vst.msk [vmem:[#allocation4 + $0x38] sm:$0xff] %vm1432_vm1, %v10995_v58  ;;  %v2573_v29 = vsel %vm12940_vm8, %v2568_v8, %v2572_v39  ;;  %v2612_v15 = vshll.u32 %v2476_v3, 16  ;;  %v2618_v17 = vshll.u32 %v2477_v54, 16  ;;  %v2606_v22 = vrot.slane %v2604_v62, 5  ;;  %v2483_v47 = vld [vmem:[#allocation2 + $0x58] sm:$0xf] }
 0x211   : > { %3281 = vst.msk [vmem:[#allocation4 + $0x38] sm:$0xff] %vm1980_vm3, %v3235_v37  ;;  %v2583_v44 = vsel %vm12940_vm8, %v2578_v21, %v2582_v4  ;;  %v2601_v24 = vor.u32 %v2600_v61, %v2596_v19  ;;  %v2611_v25 = vrot.slane %v2609_v42, 4  ;;  %v2592_v5 = vrot.slane %v2591_v9, 4  ;;  %v2484_v40 = vld [vmem:[#allocation2 + $0x5c] sm:$0x1]  ;;  %v4309_v34 = vld [vmem:[#allocation4 + $0x120] sm:$0xff]  ;;  %v3239_v37 = vpop.permute.xlu1 %3238  ;;  %v3930_v9 = vpop.permute.xlu0 %3929 }
 0x212   : > { %v10996_v27 = vcombine.low %v2573_v29, %v2583_v44  ;;  %v2614_v28 = vrot.slane %v2612_v15, 5  ;;  %v2620_v59 = vrot.slane %v2618_v17, 5  ;;  %v2622_v45 = vshrl.u32 %v2477_v54, 16  ;;  %v2485_v60 = vld [vmem:[#allocation2 + $0x60] sm:$0xf]  ;;  %3973 = vst.msk [vmem:[#allocation4 + $0xb8] sm:$0xff] %vm1980_vm3, %v3930_v9 }
 0x213   : > { %v2602_v31 = vrot.slane %v2601_v24, 4  ;;  %v2628_v35 = vshll.u32 %v2478_v63, 16  ;;  %v2633_v36 = vshrl.u32 %v2479_v7, 16  ;;  %v2597_v56 = vsel %vm12940_vm8, %v2592_v5, %v2596_v19  ;;  %v2486_v42 = vld [vmem:[#allocation2 + $0x64] sm:$0xf] }
 0x214   : > { %2962 = vst.msk [vmem:[#allocation4 + $0x60] sm:$0xff] %vm1432_vm1, %v10996_v27  ;;  %v2615_v41 = vor.u32 %v2614_v28, %v2611_v25  ;;  %v2636_v43 = vshll.u32 %v2479_v7, 16  ;;  %v2642_v48 = vshll.u32 %v2480_v26, 16  ;;  %v2624_v38 = vrot.slane %v2622_v45, 4  ;;  %v2487_v16 = vld [vmem:[#allocation2 + $0x68] sm:$0x1] }
 0x215   : > { %3282 = vst.msk [vmem:[#allocation4 + $0x60] sm:$0xff] %vm1980_vm3, %v3237_v11  ;;  %v2607_v6 = vsel %vm12940_vm8, %v2602_v31, %v2606_v22  ;;  %v2630_v2 = vrot.slane %v2628_v35, 5  ;;  %v2635_v32 = vrot.slane %v2633_v36, 4  ;;  %v2646_v1 = vshrl.u32 %v2480_v26, 16  ;;  %v2488_v44 = vld [vmem:[#allocation2 + $0x6c] sm:$0xf] }
 0x216   : > { %v10997_v46 = vcombine.low %v2597_v56, %v2607_v6  ;;  %v2616_v23 = vrot.slane %v2615_v41, 4  ;;  %v2638_v39 = vrot.slane %v2636_v43, 5  ;;  %v2644_v57 = vrot.slane %v2642_v48, 5  ;;  %4777 = vmatmul.mubr.bf16.gmra.mrb[56].mxu1 %v4303_v18  ;;  %v4314_v27 = vld [vmem:[#allocation4 + $0x148] sm:$0xff]  ;;  %v4308_v45 = vld [vmem:[#allocation4 + $0x118] sm:$0xff]  ;;  %v3932_v6 = vpop.permute.xlu0 %3931 }
 0x217   : > { %v2625_v4 = vor.u32 %v2624_v38, %v2620_v59  ;;  %v2652_v20 = vshll.u32 %v2481_v10, 16  ;;  %v2657_v52 = vshrl.u32 %v2482_v53, 16  ;;  %v2660_v51 = vshll.u32 %v2482_v53, 16  ;;  %4784 = vmatprep.mubr.bf16.mxu1 %v4309_v34  ;;  %v2489_v56 = vld [vmem:[#allocation2 + $0x70] sm:$0xf]  ;;  %v3241_v38 = vpop.permute.xlu1 %3240  ;;  %3974 = vst.msk [vmem:[#allocation4 + $0xe0] sm:$0xff] %vm1980_vm3, %v3932_v6 }
 0x218   : > { %2963 = vst.msk [vmem:[#allocation4 + $0x88] sm:$0xff] %vm1432_vm1, %v10997_v46  ;;  %v2621_v50 = vsel %vm12940_vm8, %v2616_v23, %v2620_v59  ;;  %v2639_v3 = vor.u32 %v2638_v39, %v2635_v32  ;;  %v2666_v0 = vshll.u32 %v2483_v47, 16  ;;  %v2648_v54 = vrot.slane %v2646_v1, 4  ;;  %v2490_v55 = vld [vmem:[#allocation2 + $0x74] sm:$0x1] }
 0x219   : > { %v2626_v12 = vrot.slane %v2625_v4, 4  ;;  %v2654_v14 = vrot.slane %v2652_v20, 5  ;;  %v2659_v58 = vrot.slane %v2657_v52, 4  ;;  %v2662_v13 = vrot.slane %v2660_v51, 5  ;;  %3283 = vst.msk [vmem:[#allocation4 + $0x88] sm:$0xff] %vm1980_vm3, %v3239_v37 }
 0x21a   : > { %v2640_v8 = vrot.slane %v2639_v3, 4  ;;  %v2668_v19 = vrot.slane %v2666_v0, 5  ;;  %v2670_v33 = vshrl.u32 %v2483_v47, 16  ;;  %v2649_v61 = vor.u32 %v2648_v54, %v2644_v57  ;;  %v2491_v23 = vld [vmem:[#allocation2 + $0x78] sm:$0xf] }
 0x21b   : > { %v2631_v21 = vsel %vm12940_vm8, %v2626_v12, %v2630_v2  ;;  %v2676_v62 = vshll.u32 %v2484_v40, 16  ;;  %v2681_v29 = vshrl.u32 %v2485_v60, 16  ;;  %v2663_v17 = vor.u32 %v2662_v13, %v2659_v58  ;;  %v2492_v34 = vld [vmem:[#allocation2 + $0x7c] sm:$0xf]  ;;  %v2493_v0 = vld [vmem:[#allocation2 + $0x80] sm:$0x1] }
 0x21c   : > { %v10998_v63 = vcombine.low %v2621_v50, %v2631_v21  ;;  %v2645_v15 = vsel %vm12940_vm8, %v2640_v8, %v2644_v57  ;;  %v2672_v7 = vrot.slane %v2670_v33, 4  ;;  %v2650_v24 = vrot.slane %v2649_v61, 4  ;;  %v2494_v37 = vld [vmem:[#allocation2 + $0x84] sm:$0xf]  ;;  %v4313_v21 = vld [vmem:[#allocation4 + $0x140] sm:$0xff]  ;;  %v3243_v61 = vpop.permute.xlu1 %3242 }
 0x21d   : > { %v2678_v22 = vrot.slane %v2676_v62, 5  ;;  %v2683_v25 = vrot.slane %v2681_v29, 4  ;;  %v2684_v26 = vshll.u32 %v2485_v60, 16  ;;  %v2664_v5 = vrot.slane %v2663_v17, 4  ;;  %v3934_v17 = vpop.permute.xlu0 %3933 }
 0x21e   : > { %2964 = vst.msk [vmem:[#allocation4 + $0xb0] sm:$0xff] %vm1432_vm1, %v10998_v63  ;;  %v2673_v28 = vor.u32 %v2672_v7, %v2668_v19  ;;  %v2690_v59 = vshll.u32 %v2486_v42, 16  ;;  %v2694_v31 = vshrl.u32 %v2486_v42, 16  ;;  %v2655_v35 = vsel %vm12940_vm8, %v2650_v24, %v2654_v14  ;;  %4785 = vmatmul.mubr.bf16.gmra.mrb[60].mxu1 %v4308_v45  ;;  %v2495_v63 = vld [vmem:[#allocation2 + $0x88] sm:$0xf] }
 0x21f   : > { %v2686_v36 = vrot.slane %v2684_v26, 5  ;;  %v2700_v11 = vshll.u32 %v2487_v16, 16  ;;  %v2705_v41 = vshrl.u32 %v2488_v44, 16  ;;  %v10999_v10 = vcombine.low %v2645_v15, %v2655_v35  ;;  %4792 = vmatprep.mubr.bf16.mxu1 %v4314_v27  ;;  %3284 = vst.msk [vmem:[#allocation4 + $0xb0] sm:$0xff] %vm1980_vm3, %v3241_v38  ;;  %v4319_v15 = vld [vmem:[#allocation4 + $0x170] sm:$0xff]  ;;  %3975 = vst.msk [vmem:[#allocation4 + $0x108] sm:$0xff] %vm1980_vm3, %v3934_v17 }
 0x220   : > { %v2669_v43 = vsel %vm12940_vm8, %v2664_v5, %v2668_v19  ;;  %v2674_v48 = vrot.slane %v2673_v28, 4  ;;  %v2692_v53 = vrot.slane %v2690_v59, 5  ;;  %v2696_v32 = vrot.slane %v2694_v31, 4  ;;  %v2496_v27 = vld [vmem:[#allocation2 + $0x8c] sm:$0x1] }
 0x221   : > { %v2687_v2 = vor.u32 %v2686_v36, %v2683_v25  ;;  %v2702_v47 = vrot.slane %v2700_v11, 5  ;;  %v2707_v46 = vrot.slane %v2705_v41, 4  ;;  %2965 = vst.msk [vmem:[#allocation4 + $0xd8] sm:$0xff] %vm1432_vm1, %v10999_v10  ;;  %v2708_v57 = vshll.u32 %v2488_v44, 16  ;;  %v2497_v35 = vld [vmem:[#allocation2 + $0x90] sm:$0xf]  ;;  %v3936_v6 = vpop.permute.xlu0 %3935  ;;  %v3245_v38 = vpop.permute.xlu1 %3244 }
 0x222   : > { %v2679_v39 = vsel %vm12940_vm8, %v2674_v48, %v2678_v22  ;;  %v2714_v18 = vshll.u32 %v2489_v56, 16  ;;  %v2718_v4 = vshrl.u32 %v2489_v56, 16  ;;  %v2697_v40 = vor.u32 %v2696_v32, %v2692_v53  ;;  %3285 = vst.msk [vmem:[#allocation4 + $0xd8] sm:$0xff] %vm1980_vm3, %v3243_v61  ;;  %v2498_v10 = vld [vmem:[#allocation2 + $0x94] sm:$0xf]  ;;  %3976 = vst.msk [vmem:[#allocation4 + $0x130] sm:$0xff] %vm1980_vm3, %v3936_v6 }
 0x223   : > { %v11000_v1 = vcombine.low %v2669_v43, %v2679_v39  ;;  %v2688_v20 = vrot.slane %v2687_v2, 4  ;;  %v2724_v52 = vshll.u32 %v2490_v55, 16  ;;  %v2710_v50 = vrot.slane %v2708_v57, 5  ;;  %v4324_v39 = vld [vmem:[#allocation4 + $0x198] sm:$0xff] }
 0x224   : > { %v2716_v3 = vrot.slane %v2714_v18, 5  ;;  %v2720_v51 = vrot.slane %v2718_v4, 4  ;;  %v2729_v60 = vshrl.u32 %v2491_v23, 16  ;;  %v2698_v54 = vrot.slane %v2697_v40, 4  ;;  %v4318_v40 = vld [vmem:[#allocation4 + $0x168] sm:$0xff] }
 0x225   : > { %2966 = vst.msk [vmem:[#allocation4 + $0x100] sm:$0xff] %vm1432_vm1, %v11000_v1  ;;  %v2693_v12 = vsel %vm12940_vm8, %v2688_v20, %v2692_v53  ;;  %v2726_v14 = vrot.slane %v2724_v52, 5  ;;  %v2732_v58 = vshll.u32 %v2491_v23, 16  ;;  %v2711_v8 = vor.u32 %v2710_v50, %v2707_v46  ;;  %v2500_v20 = vld [vmem:[#allocation2 + $0x9c] sm:$0xf] }
 0x226   : > { %v2721_v13 = vor.u32 %v2720_v51, %v2716_v3  ;;  %v2731_v19 = vrot.slane %v2729_v60, 4  ;;  %v2738_v33 = vshll.u32 %v2492_v34, 16  ;;  %v2703_v62 = vsel %vm12940_vm8, %v2698_v54, %v2702_v47  ;;  %4793 = vmatmul.mubr.bf16.gmra.mrb[64].mxu1 %v4313_v21  ;;  %v2499_v47 = vld [vmem:[#allocation2 + $0x98] sm:$0x1]  ;;  %3286 = vst.msk [vmem:[#allocation4 + $0x100] sm:$0xff] %vm1980_vm3, %v3245_v38 }
 0x227   : > { %v2734_v42 = vrot.slane %v2732_v58, 5  ;;  %v2742_v29 = vshrl.u32 %v2492_v34, 16  ;;  %v2748_v9 = vshll.u32 %v2493_v0, 16  ;;  %v11001_v7 = vcombine.low %v2693_v12, %v2703_v62  ;;  %4800 = vmatprep.mubr.bf16.mxu1 %v4319_v15  ;;  %v2501_v51 = vld [vmem:[#allocation2 + $0xa0] sm:$0xf]  ;;  %v3247_v62 = vpop.permute.xlu1 %3246  ;;  %v3938_v17 = vpop.permute.xlu0 %3937 }
 0x228   : > { %v2712_v16 = vrot.slane %v2711_v8, 4  ;;  %v2722_v44 = vrot.slane %v2721_v13, 4  ;;  %v2740_v24 = vrot.slane %v2738_v33, 5  ;;  %v2753_v5 = vshrl.u32 %v2494_v37, 16  ;;  %v2503_v15 = vld [vmem:[#allocation2 + $0xa8] sm:$0xf] }
 0x229   : > { %v2735_v22 = vor.u32 %v2734_v42, %v2731_v19  ;;  %v2744_v25 = vrot.slane %v2742_v29, 4  ;;  %v2750_v26 = vrot.slane %v2748_v9, 5  ;;  %2967 = vst.msk [vmem:[#allocation4 + $0x128] sm:$0xff] %vm1432_vm1, %v11001_v7  ;;  %v2756_v31 = vshll.u32 %v2494_v37, 16  ;;  %v2502_v37 = vld [vmem:[#allocation2 + $0xa4] sm:$0x1] }
 0x22a   : > { %v2717_v28 = vsel %vm12940_vm8, %v2712_v16, %v2716_v3  ;;  %v2727_v59 = vsel %vm12940_vm8, %v2722_v44, %v2726_v14  ;;  %v2762_v45 = vshll.u32 %v2495_v63, 16  ;;  %v2755_v41 = vrot.slane %v2753_v5, 4  ;;  %3287 = vst.msk [vmem:[#allocation4 + $0x128] sm:$0xff] %vm1980_vm3, %v3247_v62  ;;  %3977 = vst.msk [vmem:[#allocation4 + $0x158] sm:$0xff] %vm1980_vm3, %v3938_v17 }
 0x22b   : > { %v11002_v36 = vcombine.low %v2717_v28, %v2727_v59  ;;  %v2736_v11 = vrot.slane %v2735_v22, 4  ;;  %v2745_v56 = vor.u32 %v2744_v25, %v2740_v24  ;;  %v2758_v43 = vrot.slane %v2756_v31, 5  ;;  %v2504_v22 = vld [vmem:[#allocation2 + $0xac] sm:$0xf]  ;;  %v2505_v31 = vld [vmem:[#allocation2 + $0xb0] sm:$0x1] }
 0x22c   : > { %v2764_v48 = vrot.slane %v2762_v45, 5  ;;  %v2766_v53 = vshrl.u32 %v2495_v63, 16  ;;  %v2772_v55 = vshll.u32 %v2496_v27, 16  ;;  %v2777_v46 = vshrl.u32 %v2497_v35, 16 }
 0x22d   : > { %2968 = vst.msk [vmem:[#allocation4 + $0x150] sm:$0xff] %vm1432_vm1, %v11002_v36  ;;  %v2741_v2 = vsel %vm12940_vm8, %v2736_v11, %v2740_v24  ;;  %v2746_v32 = vrot.slane %v2745_v56, 4  ;;  %v2780_v23 = vshll.u32 %v2497_v35, 16  ;;  %v2759_v57 = vor.u32 %v2758_v43, %v2755_v41  ;;  %v4323_v36 = vld [vmem:[#allocation4 + $0x190] sm:$0xff]  ;;  %v2506_v43 = vld [vmem:[#allocation2 + $0xb4] sm:$0xf] }
 0x22e   : > { %v2768_v18 = vrot.slane %v2766_v53, 4  ;;  %v2774_v4 = vrot.slane %v2772_v55, 5  ;;  %v2786_v1 = vshll.u32 %v2498_v10, 16  ;;  %v2779_v34 = vrot.slane %v2777_v46, 4  ;;  %4801 = vmatmul.mubr.bf16.gmra.mrb[68].mxu1 %v4318_v40 }
 0x22f   : > { %v2751_v52 = vsel %vm12940_vm8, %v2746_v32, %v2750_v26  ;;  %v2782_v50 = vrot.slane %v2780_v23, 5  ;;  %v2790_v3 = vshrl.u32 %v2498_v10, 16  ;;  %v2760_v60 = vrot.slane %v2759_v57, 4  ;;  %4808 = vmatprep.mubr.bf16.mxu1 %v4324_v39  ;;  %v3940_v32 = vpop.permute.xlu0 %3939 }
 0x230   : > { %v11003_v0 = vcombine.low %v2741_v2, %v2751_v52  ;;  %v2769_v12 = vor.u32 %v2768_v18, %v2764_v48  ;;  %v2788_v54 = vrot.slane %v2786_v1, 5  ;;  %v2796_v8 = vshll.u32 %v2499_v47, 16  ;;  %v2507_v2 = vld [vmem:[#allocation2 + $0xb8] sm:$0xf]  ;;  %v3249_v47 = vpop.permute.xlu1 %3248  ;;  %3978 = vst.msk [vmem:[#allocation4 + $0x180] sm:$0xff] %vm1980_vm3, %v3940_v32 }
 0x231   : > { %v2783_v14 = vor.u32 %v2782_v50, %v2779_v34  ;;  %v2792_v58 = vrot.slane %v2790_v3, 4  ;;  %v2801_v13 = vshrl.u32 %v2500_v20, 16  ;;  %v2765_v19 = vsel %vm12940_vm8, %v2760_v60, %v2764_v48  ;;  %v4329_v48 = vld [vmem:[#allocation4 + $0x1c0] sm:$0xff]  ;;  %3288 = vst.msk [vmem:[#allocation4 + $0x150] sm:$0xff] %vm1980_vm3, %v3249_v47  ;;  %v2508_v50 = vld [vmem:[#allocation2 + $0xbc] sm:$0x1] }
 0x232   : > { %2969 = vst.msk [vmem:[#allocation4 + $0x178] sm:$0xff] %vm1432_vm1, %v11003_v0  ;;  %v2770_v33 = vrot.slane %v2769_v12, 4  ;;  %v2804_v21 = vshll.u32 %v2500_v20, 16  ;;  %v2810_v61 = vshll.u32 %v2501_v51, 16  ;;  %v2798_v9 = vrot.slane %v2796_v8, 5 }
 0x233   : > { %v2784_v42 = vrot.slane %v2783_v14, 4  ;;  %v2793_v29 = vor.u32 %v2792_v58, %v2788_v54  ;;  %v2803_v63 = vrot.slane %v2801_v13, 4  ;;  %v2814_v24 = vshrl.u32 %v2501_v51, 16  ;;  %v2509_v51 = vld [vmem:[#allocation2 + $0xc0] sm:$0xf] }
 0x234   : > { %v2775_v7 = vsel %vm12940_vm8, %v2770_v33, %v2774_v4  ;;  %v2806_v16 = vrot.slane %v2804_v21, 5  ;;  %v2812_v44 = vrot.slane %v2810_v61, 5  ;;  %v2820_v5 = vshll.u32 %v2502_v37, 16  ;;  %v2510_v14 = vld [vmem:[#allocation2 + $0xc4] sm:$0xf]  ;;  %v4328_v33 = vld [vmem:[#allocation4 + $0x1b8] sm:$0xff] }
 0x235   : > { %v11004_v25 = vcombine.low %v2765_v19, %v2775_v7  ;;  %v2789_v26 = vsel %vm12940_vm8, %v2784_v42, %v2788_v54  ;;  %v2794_v27 = vrot.slane %v2793_v29, 4  ;;  %v2816_v59 = vrot.slane %v2814_v24, 4  ;;  %v4334_v37 = vld [vmem:[#allocation4 + $0x1e8] sm:$0xff]  ;;  %v3251_v29 = vpop.permute.xlu1 %3250 }
 0x236   : > { %v2807_v28 = vor.u32 %v2806_v16, %v2803_v63  ;;  %v2825_v45 = vshrl.u32 %v2503_v15, 16  ;;  %v2828_v35 = vshll.u32 %v2503_v15, 16  ;;  %v2822_v56 = vrot.slane %v2820_v5, 5  ;;  %4809 = vmatmul.mubr.bf16.gmra.mrb[72].mxu1 %v4323_v36  ;;  %v2511_v15 = vld [vmem:[#allocation2 + $0xc8] sm:$0x1]  ;;  %3289 = vst.msk [vmem:[#allocation4 + $0x178] sm:$0xff] %vm1980_vm3, %v3251_v29 }
 0x237   : > { %2970 = vst.msk [vmem:[#allocation4 + $0x1a0] sm:$0xff] %vm1432_vm1, %v11004_v25  ;;  %v2799_v11 = vsel %vm12940_vm8, %v2794_v27, %v2798_v9  ;;  %v2834_v41 = vshll.u32 %v2504_v22, 16  ;;  %v2838_v10 = vshrl.u32 %v2504_v22, 16  ;;  %v2817_v6 = vor.u32 %v2816_v59, %v2812_v44  ;;  %4816 = vmatprep.mubr.bf16.mxu1 %v4329_v48  ;;  %v3486_v16 = vld [vmem:[#allocation2 + $0xcc] sm:$0xf] }
 0x238   : > { %v11005_v53 = vcombine.low %v2789_v26, %v2799_v11  ;;  %v2808_v55 = vrot.slane %v2807_v28, 4  ;;  %v2827_v38 = vrot.slane %v2825_v45, 4  ;;  %v2830_v46 = vrot.slane %v2828_v35, 5  ;;  %v3487_v27 = vld [vmem:[#allocation2 + $0xd0] sm:$0xf] }
 0x239   : > { %v2836_v23 = vrot.slane %v2834_v41, 5  ;;  %v2840_v39 = vrot.slane %v2838_v10, 4  ;;  %v2844_v57 = vshll.u32 %v2505_v31, 16  ;;  %v2818_v4 = vrot.slane %v2817_v6, 4  ;;  %v3488_v11 = vld [vmem:[#allocation2 + $0xd4] sm:$0x1] }
 0x23a   : > { %2971 = vst.msk [vmem:[#allocation4 + $0x1c8] sm:$0xff] %vm1432_vm1, %v11005_v53  ;;  %v2813_v18 = vsel %vm12940_vm8, %v2808_v55, %v2812_v44  ;;  %v2849_v1 = vshrl.u32 %v2506_v43, 16  ;;  %v2852_v20 = vshll.u32 %v2506_v43, 16  ;;  %v2831_v40 = vor.u32 %v2830_v46, %v2827_v38  ;;  %v3942_v44 = vpop.permute.xlu0 %3941  ;;  %v3985_v53 = vld [vmem:[#allocation2 + $0x18] sm:$0xe]  ;;  %v3253_v46 = vpop.permute.xlu1 %3252 }
 0x23b   : > { %v2841_v52 = vor.u32 %v2840_v39, %v2836_v23  ;;  %v2846_v34 = vrot.slane %v2844_v57, 5  ;;  %v2858_v3 = vshll.u32 %v2507_v2, 16  ;;  %v2823_v0 = vsel %vm12940_vm8, %v2818_v4, %v2822_v56  ;;  %3979 = vst.msk [vmem:[#allocation4 + $0x1a8] sm:$0xff] %vm1980_vm3, %v3942_v44  ;;  %v3986_v32 = vld [vmem:[#allocation2 + $0x1c] sm:$0xf]  ;;  %3290 = vst.msk [vmem:[#allocation4 + $0x1a0] sm:$0xff] %vm1980_vm3, %v3253_v46 }
 0x23c   : > { %v2851_v60 = vrot.slane %v2849_v1, 4  ;;  %v2854_v12 = vrot.slane %v2852_v20, 5  ;;  %v2862_v54 = vshrl.u32 %v2507_v2, 16  ;;  %v11006_v58 = vcombine.low %v2813_v18, %v2823_v0  ;;  %v3987_v1 = vld [vmem:[#allocation2 + $0x20] sm:$0x1] }
 0x23d   : > { %v2832_v8 = vrot.slane %v2831_v40, 4  ;;  %v2842_v13 = vrot.slane %v2841_v52, 4  ;;  %v2860_v19 = vrot.slane %v2858_v3, 5  ;;  %v2868_v62 = vshll.u32 %v2508_v50, 16  ;;  %v3991_v20 = vld [vmem:[#allocation2 + $0x30] sm:$0xe] }
 0x23e   : > { %v2855_v21 = vor.u32 %v2854_v12, %v2851_v60  ;;  %v2864_v61 = vrot.slane %v2862_v54, 4  ;;  %v2873_v42 = vshrl.u32 %v2509_v51, 16  ;;  %2972 = vst.msk [vmem:[#allocation4 + $0x1f0] sm:$0xff] %vm1432_vm1, %v11006_v58  ;;  %v2876_v17 = vshll.u32 %v2509_v51, 16  ;;  %4817 = vmatmul.mubr.bf16.gmra.mrb[76].mxu1 %v4328_v33  ;;  %v3944_v47 = vpop.permute.xlu0 %3943  ;;  %v3992_v3 = vld [vmem:[#allocation2 + $0x34] sm:$0xf] }
 0x23f   : > { %v2837_v9 = vsel %vm12940_vm8, %v2832_v8, %v2836_v23  ;;  %v2847_v63 = vsel %vm12940_vm8, %v2842_v13, %v2846_v34  ;;  %v2882_v7 = vshll.u32 %v2510_v14, 16  ;;  %v2870_v26 = vrot.slane %v2868_v62, 5  ;;  %4824 = vmatprep.mubr.bf16.mxu1 %v4334_v37  ;;  %v4333_v23 = vld [vmem:[#allocation4 + $0x1e0] sm:$0xff]  ;;  %3980 = vst.msk [vmem:[#allocation4 + $0x1d0] sm:$0xff] %vm1980_vm3, %v3944_v47  ;;  %v3993_v54 = vld [vmem:[#allocation2 + $0x38] sm:$0x1] }
 0x240   : > { %v11007_v24 = vcombine.low %v2837_v9, %v2847_v63  ;;  %v2856_v22 = vrot.slane %v2855_v21, 4  ;;  %v2865_v25 = vor.u32 %v2864_v61, %v2860_v19  ;;  %v2875_v5 = vrot.slane %v2873_v42, 4  ;;  %v4339_v58 = vld [vmem:[#allocation4 + $0x210] sm:$0xff]  ;;  %v15911_v33 = vld [vmem:[#allocation9_spill] sm:$0xff] }
 0x241   : > { %v2878_v28 = vrot.slane %v2876_v17, 5  ;;  %v2884_v59 = vrot.slane %v2882_v7, 5  ;;  %v2886_v31 = vshrl.u32 %v2510_v14, 16  ;;  %v2892_v36 = vshll.u32 %v2511_v15, 16  ;;  %v3994_v14 = vld [vmem:[#allocation2 + $0x3c] sm:$0xe] }
 0x242   : > { %2973 = vst.msk [vmem:[#allocation4 + $0x218] sm:$0xff] %vm1432_vm1, %v11007_v24  ;;  %v2861_v45 = vsel %vm12940_vm8, %v2856_v22, %v2860_v19  ;;  %v2866_v35 = vrot.slane %v2865_v25, 4  ;;  %v3850_v56 = vshrl.u32 %v3486_v16, 16  ;;  %v3853_v43 = vshll.u32 %v3486_v16, 16  ;;  %v15913_v21 = vld [vmem:[#allocation8_spill] sm:$0xff]  ;;  %v15915_v24 = vld [vmem:[#allocation10_spill] sm:$0xff] }
 0x243   : > { %v2879_v41 = vor.u32 %v2878_v28, %v2875_v5  ;;  %v2888_v10 = vrot.slane %v2886_v31, 4  ;;  %v3859_v48 = vshll.u32 %v3487_v27, 16  ;;  %v2894_v6 = vrot.slane %v2892_v36, 5  ;;  %v3995_v42 = vld [vmem:[#allocation2 + $0x40] sm:$0xf]  ;;  %v15917_v25 = vld [vmem:[#allocation11_spill] sm:$0xff] }
 0x244   : > { %v2871_v55 = vsel %vm12940_vm8, %v2866_v35, %v2870_v26  ;;  %v3852_v38 = vrot.slane %v3850_v56, 4  ;;  %v3863_v2 = vshrl.u32 %v3487_v27, 16  ;;  %v3855_v4 = vrot.slane %v3853_v43, 5  ;;  %v3996_v17 = vld [vmem:[#allocation2 + $0x44] sm:$0x1] }
 0x245   : > { %v11008_v39 = vcombine.low %v2861_v45, %v2871_v55  ;;  %v2880_v57 = vrot.slane %v2879_v41, 4  ;;  %v2889_v18 = vor.u32 %v2888_v10, %v2884_v59  ;;  %v3861_v40 = vrot.slane %v3859_v48, 5  ;;  %v3997_v7 = vld [vmem:[#allocation2 + $0x48] sm:$0xe]  ;;  %v3998_v5 = vld [vmem:[#allocation2 + $0x4c] sm:$0xf] }
 0x246   : > { %v3865_v52 = vrot.slane %v3863_v2, 4  ;;  %v3869_v34 = vshll.u32 %v3488_v11, 16  ;;  %v11074_v50 = vrot.slane %v3985_v53, 9  ;;  %v3856_v60 = vor.u32 %v3855_v4, %v3852_v38  ;;  %4825 = vmatmul.mubr.bf16.gmra.mrb[80].mxu1 %v4333_v23  ;;  %v3999_v28 = vld [vmem:[#allocation2 + $0x50] sm:$0x1]  ;;  %v4344_v41 = vld [vmem:[#allocation4 + $0x238] sm:$0xff] }
 0x247   : > { %2974 = vst.msk [vmem:[#allocation4 + $0x240] sm:$0xff] %vm1432_vm1, %v11008_v39  ;;  %v2885_v51 = vsel %vm12940_vm8, %v2880_v57, %v2884_v59  ;;  %v2890_v0 = vrot.slane %v2889_v18, 4  ;;  %v4083_v12 = vrot.slane %v3986_v32, 5  ;;  %v4086_v19 = vrot.slane %v3987_v1, 5  ;;  %4832 = vmatprep.mubr.bf16.mxu1 %v4339_v58  ;;  %v4000_v36 = vld [vmem:[#allocation2 + $0x54] sm:$0xe] }
 0x248   : > { %v3866_v8 = vor.u32 %v3865_v52, %v3861_v40  ;;  %v3871_v13 = vrot.slane %v3869_v34, 5  ;;  %v15912_v37 = vrot.slane %v15911_v33, 5  ;;  %v15914_v61 = vrot.slane %v15913_v21, 9  ;;  %v4001_v11 = vld [vmem:[#allocation2 + $0x58] sm:$0xf] }
 0x249   : > { %v2895_v29 = vsel %vm12940_vm8, %v2890_v0, %v2894_v6  ;;  %v3857_v9 = vrot.slane %v3856_v60, 4  ;;  %v4084_v63 = vsel %vm13361_vm0, %v11074_v50, %v4083_v12  ;;  %v4085_v15 = vrot.slane %v4083_v12, 4  ;;  %v4002_v55 = vld [vmem:[#allocation2 + $0x5c] sm:$0x1]  ;;  %v4003_v23 = vld [vmem:[#allocation2 + $0x60] sm:$0xe] }
 0x24a   : > { %v4091_v62 = vsel %vm13361_vm0, %v15914_v61, %v15912_v37  ;;  %v11009_v16 = vcombine.low %v2885_v51, %v2895_v29  ;;  %v3867_v44 = vrot.slane %v3866_v8, 4  ;;  %v15916_v22 = vrot.slane %v15915_v24, 5  ;;  %v3946_v56 = vpop.permute.xlu0 %3945  ;;  %v4338_v38 = vld [vmem:[#allocation4 + $0x208] sm:$0xff]  ;;  %v4004_v39 = vld [vmem:[#allocation2 + $0x64] sm:$0xf] }
 0x24b   : > { %v11076_v27 = vrot.slane %v3991_v20, 9  ;;  %v3862_v59 = vsel %vm12940_vm8, %v3857_v9, %v3861_v40  ;;  %v4087_v31 = vsel %vm13361_vm0, %v4085_v15, %v4086_v19  ;;  %v4097_v35 = vrot.slane %v3992_v3, 5  ;;  %3981 = vst.msk [vmem:[#allocation4 + $0x1f8] sm:$0xff] %vm1980_vm3, %v3946_v56  ;;  %v3255_v6 = vpop.permute.xlu1 %3254  ;;  %v4005_v20 = vld [vmem:[#allocation2 + $0x68] sm:$0x1] }
 0x24c   : > { %v4094_v26 = vsel %vm13361_vm0, %v15917_v25, %v15916_v22  ;;  %2975 = vst.msk [vmem:[#allocation4 + $0x268] sm:$0xff] %vm1432_vm1, %v11009_v16  ;;  %v3872_v10 = vsel %vm12940_vm8, %v3867_v44, %v3871_v13  ;;  %v11090_v43 = vcombine.low %v4084_v63, %v4087_v31  ;;  %v4100_v48 = vrot.slane %v3993_v54, 5  ;;  %v4006_v3 = vld [vmem:[#allocation2 + $0x6c] sm:$0xe]  ;;  %v4007_v51 = vld [vmem:[#allocation2 + $0x70] sm:$0xf] }
 0x24d   : > { %v11091_v45 = vcombine.low %v4091_v62, %v4094_v26  ;;  %v11077_v53 = vrot.slane %v3994_v14, 9  ;;  %v11073_v2 = vcombine.low %v3862_v59, %v3872_v10  ;;  %v4098_v32 = vsel %vm13361_vm0, %v11076_v27, %v4097_v35  ;;  %3291 = vst.msk [vmem:[#allocation4 + $0x1c8] sm:$0xff] %vm1980_vm3, %v3255_v6  ;;  %v4008_v14 = vld [vmem:[#allocation2 + $0x74] sm:$0x1]  ;;  %v4009_v58 = vld [vmem:[#allocation2 + $0x78] sm:$0xe] }
 0x24e   : > { %v4099_v47 = vrot.slane %v4097_v35, 4  ;;  %v4104_v46 = vrot.slane %v3995_v42, 5  ;;  %4257 = vst.msk [vmem:[#allocation4 + $0x20] sm:$0xff] %vm1432_vm1, %v11090_v43  ;;  %v4107_v57 = vrot.slane %v3996_v17, 5  ;;  %v11078_v18 = vrot.slane %v3997_v7, 9  ;;  %4833 = vmatmul.mubr.bf16.gmra.mrb[84].mxu1 %v4338_v38  ;;  %v12369_v6 = vld [vmem:[#allocation2 + $0xcc] sm:$0xff]  }
 0x24f   : > { %4258 = vst.msk [vmem:[#allocation4 + $0x48] sm:$0xff] %vm1432_vm1, %v11091_v45  ;;  %v4111_v4 = vrot.slane %v3998_v5, 5  ;;  %v4114_v1 = vrot.slane %v3999_v28, 5  ;;  %3951 = vrot.lane.b32.xlu0 %v11073_v2, %s12648_s25  ;;  %v11079_v50 = vrot.slane %v4000_v36, 9  ;;  %v4118_v54 = vrot.slane %v4001_v11, 5  ;;  %4840 = vmatprep.mubr.bf16.mxu1 %v4344_v41  ;;  %v3257_v24 = vpop.permute.xlu1 %3256  ;;  %v4343_v28 = vld [vmem:[#allocation4 + $0x230] sm:$0xff] }
 0x250   : > { %v4101_v40 = vsel %vm13361_vm0, %v4099_v47, %v4100_v48  ;;  %v4105_v52 = vsel %vm13361_vm0, %v11077_v53, %v4104_v46  ;;  %v4106_v34 = vrot.slane %v4104_v46, 4  ;;  %v4121_v13 = vrot.slane %v4002_v55, 5  ;;  %v4010_v37 = vld [vmem:[#allocation2 + $0x7c] sm:$0xf]  ;;  %v4011_v29 = vld [vmem:[#allocation2 + $0x80] sm:$0x1] }
 0x251   : > { %v11092_v0 = vcombine.low %v4098_v32, %v4101_v40  ;;  %v4112_v60 = vsel %vm13361_vm0, %v11078_v18, %v4111_v4  ;;  %v4113_v12 = vrot.slane %v4111_v4, 4  ;;  %v11080_v19 = vrot.slane %v4003_v23, 9  ;;  %v4012_v9 = vld [vmem:[#allocation2 + $0x84] sm:$0xe]  ;;  %v4013_v16 = vld [vmem:[#allocation2 + $0x88] sm:$0xf] }
 0x252   : > { %v4108_v8 = vsel %vm13361_vm0, %v4106_v34, %v4107_v57  ;;  %v4125_v33 = vrot.slane %v4004_v39, 5  ;;  %v4119_v62 = vsel %vm13361_vm0, %v11079_v50, %v4118_v54  ;;  %v4120_v42 = vrot.slane %v4118_v54, 4  ;;  %v4014_v44 = vld [vmem:[#allocation2 + $0x8c] sm:$0x1]  ;;  %v4015_v5 = vld [vmem:[#allocation2 + $0x90] sm:$0xe]  ;;  %v3948_v55 = vpop.permute.xlu0 %3947 }
 0x253   : > { %4259 = vst.msk [vmem:[#allocation4 + $0x70] sm:$0xff] %vm1432_vm1, %v11092_v0  ;;  %v11093_v21 = vcombine.low %v4105_v52, %v4108_v8  ;;  %v4115_v61 = vsel %vm13361_vm0, %v4113_v12, %v4114_v1  ;;  %v4128_v7 = vrot.slane %v4005_v20, 5  ;;  %v11081_v25 = vrot.slane %v4006_v3, 9  ;;  %v4016_v36 = vld [vmem:[#allocation2 + $0x94] sm:$0xf]  ;;  %3440 = vst.msk [vmem:[#allocation4 + $0x270] sm:$0xff] %vm1432_vm1, %v12369_v6 }
 0x254   : > { %v11094_v63 = vcombine.low %v4112_v60, %v4115_v61  ;;  %v4126_v15 = vsel %vm13361_vm0, %v11080_v19, %v4125_v33  ;;  %v4127_v17 = vrot.slane %v4125_v33, 4  ;;  %v4122_v22 = vsel %vm13361_vm0, %v4120_v42, %v4121_v13  ;;  %3292 = vst.msk [vmem:[#allocation4 + $0x1f0] sm:$0xff] %vm1980_vm3, %v3257_v24  ;;  %v4017_v11 = vld [vmem:[#allocation2 + $0x98] sm:$0x1]  ;;  %v4018_v48 = vld [vmem:[#allocation2 + $0x9c] sm:$0xe] }
 0x255   : > { %4260 = vst.msk [vmem:[#allocation4 + $0x98] sm:$0xff] %vm1432_vm1, %v11093_v21  ;;  %v4132_v26 = vrot.slane %v4007_v51, 5  ;;  %v4135_v27 = vrot.slane %v4008_v14, 5  ;;  %v11095_v59 = vcombine.low %v4119_v62, %v4122_v22  ;;  %v11082_v45 = vrot.slane %v4009_v58, 9  ;;  %v4019_v53 = vld [vmem:[#allocation2 + $0xa0] sm:$0xf]  ;;  %v3259_v51 = vpop.permute.xlu1 %3258 }
 0x256   : > { %4261 = vst.msk [vmem:[#allocation4 + $0xc0] sm:$0xff] %vm1432_vm1, %v11094_v63  ;;  %v4129_v31 = vsel %vm13361_vm0, %v4127_v17, %v4128_v7  ;;  %v4139_v35 = vrot.slane %v4010_v37, 5  ;;  %v4142_v43 = vrot.slane %v4011_v29, 5  ;;  %v11083_v32 = vrot.slane %v4012_v9, 9  ;;  %v4020_v46 = vld [vmem:[#allocation2 + $0xa4] sm:$0x1]  ;;  %4841 = vmatmul.mubr.bf16.gmra.mrb[88].mxu1 %v4343_v28 }
 0x257   : > { %v11096_v56 = vcombine.low %v4126_v15, %v4129_v31  ;;  %v4133_v41 = vsel %vm13361_vm0, %v11081_v25, %v4132_v26  ;;  %v4134_v10 = vrot.slane %v4132_v26, 4  ;;  %4262 = vst.msk [vmem:[#allocation4 + $0xe8] sm:$0xff] %vm1432_vm1, %v11095_v59  ;;  %v4146_v47 = vrot.slane %v4013_v16, 5  ;;  %v4349_v23 = vld [vmem:[#allocation4 + $0x260] sm:$0xff]  ;;  %v4021_v1 = vld [vmem:[#allocation2 + $0xa8] sm:$0xe]  ;;  %v3950_v21 = vpop.permute.xlu0 %3949 }
 0x258   : > { %v4140_v38 = vsel %vm13361_vm0, %v11082_v45, %v4139_v35  ;;  %v4141_v2 = vrot.slane %v4139_v35, 4  ;;  %3982 = vst.msk [vmem:[#allocation4 + $0x220] sm:$0xff] %vm1980_vm3, %v3948_v55  ;;  %v4149_v57 = vrot.slane %v4014_v44, 5  ;;  %v11084_v18 = vrot.slane %v4015_v5, 9  ;;  %4848 = vmatprep.mubr.bf16.mxu1 %v4349_v23  ;;  %v4022_v50 = vld [vmem:[#allocation2 + $0xac] sm:$0xf] }
 0x259   : > { %4263 = vst.msk [vmem:[#allocation4 + $0x110] sm:$0xff] %vm1432_vm1, %v11096_v56  ;;  %v4136_v39 = vsel %vm13361_vm0, %v4134_v10, %v4135_v27  ;;  %v4153_v4 = vrot.slane %v4016_v36, 5  ;;  %v4147_v52 = vsel %vm13361_vm0, %v11083_v32, %v4146_v47  ;;  %v4148_v34 = vrot.slane %v4146_v47, 4  ;;  %v4023_v3 = vld [vmem:[#allocation2 + $0xb0] sm:$0x1]  ;;  %v3261_v44 = vpop.permute.xlu1 %3260  ;;  %v4348_v5 = vld [vmem:[#allocation4 + $0x258] sm:$0xff] }
 0x25a   : > { %v11097_v20 = vcombine.low %v4133_v41, %v4136_v39  ;;  %v4143_v40 = vsel %vm13361_vm0, %v4141_v2, %v4142_v43  ;;  %v4156_v54 = vrot.slane %v4017_v11, 5  ;;  %v4025_v14 = vld [vmem:[#allocation2 + $0xb8] sm:$0xf]  ;;  %v4028_v58 = vld [vmem:[#allocation2 + $0xc4] sm:$0xf]  ;;  %3293 = vst.msk [vmem:[#allocation4 + $0x218] sm:$0xff] %vm1980_vm3, %v3259_v51 }
 0x25b   : > { %v11098_v0 = vcombine.low %v4140_v38, %v4143_v40  ;;  %v4154_v60 = vsel %vm13361_vm0, %v11084_v18, %v4153_v4  ;;  %v4155_v12 = vrot.slane %v4153_v4, 4  ;;  %v4150_v8 = vsel %vm13361_vm0, %v4148_v34, %v4149_v57  ;;  %v4024_v37 = vld [vmem:[#allocation2 + $0xb4] sm:$0xe]  ;;  %v4026_v9 = vld [vmem:[#allocation2 + $0xbc] sm:$0x1]  ;;  %3983 = vst.msk [vmem:[#allocation4 + $0x248] sm:$0xff] %vm1980_vm3, %v3950_v21 }
 0x25c   : > { %4264 = vst.msk [vmem:[#allocation4 + $0x138] sm:$0xff] %vm1432_vm1, %v11097_v20  ;;  %v11085_v13 = vrot.slane %v4018_v48, 9  ;;  %v4160_v19 = vrot.slane %v4019_v53, 5  ;;  %v4163_v33 = vrot.slane %v4020_v46, 5  ;;  %v11099_v61 = vcombine.low %v4147_v52, %v4150_v8  ;;  %v4027_v63 = vld [vmem:[#allocation2 + $0xc0] sm:$0xe] }
 0x25d   : > { %4265 = vst.msk [vmem:[#allocation4 + $0x160] sm:$0xff] %vm1432_vm1, %v11098_v0  ;;  %v4157_v62 = vsel %vm13361_vm0, %v4155_v12, %v4156_v54  ;;  %v11086_v42 = vrot.slane %v4021_v1, 9  ;;  %v4167_v29 = vrot.slane %v4022_v50, 5  ;;  %v4170_v16 = vrot.slane %v4023_v3, 5  ;;  %v4029_v27 = vld [vmem:[#allocation2 + $0xc8] sm:$0x1]  ;;  %v3263_v55 = vpop.permute.xlu1 %3262 }
 0x25e   : > { %v11100_v15 = vcombine.low %v4154_v60, %v4157_v62  ;;  %v4161_v17 = vsel %vm13361_vm0, %v11085_v13, %v4160_v19  ;;  %v4162_v7 = vrot.slane %v4160_v19, 4  ;;  %4266 = vst.msk [vmem:[#allocation4 + $0x188] sm:$0xff] %vm1432_vm1, %v11099_v61  ;;  %v11087_v25 = vrot.slane %v4024_v37, 9  ;;  %4849 = vmatmul.mubr.bf16.gmra.mrb[92].mxu1 %v4348_v5  ;;  %v4276_v35 = vld [vmem:[#allocation4 + $0x18] sm:$0xff]  ;;  %v4275_v46 = vld [vmem:[#allocation4 + $0x10] sm:$0xff]  ;;  %v4281_v23 = vld [vmem:[#allocation4 + $0x40] sm:$0xff] }
 0x25f   : > { %v4168_v24 = vsel %vm13361_vm0, %v11086_v42, %v4167_v29  ;;  %v4169_v22 = vrot.slane %v4167_v29, 4  ;;  %v4174_v26 = vrot.slane %v4025_v14, 5  ;;  %3294 = vst.msk [vmem:[#allocation4 + $0x240] sm:$0xff] %vm1980_vm3, %v3261_v44  ;;  %v4177_v59 = vrot.slane %v4026_v9, 5  ;;  %4889 = vmatprep.mubr.bf16.mxu1 %v4276_v35  ;;  %3295 = vst.msk [vmem:[#allocation4 + $0x268] sm:$0xff] %vm1980_vm3, %v3263_v55  ;;  %v12366_v47 = vld [vmem:[%s15856_s3 + $0x108] sm:$0xff]  }
 0x260   : > { %4267 = vst.msk [vmem:[#allocation4 + $0x1b0] sm:$0xff] %vm1432_vm1, %v11100_v15  ;;  %v4164_v28 = vsel %vm13361_vm0, %v4162_v7, %v4163_v33  ;;  %v11088_v31 = vrot.slane %v4027_v63, 9  ;;  %v4181_v45 = vrot.slane %v4028_v58, 5  ;;  %v4184_v53 = vrot.slane %v4029_v27, 5  ;;  %v12638_v39 = vld [vmem:[%s15856_s3 + $0x100] sm:$0xff]   ;;  %v12367_v57 = vld [vmem:[%s15856_s3 + $0x110] sm:$0xff]  }
 0x261   : > { %v11101_v36 = vcombine.low %v4161_v17, %v4164_v28  ;;  %v4171_v11 = vsel %vm13361_vm0, %v4169_v22, %v4170_v16  ;;  %v4175_v56 = vsel %vm13361_vm0, %v11087_v25, %v4174_v26  ;;  %v4176_v41 = vrot.slane %v4174_v26, 4  ;;  %v12368_v18 = vld [vmem:[%s15856_s3 + $0x118] sm:$0xff]   ;;  %v4280_v4 = vld [vmem:[#allocation4 + $0x38] sm:$0xff]  ;;  %v4285_v20 = vld [vmem:[#allocation4 + $0x60] sm:$0xff] }
 0x262   : > { %v11102_v10 = vcombine.low %v4168_v24, %v4171_v11  ;;  %v4182_v43 = vsel %vm13361_vm0, %v11088_v31, %v4181_v45  ;;  %v4183_v48 = vrot.slane %v4181_v45, 4  ;;  %v4286_v1 = vld [vmem:[#allocation4 + $0x68] sm:$0xff]  ;;  %v4291_v40 = vld [vmem:[#allocation4 + $0x90] sm:$0xff]  ;;  %v4296_v34 = vld [vmem:[#allocation4 + $0xb8] sm:$0xff] }
 0x263   : > { %4268 = vst.msk [vmem:[#allocation4 + $0x1d8] sm:$0xff] %vm1432_vm1, %v11101_v36  ;;  %v4178_v6 = vsel %vm13361_vm0, %v4176_v41, %v4177_v59  ;;  %v4290_v52 = vld [vmem:[#allocation4 + $0x88] sm:$0xff]  ;;  %v4295_v50 = vld [vmem:[#allocation4 + $0xb0] sm:$0xff]  ;;  %v4301_v3 = vld [vmem:[#allocation4 + $0xe0] sm:$0xff] }
 0x264   : > { %4269 = vst.msk [vmem:[#allocation4 + $0x200] sm:$0xff] %vm1432_vm1, %v11102_v10  ;;  %v11103_v38 = vcombine.low %v4175_v56, %v4178_v6  ;;  %v4185_v2 = vsel %vm13361_vm0, %v4183_v48, %v4184_v53  ;;  %v4300_v51 = vld [vmem:[#allocation4 + $0xd8] sm:$0xff]  ;;  %v4306_v0 = vld [vmem:[#allocation4 + $0x108] sm:$0xff]  ;;  %v4305_v60 = vld [vmem:[#allocation4 + $0x100] sm:$0xff] }
 0x265   : > { %v11104_v32 = vcombine.low %v4182_v43, %v4185_v2  ;;  %v4311_v12 = vld [vmem:[#allocation4 + $0x130] sm:$0xff]  ;;  %v4310_v54 = vld [vmem:[#allocation4 + $0x128] sm:$0xff]  ;;  %v4316_v14 = vld [vmem:[#allocation4 + $0x158] sm:$0xff] }
 0x266   : > { %4270 = vst.msk [vmem:[#allocation4 + $0x228] sm:$0xff] %vm1432_vm1, %v11103_v38  ;;  %4890 = vmatmul.mubr.bf16.vlgmr.msra.gmra.mrb[96].mxu1 %v4275_v46  ;;  %v4030_v58 = vld [vmem:[#allocation2 + $0xcc] sm:$0xe]  ;;  %v4031_v8 = vld [vmem:[#allocation2 + $0xd0] sm:$0xf]  ;;  %v4315_v42 = vld [vmem:[#allocation4 + $0x150] sm:$0xff] }
 0x267   : > { %4271 = vst.msk [vmem:[#allocation4 + $0x250] sm:$0xff] %vm1432_vm1, %v11104_v32  ;;  %4897 = vmatprep.mubr.bf16.mxu1 %v4281_v23  ;;  %11896 = vmatpush3.bf16.msra.mxu1 %v12638_v39  ;;  %v4032_v13 = vld [vmem:[#allocation2 + $0xd4] sm:$0x1]  ;;  %v11089_v19 = vrot.slane %v4030_v58, 9  ;;  %v4188_v33 = vrot.slane %v4031_v8, 5  ;;  %v4320_v63 = vld [vmem:[#allocation4 + $0x178] sm:$0xff] }
 0x268   : > { %11897 = vmatprep.subr.bf16.mxu1 %v12366_v47  ;;  %v4191_v37 = vrot.slane %v4032_v13, 5  ;;  %v4321_v9 = vld [vmem:[#allocation4 + $0x180] sm:$0xff]  ;;  %v4326_v15 = vld [vmem:[#allocation4 + $0x1a8] sm:$0xff]  ;;  %v4331_v7 = vld [vmem:[#allocation4 + $0x1d0] sm:$0xff] }
 0x269   : > { %v4189_v21 = vsel %vm13361_vm0, %v11089_v19, %v4188_v33  ;;  %v4190_v61 = vrot.slane %v4188_v33, 4  ;;  %v4325_v17 = vld [vmem:[#allocation4 + $0x1a0] sm:$0xff]  ;;  %v4330_v27 = vld [vmem:[#allocation4 + $0x1c8] sm:$0xff]  ;;  %v4336_v5 = vld [vmem:[#allocation4 + $0x1f8] sm:$0xff] }
 0x26a   : > { %v4335_v56 = vld [vmem:[#allocation4 + $0x1f0] sm:$0xff]  ;;  %v4341_v41 = vld [vmem:[#allocation4 + $0x220] sm:$0xff]  ;;  %v4340_v38 = vld [vmem:[#allocation4 + $0x218] sm:$0xff] }
 0x26b   : > { %11898 = vmatpush3.bf16.msra.mxu1 %v12366_v47  ;;  %v4192_v62 = vsel %vm13361_vm0, %v4190_v61, %v4191_v37  ;;  %v4346_v2 = vld [vmem:[#allocation4 + $0x248] sm:$0xff]  ;;  %v4287_v13 = vld [vmem:[#allocation4 + $0x70] sm:$0xff] }
 0x26c   : > { %11899 = vmatprep.subr.bf16.mxu1 %v12367_v57  ;;  %v11105_v29 = vcombine.low %v4189_v21, %v4192_v62  ;;  %v4282_v8 = vld [vmem:[#allocation4 + $0x48] sm:$0xff] }
 0x26e   : > { %4898 = vmatmul.mubr.bf16.gmra.mrb[100].mxu1 %v4280_v4  ;;  %4272 = vst.msk [vmem:[#allocation4 + $0x278] sm:$0xff] %vm1432_vm1, %v11105_v29  ;;  %v4345_v4 = vld [vmem:[#allocation4 + $0x240] sm:$0xff] }
 0x26f   : > { %4905 = vmatprep.mubr.bf16.mxu1 %v4286_v1  ;;  %11900 = vmatpush3.bf16.msra.mxu1 %v12367_v57  ;;  %v4297_v29 = vld [vmem:[#allocation4 + $0xc0] sm:$0xff] }
 0x270   : > { %11901 = vmatprep.subr.bf16.mxu1 %v12368_v18 }
 0x273   : > { %11902 = vmatpush3.bf16.msra.mxu1 %v12368_v18 }
 0x276   : > { %4906 = vmatmul.mubr.bf16.gmra.mrb[104].mxu1 %v4285_v20 }
 0x277   : > { %4913 = vmatprep.mubr.bf16.mxu1 %v4291_v40 }
 0x27e   : > { %4914 = vmatmul.mubr.bf16.gmra.mrb[108].mxu1 %v4290_v52 }
 0x27f   : > { %4921 = vmatprep.mubr.bf16.mxu1 %v4296_v34 }
 0x286   : > { %4922 = vmatmul.mubr.bf16.gmra.mrb[112].mxu1 %v4295_v50 }
 0x287   : > { %4929 = vmatprep.mubr.bf16.mxu1 %v4301_v3  ;;  %v4350_v3 = vld [vmem:[#allocation4 + $0x268] sm:$0xff] }
 0x28e   : > { %4930 = vmatmul.mubr.bf16.gmra.mrb[116].mxu1 %v4300_v51  ;;  %v4277_v51 = vld [vmem:[#allocation4 + $0x20] sm:$0xff] }
 0x28f   : > { %4937 = vmatprep.mubr.bf16.mxu1 %v4306_v0 }
 0x296   : > { %4938 = vmatmul.mubr.bf16.gmra.mrb[120].mxu1 %v4305_v60 }
 0x297   : > { %4945 = vmatprep.mubr.bf16.mxu1 %v4311_v12 }
 0x29e   : > { %4946 = vmatmul.mubr.bf16.gmra.mrb[124].mxu1 %v4310_v54 }
 0x29f   : > { %4953 = vmatprep.mubr.bf16.mxu1 %v4316_v14 }
 0x2a6   : > { %4954 = vmatmul.mubr.bf16.gmra.mrb[128].mxu1 %v4315_v42  ;;  %v4292_v42 = vld [vmem:[#allocation4 + $0x98] sm:$0xff] }
 0x2a7   : > { %4961 = vmatprep.mubr.bf16.mxu1 %v4321_v9 }
 0x2ae   : > { %4962 = vmatmul.mubr.bf16.gmra.mrb[132].mxu1 %v4320_v63 }
 0x2af   : > { %4969 = vmatprep.mubr.bf16.mxu1 %v4326_v15 }
 0x2b6   : > { %4970 = vmatmul.mubr.bf16.gmra.mrb[136].mxu1 %v4325_v17  ;;  %v11631_v16 = vpop.f32.mrb[32].mxu1 }
 0x2b7   : > { %4977 = vmatprep.mubr.bf16.mxu1 %v4331_v7  ;;  %v11632_v44 = vpop.f32.mrb[33].mxu1 }
 0x2b8   : > { %v14162_v24 = vadd.f32 %v11632_v44, %v11631_v16  ;;  %v11634_v22 = vpop.f32.mrb[34].mxu1  ;;  %v4302_v44 = vld [vmem:[#allocation4 + $0xe8] sm:$0xff] }
 0x2b9   : > { %v11635_v25 = vpop.f32.mrb[35].mxu1 }
 0x2ba   : > { %v14164_v26 = vadd.f32 %v11635_v25, %v11634_v22  ;;  %v4307_v22 = vld [vmem:[#allocation4 + $0x110] sm:$0xff] }
 0x2be   : > { %4978 = vmatmul.mubr.bf16.gmra.mrb[140].mxu1 %v4330_v27  ;;  %v11637_v59 = vpop.f32.mrb[36].mxu1 }
 0x2bf   : > { %4985 = vmatprep.mubr.bf16.mxu1 %v4336_v5  ;;  %v11638_v31 = vpop.f32.mrb[37].mxu1 }
 0x2c0   : > { %v14167_v45 = vadd.f32 %v11638_v31, %v11637_v59  ;;  %v11640_v35 = vpop.f32.mrb[38].mxu1 }
 0x2c1   : > { %v3952_v28 = vpop.permute.xlu0 %3951  ;;  %v11641_v36 = vpop.f32.mrb[39].mxu1 }
 0x2c2   : > { %3984 = vst.msk [vmem:[#allocation4 + $0x270] sm:$0xff] %vm1980_vm3, %v3952_v28  ;;  %v14169_v11 = vadd.f32 %v11641_v36, %v11640_v35  ;;  %v4312_v35 = vld [vmem:[#allocation4 + $0x138] sm:$0xff]  ;;  %v4317_v36 = vld [vmem:[#allocation4 + $0x160] sm:$0xff] }
 0x2c6   : > { %4986 = vmatmul.mubr.bf16.gmra.mrb[144].mxu1 %v4335_v56 }
 0x2c7   : > { %4993 = vmatprep.mubr.bf16.mxu1 %v4341_v41 }
 0x2c9   : > { %v11643_v10 = vpop.f32.mrb[40].mxu1  ;;  %v4351_v57 = vld [vmem:[#allocation4 + $0x270] sm:$0xff] }
 0x2ca   : > { %v11644_v43 = vpop.f32.mrb[41].mxu1 }
 0x2cb   : > { %v14171_v48 = vadd.f32 %v11644_v43, %v11643_v10  ;;  %v11646_v53 = vpop.f32.mrb[42].mxu1 }
 0x2cc   : > { %v11647_v55 = vpop.f32.mrb[43].mxu1 }
 0x2cd   : > { %v14173_v6 = vadd.f32 %v11647_v55, %v11646_v53 }
 0x2ce   : > { %4994 = vmatmul.mubr.bf16.gmra.mrb[148].mxu1 %v4340_v38  ;;  %v4322_v38 = vld [vmem:[#allocation4 + $0x188] sm:$0xff] }
 0x2cf   : > { %5001 = vmatprep.mubr.bf16.mxu1 %v4346_v2  ;;  %v4327_v2 = vld [vmem:[#allocation4 + $0x1b0] sm:$0xff] }
 0x2d1   : > { %v11649_v32 = vpop.f32.mrb[44].mxu1 }
 0x2d2   : > { %v11650_v47 = vpop.f32.mrb[45].mxu1 }
 0x2d3   : > { %v14175_v46 = vadd.f32 %v11650_v47, %v11649_v32  ;;  %v11652_v23 = vpop.f32.mrb[46].mxu1 }
 0x2d4   : > { %v11653_v39 = vpop.f32.mrb[47].mxu1 }
 0x2d5   : > { %v14177_v18 = vadd.f32 %v11653_v39, %v11652_v23 }
 0x2d6   : > { %5002 = vmatmul.mubr.bf16.gmra.mrb[152].mxu1 %v4345_v4 }
 0x2d7   : > { %5009 = vmatprep.mubr.bf16.mxu1 %v4351_v57 }
 0x2d9   : > { %v11655_v1 = vpop.f32.mrb[48].mxu1 }
 0x2da   : > { %v11656_v20 = vpop.f32.mrb[49].mxu1 }
 0x2db   : > { %v14179_v40 = vadd.f32 %v11656_v20, %v11655_v1  ;;  %v11658_v52 = vpop.f32.mrb[50].mxu1  ;;  %v4332_v1 = vld [vmem:[#allocation4 + $0x1d8] sm:$0xff]  ;;  %v4337_v20 = vld [vmem:[#allocation4 + $0x200] sm:$0xff] }
 0x2dc   : > { %v11659_v34 = vpop.f32.mrb[51].mxu1 }
 0x2dd   : > { %v14181_v50 = vadd.f32 %v11659_v34, %v11658_v52 }
 0x2de   : > { %5010 = vmatmul.mubr.bf16.gmra.mrb[156].mxu1 %v4350_v3 }
 0x2df   : > { %11903 = vmatprep.mubr.msk.bf16.mxu1 %vm1432_vm1, %v4277_v51 }
 0x2e1   : > { %v11661_v0 = vpop.f32.mrb[52].mxu1 }
 0x2e2   : > { %v11662_v60 = vpop.f32.mrb[53].mxu1 }
 0x2e3   : > { %v14184_v12 = vadd.f32 %v11662_v60, %v11661_v0  ;;  %v11664_v54 = vpop.f32.mrb[54].mxu1  ;;  %v4342_v60 = vld [vmem:[#allocation4 + $0x228] sm:$0xff] }
 0x2e4   : > { %v11665_v14 = vpop.f32.mrb[55].mxu1 }
 0x2e5   : > { %v14186_v58 = vadd.f32 %v11665_v14, %v11664_v54  ;;  %v12370_v14 = vld [vmem:[%s15858_s5 + $0x104] ss:$8 sps:$4 sm:$0xff]  }
 0x2e6   : > { %11904 = vmatmul.mubr.msk.bf16.vlgmr.msra.gmra.mrb[160].mxu1 %vm1432_vm1, %v4282_v8  ;;  %v12372_v8 = vld [vmem:[%s15858_s5] ss:$8 sps:$4 sm:$0xff]   ;;  %9844 = vmatprep.subr.bf16.mxu0 %v12370_v14 }
 0x2e7   : > { %11907 = vmatprep.mubr.msk.bf16.mxu1 %vm1432_vm1, %v4287_v13  ;;  %v12374_v13 = vld [vmem:[%s15858_s5 + $0x4] ss:$8 sps:$4 sm:$0xff]  }
 0x2e8   : > { %9651 = vmatprep.subr.bf16.mxu1 %v12374_v13  ;;  %v12404_v13 = vld [vmem:[%s15858_s5 + $0x54] ss:$8 sps:$4 sm:$0xff]  }
 0x2e9   : > { %v11667_v19 = vpop.f32.mrb[56].mxu1  ;;  %9652 = vmatpush1.bf16.msra.mxu1 %v12372_v8  ;;  %v12402_v8 = vld [vmem:[%s15858_s5 + $0x50] ss:$8 sps:$4 sm:$0xff]  }
 0x2ea   : > { %v11668_v33 = vpop.f32.mrb[57].mxu1 }
 0x2eb   : > { %v14190_v37 = vadd.f32 %v11668_v33, %v11667_v19  ;;  %v11670_v21 = vpop.f32.mrb[58].mxu1  ;;  %v4347_v19 = vld [vmem:[#allocation4 + $0x250] sm:$0xff] }
 0x2ec   : > { %v11671_v61 = vpop.f32.mrb[59].mxu1  ;;  %v12375_v33 = vld [vmem:[%s15858_s5 + $0x100] ss:$8 sps:$4 sm:$0xff]  }
 0x2ed   : > { %v14192_v62 = vadd.f32 %v11671_v61, %v11670_v21  ;;  %9845 = vmatpush1.bf16.msra.mxu0 %v12375_v33  ;;  %v12376_v61 = vld [vmem:[%s15858_s5 + $0x114] ss:$8 sps:$4 sm:$0xff]   ;;  %v12405_v33 = vld [vmem:[%s15858_s5 + $0x150] ss:$8 sps:$4 sm:$0xff]  }
 0x2ee   : > { %11908 = vmatmul.mubr.msk.bf16.gmra.mrb[164].mxu1 %vm1432_vm1, %v4292_v42  ;;  %9846 = vmatprep.subr.bf16.mxu0 %v12376_v61  ;;  %v12406_v61 = vld [vmem:[%s15858_s5 + $0x164] ss:$8 sps:$4 sm:$0xff]  }
 0x2ef   : > { %11911 = vmatprep.mubr.msk.bf16.mxu1 %vm1432_vm1, %v4297_v29 }
 0x2f1   : > { %v11673_v9 = vpop.f32.mrb[60].mxu1 }
 0x2f2   : > { %v11674_v63 = vpop.f32.mrb[61].mxu1 }
 0x2f3   : > { %v14196_v15 = vadd.f32 %v11674_v63, %v11673_v9  ;;  %v11676_v17 = vpop.f32.mrb[62].mxu1  ;;  %v4352_v63 = vld [vmem:[#allocation4 + $0x278] sm:$0xff] }
 0x2f4   : > { %v11677_v7 = vpop.f32.mrb[63].mxu1 }
 0x2f5   : > { %v14198_v16 = vadd.f32 %v11677_v7, %v11676_v17  ;;  %v12378_v17 = vld [vmem:[%s15858_s5 + $0x10] ss:$8 sps:$4 sm:$0xff]   ;;  %v12380_v7 = vld [vmem:[%s15858_s5 + $0x14] ss:$8 sps:$4 sm:$0xff]  }
 0x2f6   : > { %11912 = vmatmul.mubr.msk.bf16.gmra.mrb[168].mxu1 %vm1432_vm1, %v4302_v44  ;;  %9653 = vmatprep.subr.bf16.mxu1 %v12380_v7  ;;  %v12412_v7 = vld [vmem:[%s15858_s5 + $0x174] ss:$8 sps:$4 sm:$0xff]  }
 0x2f7   : > { %11915 = vmatprep.mubr.msk.bf16.mxu1 %vm1432_vm1, %v4307_v22  ;;  %v12381_v22 = vld [vmem:[%s15858_s5 + $0x110] ss:$8 sps:$4 sm:$0xff]   ;;  %9654 = vmatpush1.bf16.msra.mxu1 %v12378_v17 }
 0x2f8   : > { %9847 = vmatpush1.bf16.msra.mxu0 %v12381_v22 }
 0x2f9   : > { %v11679_v25 = vpop.f32.mrb[64].mxu1 }
 0x2fa   : > { %v11680_v27 = vpop.f32.mrb[65].mxu1 }
 0x2fb   : > { %v14202_v5 = vadd.f32 %v11680_v27, %v11679_v25  ;;  %v11682_v28 = vpop.f32.mrb[66].mxu1  ;;  %v12382_v27 = vld [vmem:[%s15858_s5 + $0x124] ss:$8 sps:$4 sm:$0xff]  }
 0x2fc   : > { %v11683_v59 = vpop.f32.mrb[67].mxu1  ;;  %9848 = vmatprep.subr.bf16.mxu0 %v12382_v27 }
 0x2fd   : > { %v14204_v31 = vadd.f32 %v11683_v59, %v11682_v28  ;;  %v12386_v28 = vld [vmem:[%s15858_s5 + $0x24] ss:$8 sps:$4 sm:$0xff]   ;;  %v12387_v59 = vld [vmem:[%s15858_s5 + $0x120] ss:$8 sps:$4 sm:$0xff]  }
 0x2fe   : > { %11916 = vmatmul.mubr.msk.bf16.gmra.mrb[172].mxu1 %vm1432_vm1, %v4312_v35  ;;  %v12384_v35 = vld [vmem:[%s15858_s5 + $0x20] ss:$8 sps:$4 sm:$0xff]   ;;  %9655 = vmatprep.subr.bf16.mxu1 %v12386_v28  ;;  %v12414_v28 = vld [vmem:[%s15858_s5 + $0x70] ss:$8 sps:$4 sm:$0xff]  }
 0x2ff   : > { %11919 = vmatprep.mubr.msk.bf16.mxu1 %vm1432_vm1, %v4317_v36  ;;  %9849 = vmatpush1.bf16.msra.mxu0 %v12387_v59  ;;  %v12416_v59 = vld [vmem:[%s15858_s5 + $0x74] ss:$8 sps:$4 sm:$0xff]  }
 0x300   : > { %9656 = vmatpush1.bf16.msra.mxu1 %v12384_v35 }
 0x301   : > { %v11685_v56 = vpop.f32.mrb[68].mxu1 }
 0x302   : > { %v11686_v41 = vpop.f32.mrb[69].mxu1 }
 0x303   : > { %v14208_v10 = vadd.f32 %v11686_v41, %v11685_v56  ;;  %v11688_v43 = vpop.f32.mrb[70].mxu1  ;;  %v12388_v56 = vld [vmem:[%s15858_s5 + $0x134] ss:$8 sps:$4 sm:$0xff]  }
 0x304   : > { %v11689_v53 = vpop.f32.mrb[71].mxu1  ;;  %9850 = vmatprep.subr.bf16.mxu0 %v12388_v56 }
 0x305   : > { %v14210_v55 = vadd.f32 %v11689_v53, %v11688_v43 }
 0x306   : > { %11920 = vmatmul.mubr.msk.bf16.gmra.mrb[176].mxu1 %vm1432_vm1, %v4322_v38  ;;  %v12390_v38 = vld [vmem:[%s15858_s5 + $0x30] ss:$8 sps:$4 sm:$0xff]  }
 0x307   : > { %11923 = vmatprep.mubr.msk.bf16.mxu1 %vm1432_vm1, %v4327_v2  ;;  %v12392_v2 = vld [vmem:[%s15858_s5 + $0x34] ss:$8 sps:$4 sm:$0xff]  }
 0x308   : > { %9657 = vmatprep.subr.bf16.mxu1 %v12392_v2  ;;  %v12420_v2 = vld [vmem:[%s15858_s5 + $0x80] ss:$8 sps:$4 sm:$0xff]  }
 0x309   : > { %v11691_v32 = vpop.f32.mrb[72].mxu1  ;;  %9658 = vmatpush1.bf16.msra.mxu1 %v12390_v38  ;;  %v12423_v38 = vld [vmem:[%s15858_s5 + $0x180] ss:$8 sps:$4 sm:$0xff]  }
 0x30a   : > { %v11692_v47 = vpop.f32.mrb[73].mxu1 }
 0x30b   : > { %v14214_v23 = vadd.f32 %v11692_v47, %v11691_v32  ;;  %v11694_v39 = vpop.f32.mrb[74].mxu1  ;;  %v12393_v47 = vld [vmem:[%s15858_s5 + $0x130] ss:$8 sps:$4 sm:$0xff]  }
 0x30c   : > { %v11695_v57 = vpop.f32.mrb[75].mxu1  ;;  %9851 = vmatpush1.bf16.msra.mxu0 %v12393_v47 }
 0x30d   : > { %v14216_v4 = vadd.f32 %v11695_v57, %v11694_v39  ;;  %v12394_v57 = vld [vmem:[%s15858_s5 + $0x144] ss:$8 sps:$4 sm:$0xff]  }
 0x30e   : > { %11924 = vmatmul.mubr.msk.bf16.gmra.mrb[180].mxu1 %vm1432_vm1, %v4332_v1  ;;  %v12398_v1 = vld [vmem:[%s15858_s5 + $0x44] ss:$8 sps:$4 sm:$0xff]   ;;  %9852 = vmatprep.subr.bf16.mxu0 %v12394_v57 }
 0x30f   : > { %11927 = vmatprep.mubr.msk.bf16.mxu1 %vm1432_vm1, %v4337_v20  ;;  %v12399_v20 = vld [vmem:[%s15858_s5 + $0x140] ss:$8 sps:$4 sm:$0xff]   ;;  %9659 = vmatprep.subr.bf16.mxu1 %v12398_v1 }
 0x310   : > { %9853 = vmatpush1.bf16.msra.mxu0 %v12399_v20 }
 0x311   : > { %v11697_v52 = vpop.f32.mrb[76].mxu1 }
 0x312   : > { %v11698_v34 = vpop.f32.mrb[77].mxu1 }
 0x313   : > { %v14220_v3 = vadd.f32 %v11698_v34, %v11697_v52  ;;  %v11700_v51 = vpop.f32.mrb[78].mxu1  ;;  %v12396_v52 = vld [vmem:[%s15858_s5 + $0x40] ss:$8 sps:$4 sm:$0xff]  }
 0x314   : > { %v11701_v0 = vpop.f32.mrb[79].mxu1  ;;  %9660 = vmatpush1.bf16.msra.mxu1 %v12396_v52 }
 0x315   : > { %v14222_v54 = vadd.f32 %v11701_v0, %v11700_v51  ;;  %v12400_v51 = vld [vmem:[%s15858_s5 + $0x154] ss:$8 sps:$4 sm:$0xff]   ;;  %9661 = vmatprep.subr.bf16.mxu1 %v12404_v13 }
 0x316   : > { %11928 = vmatmul.mubr.msk.bf16.gmra.mrb[184].mxu1 %vm1432_vm1, %v4342_v60  ;;  %9854 = vmatprep.subr.bf16.mxu0 %v12400_v51  ;;  %v14354_v51 = vld [vmem:[%s15857_s4] ss:$0 sm:$0xff] }
 0x317   : > { %11931 = vmatprep.mubr.msk.bf16.mxu1 %vm1432_vm1, %v4347_v19  ;;  %9855 = vmatpush1.bf16.msra.mxu0 %v12405_v33  ;;  %v4731_v33 = vadd.f32 %v14162_v24, %v14354_v51  ;;  %v12428_v24 = vld [vmem:[%s15858_s5 + $0x94] ss:$8 sps:$4 sm:$0xff]  }
 0x318   : > { %9662 = vmatpush1.bf16.msra.mxu1 %v12402_v8  ;;  %9856 = vmatprep.subr.bf16.mxu0 %v12406_v61 }
 0x319   : > { %v11703_v21 = vpop.f32.mrb[80].mxu1 }
 0x31a   : > { %v11704_v42 = vpop.f32.mrb[81].mxu1 }
 0x31b   : > { %v14241_v29 = vadd.f32 %v11704_v42, %v11703_v21  ;;  %v11706_v9 = vpop.f32.mrb[82].mxu1  ;;  %v12410_v42 = vld [vmem:[%s15858_s5 + $0x64] ss:$8 sps:$4 sm:$0xff]  }
 0x31c   : > { %v11707_v44 = vpop.f32.mrb[83].mxu1  ;;  %9663 = vmatprep.subr.bf16.mxu1 %v12410_v42 }
 0x31d   : > { %v14252_v25 = vadd.f32 %v11707_v44, %v11706_v9  ;;  %v12411_v9 = vld [vmem:[%s15858_s5 + $0x160] ss:$8 sps:$4 sm:$0xff]  }
 0x31e   : > { %11932 = vmatmul.mubr.msk.bf16.gmra.mrb[188].mxu1 %vm1432_vm1, %v4352_v63  ;;  %v12408_v63 = vld [vmem:[%s15858_s5 + $0x60] ss:$8 sps:$4 sm:$0xff]   ;;  %9857 = vmatpush1.bf16.msra.mxu0 %v12411_v9  ;;  %v4742_v9 = vadd.f32 %v14169_v11, %v14354_v51  ;;  %v12429_v11 = vld [vmem:[%s15858_s5 + $0x190] ss:$8 sps:$4 sm:$0xff]  }
 0x31f   : > { %9664 = vmatpush1.bf16.msra.mxu1 %v12408_v63  ;;  %9858 = vmatprep.subr.bf16.mxu0 %v12412_v7  ;;  %v4734_v63 = vadd.f32 %v14164_v26, %v14354_v51  ;;  %v12426_v7 = vld [vmem:[%s15858_s5 + $0x90] ss:$8 sps:$4 sm:$0xff]  }
 0x320   : > { %9665 = vmatprep.subr.bf16.mxu1 %v12416_v59  ;;  %v12430_v59 = vld [vmem:[%s15858_s5 + $0x1a4] ss:$8 sps:$4 sm:$0xff]  }
 0x321   : > { %v11709_v36 = vpop.f32.mrb[84].mxu1 }
 0x322   : > { %v11710_v41 = vpop.f32.mrb[85].mxu1 }
 0x323   : > { %v14270_v43 = vadd.f32 %v11710_v41, %v11709_v36  ;;  %v11712_v53 = vpop.f32.mrb[86].mxu1  ;;  %v12417_v36 = vld [vmem:[%s15858_s5 + $0x170] ss:$8 sps:$4 sm:$0xff]   ;;  %v12418_v41 = vld [vmem:[%s15858_s5 + $0x184] ss:$8 sps:$4 sm:$0xff]   ;;  %9666 = vmatpush1.bf16.msra.mxu1 %v12414_v28 }
 0x324   : > { %v11713_v32 = vpop.f32.mrb[87].mxu1  ;;  %9859 = vmatpush1.bf16.msra.mxu0 %v12417_v36 }
 0x325   : > { %v14281_v39 = vadd.f32 %v11713_v32, %v11712_v53  ;;  %v12422_v53 = vld [vmem:[%s15858_s5 + $0x84] ss:$8 sps:$4 sm:$0xff]   ;;  %9860 = vmatprep.subr.bf16.mxu0 %v12418_v41  ;;  %v12432_v41 = vld [vmem:[%s15858_s5 + $0xa0] ss:$8 sps:$4 sm:$0xff]  }
 0x326   : > { %9667 = vmatprep.subr.bf16.mxu1 %v12422_v53  ;;  %v12434_v53 = vld [vmem:[%s15858_s5 + $0xa4] ss:$8 sps:$4 sm:$0xff]  }
 0x327   : > { %9668 = vmatpush1.bf16.msra.mxu1 %v12420_v2  ;;  %v12435_v2 = vld [vmem:[%s15858_s5 + $0x1a0] ss:$8 sps:$4 sm:$0xff]  }
 0x328   : > { %9861 = vmatpush1.bf16.msra.mxu0 %v12423_v38  ;;  %9669 = vmatprep.subr.bf16.mxu1 %v12428_v24  ;;  %v12444_v24 = vld [vmem:[%s15858_s5 + $0xc0] ss:$8 sps:$4 sm:$0xff]  }
 0x329   : > { %v11715_v34 = vpop.f32.mrb[88].mxu1 }
 0x32a   : > { %v11716_v0 = vpop.f32.mrb[89].mxu1 }
 0x32b   : > { %v14298_v60 = vadd.f32 %v11716_v0, %v11715_v34  ;;  %v11718_v14 = vpop.f32.mrb[90].mxu1  ;;  %9670 = vmatpush1.bf16.msra.mxu1 %v12426_v7 }
 0x32c   : > { %v11719_v19 = vpop.f32.mrb[91].mxu1  ;;  %9671 = vmatprep.subr.bf16.mxu1 %v12434_v53  ;;  %v12452_v53 = vld [vmem:[%s15858_s5 + $0xd4] ss:$8 sps:$4 sm:$0xff]  }
 0x32d   : > { %v14309_v21 = vadd.f32 %v11719_v19, %v11718_v14  ;;  %v4739_v14 = vadd.f32 %v14167_v45, %v14354_v51 }
 0x32f   : > { %9672 = vmatpush1.bf16.msra.mxu1 %v12432_v41 }
 0x331   : > { %v11721_v17 = vpop.f32.mrb[92].mxu1 }
 0x332   : > { %v11722_v44 = vpop.f32.mrb[93].mxu1 }
 0x333   : > { %v14326_v22 = vadd.f32 %v11722_v44, %v11721_v17  ;;  %v11724_v27 = vpop.f32.mrb[94].mxu1  ;;  %v12424_v17 = vld [vmem:[%s15858_s5 + $0x194] ss:$8 sps:$4 sm:$0xff]  }
 0x334   : > { %v11725_v35 = vpop.f32.mrb[95].mxu1  ;;  %9862 = vmatprep.subr.bf16.mxu0 %v12424_v17 }
 0x335   : > { %v14337_v56 = vadd.f32 %v11725_v35, %v11724_v27  ;;  %9863 = vmatpush1.bf16.msra.mxu0 %v12429_v11 }
 0x336   : > { %9864 = vmatprep.subr.bf16.mxu0 %v12430_v59  ;;  %v12450_v59 = vld [vmem:[%s15858_s5 + $0xd0] ss:$8 sps:$4 sm:$0xff]  }
 0x339   : > { %v11743_v32 = vpop.f32.mrb[96].mxu1  ;;  %9865 = vmatpush1.bf16.msra.mxu0 %v12435_v2 }
 0x33a   : > { %v11744_v47 = vpop.f32.mrb[97].mxu1 }
 0x33b   : > { %v11745_v57 = vadd.f32 %v11744_v47, %v11743_v32  ;;  %v11746_v1 = vpop.f32.mrb[98].mxu1  ;;  %v4747_v32 = vadd.f32 %v14171_v48, %v14354_v51  ;;  %v12441_v48 = vld [vmem:[%s15858_s5 + $0x1b0] ss:$8 sps:$4 sm:$0xff]  }
 0x33c   : > { %v11747_v20 = vpop.f32.mrb[99].mxu1 }
 0x33d   : > { %v11748_v52 = vadd.f32 %v11747_v20, %v11746_v1  ;;  %v14369_v45 = vadd.f32 %v11745_v57, %v4731_v33  ;;  %v12436_v57 = vld [vmem:[%s15858_s5 + $0x1b4] ss:$8 sps:$4 sm:$0xff]   ;;  %v12438_v20 = vld [vmem:[%s15858_s5 + $0xb0] ss:$8 sps:$4 sm:$0xff]   ;;  %v4750_v33 = vadd.f32 %v14173_v6, %v14354_v51  ;;  %v12446_v6 = vld [vmem:[%s15858_s5 + $0xc4] ss:$8 sps:$4 sm:$0xff]  }
 0x33e   : > { %9866 = vmatprep.subr.bf16.mxu0 %v12436_v57 }
 0x33f   : > { %v14382_v27 = vadd.f32 %v11748_v52, %v4734_v63  ;;  %v12440_v52 = vld [vmem:[%s15858_s5 + $0xb4] ss:$8 sps:$4 sm:$0xff]   ;;  %9867 = vmatpush1.bf16.msra.mxu0 %v12441_v48  ;;  %v12456_v48 = vld [vmem:[%s15858_s5 + $0xe0] ss:$8 sps:$4 sm:$0xff]  }
 0x340   : > { %9673 = vmatprep.subr.bf16.mxu1 %v12440_v52 }
 0x341   : > { %v11749_v34 = vpop.f32.mrb[100].mxu1  ;;  %9674 = vmatpush1.bf16.msra.mxu1 %v12438_v20  ;;  %v12454_v20 = vld [vmem:[%s15858_s5 + $0x1e4] ss:$8 sps:$4 sm:$0xff]  }
 0x342   : > { %v11750_v0 = vpop.f32.mrb[101].mxu1  ;;  %9675 = vmatprep.subr.bf16.mxu1 %v12446_v6  ;;  %v12465_v6 = vld [vmem:[%s15858_s5 + $0x1f0] ss:$8 sps:$4 sm:$0xff]  }
 0x343   : > { %v11751_v8 = vadd.f32 %v11750_v0, %v11749_v34  ;;  %v11752_v13 = vpop.f32.mrb[102].mxu1 }
 0x344   : > { %v11753_v19 = vpop.f32.mrb[103].mxu1 }
 0x345   : > { %v11754_v61 = vadd.f32 %v11753_v19, %v11752_v13  ;;  %v14360_v42 = vadd.f32 %v11751_v8, %v4739_v14  ;;  %v4755_v14 = vadd.f32 %v14175_v46, %v14354_v51  ;;  %v12442_v46 = vld [vmem:[%s15858_s5 + $0x1c4] ss:$8 sps:$4 sm:$0xff]   ;;  %9676 = vmatpush1.bf16.msra.mxu1 %v12444_v24 }
 0x346   : > { %9868 = vmatprep.subr.bf16.mxu0 %v12442_v46  ;;  %9677 = vmatprep.subr.bf16.mxu1 %v12452_v53 }
 0x347   : > { %v14380_v44 = vadd.f32 %v11754_v61, %v4742_v9  ;;  %v4758_v61 = vadd.f32 %v14177_v18, %v14354_v51  ;;  %v12447_v18 = vld [vmem:[%s15858_s5 + $0x1c0] ss:$8 sps:$4 sm:$0xff]  }
 0x348   : > { %9869 = vmatpush1.bf16.msra.mxu0 %v12447_v18 }
 0x349   : > { %v11755_v26 = vpop.f32.mrb[104].mxu1  ;;  %9678 = vmatpush1.bf16.msra.mxu1 %v12450_v59  ;;  %v5944_v59 = vld [vmem:[#allocation3 + $0x8] sm:$0x1] }
 0x34a   : > { %v11756_v28 = vpop.f32.mrb[105].mxu1 }
 0x34b   : > { %v11757_v35 = vadd.f32 %v11756_v28, %v11755_v26  ;;  %v11758_v36 = vpop.f32.mrb[106].mxu1  ;;  %v12448_v26 = vld [vmem:[%s15858_s5 + $0x1d4] ss:$8 sps:$4 sm:$0xff]  }
 0x34c   : > { %v11759_v38 = vpop.f32.mrb[107].mxu1  ;;  %9870 = vmatprep.subr.bf16.mxu0 %v12448_v26 }
 0x34d   : > { %v11760_v47 = vadd.f32 %v11759_v38, %v11758_v36  ;;  %v14401_v1 = vadd.f32 %v11757_v35, %v4747_v32  ;;  %v4763_v35 = vadd.f32 %v14179_v40, %v14354_v51  ;;  %v12453_v38 = vld [vmem:[%s15858_s5 + $0x1d0] ss:$8 sps:$4 sm:$0xff]   ;;  %v4766_v40 = vadd.f32 %v14181_v50, %v14354_v51  ;;  %v12459_v50 = vld [vmem:[%s15858_s5 + $0x1e0] ss:$8 sps:$4 sm:$0xff]  }
 0x34e   : > { %9871 = vmatpush1.bf16.msra.mxu0 %v12453_v38  ;;  %v6010_v38 = vshll.u32 %v5944_v59, 16 }
 0x34f   : > { %v14422_v7 = vadd.f32 %v11760_v47, %v4750_v33  ;;  %9872 = vmatprep.subr.bf16.mxu0 %v12454_v20 }
 0x351   : > { %v11761_v34 = vpop.f32.mrb[108].mxu1 }
 0x352   : > { %v11762_v0 = vpop.f32.mrb[109].mxu1  ;;  %9873 = vmatpush1.bf16.msra.mxu0 %v12459_v50  ;;  %v4782_v50 = vadd.f32 %v14192_v62, %v14354_v51 }
 0x353   : > { %v11763_v8 = vadd.f32 %v11762_v0, %v11761_v34  ;;  %v11764_v13 = vpop.f32.mrb[110].mxu1  ;;  %v12458_v34 = vld [vmem:[%s15858_s5 + $0xe4] ss:$8 sps:$4 sm:$0xff]  }
 0x354   : > { %v11765_v19 = vpop.f32.mrb[111].mxu1  ;;  %9679 = vmatprep.subr.bf16.mxu1 %v12458_v34 }
 0x355   : > { %v11766_v9 = vadd.f32 %v11765_v19, %v11764_v13  ;;  %v14418_v63 = vadd.f32 %v11763_v8, %v4755_v14  ;;  %v4771_v14 = vadd.f32 %v14184_v12, %v14354_v51  ;;  %v12460_v19 = vld [vmem:[%s15858_s5 + $0x1f4] ss:$8 sps:$4 sm:$0xff]   ;;  %9680 = vmatpush1.bf16.msra.mxu1 %v12456_v48  ;;  %v4774_v12 = vadd.f32 %v14186_v58, %v14354_v51 }
 0x356   : > { %9874 = vmatprep.subr.bf16.mxu0 %v12460_v19 }
 0x357   : > { %v14420_v17 = vadd.f32 %v11766_v9, %v4758_v61  ;;  %v12462_v61 = vld [vmem:[%s15858_s5 + $0xf0] ss:$8 sps:$4 sm:$0xff]   ;;  %v12464_v9 = vld [vmem:[%s15858_s5 + $0xf4] ss:$8 sps:$4 sm:$0xff]   ;;  %9875 = vmatpush1.bf16.msra.mxu0 %v12465_v6 }
 0x358   : > { %9681 = vmatprep.subr.bf16.mxu1 %v12464_v9 }
 0x359   : > { %v11767_v11 = vpop.f32.mrb[112].mxu1  ;;  %9682 = vmatpush1.bf16.msra.mxu1 %v12462_v61 }
 0x35a   : > { %v11768_v28 = vpop.f32.mrb[113].mxu1 }
 0x35b   : > { %v11769_v36 = vadd.f32 %v11768_v28, %v11767_v11  ;;  %v11770_v41 = vpop.f32.mrb[114].mxu1  ;;  %v5942_v11 = vld [vmem:[#allocation3] sm:$0xf]  ;;  %v5943_v28 = vld [vmem:[#allocation3 + $0x4] sm:$0xf] }
 0x35c   : > { %v11771_v2 = vpop.f32.mrb[115].mxu1  ;;  %v5994_v58 = vshll.u32 %v5942_v11, 16  ;;  %v6004_v53 = vshrl.u32 %v5943_v28, 16 }
 0x35d   : > { %v11772_v32 = vadd.f32 %v11771_v2, %v11770_v41  ;;  %v14450_v47 = vadd.f32 %v11769_v36, %v4763_v35  ;;  %v5991_v35 = vshrl.u32 %v5942_v11, 16  ;;  %v6000_v41 = vshll.u32 %v5943_v28, 16 }
 0x35e   : > { %v4779_v2 = vadd.f32 %v14190_v37, %v14354_v51  ;;  %v5996_v48 = vrot.slane %v5994_v58, 5  ;;  %v12469_v37 = vld [vmem:[%s15858_s5 + $0x204] ss:$8 sps:$4 sm:$0xff]   ;;  %v4787_v28 = vadd.f32 %v14196_v15, %v14354_v51 }
 0x35f   : > { %v14454_v57 = vadd.f32 %v11772_v32, %v4766_v40  ;;  %v5993_v20 = vrot.slane %v5991_v35, 4  ;;  %v6002_v34 = vrot.slane %v6000_v41, 5  ;;  %10037 = vmatprep.subr.bf16.mxu0 %v12469_v37  ;;  %v4790_v41 = vadd.f32 %v14198_v16, %v14354_v51 }
 0x361   : > { %v11773_v52 = vpop.f32.mrb[116].mxu1 }
 0x362   : > { %v11774_v0 = vpop.f32.mrb[117].mxu1 }
 0x363   : > { %v11775_v8 = vadd.f32 %v11774_v0, %v11773_v52  ;;  %v11776_v13 = vpop.f32.mrb[118].mxu1  ;;  %v6006_v0 = vrot.slane %v6004_v53, 4 }
 0x364   : > { %v11777_v33 = vpop.f32.mrb[119].mxu1 }
 0x365   : > { %v11778_v46 = vadd.f32 %v11777_v33, %v11776_v13  ;;  %v14481_v24 = vadd.f32 %v11775_v8, %v4771_v14  ;;  %v5997_v13 = vor.u32 %v5996_v48, %v5993_v20  ;;  %v6007_v19 = vor.u32 %v6006_v0, %v6002_v34 }
 0x366   : > { %v6012_v33 = vrot.slane %v6010_v38, 5  ;;  %v4795_v20 = vadd.f32 %v14202_v5, %v14354_v51  ;;  %v4806_v5 = vadd.f32 %v14210_v55, %v14354_v51 }
 0x367   : > { %v14486_v18 = vadd.f32 %v11778_v46, %v4774_v12  ;;  %v5998_v9 = vrot.slane %v5997_v13, 4  ;;  %v6008_v12 = vrot.slane %v6007_v19, 4  ;;  %v4803_v19 = vadd.f32 %v14208_v10, %v14354_v51 }
 0x368   : > { %v4814_v10 = vadd.f32 %v14216_v4, %v14354_v51 }
 0x369   : > { %v11779_v26 = vpop.f32.mrb[120].mxu1  ;;  %v6003_v62 = vsel %vm12940_vm8, %v5998_v9, %v6002_v34  ;;  %v6013_v11 = vsel %vm12940_vm8, %v6008_v12, %v6012_v33  ;;  %v4798_v34 = vadd.f32 %v14204_v31, %v14354_v51 }
 0x36a   : > { %v11780_v36 = vpop.f32.mrb[121].mxu1 }
 0x36b   : > { %v11781_v32 = vadd.f32 %v11780_v36, %v11779_v26  ;;  %v11782_v40 = vpop.f32.mrb[122].mxu1  ;;  %v12470_v26 = vld [vmem:[#allocation3] sm:$0xff]   ;;  %v11207_v36 = vcombine.low %v6003_v62, %v6013_v11  ;;  %v4811_v11 = vadd.f32 %v14214_v23, %v14354_v51  ;;  %v4822_v23 = vadd.f32 %v14222_v54, %v14354_v51 }
 0x36c   : > { %v11783_v52 = vpop.f32.mrb[123].mxu1 }
 0x36d   : > { %v11784_v14 = vadd.f32 %v11783_v52, %v11782_v40  ;;  %v14492_v8 = vadd.f32 %v11781_v32, %v4779_v2  ;;  %9683 = vmatprep.mubr.bf16.mxu1 %v11207_v36 }
 0x36e   : > { %9684 = vmatmul.mubr.bf16.vlgmr.msra.gmra.mrb[192].mxu1 %v12470_v26 }
 0x36f   : > { %v14497_v61 = vadd.f32 %v11784_v14, %v4782_v50 }
 0x371   : > { %v11785_v46 = vpop.f32.mrb[124].mxu1 }
 0x372   : > { %v11786_v6 = vpop.f32.mrb[125].mxu1 }
 0x373   : > { %v11787_v59 = vadd.f32 %v11786_v6, %v11785_v46  ;;  %v11788_v35 = vpop.f32.mrb[126].mxu1 }
 0x374   : > { %v11789_v58 = vpop.f32.mrb[127].mxu1 }
 0x375   : > { %v11790_v53 = vadd.f32 %v11789_v58, %v11788_v35  ;;  %v14507_v38 = vadd.f32 %v11787_v59, %v4787_v28 }
 0x377   : > { %v14509_v2 = vadd.f32 %v11790_v53, %v4790_v41  ;;  %v4819_v53 = vadd.f32 %v14220_v3, %v14354_v51  ;;  %v4830_v3 = vadd.f32 %v14252_v25, %v14354_v51 }
 0x379   : > { %v11791_v32 = vpop.f32.mrb[128].mxu1 }
 0x37a   : > { %v11792_v40 = vpop.f32.mrb[129].mxu1 }
 0x37b   : > { %v11793_v15 = vadd.f32 %v11792_v40, %v11791_v32  ;;  %v11794_v52 = vpop.f32.mrb[130].mxu1 }
 0x37c   : > { %v11795_v48 = vpop.f32.mrb[131].mxu1 }
 0x37d   : > { %v11796_v0 = vadd.f32 %v11795_v48, %v11794_v52  ;;  %v14515_v16 = vadd.f32 %v11793_v15, %v4795_v20 }
 0x37f   : > { %v14517_v50 = vadd.f32 %v11796_v0, %v4798_v34  ;;  %v4827_v0 = vadd.f32 %v14241_v29, %v14354_v51  ;;  %v4838_v29 = vadd.f32 %v14281_v39, %v14354_v51 }
 0x381   : > { %v11797_v14 = vpop.f32.mrb[132].mxu1 }
 0x382   : > { %v11798_v13 = vpop.f32.mrb[133].mxu1 }
 0x383   : > { %v11799_v33 = vadd.f32 %v11798_v13, %v11797_v14  ;;  %v11800_v37 = vpop.f32.mrb[134].mxu1 }
 0x384   : > { %v11801_v9 = vpop.f32.mrb[135].mxu1 }
 0x385   : > { %v11802_v12 = vadd.f32 %v11801_v9, %v11800_v37  ;;  %v14523_v46 = vadd.f32 %v11799_v33, %v4803_v19 }
 0x387   : > { %v14525_v31 = vadd.f32 %v11802_v12, %v4806_v5  ;;  %v4835_v12 = vadd.f32 %v14270_v43, %v14354_v51  ;;  %v4846_v43 = vadd.f32 %v14309_v21, %v14354_v51 }
 0x389   : > { %v11803_v6 = vpop.f32.mrb[136].mxu1 }
 0x38a   : > { %v11804_v62 = vpop.f32.mrb[137].mxu1 }
 0x38b   : > { %v11805_v26 = vadd.f32 %v11804_v62, %v11803_v6  ;;  %v11806_v28 = vpop.f32.mrb[138].mxu1 }
 0x38c   : > { %v11807_v59 = vpop.f32.mrb[139].mxu1 }
 0x38d   : > { %v11808_v35 = vadd.f32 %v11807_v59, %v11806_v28  ;;  %v14531_v36 = vadd.f32 %v11805_v26, %v4811_v11 }
 0x38f   : > { %v14533_v55 = vadd.f32 %v11808_v35, %v4814_v10  ;;  %v4843_v35 = vadd.f32 %v14298_v60, %v14354_v51  ;;  %v4854_v60 = vadd.f32 %v14337_v56, %v14354_v51 }
 0x391   : > { %v11809_v58 = vpop.f32.mrb[140].mxu1 }
 0x392   : > { %v11810_v41 = vpop.f32.mrb[141].mxu1 }
 0x393   : > { %v11811_v32 = vadd.f32 %v11810_v41, %v11809_v58  ;;  %v11812_v40 = vpop.f32.mrb[142].mxu1 }
 0x394   : > { %v11813_v20 = vpop.f32.mrb[143].mxu1 }
 0x395   : > { %v11814_v15 = vadd.f32 %v11813_v20, %v11812_v40  ;;  %v14539_v52 = vadd.f32 %v11811_v32, %v4819_v53 }
 0x397   : > { %v14541_v4 = vadd.f32 %v11814_v15, %v4822_v23  ;;  %v4851_v15 = vadd.f32 %v14326_v22, %v14354_v51 }
 0x399   : > { %v11815_v48 = vpop.f32.mrb[144].mxu1 }
 0x39a   : > { %v11816_v34 = vpop.f32.mrb[145].mxu1 }
 0x39b   : > { %v11817_v14 = vadd.f32 %v11816_v34, %v11815_v48  ;;  %v11818_v13 = vpop.f32.mrb[146].mxu1 }
 0x39c   : > { %v11819_v19 = vpop.f32.mrb[147].mxu1 }
 0x39d   : > { %v11820_v33 = vadd.f32 %v11819_v19, %v11818_v13  ;;  %v14547_v37 = vadd.f32 %v11817_v14, %v4827_v0 }
 0x39f   : > { %v14549_v54 = vadd.f32 %v11820_v33, %v4830_v3  ;;  %v6454_v3 = vld [vmem:[#allocation3] sm:$0xe]  ;;  %v6455_v33 = vld [vmem:[#allocation3 + $0x4] sm:$0xf] }
 0x3a0   : > { %v11223_v56 = vrot.slane %v6454_v3, 9  ;;  %v6552_v51 = vrot.slane %v6455_v33, 5  ;;  %v5693_v3 = vld [vmem:[#allocation3 + $0x18] sm:$0xf] }
 0x3a1   : > { %v11821_v9 = vpop.f32.mrb[148].mxu1 }
 0x3a2   : > { %v11822_v5 = vpop.f32.mrb[149].mxu1 }
 0x3a3   : > { %v11823_v6 = vadd.f32 %v11822_v5, %v11821_v9  ;;  %v11824_v62 = vpop.f32.mrb[150].mxu1 }
 0x3a4   : > { %v11825_v11 = vpop.f32.mrb[151].mxu1 }
 0x3a5   : > { %v11826_v26 = vadd.f32 %v11825_v11, %v11824_v62  ;;  %v14555_v28 = vadd.f32 %v11823_v6, %v4835_v12 }
 0x3a7   : > { %v14557_v25 = vadd.f32 %v11826_v26, %v4838_v29  ;;  %v6456_v29 = vld [vmem:[#allocation3 + $0x8] sm:$0x1] }
 0x3a9   : > { %v11827_v59 = vpop.f32.mrb[152].mxu1 }
 0x3aa   : > { %v11828_v10 = vpop.f32.mrb[153].mxu1 }
 0x3ab   : > { %v11829_v58 = vadd.f32 %v11828_v10, %v11827_v59  ;;  %v11830_v41 = vpop.f32.mrb[154].mxu1 }
 0x3ac   : > { %v11831_v53 = vpop.f32.mrb[155].mxu1 }
 0x3ad   : > { %v11832_v32 = vadd.f32 %v11831_v53, %v11830_v41  ;;  %v14563_v40 = vadd.f32 %v11829_v58, %v4843_v35 }
 0x3af   : > { %v14565_v39 = vadd.f32 %v11832_v32, %v4846_v43 }
 0x3b1   : > { %v11833_v20 = vpop.f32.mrb[156].mxu1 }
 0x3b2   : > { %v11834_v23 = vpop.f32.mrb[157].mxu1 }
 0x3b3   : > { %v11835_v48 = vadd.f32 %v11834_v23, %v11833_v20  ;;  %v11836_v34 = vpop.f32.mrb[158].mxu1 }
 0x3b4   : > { %v11837_v0 = vpop.f32.mrb[159].mxu1 }
 0x3b5   : > { %v11838_v14 = vadd.f32 %v11837_v0, %v11836_v34  ;;  %v14571_v13 = vadd.f32 %v11835_v48, %v4851_v15 }
 0x3b7   : > { %v14573_v21 = vadd.f32 %v11838_v14, %v4854_v60 }
 0x3b9   : > { %v11905_v19 = vpop.f32.mrb[160].mxu1 }
 0x3ba   : > { %v5061_v9 = vadd.f32 %v11905_v19, %v14360_v42  ;;  %v5052_v5 = vpop.f32.mrb[161].mxu1  ;;  %v6555_v42 = vrot.slane %v6456_v29, 5  ;;  %v12527_v19 = vld [vmem:[%s15858_s5 + $0x2c0] ss:$8 sps:$4 sm:$0xff]  }
 0x3bb   : > { %v5053_v12 = vadd.f32 %v5052_v5, %v14369_v45  ;;  %v11906_v22 = vpop.f32.mrb[162].mxu1  ;;  %v14581_v45 = vsel %vm13361_vm0, %v11223_v56, %v6552_v51 }
 0x3bc   : > { %v5181_v6 = vmax.f32 %v5061_v9, 0.0  ;;  %v5064_v62 = vadd.f32 %v11906_v22, %v14380_v44  ;;  %v5055_v11 = vpop.f32.mrb[163].mxu1  ;;  %v6554_v44 = vrot.slane %v6552_v51, 4 }
 0x3bd   : > { %v5179_v26 = vmax.f32 %v5053_v12, 0.0  ;;  %v5056_v59 = vadd.f32 %v5055_v11, %v14382_v27  ;;  %v5684_v11 = vld [vmem:[#allocation3 + $0xc] sm:$0xf] }
 0x3be   : > { %v11567_v10 = vpack.c.bf16 %v5181_v6, %v5181_v6  ;;  %v5182_v35 = vmax.f32 %v5064_v62, 0.0 }
 0x3bf   : > { %v11565_v58 = vpack.c.bf16 %v5179_v26, %v5179_v26  ;;  %v5180_v41 = vmax.f32 %v5056_v59, 0.0  ;;  %v5697_v59 = vld [vmem:[#allocation3 + $0x20] sm:$0x1] }
 0x3c0   : > { %v5379_v53 = vshrl.u32 %v11567_v10, 16  ;;  %v11568_v43 = vpack.c.bf16 %v5182_v35, %v5182_v35  ;;  %v5382_v32 = vshll.u32 %v11567_v10, 16 }
 0x3c1   : > { %v5362_v20 = vshrl.u32 %v11565_v58, 16  ;;  %v5365_v23 = vshll.u32 %v11565_v58, 16  ;;  %v11566_v15 = vpack.c.bf16 %v5180_v41, %v5180_v41  ;;  %v11909_v48 = vpop.f32.mrb[164].mxu1 }
 0x3c2   : > { %v5381_v34 = vrot.slane %v5379_v53, 7  ;;  %v5387_v27 = vshrl.u32 %v11568_v43, 16  ;;  %v5390_v0 = vshll.u32 %v11568_v43, 16  ;;  %v5077_v60 = vadd.f32 %v11909_v48, %v14418_v63  ;;  %v5068_v14 = vpop.f32.mrb[165].mxu1  ;;  %v5690_v43 = vld [vmem:[#allocation3 + $0x14] sm:$0x1] }
 0x3c3   : > { %v5364_v33 = vrot.slane %v5362_v20, 7  ;;  %v5370_v9 = vshrl.u32 %v11566_v15, 16  ;;  %v5373_v5 = vshll.u32 %v11566_v15, 16  ;;  %v5069_v12 = vadd.f32 %v5068_v14, %v14401_v1  ;;  %v11910_v22 = vpop.f32.mrb[166].mxu1 }
 0x3c4   : > { %v5384_v6 = vor.u32 %v5382_v32, %v5381_v34  ;;  %v5385_v62 = vrot.slane %v5381_v34, 4  ;;  %v5389_v29 = vrot.slane %v5387_v27, 7  ;;  %v5185_v56 = vmax.f32 %v5077_v60, 0.0  ;;  %v5071_v63 = vpop.f32.mrb[167].mxu1 }
 0x3c5   : > { %v5367_v51 = vor.u32 %v5365_v23, %v5364_v33  ;;  %v5368_v26 = vrot.slane %v5364_v33, 4  ;;  %v5372_v10 = vrot.slane %v5370_v9, 7  ;;  %v5183_v35 = vmax.f32 %v5069_v12, 0.0 }
 0x3c6   : > { %v5694_v58 = vsel %vm14586_vm5, %v5384_v6, %v5693_v3  ;;  %v5392_v41 = vor.u32 %v5390_v0, %v5389_v29  ;;  %v5394_v53 = vrot.slane %v5389_v29, 4  ;;  %v11571_v20 = vpack.c.bf16 %v5185_v56, %v5185_v56  ;;  %v5707_v29 = vld [vmem:[#allocation3 + $0x30] sm:$0xf] }
 0x3c7   : > { %5695 = vst [vmem:[#allocation3 + $0x18] sm:$0xf] %v5694_v58  ;;  %v5685_v1 = vsel %vm14586_vm5, %v5367_v51, %v5684_v11  ;;  %v5375_v32 = vor.u32 %v5373_v5, %v5372_v10  ;;  %v5377_v15 = vrot.slane %v5372_v10, 4  ;;  %v11569_v48 = vpack.c.bf16 %v5183_v35, %v5183_v35 }
 0x3c8   : > { %5686 = vst [vmem:[#allocation3 + $0xc] sm:$0xf] %v5685_v1  ;;  %v5393_v34 = vsel %vm12962_vm12, %v5385_v62, %v5392_v41  ;;  %v5698_v60 = vsel %vm12716_vm2, %v5394_v53, %v5697_v59  ;;  %v5413_v14 = vshrl.u32 %v11571_v20, 16  ;;  %v14601_v0 = vsel %vm13361_vm0, %v6554_v44, %v6555_v42 }
 0x3c9   : > { %5696 = vst [vmem:[#allocation3 + $0x1c] sm:$0xf] %v5393_v34  ;;  %5699 = vst [vmem:[#allocation3 + $0x20] sm:$0x1] %v5698_v60  ;;  %v5376_v3 = vsel %vm12962_vm12, %v5368_v26, %v5375_v32  ;;  %v5691_v33 = vsel %vm12716_vm2, %v5377_v15, %v5690_v43  ;;  %v5416_v9 = vshll.u32 %v11571_v20, 16  ;;  %v5396_v5 = vshrl.u32 %v11569_v48, 16 }
 0x3ca   : > { %v11913_v12 = vpop.f32.mrb[168].mxu1  ;;  %5687 = vst [vmem:[#allocation3 + $0x10] sm:$0xf] %v5376_v3  ;;  %5692 = vst [vmem:[#allocation3 + $0x14] sm:$0x1] %v5691_v33  ;;  %v14607_v6 = vrot.slane %v5413_v14, 7  ;;  %v5080_v62 = vadd.f32 %v11910_v22, %v14420_v17  ;;  %v5072_v42 = vadd.f32 %v5071_v63, %v14422_v7  ;;  %v11239_v10 = vcombine.low %v14581_v45, %v14601_v0 }
 0x3cb   : > { %v5093_v44 = vadd.f32 %v11913_v12, %v14481_v24  ;;  %v5084_v11 = vpop.f32.mrb[169].mxu1  ;;  %v14612_v56 = vrot.slane %v5396_v5, 7  ;;  %v5399_v51 = vshll.u32 %v11569_v48, 16  ;;  %v5700_v17 = vld [vmem:[#allocation3 + $0x24] sm:$0xf] }
 0x3cc   : > { %v5085_v26 = vadd.f32 %v5084_v11, %v14450_v47  ;;  %v11914_v59 = vpop.f32.mrb[170].mxu1  ;;  %v5418_v35 = vor.u32 %v5416_v9, %v14607_v6  ;;  %v5419_v58 = vrot.slane %v14607_v6, 4  ;;  %v5186_v22 = vmax.f32 %v5080_v62, 0.0  ;;  %v12467_v60 = vld [vmem:[%s15858_s5 + $0x200] ss:$8 sps:$4 sm:$0xff]  }
 0x3cd   : > { %v5184_v7 = vmax.f32 %v5072_v42, 0.0  ;;  %v5087_v63 = vpop.f32.mrb[171].mxu1  ;;  %v5401_v24 = vor.u32 %v5399_v51, %v14612_v56  ;;  %v5402_v41 = vrot.slane %v14612_v56, 4  ;;  %v5189_v53 = vmax.f32 %v5093_v44, 0.0  ;;  %v5711_v9 = vld [vmem:[#allocation3 + $0x38] sm:$0x1] }
 0x3ce   : > { %v5187_v43 = vmax.f32 %v5085_v26, 0.0  ;;  %v5708_v47 = vsel %vm14586_vm5, %v5418_v35, %v5707_v29  ;;  %v11572_v20 = vpack.c.bf16 %v5186_v22, %v5186_v22  ;;  %v5096_v45 = vadd.f32 %v11914_v59, %v14486_v18  ;;  %v12474_v18 = vld [vmem:[%s15858_s5 + $0x214] ss:$8 sps:$4 sm:$0xff]   ;;  %v5704_v5 = vld [vmem:[#allocation3 + $0x2c] sm:$0x1] }
 0x3cf   : > { %v11570_v1 = vpack.c.bf16 %v5184_v7, %v5184_v7  ;;  %5709 = vst [vmem:[#allocation3 + $0x30] sm:$0xf] %v5708_v47  ;;  %v5701_v32 = vsel %vm14586_vm5, %v5401_v24, %v5700_v17  ;;  %v11575_v15 = vpack.c.bf16 %v5189_v53, %v5189_v53  ;;  %v5088_v34 = vadd.f32 %v5087_v63, %v14454_v57  ;;  %v5721_v56 = vld [vmem:[#allocation3 + $0x48] sm:$0xf] }
 0x3d0   : > { %v11573_v48 = vpack.c.bf16 %v5187_v43, %v5187_v43  ;;  %5702 = vst [vmem:[#allocation3 + $0x24] sm:$0xf] %v5701_v32  ;;  %v5421_v14 = vshrl.u32 %v11572_v20, 16  ;;  %v5424_v0 = vshll.u32 %v11572_v20, 16  ;;  %v5190_v51 = vmax.f32 %v5096_v45, 0.0  ;;  %v12471_v24 = vld [vmem:[#allocation3 + $0x18] sm:$0xff]  }
 0x3d1   : > { %v5404_v3 = vshrl.u32 %v11570_v1, 16  ;;  %v5407_v33 = vshll.u32 %v11570_v1, 16  ;;  %v5447_v12 = vshrl.u32 %v11575_v15, 16  ;;  %v5450_v6 = vshll.u32 %v11575_v15, 16  ;;  %v11917_v57 = vpop.f32.mrb[172].mxu1  ;;  %v12466_v44 = vld [vmem:[#allocation3 + $0xc] sm:$0xff]  }
 0x3d2   : > { %v5430_v62 = vshrl.u32 %v11573_v48, 16  ;;  %v5433_v42 = vshll.u32 %v11573_v48, 16  ;;  %v5423_v11 = vrot.slane %v5421_v14, 7  ;;  %v5188_v26 = vmax.f32 %v5088_v34, 0.0  ;;  %v5100_v59 = vpop.f32.mrb[173].mxu1  ;;  %9876 = vmatprep.mubr.bf16.mxu0 %v12466_v44 }
 0x3d3   : > { %v5406_v29 = vrot.slane %v5404_v3, 7  ;;  %v14633_v35 = vrot.slane %v5447_v12, 7  ;;  %v5109_v22 = vadd.f32 %v11917_v57, %v14507_v38  ;;  %v5101_v7 = vadd.f32 %v5100_v59, %v14492_v8  ;;  %v11918_v63 = vpop.f32.mrb[174].mxu1  ;;  %v5714_v1 = vld [vmem:[#allocation3 + $0x3c] sm:$0xf]  ;;  %9877 = vmatmul.mubr.bf16.vlgmr.msra.gmra.mrb[0].mxu0 %v11239_v10 }
 0x3d4   : > { %v14635_v17 = vrot.slane %v5430_v62, 7  ;;  %v5426_v53 = vor.u32 %v5424_v0, %v5423_v11  ;;  %v5428_v43 = vrot.slane %v5423_v11, 4  ;;  %v5103_v32 = vpop.f32.mrb[175].mxu1  ;;  %9886 = vmatprep.mubr.bf16.mxu0 %v12471_v24  ;;  %10038 = vmatpush1.bf16.msra.mxu0 %v12467_v60  ;;  %v12472_v8 = vld [vmem:[%s15858_s5 + $0x210] ss:$8 sps:$4 sm:$0xff]  }
 0x3d5   : > { %v5409_v47 = vor.u32 %v5407_v33, %v5406_v29  ;;  %v5411_v20 = vrot.slane %v5406_v29, 4  ;;  %v5452_v45 = vor.u32 %v5450_v6, %v14633_v35  ;;  %v5453_v15 = vrot.slane %v14633_v35, 4  ;;  %10039 = vmatprep.subr.bf16.mxu0 %v12474_v18  ;;  %v12479_v60 = vld [vmem:[%s15858_s5 + $0x224] ss:$8 sps:$4 sm:$0xff]   ;;  %v12477_v6 = vld [vmem:[%s15858_s5 + $0x220] ss:$8 sps:$4 sm:$0xff]  }
 0x3d6   : > { %v5435_v48 = vor.u32 %v5433_v42, %v14635_v17  ;;  %v5436_v38 = vrot.slane %v14635_v17, 4  ;;  %v5427_v34 = vsel %vm12962_vm12, %v5419_v58, %v5426_v53  ;;  %v5712_v10 = vsel %vm12716_vm2, %v5428_v43, %v5711_v9  ;;  %v12484_v62 = vld [vmem:[%s15858_s5 + $0x234] ss:$8 sps:$4 sm:$0xff]  }
 0x3d7   : > { %v5410_v14 = vsel %vm12962_vm12, %v5402_v41, %v5409_v47  ;;  %v5705_v0 = vsel %vm12716_vm2, %v5411_v20, %v5704_v5  ;;  %5710 = vst [vmem:[#allocation3 + $0x34] sm:$0xf] %v5427_v34  ;;  %5713 = vst [vmem:[#allocation3 + $0x38] sm:$0x1] %v5712_v10  ;;  %v5722_v58 = vsel %vm14586_vm5, %v5452_v45, %v5721_v56  ;;  %v5193_v9 = vmax.f32 %v5109_v22, 0.0 }
 0x3d8   : > { %5703 = vst [vmem:[#allocation3 + $0x28] sm:$0xf] %v5410_v14  ;;  %5706 = vst [vmem:[#allocation3 + $0x2c] sm:$0x1] %v5705_v0  ;;  %v5715_v3 = vsel %vm14586_vm5, %v5435_v48, %v5714_v1  ;;  %v11576_v33 = vpack.c.bf16 %v5190_v51, %v5190_v51  ;;  %v11574_v41 = vpack.c.bf16 %v5188_v26, %v5188_v26  ;;  %v5191_v18 = vmax.f32 %v5101_v7, 0.0 }
 0x3d9   : > { %5723 = vst [vmem:[#allocation3 + $0x48] sm:$0xf] %v5722_v58  ;;  %5716 = vst [vmem:[#allocation3 + $0x3c] sm:$0xf] %v5715_v3  ;;  %v5112_v5 = vadd.f32 %v11918_v63, %v14509_v2  ;;  %v5104_v12 = vadd.f32 %v5103_v32, %v14497_v61  ;;  %v11921_v29 = vpop.f32.mrb[176].mxu1  ;;  %10040 = vmatpush1.bf16.msra.mxu0 %v12472_v8  ;;  %v11579_v26 = vpack.c.bf16 %v5193_v9, %v5193_v9 }
 0x3da   : > { %v5455_v42 = vshrl.u32 %v11576_v33, 16  ;;  %v5458_v57 = vshll.u32 %v11576_v33, 16  ;;  %v5438_v44 = vshrl.u32 %v11574_v41, 16  ;;  %v5441_v11 = vshll.u32 %v11574_v41, 16  ;;  %v5725_v56 = vld [vmem:[#allocation3 + $0x50] sm:$0x1]  ;;  %10041 = vmatprep.subr.bf16.mxu0 %v12479_v60 }
 0x3db   : > { %v5718_v51 = vld [vmem:[#allocation3 + $0x44] sm:$0x1]  ;;  %v11577_v2 = vpack.c.bf16 %v5191_v18, %v5191_v18  ;;  %v5194_v59 = vmax.f32 %v5112_v5, 0.0  ;;  %v5192_v61 = vmax.f32 %v5104_v12, 0.0  ;;  %v5116_v22 = vpop.f32.mrb[177].mxu1  ;;  %v5125_v24 = vadd.f32 %v11921_v29, %v14523_v46 }
 0x3dc   : > { %v5457_v7 = vrot.slane %v5455_v42, 7  ;;  %v5440_v63 = vrot.slane %v5438_v44, 7  ;;  %v5117_v53 = vadd.f32 %v5116_v22, %v14515_v16  ;;  %v11922_v43 = vpop.f32.mrb[178].mxu1  ;;  %v5481_v47 = vshrl.u32 %v11579_v26, 16  ;;  %v12482_v14 = vld [vmem:[%s15858_s5 + $0x230] ss:$8 sps:$4 sm:$0xff]  }
 0x3dd   : > { %v5484_v20 = vshll.u32 %v11579_v26, 16  ;;  %v5464_v1 = vshrl.u32 %v11577_v2, 16  ;;  %v5467_v32 = vshll.u32 %v11577_v2, 16  ;;  %v5119_v45 = vpop.f32.mrb[179].mxu1  ;;  %10042 = vmatpush1.bf16.msra.mxu0 %v12477_v6  ;;  %v11580_v16 = vpack.c.bf16 %v5194_v59, %v5194_v59  ;;  %v12489_v58 = vld [vmem:[%s15858_s5 + $0x244] ss:$8 sps:$4 sm:$0xff]  }
 0x3de   : > { %v5460_v48 = vor.u32 %v5458_v57, %v5457_v7  ;;  %v5462_v8 = vrot.slane %v5457_v7, 4  ;;  %v5443_v34 = vor.u32 %v5441_v11, %v5440_v63  ;;  %v5445_v10 = vrot.slane %v5440_v63, 4  ;;  %10043 = vmatprep.subr.bf16.mxu0 %v12484_v62  ;;  %v5735_v18 = vld [vmem:[#allocation3 + $0x60] sm:$0xf]  ;;  %v5728_v5 = vld [vmem:[#allocation3 + $0x54] sm:$0xf] }
 0x3df   : > { %v14674_v0 = vrot.slane %v5481_v47, 7  ;;  %v14676_v46 = vrot.slane %v5464_v1, 7  ;;  %v11578_v60 = vpack.c.bf16 %v5192_v61, %v5192_v61  ;;  %v5945_v6 = vld [vmem:[#allocation3 + $0xc] sm:$0xf]  ;;  %v5489_v62 = vshrl.u32 %v11580_v16, 16 }
 0x3e0   : > { %v5461_v3 = vsel %vm12962_vm12, %v5453_v15, %v5460_v48  ;;  %v5726_v33 = vsel %vm12716_vm2, %v5462_v8, %v5725_v56  ;;  %v5444_v41 = vsel %vm12962_vm12, %v5436_v38, %v5443_v34  ;;  %v5719_v9 = vsel %vm12716_vm2, %v5445_v10, %v5718_v51  ;;  %v12487_v38 = vld [vmem:[%s15858_s5 + $0x240] ss:$8 sps:$4 sm:$0xff]   ;;  %v5732_v26 = vld [vmem:[#allocation3 + $0x5c] sm:$0x1] }
 0x3e1   : > { %5724 = vst [vmem:[#allocation3 + $0x4c] sm:$0xf] %v5461_v3  ;;  %5727 = vst [vmem:[#allocation3 + $0x50] sm:$0x1] %v5726_v33  ;;  %v5486_v35 = vor.u32 %v5484_v20, %v14674_v0  ;;  %v5487_v15 = vrot.slane %v14674_v0, 4  ;;  %v5469_v12 = vor.u32 %v5467_v32, %v14676_v46  ;;  %v5470_v17 = vrot.slane %v14676_v46, 4  ;;  %10044 = vmatpush1.bf16.msra.mxu0 %v12482_v14 }
 0x3e2   : > { %5717 = vst [vmem:[#allocation3 + $0x40] sm:$0xf] %v5444_v41  ;;  %5720 = vst [vmem:[#allocation3 + $0x44] sm:$0x1] %v5719_v9  ;;  %v5492_v42 = vshll.u32 %v11580_v16, 16  ;;  %v5472_v57 = vshrl.u32 %v11578_v60, 16  ;;  %10045 = vmatprep.subr.bf16.mxu0 %v12489_v58  ;;  %v5128_v47 = vadd.f32 %v11922_v43, %v14525_v31  ;;  %v5120_v20 = vadd.f32 %v5119_v45, %v14517_v50 }
 0x3e3   : > { %v5475_v44 = vshll.u32 %v11578_v60, 16  ;;  %v14700_v11 = vpop.f32.mrb[180].mxu1  ;;  %v5736_v29 = vsel %vm14586_vm5, %v5486_v35, %v5735_v18  ;;  %v5729_v56 = vsel %vm14586_vm5, %v5469_v12, %v5728_v5  ;;  %v5739_v51 = vld [vmem:[#allocation3 + $0x68] sm:$0x1]  ;;  %v5197_v2 = vmax.f32 %v5125_v24, 0.0 }
 0x3e4   : > { %v5195_v59 = vmax.f32 %v5117_v53, 0.0  ;;  %v14706_v61 = vpop.f32.mrb[181].mxu1  ;;  %v12494_v22 = vld [vmem:[%s15858_s5 + $0x254] ss:$8 sps:$4 sm:$0xff]   ;;  %5737 = vst [vmem:[#allocation3 + $0x60] sm:$0xf] %v5736_v29 }
 0x3e5   : > { %5730 = vst [vmem:[#allocation3 + $0x54] sm:$0xf] %v5729_v56  ;;  %v5491_v7 = vrot.slane %v5489_v62, 7  ;;  %v5474_v63 = vrot.slane %v5472_v57, 7  ;;  %v14713_v1 = vpop.f32.mrb[182].mxu1  ;;  %v11583_v53 = vpack.c.bf16 %v5197_v2, %v5197_v2  ;;  %v6015_v48 = vshrl.u32 %v5945_v6, 16  ;;  %10046 = vmatpush1.bf16.msra.mxu0 %v12487_v38 }
 0x3e6   : > { %v12492_v24 = vld [vmem:[%s15858_s5 + $0x250] ss:$8 sps:$4 sm:$0xff]   ;;  %v11581_v32 = vpack.c.bf16 %v5195_v59, %v5195_v59  ;;  %v6018_v8 = vshll.u32 %v5945_v6, 16  ;;  %v14718_v34 = vpop.f32.mrb[183].mxu1  ;;  %v12499_v50 = vld [vmem:[%s15858_s5 + $0x264] ss:$8 sps:$4 sm:$0xff]   ;;  %10047 = vmatprep.subr.bf16.mxu0 %v12494_v22 }
 0x3e7   : > { %v5494_v10 = vor.u32 %v5492_v42, %v5491_v7  ;;  %v5496_v14 = vrot.slane %v5491_v7, 4  ;;  %v5477_v0 = vor.u32 %v5475_v44, %v5474_v63  ;;  %v5479_v46 = vrot.slane %v5474_v63, 4  ;;  %v5946_v60 = vld [vmem:[#allocation3 + $0x10] sm:$0xf]  ;;  %v5749_v9 = vld [vmem:[#allocation3 + $0x78] sm:$0xf] }
 0x3e8   : > { %v5515_v31 = vshrl.u32 %v11583_v53, 16  ;;  %v5518_v43 = vshll.u32 %v11583_v53, 16  ;;  %v5498_v45 = vshrl.u32 %v11581_v32, 16  ;;  %v5501_v16 = vshll.u32 %v11581_v32, 16  ;;  %v5742_v18 = vld [vmem:[#allocation3 + $0x6c] sm:$0xf] }
 0x3e9   : > { %v5495_v58 = vsel %vm12962_vm12, %v5487_v15, %v5494_v10  ;;  %v5740_v3 = vsel %vm12716_vm2, %v5496_v14, %v5739_v51  ;;  %v5478_v33 = vsel %vm12962_vm12, %v5470_v17, %v5477_v0  ;;  %v5733_v41 = vsel %vm12716_vm2, %v5479_v46, %v5732_v26  ;;  %v12497_v5 = vld [vmem:[%s15858_s5 + $0x260] ss:$8 sps:$4 sm:$0xff]   ;;  %v5947_v17 = vld [vmem:[#allocation3 + $0x14] sm:$0x1]  ;;  %v12504_v38 = vld [vmem:[%s15858_s5 + $0x274] ss:$8 sps:$4 sm:$0xff]   ;;  %10048 = vmatpush1.bf16.msra.mxu0 %v12492_v24 }
 0x3ea   : > { %5738 = vst [vmem:[#allocation3 + $0x64] sm:$0xf] %v5495_v58  ;;  %5741 = vst [vmem:[#allocation3 + $0x68] sm:$0x1] %v5740_v3  ;;  %v14734_v35 = vrot.slane %v5515_v31, 7  ;;  %v14736_v15 = vrot.slane %v5498_v45, 7  ;;  %10049 = vmatprep.subr.bf16.mxu0 %v12499_v50 }
 0x3eb   : > { %5731 = vst [vmem:[#allocation3 + $0x58] sm:$0xf] %v5478_v33  ;;  %5734 = vst [vmem:[#allocation3 + $0x5c] sm:$0x1] %v5733_v41  ;;  %v5198_v12 = vmax.f32 %v5128_v47, 0.0  ;;  %v5196_v6 = vmax.f32 %v5120_v20, 0.0 }
 0x3ec   : > { %v6017_v62 = vrot.slane %v6015_v48, 4  ;;  %v6020_v42 = vrot.slane %v6018_v8, 5  ;;  %v6024_v57 = vshll.u32 %v5946_v60, 16  ;;  %v6028_v44 = vshrl.u32 %v5946_v60, 16  ;;  %v6457_v29 = vld [vmem:[#allocation3 + $0xc] sm:$0xe] }
 0x3ed   : > { %v14741_v56 = vpop.f32.mrb[184].mxu1  ;;  %v5520_v51 = vor.u32 %v5518_v43, %v14734_v35  ;;  %v5521_v26 = vrot.slane %v14734_v35, 4  ;;  %v5503_v2 = vor.u32 %v5501_v16, %v14736_v15  ;;  %v5504_v59 = vrot.slane %v14736_v15, 4  ;;  %v6458_v22 = vld [vmem:[#allocation3 + $0x10] sm:$0xf]  ;;  %10050 = vmatpush1.bf16.msra.mxu0 %v12497_v5 }
 0x3ee   : > { %v14747_v7 = vpop.f32.mrb[185].mxu1  ;;  %v11584_v63 = vpack.c.bf16 %v5198_v12, %v5198_v12  ;;  %v11582_v47 = vpack.c.bf16 %v5196_v6, %v5196_v6  ;;  %v6021_v20 = vor.u32 %v6020_v42, %v6017_v62  ;;  %v6026_v53 = vrot.slane %v6024_v57, 5  ;;  %v6459_v32 = vld [vmem:[#allocation3 + $0x14] sm:$0x1]  ;;  %v5948_v48 = vld [vmem:[#allocation3 + $0x18] sm:$0xf]  ;;  %10051 = vmatprep.subr.bf16.mxu0 %v12504_v38 }
 0x3ef   : > { %v14749_v8 = vpop.f32.mrb[186].mxu1  ;;  %v12502_v24 = vld [vmem:[%s15858_s5 + $0x270] ss:$8 sps:$4 sm:$0xff]   ;;  %v5750_v10 = vsel %vm14586_vm5, %v5520_v51, %v5749_v9  ;;  %v5743_v14 = vsel %vm14586_vm5, %v5503_v2, %v5742_v18  ;;  %v6030_v0 = vrot.slane %v6028_v44, 4  ;;  %v6034_v46 = vshll.u32 %v5947_v17, 16 }
 0x3f0   : > { %v14758_v50 = vpop.f32.mrb[187].mxu1  ;;  %v12509_v31 = vld [vmem:[%s15858_s5 + $0x284] ss:$8 sps:$4 sm:$0xff]   ;;  %5751 = vst [vmem:[#allocation3 + $0x78] sm:$0xf] %v5750_v10  ;;  %v5523_v43 = vshrl.u32 %v11584_v63, 16 }
 0x3f1   : > { %5744 = vst [vmem:[#allocation3 + $0x6c] sm:$0xf] %v5743_v14  ;;  %v5526_v45 = vshll.u32 %v11584_v63, 16  ;;  %v5506_v16 = vshrl.u32 %v11582_v47, 16  ;;  %v5509_v60 = vshll.u32 %v11582_v47, 16  ;;  %v6022_v33 = vrot.slane %v6021_v20, 4  ;;  %10052 = vmatpush1.bf16.msra.mxu0 %v12502_v24 }
 0x3f2   : > { %v5753_v58 = vld [vmem:[#allocation3 + $0x80] sm:$0x1]  ;;  %v5746_v3 = vld [vmem:[#allocation3 + $0x74] sm:$0x1]  ;;  %v6031_v41 = vor.u32 %v6030_v0, %v6026_v53  ;;  %v6036_v9 = vrot.slane %v6034_v46, 5  ;;  %v11224_v18 = vrot.slane %v6457_v29, 9  ;;  %10053 = vmatprep.subr.bf16.mxu0 %v12509_v31 }
 0x3f3   : > { %v5525_v35 = vrot.slane %v5523_v43, 7  ;;  %v5508_v15 = vrot.slane %v5506_v16, 7  ;;  %v6559_v12 = vrot.slane %v6458_v22, 5  ;;  %v6562_v6 = vrot.slane %v6459_v32, 5  ;;  %v12507_v17 = vld [vmem:[%s15858_s5 + $0x280] ss:$8 sps:$4 sm:$0xff]  }
 0x3f4   : > { %v6027_v62 = vsel %vm12940_vm8, %v6022_v33, %v6026_v53  ;;  %v6032_v42 = vrot.slane %v6031_v41, 4  ;;  %v6039_v5 = vshrl.u32 %v5948_v48, 16  ;;  %v6042_v57 = vshll.u32 %v5948_v48, 16  ;;  %v12514_v44 = vld [vmem:[%s15858_s5 + $0x294] ss:$8 sps:$4 sm:$0xff]   ;;  %v14771_v63 = vpop.f32.mrb[188].mxu1 }
 0x3f5   : > { %v5528_v29 = vor.u32 %v5526_v45, %v5525_v35  ;;  %v5530_v38 = vrot.slane %v5525_v35, 4  ;;  %v5511_v51 = vor.u32 %v5509_v60, %v5508_v15  ;;  %v5513_v2 = vrot.slane %v5508_v15, 4  ;;  %v5949_v22 = vld [vmem:[#allocation3 + $0x1c] sm:$0xf]  ;;  %v5950_v32 = vld [vmem:[#allocation3 + $0x20] sm:$0x1]  ;;  %10054 = vmatpush1.bf16.msra.mxu0 %v12507_v17 }
 0x3f6   : > { %v6037_v47 = vsel %vm12940_vm8, %v6032_v42, %v6036_v9  ;;  %v6560_v20 = vsel %vm13361_vm0, %v11224_v18, %v6559_v12  ;;  %v6561_v53 = vrot.slane %v6559_v12, 4  ;;  %v6041_v48 = vrot.slane %v6039_v5, 4  ;;  %v14777_v10 = vpop.f32.mrb[189].mxu1  ;;  %v14787_v43 = vld [vmem:[#allocation3 + $0x18] sm:$0xe]  ;;  %v12476_v35 = vld [vmem:[#allocation3 + $0x24] sm:$0xff]   ;;  %10055 = vmatprep.subr.bf16.mxu0 %v12514_v44 }
 0x3f7   : > { %v5529_v14 = vsel %vm12962_vm12, %v5521_v26, %v5528_v29  ;;  %v5754_v0 = vsel %vm12716_vm2, %v5530_v38, %v5753_v58  ;;  %v5512_v24 = vsel %vm12962_vm12, %v5504_v59, %v5511_v51  ;;  %v5747_v46 = vsel %vm12716_vm2, %v5513_v2, %v5746_v3  ;;  %v14789_v45 = vpop.f32.mrb[190].mxu1  ;;  %v12512_v31 = vld [vmem:[%s15858_s5 + $0x290] ss:$8 sps:$4 sm:$0xff]   ;;  %v12475_v59 = vld [vmem:[#allocation3 + $0xc] sm:$0xff]   ;;  %v6461_v42 = vld [vmem:[#allocation3 + $0x1c] sm:$0xf] }
 0x3f8   : > { %5752 = vst [vmem:[#allocation3 + $0x7c] sm:$0xf] %v5529_v14  ;;  %5755 = vst [vmem:[#allocation3 + $0x80] sm:$0x1] %v5754_v0  ;;  %v11208_v26 = vcombine.low %v6027_v62, %v6037_v47  ;;  %v6563_v16 = vsel %vm13361_vm0, %v6561_v53, %v6562_v6  ;;  %v6044_v60 = vrot.slane %v6042_v57, 5  ;;  %v6048_v58 = vshll.u32 %v5949_v22, 16 }
 0x3f9   : > { %5745 = vst [vmem:[#allocation3 + $0x70] sm:$0xf] %v5512_v24  ;;  %5748 = vst [vmem:[#allocation3 + $0x74] sm:$0x1] %v5747_v46  ;;  %v14796_v3 = vpop.f32.mrb[191].mxu1  ;;  %v11240_v33 = vcombine.low %v6560_v20, %v6563_v16  ;;  %v6052_v41 = vshrl.u32 %v5949_v22, 16  ;;  %v5141_v18 = vadd.f32 %v14700_v11, %v14539_v52  ;;  %v5133_v62 = vadd.f32 %v14706_v61, %v14531_v36 }
 0x3fa   : > { %v6058_v9 = vshll.u32 %v5950_v32, 16  ;;  %9693 = vmatprep.mubr.bf16.mxu1 %v11208_v26  ;;  %v6045_v15 = vor.u32 %v6044_v60, %v6041_v48  ;;  %v6050_v12 = vrot.slane %v6048_v58, 5  ;;  %v5144_v6 = vadd.f32 %v14713_v1, %v14541_v4  ;;  %v6462_v11 = vld [vmem:[#allocation3 + $0x20] sm:$0x1]  ;;  %10056 = vmatpush1.bf16.msra.mxu0 %v12512_v31  ;;  %v5763_v48 = vld [vmem:[#allocation3 + $0x90] sm:$0xf] }
 0x3fb   : > { %9887 = vmatmul.mubr.bf16.gmra.mrb[4].mxu0 %v11240_v33  ;;  %9694 = vmatmul.mubr.bf16.gmra.mrb[196].mxu1 %v12475_v59  ;;  %v6054_v5 = vrot.slane %v6052_v41, 4  ;;  %v5201_v29 = vmax.f32 %v5141_v18, 0.0  ;;  %v5136_v52 = vadd.f32 %v14718_v34, %v14533_v55  ;;  %v5199_v38 = vmax.f32 %v5133_v62, 0.0  ;;  %v5756_v58 = vld [vmem:[#allocation3 + $0x84] sm:$0xf] }
 0x3fc   : > { %v6060_v57 = vrot.slane %v6058_v9, 5  ;;  %9896 = vmatprep.mubr.bf16.mxu0 %v12476_v35  ;;  %v6046_v17 = vrot.slane %v6045_v15, 4  ;;  %v5202_v51 = vmax.f32 %v5144_v6, 0.0  ;;  %v11225_v36 = vrot.slane %v14787_v43, 9  ;;  %v5767_v41 = vld [vmem:[#allocation3 + $0x98] sm:$0x1] }
 0x3fd   : > { %v6055_v61 = vor.u32 %v6054_v5, %v6050_v12  ;;  %v11587_v2 = vpack.c.bf16 %v5201_v29, %v5201_v29  ;;  %v5200_v4 = vmax.f32 %v5136_v52, 0.0  ;;  %v6566_v1 = vrot.slane %v6461_v42, 5  ;;  %v12480_v6 = vld [vmem:[#allocation3 + $0x18] sm:$0xff]   ;;  %v5951_v52 = vld [vmem:[#allocation3 + $0x24] sm:$0xf] }
 0x3fe   : > { %v6051_v44 = vsel %vm12940_vm8, %v6046_v17, %v6050_v12  ;;  %v11585_v22 = vpack.c.bf16 %v5199_v38, %v5199_v38  ;;  %v11588_v47 = vpack.c.bf16 %v5202_v51, %v5202_v51  ;;  %v6569_v20 = vrot.slane %v6462_v11, 5  ;;  %v5760_v12 = vld [vmem:[#allocation3 + $0x8c] sm:$0x1]  ;;  %v5952_v11 = vld [vmem:[#allocation3 + $0x28] sm:$0xf] }
 0x3ff   : > { %v6056_v53 = vrot.slane %v6055_v61, 4  ;;  %v5549_v55 = vshrl.u32 %v11587_v2, 16  ;;  %v5552_v34 = vshll.u32 %v11587_v2, 16  ;;  %v11586_v32 = vpack.c.bf16 %v5200_v4, %v5200_v4  ;;  %v5953_v61 = vld [vmem:[#allocation3 + $0x2c] sm:$0x1] }
 0x400   : > { %v5532_v14 = vshrl.u32 %v11585_v22, 16  ;;  %v5535_v0 = vshll.u32 %v11585_v22, 16  ;;  %v5557_v24 = vshrl.u32 %v11588_v47, 16  ;;  %v5560_v46 = vshll.u32 %v11588_v47, 16 }
 0x401   : > { %v6061_v43 = vsel %vm12940_vm8, %v6056_v53, %v6060_v57  ;;  %v5551_v26 = vrot.slane %v5549_v55, 7  ;;  %v5540_v31 = vshrl.u32 %v11586_v32, 16  ;;  %v5543_v16 = vshll.u32 %v11586_v32, 16 }
 0x402   : > { %v11209_v59 = vcombine.low %v6051_v44, %v6061_v43  ;;  %v5534_v60 = vrot.slane %v5532_v14, 7  ;;  %v5559_v33 = vrot.slane %v5557_v24, 7  ;;  %v6567_v9 = vsel %vm13361_vm0, %v11225_v36, %v6566_v1 }
 0x403   : > { %v5554_v18 = vor.u32 %v5552_v34, %v5551_v26  ;;  %v5555_v35 = vrot.slane %v5551_v26, 4  ;;  %v5542_v15 = vrot.slane %v5540_v31, 7  ;;  %v6568_v62 = vrot.slane %v6566_v1, 4  ;;  %v6463_v26 = vld [vmem:[#allocation3 + $0x24] sm:$0xe] }
 0x404   : > { %9703 = vmatprep.mubr.bf16.mxu1 %v11209_v59  ;;  %v5537_v42 = vor.u32 %v5535_v0, %v5534_v60  ;;  %v5538_v5 = vrot.slane %v5534_v60, 4  ;;  %v5562_v57 = vor.u32 %v5560_v46, %v5559_v33  ;;  %v5564_v29 = vrot.slane %v5559_v33, 4  ;;  %v6464_v31 = vld [vmem:[#allocation3 + $0x28] sm:$0xf] }
 0x405   : > { %v5764_v17 = vsel %vm14586_vm5, %v5554_v18, %v5763_v48  ;;  %v5545_v38 = vor.u32 %v5543_v16, %v5542_v15  ;;  %v5547_v51 = vrot.slane %v5542_v15, 4  ;;  %v6570_v36 = vsel %vm13361_vm0, %v6568_v62, %v6569_v20  ;;  %9704 = vmatmul.mubr.bf16.gmra.mrb[200].mxu1 %v12480_v6  ;;  %v12481_v20 = vld [vmem:[#allocation3 + $0x30] sm:$0xff]  }
 0x406   : > { %5765 = vst [vmem:[#allocation3 + $0x90] sm:$0xf] %v5764_v17  ;;  %v5757_v2 = vsel %vm14586_vm5, %v5537_v42, %v5756_v58  ;;  %v5563_v4 = vsel %vm12962_vm12, %v5555_v35, %v5562_v57  ;;  %v5768_v1 = vsel %vm12716_vm2, %v5564_v29, %v5767_v41  ;;  %v11241_v44 = vcombine.low %v6567_v9, %v6570_v36  ;;  %v5777_v57 = vld [vmem:[#allocation3 + $0xa8] sm:$0xf]  ;;  %v5770_v17 = vld [vmem:[#allocation3 + $0x9c] sm:$0xf] }
 0x407   : > { %5758 = vst [vmem:[#allocation3 + $0x84] sm:$0xf] %v5757_v2  ;;  %5766 = vst [vmem:[#allocation3 + $0x94] sm:$0xf] %v5563_v4  ;;  %v5546_v22 = vsel %vm12962_vm12, %v5538_v5, %v5545_v38  ;;  %v5761_v47 = vsel %vm12716_vm2, %v5547_v51, %v5760_v12  ;;  %v6063_v53 = vshrl.u32 %v5951_v52, 16  ;;  %v6066_v55 = vshll.u32 %v5951_v52, 16 }
 0x408   : > { %5769 = vst [vmem:[#allocation3 + $0x98] sm:$0x1] %v5768_v1  ;;  %5759 = vst [vmem:[#allocation3 + $0x88] sm:$0xf] %v5546_v22  ;;  %9897 = vmatmul.mubr.bf16.gmra.mrb[8].mxu0 %v11241_v44  ;;  %v6072_v34 = vshll.u32 %v5952_v11, 16  ;;  %v6076_v32 = vshrl.u32 %v5952_v11, 16  ;;  %v5157_v14 = vadd.f32 %v14741_v56, %v14555_v28  ;;  %v5149_v46 = vadd.f32 %v14747_v7, %v14547_v37 }
 0x409   : > { %5762 = vst [vmem:[#allocation3 + $0x8c] sm:$0x1] %v5761_v47  ;;  %v6082_v48 = vshll.u32 %v5953_v61, 16  ;;  %9906 = vmatprep.mubr.bf16.mxu0 %v12481_v20  ;;  %v6065_v0 = vrot.slane %v6063_v53, 4  ;;  %v6068_v24 = vrot.slane %v6066_v55, 5  ;;  %v5160_v43 = vadd.f32 %v14749_v8, %v14557_v25 }
 0x40a   : > { %v6074_v16 = vrot.slane %v6072_v34, 5  ;;  %v6078_v59 = vrot.slane %v6076_v32, 4  ;;  %v5205_v58 = vmax.f32 %v5157_v14, 0.0  ;;  %v5203_v41 = vmax.f32 %v5149_v46, 0.0  ;;  %v5781_v51 = vld [vmem:[#allocation3 + $0xb0] sm:$0x1] }
 0x40b   : > { %v6084_v60 = vrot.slane %v6082_v48, 5  ;;  %v6069_v33 = vor.u32 %v6068_v24, %v6065_v0  ;;  %v5206_v9 = vmax.f32 %v5160_v43, 0.0  ;;  %v5152_v28 = vadd.f32 %v14758_v50, %v14549_v54  ;;  %v6465_v61 = vld [vmem:[#allocation3 + $0x2c] sm:$0x1]  ;;  %v5954_v2 = vld [vmem:[#allocation3 + $0x30] sm:$0xf] }
 0x40c   : > { %v6079_v56 = vor.u32 %v6078_v59, %v6074_v16  ;;  %v11591_v18 = vpack.c.bf16 %v5205_v58, %v5205_v58  ;;  %v11226_v35 = vrot.slane %v6463_v26, 9  ;;  %v6573_v15 = vrot.slane %v6464_v31, 5  ;;  %v12485_v34 = vld [vmem:[#allocation3 + $0x24] sm:$0xff]   ;;  %v5955_v26 = vld [vmem:[#allocation3 + $0x34] sm:$0xf] }
 0x40d   : > { %v6070_v37 = vrot.slane %v6069_v33, 4  ;;  %v11589_v7 = vpack.c.bf16 %v5203_v41, %v5203_v41  ;;  %v11592_v12 = vpack.c.bf16 %v5206_v9, %v5206_v9  ;;  %v5204_v25 = vmax.f32 %v5152_v28, 0.0  ;;  %v5774_v58 = vld [vmem:[#allocation3 + $0xa4] sm:$0x1]  ;;  %v5956_v33 = vld [vmem:[#allocation3 + $0x38] sm:$0x1] }
 0x40e   : > { %v6080_v8 = vrot.slane %v6079_v56, 4  ;;  %v5583_v62 = vshrl.u32 %v11591_v18, 16  ;;  %v5586_v6 = vshll.u32 %v11591_v18, 16  ;;  %v14837_v42 = vsel %vm13361_vm0, %v11226_v35, %v6573_v15  ;;  %v6466_v35 = vld [vmem:[#allocation3 + $0x30] sm:$0xe] }
 0x40f   : > { %v6075_v5 = vsel %vm12940_vm8, %v6070_v37, %v6074_v16  ;;  %v5566_v54 = vshrl.u32 %v11589_v7, 16  ;;  %v5569_v50 = vshll.u32 %v11589_v7, 16  ;;  %v5591_v29 = vshrl.u32 %v11592_v12, 16 }
 0x410   : > { %v6085_v52 = vsel %vm12940_vm8, %v6080_v8, %v6084_v60  ;;  %v5585_v11 = vrot.slane %v5583_v62, 7  ;;  %v5594_v38 = vshll.u32 %v11592_v12, 16  ;;  %v11590_v36 = vpack.c.bf16 %v5204_v25, %v5204_v25  ;;  %v6467_v25 = vld [vmem:[#allocation3 + $0x34] sm:$0xf] }
 0x411   : > { %v11210_v4 = vcombine.low %v6075_v5, %v6085_v52  ;;  %v5568_v1 = vrot.slane %v5566_v54, 7  ;;  %v5593_v44 = vrot.slane %v5591_v29, 7  ;;  %v6575_v22 = vrot.slane %v6573_v15, 4  ;;  %v14860_v54 = vld [vmem:[#allocation3 + $0x38] sm:$0x1] }
 0x412   : > { %v5588_v47 = vor.u32 %v5586_v6, %v5585_v11  ;;  %v5589_v20 = vrot.slane %v5585_v11, 4  ;;  %v5574_v53 = vshrl.u32 %v11590_v36, 16  ;;  %v5577_v55 = vshll.u32 %v11590_v36, 16  ;;  %v12486_v6 = vld [vmem:[#allocation3 + $0x3c] sm:$0xff]  }
 0x413   : > { %9713 = vmatprep.mubr.bf16.mxu1 %v11210_v4  ;;  %v5571_v32 = vor.u32 %v5569_v50, %v5568_v1  ;;  %v5572_v48 = vrot.slane %v5568_v1, 4  ;;  %v5596_v14 = vor.u32 %v5594_v38, %v5593_v44  ;;  %v5598_v0 = vrot.slane %v5593_v44, 4  ;;  %v12519_v50 = vld [vmem:[%s15858_s5 + $0x2a4] ss:$8 sps:$4 sm:$0xff]  }
 0x414   : > { %v5778_v24 = vsel %vm14586_vm5, %v5588_v47, %v5777_v57  ;;  %v5576_v46 = vrot.slane %v5574_v53, 7  ;;  %v6576_v43 = vrot.slane %v6465_v61, 5  ;;  %9714 = vmatmul.mubr.bf16.gmra.mrb[204].mxu1 %v12485_v34  ;;  %v6087_v31 = vshrl.u32 %v5954_v2, 16  ;;  %10057 = vmatprep.subr.bf16.mxu0 %v12519_v50  ;;  %v12491_v50 = vld [vmem:[#allocation3 + $0x48] sm:$0xff]  }
 0x415   : > { %5779 = vst [vmem:[#allocation3 + $0xa8] sm:$0xf] %v5778_v24  ;;  %v5771_v16 = vsel %vm14586_vm5, %v5571_v32, %v5770_v17  ;;  %v5597_v59 = vsel %vm12962_vm12, %v5589_v20, %v5596_v14  ;;  %v5782_v60 = vsel %vm12716_vm2, %v5598_v0, %v5781_v51  ;;  %v6090_v41 = vshll.u32 %v5954_v2, 16  ;;  %v5791_v32 = vld [vmem:[#allocation3 + $0xc0] sm:$0xf] }
 0x416   : > { %5772 = vst [vmem:[#allocation3 + $0x9c] sm:$0xf] %v5771_v16  ;;  %5780 = vst [vmem:[#allocation3 + $0xac] sm:$0xf] %v5597_v59  ;;  %v5579_v9 = vor.u32 %v5577_v55, %v5576_v46  ;;  %v5581_v28 = vrot.slane %v5576_v46, 4  ;;  %v6577_v56 = vsel %vm13361_vm0, %v6575_v22, %v6576_v43  ;;  %v6089_v18 = vrot.slane %v6087_v31, 4 }
 0x417   : > { %5783 = vst [vmem:[#allocation3 + $0xb0] sm:$0x1] %v5782_v60  ;;  %v11242_v15 = vcombine.low %v14837_v42, %v6577_v56  ;;  %v6092_v37 = vrot.slane %v6090_v41, 5  ;;  %v6096_v7 = vshll.u32 %v5955_v26, 16  ;;  %v6100_v12 = vshrl.u32 %v5955_v26, 16  ;;  %v12490_v60 = vld [vmem:[#allocation3 + $0x30] sm:$0xff]  }
 0x418   : > { %v5580_v8 = vsel %vm12962_vm12, %v5572_v48, %v5579_v9  ;;  %v5775_v62 = vsel %vm12716_vm2, %v5581_v28, %v5774_v58  ;;  %v6106_v5 = vshll.u32 %v5956_v33, 16  ;;  %v5173_v57 = vadd.f32 %v14771_v63, %v14571_v13  ;;  %v12517_v42 = vld [vmem:[%s15858_s5 + $0x2a0] ss:$8 sps:$4 sm:$0xff]   ;;  %v14877_v55 = vld [vmem:[#allocation3 + $0x3c] sm:$0xf] }
 0x419   : > { %5773 = vst [vmem:[#allocation3 + $0xa0] sm:$0xf] %v5580_v8  ;;  %5776 = vst [vmem:[#allocation3 + $0xa4] sm:$0x1] %v5775_v62  ;;  %9907 = vmatmul.mubr.bf16.gmra.mrb[12].mxu0 %v11242_v15  ;;  %v6093_v29 = vor.u32 %v6092_v37, %v6089_v18  ;;  %v6098_v52 = vrot.slane %v6096_v7, 5  ;;  %v6102_v11 = vrot.slane %v6100_v12, 4  ;;  %v5165_v17 = vadd.f32 %v14777_v10, %v14563_v40 }
 0x41a   : > { %9916 = vmatprep.mubr.bf16.mxu0 %v12486_v6  ;;  %v6108_v13 = vrot.slane %v6106_v5, 5  ;;  %v5209_v63 = vmax.f32 %v5173_v57, 0.0  ;;  %v5176_v38 = vadd.f32 %v14789_v45, %v14573_v21  ;;  %v5168_v51 = vadd.f32 %v14796_v3, %v14565_v39  ;;  %10058 = vmatpush1.bf16.msra.mxu0 %v12517_v42  ;;  %v12522_v24 = vld [vmem:[%s15858_s5 + $0x2b0] ss:$8 sps:$4 sm:$0xff]   ;;  %v12524_v46 = vld [vmem:[%s15858_s5 + $0x2b4] ss:$8 sps:$4 sm:$0xff]  }
 0x41b   : > { %v6094_v36 = vrot.slane %v6093_v29, 4  ;;  %v6103_v61 = vor.u32 %v6102_v11, %v6098_v52  ;;  %v5207_v2 = vmax.f32 %v5165_v17, 0.0  ;;  %v11227_v4 = vrot.slane %v6466_v35, 9  ;;  %v5784_v31 = vld [vmem:[#allocation3 + $0xb4] sm:$0xf]  ;;  %10059 = vmatprep.subr.bf16.mxu0 %v12524_v46 }
 0x41c   : > { %v11595_v1 = vpack.c.bf16 %v5209_v63, %v5209_v63  ;;  %v5210_v44 = vmax.f32 %v5176_v38, 0.0  ;;  %v5208_v22 = vmax.f32 %v5168_v51, 0.0  ;;  %v6580_v47 = vrot.slane %v6467_v25, 5  ;;  %v5795_v33 = vld [vmem:[#allocation3 + $0xc8] sm:$0x1] }
 0x41d   : > { %v6099_v40 = vsel %vm12940_vm8, %v6094_v36, %v6098_v52  ;;  %v6104_v10 = vrot.slane %v6103_v61, 4  ;;  %v11593_v20 = vpack.c.bf16 %v5207_v2, %v5207_v2  ;;  %v6583_v21 = vrot.slane %v14860_v54, 5  ;;  %v5958_v56 = vld [vmem:[#allocation3 + $0x40] sm:$0xf]  ;;  %v5788_v37 = vld [vmem:[#allocation3 + $0xbc] sm:$0x1] }
 0x41e   : > { %v5617_v45 = vshrl.u32 %v11595_v1, 16  ;;  %v5620_v53 = vshll.u32 %v11595_v1, 16  ;;  %v11596_v39 = vpack.c.bf16 %v5210_v44, %v5210_v44  ;;  %v11594_v3 = vpack.c.bf16 %v5208_v22, %v5208_v22  ;;  %10060 = vmatpush1.bf16.msra.mxu0 %v12522_v24  ;;  %v5959_v6 = vld [vmem:[#allocation3 + $0x44] sm:$0x1]  ;;  %v6469_v29 = vld [vmem:[#allocation3 + $0x3c] sm:$0xe] }
 0x41f   : > { %v6109_v34 = vsel %vm12940_vm8, %v6104_v10, %v6108_v13  ;;  %v5600_v48 = vshrl.u32 %v11593_v20, 16  ;;  %v5603_v14 = vshll.u32 %v11593_v20, 16  ;;  %v6581_v0 = vsel %vm13361_vm0, %v11227_v4, %v6580_v47  ;;  %v6470_v52 = vld [vmem:[#allocation3 + $0x40] sm:$0xf]  ;;  %v6471_v38 = vld [vmem:[#allocation3 + $0x44] sm:$0x1] }
 0x420   : > { %v11211_v43 = vcombine.low %v6099_v40, %v6109_v34  ;;  %v5619_v26 = vrot.slane %v5617_v45, 7  ;;  %v5625_v16 = vshrl.u32 %v11596_v39, 16  ;;  %v5628_v59 = vshll.u32 %v11596_v39, 16  ;;  %v5960_v51 = vld [vmem:[#allocation3 + $0x48] sm:$0xf] }
 0x421   : > { %v5602_v58 = vrot.slane %v5600_v48, 7  ;;  %v5608_v41 = vshrl.u32 %v11594_v3, 16  ;;  %v5611_v9 = vshll.u32 %v11594_v3, 16  ;;  %v6582_v28 = vrot.slane %v6580_v47, 4  ;;  %v5961_v1 = vld [vmem:[#allocation3 + $0x4c] sm:$0xf] }
 0x422   : > { %9723 = vmatprep.mubr.bf16.mxu1 %v11211_v43  ;;  %v5622_v18 = vor.u32 %v5620_v53, %v5619_v26  ;;  %v5623_v35 = vrot.slane %v5619_v26, 4  ;;  %v5627_v15 = vrot.slane %v5625_v16, 7  ;;  %v6111_v7 = vshrl.u32 %v14877_v55, 16  ;;  %v5962_v10 = vld [vmem:[#allocation3 + $0x50] sm:$0x1] }
 0x423   : > { %v5605_v12 = vor.u32 %v5603_v14, %v5602_v58  ;;  %v5606_v25 = vrot.slane %v5602_v58, 4  ;;  %v5610_v8 = vrot.slane %v5608_v41, 7  ;;  %v6584_v62 = vsel %vm13361_vm0, %v6582_v28, %v6583_v21  ;;  %9724 = vmatmul.mubr.bf16.gmra.mrb[208].mxu1 %v12490_v60  ;;  %v12529_v20 = vld [vmem:[%s15858_s5 + $0x2c4] ss:$8 sps:$4 sm:$0xff]  }
 0x424   : > { %v5792_v5 = vsel %vm14586_vm5, %v5622_v18, %v5791_v32  ;;  %v5630_v57 = vor.u32 %v5628_v59, %v5627_v15  ;;  %v5632_v54 = vrot.slane %v5627_v15, 4  ;;  %v11243_v42 = vcombine.low %v6581_v0, %v6584_v62  ;;  %10061 = vmatprep.subr.bf16.mxu0 %v12529_v20  ;;  %v6472_v0 = vld [vmem:[#allocation3 + $0x48] sm:$0xe]  ;;  %v5963_v18 = vld [vmem:[#allocation3 + $0x54] sm:$0xf] }
 0x425   : > { %5793 = vst [vmem:[#allocation3 + $0xc0] sm:$0xf] %v5792_v5  ;;  %v5785_v11 = vsel %vm14586_vm5, %v5605_v12, %v5784_v31  ;;  %v5613_v17 = vor.u32 %v5611_v9, %v5610_v8  ;;  %v5615_v13 = vrot.slane %v5610_v8, 4  ;;  %v6113_v63 = vrot.slane %v6111_v7, 4  ;;  %10062 = vmatpush1.bf16.msra.mxu0 %v12527_v19  ;;  %v6473_v31 = vld [vmem:[#allocation3 + $0x4c] sm:$0xf] }
 0x426   : > { %5786 = vst [vmem:[#allocation3 + $0xb4] sm:$0xf] %v5785_v11  ;;  %v5631_v36 = vsel %vm12962_vm12, %v5623_v35, %v5630_v57  ;;  %v5796_v61 = vsel %vm12716_vm2, %v5632_v54, %v5795_v33  ;;  %9917 = vmatmul.mubr.bf16.gmra.mrb[16].mxu0 %v11243_v42  ;;  %v6114_v2 = vshll.u32 %v14877_v55, 16  ;;  %v6120_v4 = vshll.u32 %v5958_v56, 16  ;;  %v6474_v33 = vld [vmem:[#allocation3 + $0x50] sm:$0x1] }
 0x427   : > { %5794 = vst [vmem:[#allocation3 + $0xc4] sm:$0xf] %v5631_v36  ;;  %5797 = vst [vmem:[#allocation3 + $0xc8] sm:$0x1] %v5796_v61  ;;  %v5614_v44 = vsel %vm12962_vm12, %v5606_v25, %v5613_v17  ;;  %v5789_v22 = vsel %vm12716_vm2, %v5615_v13, %v5788_v37  ;;  %9926 = vmatprep.mubr.bf16.mxu0 %v12491_v50  ;;  %v6124_v47 = vshrl.u32 %v5958_v56, 16  ;;  %v6130_v40 = vshll.u32 %v5959_v6, 16 }
 0x428   : > { %5787 = vst [vmem:[#allocation3 + $0xb8] sm:$0xf] %v5614_v44  ;;  %5790 = vst [vmem:[#allocation3 + $0xbc] sm:$0x1] %v5789_v22  ;;  %v6116_v21 = vrot.slane %v6114_v2, 5  ;;  %v6122_v45 = vrot.slane %v6120_v4, 5 }
 0x429   : > { %v11228_v53 = vrot.slane %v6469_v29, 9  ;;  %v6587_v39 = vrot.slane %v6470_v52, 5  ;;  %v6126_v3 = vrot.slane %v6124_v47, 4  ;;  %v6132_v23 = vrot.slane %v6130_v40, 5  ;;  %v12496_v15 = vld [vmem:[#allocation3 + $0x54] sm:$0xff]   ;;  %v12495_v50 = vld [vmem:[#allocation3 + $0x3c] sm:$0xff]  }
 0x42a   : > { %v6590_v55 = vrot.slane %v6471_v38, 5  ;;  %v6135_v34 = vshrl.u32 %v5960_v51, 16  ;;  %v6117_v27 = vor.u32 %v6116_v21, %v6113_v63  ;;  %v6138_v14 = vshll.u32 %v5960_v51, 16  ;;  %v5964_v12 = vld [vmem:[#allocation3 + $0x58] sm:$0xf] }
 0x42b   : > { %v6588_v32 = vsel %vm13361_vm0, %v11228_v53, %v6587_v39  ;;  %v6589_v48 = vrot.slane %v6587_v39, 4  ;;  %v6127_v24 = vor.u32 %v6126_v3, %v6122_v45  ;;  %v6144_v43 = vshll.u32 %v5961_v1, 16  ;;  %v5965_v25 = vld [vmem:[#allocation3 + $0x5c] sm:$0x1]  ;;  %v12532_v57 = vld [vmem:[%s15858_s5 + $0x2d0] ss:$8 sps:$4 sm:$0xff]  }
 0x42c   : > { %v6137_v46 = vrot.slane %v6135_v34, 4  ;;  %v6148_v26 = vshrl.u32 %v5961_v1, 16  ;;  %v6118_v16 = vrot.slane %v6117_v27, 4  ;;  %v6140_v60 = vrot.slane %v6138_v14, 5  ;;  %v12534_v54 = vld [vmem:[%s15858_s5 + $0x2d4] ss:$8 sps:$4 sm:$0xff]  }
 0x42d   : > { %v6591_v59 = vsel %vm13361_vm0, %v6589_v48, %v6590_v55  ;;  %v6154_v58 = vshll.u32 %v5962_v10, 16  ;;  %v6128_v41 = vrot.slane %v6127_v24, 4  ;;  %v6146_v28 = vrot.slane %v6144_v43, 5  ;;  %v6476_v17 = vld [vmem:[#allocation3 + $0x58] sm:$0xf]  ;;  %10063 = vmatprep.subr.bf16.mxu0 %v12534_v54  ;;  %v12501_v27 = vld [vmem:[#allocation3 + $0x60] sm:$0xff]  }
 0x42e   : > { %v11244_v9 = vcombine.low %v6588_v32, %v6591_v59  ;;  %v6150_v56 = vrot.slane %v6148_v26, 4  ;;  %v6123_v35 = vsel %vm12940_vm8, %v6118_v16, %v6122_v45  ;;  %v6141_v37 = vor.u32 %v6140_v60, %v6137_v46  ;;  %10064 = vmatpush1.bf16.msra.mxu0 %v12532_v57  ;;  %v5966_v47 = vld [vmem:[#allocation3 + $0x60] sm:$0xf]  ;;  %v6477_v45 = vld [vmem:[#allocation3 + $0x5c] sm:$0x1] }
 0x42f   : > { %v6156_v7 = vrot.slane %v6154_v58, 5  ;;  %v6133_v8 = vsel %vm12940_vm8, %v6128_v41, %v6132_v23  ;;  %v11229_v6 = vrot.slane %v6472_v0, 9  ;;  %v6594_v5 = vrot.slane %v6473_v31, 5  ;;  %v5967_v53 = vld [vmem:[#allocation3 + $0x64] sm:$0xf] }
 0x430   : > { %9927 = vmatmul.mubr.bf16.gmra.mrb[20].mxu0 %v11244_v9  ;;  %v6151_v62 = vor.u32 %v6150_v56, %v6146_v28  ;;  %v11212_v42 = vcombine.low %v6123_v35, %v6133_v8  ;;  %v6142_v29 = vrot.slane %v6141_v37, 4  ;;  %v6159_v52 = vshrl.u32 %v5963_v18, 16  ;;  %v6475_v23 = vld [vmem:[#allocation3 + $0x54] sm:$0xe]  ;;  %v5968_v34 = vld [vmem:[#allocation3 + $0x68] sm:$0x1] }
 0x431   : > { %9936 = vmatprep.mubr.bf16.mxu0 %v12496_v15  ;;  %v6162_v11 = vshll.u32 %v5963_v18, 16  ;;  %v6596_v63 = vrot.slane %v6594_v5, 4  ;;  %v6597_v38 = vrot.slane %v6474_v33, 5  ;;  %v6168_v51 = vshll.u32 %v5964_v12, 16  ;;  %v14933_v24 = vld [vmem:[#allocation3 + $0x64] sm:$0xf] }
 0x432   : > { %v6152_v13 = vrot.slane %v6151_v62, 4  ;;  %9733 = vmatprep.mubr.bf16.mxu1 %v11212_v42  ;;  %v6147_v36 = vsel %vm12940_vm8, %v6142_v29, %v6146_v28  ;;  %v6161_v61 = vrot.slane %v6159_v52, 4  ;;  %v6172_v4 = vshrl.u32 %v5964_v12, 16  ;;  %v5969_v16 = vld [vmem:[#allocation3 + $0x6c] sm:$0xf] }
 0x433   : > { %v6164_v2 = vrot.slane %v6162_v11, 5  ;;  %9734 = vmatmul.mubr.bf16.gmra.mrb[212].mxu1 %v12495_v50  ;;  %v6598_v19 = vsel %vm13361_vm0, %v6596_v63, %v6597_v38  ;;  %v6170_v44 = vrot.slane %v6168_v51, 5  ;;  %v6178_v22 = vshll.u32 %v5965_v25, 16  ;;  %v12537_v41 = vld [vmem:[%s15858_s5 + $0x2e0] ss:$8 sps:$4 sm:$0xff]  }
 0x434   : > { %v6157_v1 = vsel %vm12940_vm8, %v6152_v13, %v6156_v7  ;;  %v6595_v10 = vsel %vm13361_vm0, %v11229_v6, %v6594_v5  ;;  %v6174_v21 = vrot.slane %v6172_v4, 4  ;;  %v6601_v55 = vrot.slane %v6476_v17, 5  ;;  %v12500_v9 = vld [vmem:[#allocation3 + $0x48] sm:$0xff]   ;;  %v5970_v25 = vld [vmem:[#allocation3 + $0x70] sm:$0xf] }
 0x435   : > { %v11213_v40 = vcombine.low %v6147_v36, %v6157_v1  ;;  %v6165_v20 = vor.u32 %v6164_v2, %v6161_v61  ;;  %v11245_v39 = vcombine.low %v6595_v10, %v6598_v19  ;;  %v6180_v3 = vrot.slane %v6178_v22, 5  ;;  %v12539_v15 = vld [vmem:[%s15858_s5 + $0x2e4] ss:$8 sps:$4 sm:$0xff]   ;;  %v6480_v42 = vld [vmem:[#allocation3 + $0x68] sm:$0x1] }
 0x436   : > { %v6175_v48 = vor.u32 %v6174_v21, %v6170_v44  ;;  %v6183_v14 = vshrl.u32 %v5966_v47, 16  ;;  %v6186_v0 = vshll.u32 %v5966_v47, 16  ;;  %v6603_v46 = vrot.slane %v6601_v55, 4  ;;  %10065 = vmatprep.subr.bf16.mxu0 %v12539_v15  ;;  %v6478_v17 = vld [vmem:[#allocation3 + $0x60] sm:$0xe]  ;;  %v12506_v38 = vld [vmem:[#allocation3 + $0x6c] sm:$0xff]  }
 0x437   : > { %9743 = vmatprep.mubr.bf16.mxu1 %v11213_v40  ;;  %v6166_v32 = vrot.slane %v6165_v20, 4  ;;  %v6604_v43 = vrot.slane %v6477_v45, 5  ;;  %v6192_v26 = vshll.u32 %v5967_v53, 16  ;;  %v6196_v31 = vshrl.u32 %v5967_v53, 16  ;;  %10066 = vmatpush1.bf16.msra.mxu0 %v12537_v41  ;;  %v5971_v51 = vld [vmem:[#allocation3 + $0x74] sm:$0x1] }
 0x438   : > { %9937 = vmatmul.mubr.bf16.gmra.mrb[24].mxu0 %v11245_v39  ;;  %v6176_v59 = vrot.slane %v6175_v48, 4  ;;  %v11230_v60 = vrot.slane %v6475_v23, 9  ;;  %v6185_v58 = vrot.slane %v6183_v14, 4  ;;  %v6188_v33 = vrot.slane %v6186_v0, 5  ;;  %v5972_v22 = vld [vmem:[#allocation3 + $0x78] sm:$0xf] }
 0x439   : > { %9946 = vmatprep.mubr.bf16.mxu0 %v12501_v27  ;;  %v6605_v28 = vsel %vm13361_vm0, %v6603_v46, %v6604_v43  ;;  %v6194_v56 = vrot.slane %v6192_v26, 5  ;;  %v6198_v18 = vrot.slane %v6196_v31, 4  ;;  %v6202_v35 = vshll.u32 %v5968_v34, 16  ;;  %v5973_v20 = vld [vmem:[#allocation3 + $0x7c] sm:$0xf]  ;;  %v12505_v45 = vld [vmem:[#allocation3 + $0x54] sm:$0xff]  }
 0x43a   : > { %v6171_v37 = vsel %vm12940_vm8, %v6166_v32, %v6170_v44  ;;  %v6181_v7 = vsel %vm12940_vm8, %v6176_v59, %v6180_v3  ;;  %v6189_v12 = vor.u32 %v6188_v33, %v6185_v58  ;;  %v6602_v62 = vsel %vm13361_vm0, %v11230_v60, %v6601_v55  ;;  %v14952_v44 = vld [vmem:[#allocation3 + $0x70] sm:$0xf]  ;;  %v12542_v21 = vld [vmem:[%s15858_s5 + $0x2f0] ss:$8 sps:$4 sm:$0xff]   ;;  %v12544_v55 = vld [vmem:[%s15858_s5 + $0x2f4] ss:$8 sps:$4 sm:$0xff]  }
 0x43b   : > { %9744 = vmatmul.mubr.bf16.gmra.mrb[216].mxu1 %v12500_v9  ;;  %v11214_v8 = vcombine.low %v6171_v37, %v6181_v7  ;;  %v6199_v6 = vor.u32 %v6198_v18, %v6194_v56  ;;  %v6608_v5 = vrot.slane %v14933_v24, 5  ;;  %v11246_v57 = vcombine.low %v6602_v62, %v6605_v28  ;;  %v6483_v0 = vld [vmem:[#allocation3 + $0x74] sm:$0x1]  ;;  %10067 = vmatprep.subr.bf16.mxu0 %v12544_v55  ;;  %v5974_v31 = vld [vmem:[#allocation3 + $0x80] sm:$0x1]  ;;  %v12511_v28 = vld [vmem:[#allocation3 + $0x78] sm:$0xff]  }
 0x43c   : > { %v6190_v54 = vrot.slane %v6189_v12, 4  ;;  %v6207_v50 = vshrl.u32 %v5969_v16, 16  ;;  %v6210_v29 = vshll.u32 %v5969_v16, 16  ;;  %v6204_v11 = vrot.slane %v6202_v35, 5  ;;  %10068 = vmatpush1.bf16.msra.mxu0 %v12542_v21  ;;  %v14967_v9 = vld [vmem:[#allocation3 + $0x7c] sm:$0xf] }
 0x43d   : > { %9753 = vmatprep.mubr.bf16.mxu1 %v11214_v8  ;;  %v6200_v52 = vrot.slane %v6199_v6, 4  ;;  %v6610_v13 = vrot.slane %v6608_v5, 4  ;;  %v6216_v63 = vshll.u32 %v5970_v25, 16  ;;  %v6220_v2 = vshrl.u32 %v5970_v25, 16  ;;  %v5975_v18 = vld [vmem:[#allocation3 + $0x84] sm:$0xf] }
 0x43e   : > { %v6209_v36 = vrot.slane %v6207_v50, 4  ;;  %v6212_v61 = vrot.slane %v6210_v29, 5  ;;  %v6611_v1 = vrot.slane %v6480_v42, 5  ;;  %v6195_v47 = vsel %vm12940_vm8, %v6190_v54, %v6194_v56  ;;  %v5976_v35 = vld [vmem:[#allocation3 + $0x88] sm:$0xf]  ;;  %v12510_v12 = vld [vmem:[#allocation3 + $0x60] sm:$0xff]  }
 0x43f   : > { %v6205_v4 = vsel %vm12940_vm8, %v6200_v52, %v6204_v11  ;;  %v6218_v19 = vrot.slane %v6216_v63, 5  ;;  %v6222_v10 = vrot.slane %v6220_v2, 4  ;;  %v11231_v39 = vrot.slane %v6478_v17, 9  ;;  %v6481_v37 = vld [vmem:[#allocation3 + $0x6c] sm:$0xe] }
 0x440   : > { %9947 = vmatmul.mubr.bf16.gmra.mrb[28].mxu0 %v11246_v57  ;;  %v6213_v40 = vor.u32 %v6212_v61, %v6209_v36  ;;  %v11215_v53 = vcombine.low %v6195_v47, %v6205_v4  ;;  %v6612_v3 = vsel %vm13361_vm0, %v6610_v13, %v6611_v1  ;;  %v6226_v23 = vshll.u32 %v5971_v51, 16  ;;  %v12548_v50 = vld [vmem:[%s15858_s5 + $0x304] ss:$8 sps:$4 sm:$0xff]   ;;  %v6486_v63 = vld [vmem:[#allocation3 + $0x80] sm:$0x1] }
 0x441   : > { %9956 = vmatprep.mubr.bf16.mxu0 %v12506_v38  ;;  %v6223_v34 = vor.u32 %v6222_v10, %v6218_v19  ;;  %v6615_v27 = vrot.slane %v14952_v44, 5  ;;  %v6231_v32 = vshrl.u32 %v5972_v22, 16  ;;  %v6234_v48 = vshll.u32 %v5972_v22, 16  ;;  %10230 = vmatprep.subr.bf16.mxu0 %v12548_v50  ;;  %v5979_v4 = vld [vmem:[#allocation3 + $0x94] sm:$0xf]  ;;  %v12520_v50 = vld [vmem:[#allocation3 + $0x78] sm:$0xff]  }
 0x442   : > { %v6609_v14 = vsel %vm13361_vm0, %v11231_v39, %v6608_v5  ;;  %v6240_v24 = vshll.u32 %v5973_v20, 16  ;;  %v6244_v46 = vshrl.u32 %v5973_v20, 16  ;;  %v6214_v43 = vrot.slane %v6213_v40, 4  ;;  %v6484_v44 = vld [vmem:[#allocation3 + $0x78] sm:$0xe]  ;;  %v12516_v40 = vld [vmem:[#allocation3 + $0x84] sm:$0xff]  }
 0x443   : > { %9754 = vmatmul.mubr.bf16.gmra.mrb[220].mxu1 %v12505_v45  ;;  %v6224_v26 = vrot.slane %v6223_v34, 4  ;;  %v6233_v16 = vrot.slane %v6231_v32, 4  ;;  %v6236_v59 = vrot.slane %v6234_v48, 5  ;;  %v11247_v60 = vcombine.low %v6609_v14, %v6612_v3  ;;  %v5977_v20 = vld [vmem:[#allocation3 + $0x8c] sm:$0x1] }
 0x444   : > { %9763 = vmatprep.mubr.bf16.mxu1 %v11215_v53  ;;  %v6228_v58 = vrot.slane %v6226_v23, 5  ;;  %v6242_v33 = vrot.slane %v6240_v24, 5  ;;  %v6246_v41 = vrot.slane %v6244_v46, 4  ;;  %v6617_v56 = vrot.slane %v6615_v27, 4  ;;  %v5978_v21 = vld [vmem:[#allocation3 + $0x90] sm:$0xf] }
 0x445   : > { %v6219_v25 = vsel %vm12940_vm8, %v6214_v43, %v6218_v19  ;;  %v6618_v8 = vrot.slane %v6483_v0, 5  ;;  %v6237_v62 = vor.u32 %v6236_v59, %v6233_v16  ;;  %v6622_v6 = vrot.slane %v14967_v9, 5  ;;  %v6488_v39 = vld [vmem:[#allocation3 + $0x88] sm:$0xf]  ;;  %v12515_v32 = vld [vmem:[#allocation3 + $0x6c] sm:$0xff]  }
 0x446   : > { %v6229_v15 = vsel %vm12940_vm8, %v6224_v26, %v6228_v58  ;;  %v6247_v7 = vor.u32 %v6246_v41, %v6242_v33  ;;  %v6250_v5 = vshll.u32 %v5974_v31, 16  ;;  %v6255_v57 = vshrl.u32 %v5975_v18, 16  ;;  %v6489_v58 = vld [vmem:[#allocation3 + $0x8c] sm:$0x1] }
 0x447   : > { %v6258_v54 = vshll.u32 %v5975_v18, 16  ;;  %v6264_v42 = vshll.u32 %v5976_v35, 16  ;;  %v11216_v29 = vcombine.low %v6219_v25, %v6229_v15  ;;  %v11232_v52 = vrot.slane %v6481_v37, 9  ;;  %v5981_v18 = vld [vmem:[#allocation3 + $0x9c] sm:$0xf] }
 0x448   : > { %9957 = vmatmul.mubr.bf16.gmra.mrb[32].mxu0 %v11247_v60  ;;  %v6619_v11 = vsel %vm13361_vm0, %v6617_v56, %v6618_v8  ;;  %v6268_v17 = vshrl.u32 %v5976_v35, 16  ;;  %v6248_v13 = vrot.slane %v6247_v7, 4  ;;  %v6238_v36 = vrot.slane %v6237_v62, 4  ;;  %v12521_v35 = vld [vmem:[#allocation3 + $0x90] sm:$0xff]   ;;  %v5980_v37 = vld [vmem:[#allocation3 + $0x98] sm:$0x1] }
 0x449   : > { %9966 = vmatprep.mubr.bf16.mxu0 %v12511_v28  ;;  %v14979_v38 = vrot.slane %v6264_v42, 5  ;;  %v6616_v51 = vsel %vm13361_vm0, %v11232_v52, %v6615_v27  ;;  %v6624_v61 = vrot.slane %v6622_v6, 4  ;;  %v6252_v19 = vrot.slane %v6250_v5, 5  ;;  %v6491_v8 = vld [vmem:[#allocation3 + $0x94] sm:$0xf]  ;;  %v14997_v42 = vpop.f32.mrb[192].mxu1 }
 0x44a   : > { %v6270_v2 = vrot.slane %v6268_v17, 4  ;;  %v11248_v1 = vcombine.low %v6616_v51, %v6619_v11  ;;  %v6257_v22 = vrot.slane %v6255_v57, 4  ;;  %v6260_v47 = vrot.slane %v6258_v54, 5 }
 0x44b   : > { %9764 = vmatmul.mubr.bf16.gmra.mrb[224].mxu1 %v12510_v12  ;;  %v6625_v10 = vrot.slane %v6486_v63, 5  ;;  %v6253_v45 = vsel %vm12940_vm8, %v6248_v13, %v6252_v19  ;;  %v6288_v3 = vshll.u32 %v5979_v4, 16  ;;  %v6292_v23 = vshrl.u32 %v5979_v4, 16  ;;  %v6487_v12 = vld [vmem:[#allocation3 + $0x84] sm:$0xe] }
 0x44c   : > { %9773 = vmatprep.mubr.bf16.mxu1 %v11216_v29  ;;  %v6271_v53 = vor.u32 %v6270_v2, %v14979_v38  ;;  %v6243_v55 = vsel %vm12940_vm8, %v6238_v36, %v6242_v33  ;;  %v11233_v34 = vrot.slane %v6484_v44, 9  ;;  %v6261_v48 = vor.u32 %v6260_v47, %v6257_v22  ;;  %v5982_v33 = vld [vmem:[#allocation3 + $0xa0] sm:$0xf] }
 0x44d   : > { %v6626_v27 = vsel %vm13361_vm0, %v6624_v61, %v6625_v10  ;;  %v6274_v14 = vshll.u32 %v5977_v20, 16  ;;  %v6279_v0 = vshrl.u32 %v5978_v21, 16  ;;  %v6282_v24 = vshll.u32 %v5978_v21, 16  ;;  %v15008_v10 = vld [vmem:[#allocation3 + $0xa0] sm:$0xf] }
 0x44e   : > { %v11217_v46 = vcombine.low %v6243_v55, %v6253_v45  ;;  %v6629_v43 = vrot.slane %v6488_v39, 5  ;;  %v6623_v26 = vsel %vm13361_vm0, %v11233_v34, %v6622_v6  ;;  %v6272_v31 = vrot.slane %v6271_v53, 4  ;;  %v12526_v20 = vld [vmem:[#allocation3 + $0x9c] sm:$0xff]   ;;  %v5983_v45 = vld [vmem:[#allocation3 + $0xa4] sm:$0x1] }
 0x44f   : > { %v14992_v16 = vrot.slane %v6288_v3, 5  ;;  %v6294_v59 = vrot.slane %v6292_v23, 4  ;;  %v11249_v60 = vcombine.low %v6623_v26, %v6626_v27  ;;  %v6262_v41 = vrot.slane %v6261_v48, 4  ;;  %v5984_v53 = vld [vmem:[#allocation3 + $0xa8] sm:$0xf]  ;;  %v15017_v26 = vpop.f32.mrb[193].mxu1 }
 0x450   : > { %9967 = vmatmul.mubr.bf16.gmra.mrb[36].mxu0 %v11248_v1  ;;  %v6276_v9 = vrot.slane %v6274_v14, 5  ;;  %v6281_v28 = vrot.slane %v6279_v0, 4  ;;  %v6284_v56 = vrot.slane %v6282_v24, 5  ;;  %v6631_v15 = vrot.slane %v6629_v43, 4  ;;  %v6490_v3 = vld [vmem:[#allocation3 + $0x90] sm:$0xe] }
 0x451   : > { %9976 = vmatprep.mubr.bf16.mxu0 %v12516_v40  ;;  %v6295_v25 = vor.u32 %v6294_v59, %v14992_v16  ;;  %v6312_v62 = vshll.u32 %v5982_v33, 16  ;;  %v6316_v6 = vshrl.u32 %v5982_v33, 16  ;;  %v6632_v5 = vrot.slane %v6489_v58, 5  ;;  %v6492_v40 = vld [vmem:[#allocation3 + $0x98] sm:$0x1]  ;;  %v12525_v14 = vld [vmem:[#allocation3 + $0x84] sm:$0xff]  }
 0x452   : > { %v6277_v7 = vsel %vm12940_vm8, %v6272_v31, %v6276_v9  ;;  %v6303_v57 = vshrl.u32 %v5981_v18, 16  ;;  %v6306_v54 = vshll.u32 %v5981_v18, 16  ;;  %v6267_v29 = vsel %vm12940_vm8, %v6262_v41, %v14979_v38  ;;  %v5985_v38 = vld [vmem:[#allocation3 + $0xac] sm:$0xf]  ;;  %v15021_v58 = vpop.f32.mrb[194].mxu1 }
 0x453   : > { %9774 = vmatmul.mubr.bf16.gmra.mrb[228].mxu1 %v12515_v32  ;;  %v6285_v52 = vor.u32 %v6284_v56, %v6281_v28  ;;  %v6298_v11 = vshll.u32 %v5980_v37, 16  ;;  %v11218_v17 = vcombine.low %v6267_v29, %v6277_v7  ;;  %v11234_v13 = vrot.slane %v6487_v12, 9  ;;  %v6495_v41 = vld [vmem:[#allocation3 + $0xa4] sm:$0x1]  ;;  %v6493_v12 = vld [vmem:[#allocation3 + $0x9c] sm:$0xe] }
 0x454   : > { %9783 = vmatprep.mubr.bf16.mxu1 %v11217_v46  ;;  %v6633_v63 = vsel %vm13361_vm0, %v6631_v15, %v6632_v5  ;;  %v6636_v51 = vrot.slane %v6491_v8, 5  ;;  %v6296_v36 = vrot.slane %v6295_v25, 4  ;;  %v15004_v61 = vrot.slane %v6312_v62, 5  ;;  %v15027_v15 = vpop.f32.mrb[195].mxu1  ;;  %v12531_v62 = vld [vmem:[#allocation3 + $0xa8] sm:$0xff]  }
 0x455   : > { %v6318_v2 = vrot.slane %v6316_v6, 4  ;;  %v6630_v4 = vsel %vm13361_vm0, %v11234_v13, %v6629_v43  ;;  %v6305_v1 = vrot.slane %v6303_v57, 4  ;;  %v6308_v19 = vrot.slane %v6306_v54, 5  ;;  %v5986_v5 = vld [vmem:[#allocation3 + $0xb0] sm:$0x1] }
 0x456   : > { %v11250_v44 = vcombine.low %v6630_v4, %v6633_v63  ;;  %v6286_v22 = vrot.slane %v6285_v52, 4  ;;  %v6300_v47 = vrot.slane %v6298_v11, 5  ;;  %v6638_v21 = vrot.slane %v6636_v51, 4  ;;  %v5987_v57 = vld [vmem:[#allocation3 + $0xb4] sm:$0xf] }
 0x457   : > { %v6319_v23 = vor.u32 %v6318_v2, %v15004_v61  ;;  %v6336_v55 = vshll.u32 %v5985_v38, 16  ;;  %v6340_v34 = vshrl.u32 %v5985_v38, 16  ;;  %v6639_v27 = vrot.slane %v6492_v40, 5  ;;  %v6497_v29 = vld [vmem:[#allocation3 + $0xac] sm:$0xf] }
 0x458   : > { %9977 = vmatmul.mubr.bf16.gmra.mrb[40].mxu0 %v11249_v60  ;;  %v6301_v39 = vsel %vm12940_vm8, %v6296_v36, %v6300_v47  ;;  %v6309_v32 = vor.u32 %v6308_v19, %v6305_v1  ;;  %v6643_v48 = vrot.slane %v15008_v10, 5  ;;  %v6291_v0 = vsel %vm12940_vm8, %v6286_v22, %v14992_v16  ;;  %v6496_v10 = vld [vmem:[#allocation3 + $0xa8] sm:$0xe] }
 0x459   : > { %9986 = vmatprep.mubr.bf16.mxu0 %v12521_v35  ;;  %v6322_v24 = vshll.u32 %v5983_v45, 16  ;;  %v6327_v46 = vshrl.u32 %v5984_v53, 16  ;;  %v6330_v43 = vshll.u32 %v5984_v53, 16  ;;  %v11219_v31 = vcombine.low %v6291_v0, %v6301_v39  ;;  %v5988_v35 = vld [vmem:[#allocation3 + $0xb8] sm:$0xf] }
 0x45a   : > { %v11235_v59 = vrot.slane %v6490_v3, 9  ;;  %v6640_v60 = vsel %vm13361_vm0, %v6638_v21, %v6639_v27  ;;  %v6320_v33 = vrot.slane %v6319_v23, 4  ;;  %v15023_v9 = vrot.slane %v6336_v55, 5  ;;  %v6498_v45 = vld [vmem:[#allocation3 + $0xb0] sm:$0x1]  ;;  %v12536_v3 = vld [vmem:[#allocation3 + $0xb4] sm:$0xff]  }
 0x45b   : > { %9784 = vmatmul.mubr.bf16.gmra.mrb[232].mxu1 %v12520_v50  ;;  %v6342_v28 = vrot.slane %v6340_v34, 4  ;;  %v6310_v56 = vrot.slane %v6309_v32, 4  ;;  %v6645_v18 = vrot.slane %v6643_v48, 4  ;;  %v6324_v7 = vrot.slane %v6322_v24, 5  ;;  %v5989_v55 = vld [vmem:[#allocation3 + $0xbc] sm:$0x1] }
 0x45c   : > { %9793 = vmatprep.mubr.bf16.mxu1 %v11218_v17  ;;  %v6637_v16 = vsel %vm13361_vm0, %v11235_v59, %v6636_v51  ;;  %v6329_v25 = vrot.slane %v6327_v46, 4  ;;  %v6332_v8 = vrot.slane %v6330_v43, 5  ;;  %v6646_v6 = vrot.slane %v6495_v41, 5  ;;  %v12530_v51 = vld [vmem:[#allocation3 + $0x90] sm:$0xff]   ;;  %v6500_v34 = vld [vmem:[#allocation3 + $0xb8] sm:$0xf] }
 0x45d   : > { %v11251_v37 = vcombine.low %v6637_v16, %v6640_v60  ;;  %v6325_v54 = vsel %vm12940_vm8, %v6320_v33, %v6324_v7  ;;  %v6343_v50 = vor.u32 %v6342_v28, %v15023_v9  ;;  %v6360_v52 = vshll.u32 %v5988_v35, 16  ;;  %v7399_v24 = vld [vmem:[#allocation3 + $0x10] sm:$0xf]  ;;  %v12535_v46 = vld [vmem:[#allocation3 + $0x9c] sm:$0xff]   ;;  %v6886_v33 = vld [vmem:[#allocation3 + $0xc] sm:$0xf] }
 0x45e   : > { %v6364_v11 = vshrl.u32 %v5988_v35, 16  ;;  %v6315_v17 = vsel %vm12940_vm8, %v6310_v56, %v15004_v61  ;;  %v11236_v13 = vrot.slane %v6493_v12, 9  ;;  %v6647_v63 = vsel %vm13361_vm0, %v6645_v18, %v6646_v6  ;;  %v6501_v7 = vld [vmem:[#allocation3 + $0xbc] sm:$0x1] }
 0x45f   : > { %v6333_v36 = vor.u32 %v6332_v8, %v6329_v25  ;;  %v6346_v2 = vshll.u32 %v5986_v5, 16  ;;  %v6351_v4 = vshrl.u32 %v5987_v57, 16  ;;  %v6354_v1 = vshll.u32 %v5987_v57, 16  ;;  %v12541_v8 = vld [vmem:[#allocation3 + $0xc0] sm:$0xff]   ;;  %v6499_v57 = vld [vmem:[#allocation3 + $0xb4] sm:$0xe] }
 0x460   : > { %9987 = vmatmul.mubr.bf16.gmra.mrb[44].mxu0 %v11250_v44  ;;  %v11220_v19 = vcombine.low %v6315_v17, %v6325_v54  ;;  %v6650_v38 = vrot.slane %v6497_v29, 5  ;;  %v6644_v44 = vsel %vm13361_vm0, %v11236_v13, %v6643_v48  ;;  %v6344_v22 = vrot.slane %v6343_v50, 4  ;;  %v6887_v48 = vld [vmem:[#allocation3 + $0x10] sm:$0xf]  ;;  %v7400_v54 = vld [vmem:[#allocation3 + $0x14] sm:$0x1] }
 0x461   : > { %9996 = vmatprep.mubr.bf16.mxu0 %v12526_v20  ;;  %v15039_v47 = vrot.slane %v6360_v52, 5  ;;  %v6366_v40 = vrot.slane %v6364_v11, 4  ;;  %v11252_v61 = vcombine.low %v6644_v44, %v6647_v63  ;;  %v6334_v20 = vrot.slane %v6333_v36, 4  ;;  %v12540_v52 = vld [vmem:[#allocation3 + $0xa8] sm:$0xff]   ;;  %v6890_v63 = vld [vmem:[#allocation3 + $0x1c] sm:$0xf] }
 0x462   : > { %v6348_v21 = vrot.slane %v6346_v2, 5  ;;  %v6353_v53 = vrot.slane %v6351_v4, 4  ;;  %v6356_v39 = vrot.slane %v6354_v1, 5  ;;  %v6652_v23 = vrot.slane %v6650_v38, 4  ;;  %v7402_v4 = vld [vmem:[#allocation3 + $0x1c] sm:$0xf] }
 0x463   : > { %9794 = vmatmul.mubr.bf16.gmra.mrb[236].mxu1 %v12525_v14  ;;  %v6367_v32 = vor.u32 %v6366_v40, %v15039_v47  ;;  %v11237_v14 = vrot.slane %v6496_v10, 9  ;;  %v6653_v0 = vrot.slane %v6498_v45, 5  ;;  %v6339_v43 = vsel %vm12940_vm8, %v6334_v20, %v15023_v9  ;;  %v6889_v40 = vld [vmem:[#allocation3 + $0x18] sm:$0xf] }
 0x464   : > { %9803 = vmatprep.mubr.bf16.mxu1 %v11219_v31  ;;  %v6349_v27 = vsel %vm12940_vm8, %v6344_v22, %v6348_v21  ;;  %v6357_v31 = vor.u32 %v6356_v39, %v6353_v53  ;;  %v6370_v59 = vshll.u32 %v5989_v55, 16  ;;  %v6657_v60 = vrot.slane %v6500_v34, 5  ;;  %v6888_v22 = vld [vmem:[#allocation3 + $0x14] sm:$0x1] }
 0x465   : > { %v11221_v41 = vcombine.low %v6339_v43, %v6349_v27  ;;  %v6654_v28 = vsel %vm13361_vm0, %v6652_v23, %v6653_v0  ;;  %v6944_v16 = vshll.u32 %v6887_v48, 16  ;;  %v6948_v56 = vshrl.u32 %v6887_v48, 16  ;;  %v7401_v48 = vld [vmem:[#allocation3 + $0x18] sm:$0xe] }
 0x466   : > { %v6368_v18 = vrot.slane %v6367_v32, 4  ;;  %v7496_v35 = vrot.slane %v7399_v24, 5  ;;  %v6935_v12 = vshrl.u32 %v6886_v33, 16  ;;  %v6938_v9 = vshll.u32 %v6886_v33, 16  ;;  %v7403_v24 = vld [vmem:[#allocation3 + $0x20] sm:$0x1] }
 0x467   : > { %v6372_v6 = vrot.slane %v6370_v59, 5  ;;  %v6659_v5 = vrot.slane %v6657_v60, 4  ;;  %v15051_v50 = vrot.slane %v6944_v16, 5  ;;  %v6950_v29 = vrot.slane %v6948_v56, 4  ;;  %v15069_v59 = vld [vmem:[#allocation3 + $0x28] sm:$0xf] }
 0x468   : > { %9997 = vmatmul.mubr.bf16.gmra.mrb[48].mxu0 %v11251_v37  ;;  %v6651_v37 = vsel %vm13361_vm0, %v11237_v14, %v6650_v38  ;;  %v6660_v17 = vrot.slane %v6501_v7, 5  ;;  %v7498_v13 = vrot.slane %v7496_v35, 4  ;;  %v6937_v36 = vrot.slane %v6935_v12, 4  ;;  %v6892_v56 = vld [vmem:[#allocation3 + $0x24] sm:$0xf] }
 0x469   : > { %10006 = vmatprep.mubr.bf16.mxu0 %v12531_v62  ;;  %v11253_v25 = vcombine.low %v6651_v37, %v6654_v28  ;;  %v6358_v62 = vrot.slane %v6357_v31, 4  ;;  %v6373_v11 = vsel %vm12940_vm8, %v6368_v18, %v6372_v6  ;;  %v6940_v2 = vrot.slane %v6938_v9, 5  ;;  %v12545_v18 = vld [vmem:[#allocation3 + $0xb4] sm:$0xff]   ;;  %v6891_v7 = vld [vmem:[#allocation3 + $0x20] sm:$0x1] }
 0x46a   : > { %v6661_v38 = vsel %vm13361_vm0, %v6659_v5, %v6660_v17  ;;  %v7499_v44 = vrot.slane %v7400_v54, 5  ;;  %v6951_v10 = vor.u32 %v6950_v29, %v15051_v50  ;;  %v6968_v20 = vshll.u32 %v6890_v63, 16  ;;  %v12546_v29 = vld [vmem:[%s15858_s5 + $0x300] ss:$8 sps:$4 sm:$0xff]  }
 0x46b   : > { %9804 = vmatmul.mubr.bf16.gmra.mrb[240].mxu1 %v12530_v51  ;;  %v7398_v51 = vld [vmem:[#allocation3 + $0xc] sm:$0xe]  ;;  %v6363_v1 = vsel %vm12940_vm8, %v6358_v62, %v15039_v47  ;;  %v6972_v21 = vshrl.u32 %v6890_v63, 16  ;;  %v7503_v39 = vrot.slane %v7402_v4, 5  ;;  %v6954_v23 = vshll.u32 %v6888_v22, 16 }
 0x46c   : > { %9813 = vmatprep.mubr.bf16.mxu1 %v11220_v19  ;;  %v11238_v19 = vrot.slane %v6499_v57, 9  ;;  %v11287_v53 = vrot.slane %v7398_v51, 9  ;;  %v7500_v47 = vsel %vm13361_vm0, %v7498_v13, %v7499_v44  ;;  %v6959_v55 = vshrl.u32 %v6889_v40, 16  ;;  %v12551_v63 = vld [vmem:[%s15858_s5 + $0x314] ss:$8 sps:$4 sm:$0xff]  }
 0x46d   : > { %v6962_v34 = vshll.u32 %v6889_v40, 16  ;;  %v6952_v0 = vrot.slane %v6951_v10, 4  ;;  %v6974_v43 = vrot.slane %v6972_v21, 4  ;;  %v7505_v31 = vrot.slane %v7503_v39, 4  ;;  %v7406_v4 = vld [vmem:[#allocation3 + $0x2c] sm:$0x1] }
 0x46e   : > { %v6658_v45 = vsel %vm13361_vm0, %v11238_v19, %v6657_v60  ;;  %v7497_v32 = vsel %vm13361_vm0, %v11287_v53, %v7496_v35  ;;  %v6893_v60 = vld [vmem:[#allocation3 + $0x28] sm:$0xf]  ;;  %v6961_v28 = vrot.slane %v6959_v55, 4  ;;  %v11288_v35 = vrot.slane %v7401_v48, 9  ;;  %v6896_v40 = vld [vmem:[#allocation3 + $0x34] sm:$0xf] }
 0x46f   : > { %v11254_v27 = vcombine.low %v6658_v45, %v6661_v38  ;;  %v11303_v14 = vcombine.low %v7497_v32, %v7500_v47  ;;  %v6964_v16 = vrot.slane %v6962_v34, 5  ;;  %v7506_v37 = vrot.slane %v7403_v24, 5  ;;  %v7408_v21 = vld [vmem:[#allocation3 + $0x34] sm:$0xf]  ;;  %v6895_v47 = vld [vmem:[#allocation3 + $0x30] sm:$0xf] }
 0x470   : > { %10007 = vmatmul.mubr.bf16.gmra.mrb[52].mxu0 %v11252_v61  ;;  %v11222_v61 = vcombine.low %v6363_v1, %v6373_v11  ;;  %v7510_v6 = vrot.slane %v15069_v59, 5  ;;  %v6983_v5 = vshrl.u32 %v6892_v56, 16  ;;  %v6986_v57 = vshll.u32 %v6892_v56, 16  ;;  %v12554_v53 = vld [vmem:[%s15858_s5 + $0x324] ss:$8 sps:$4 sm:$0xff]  }
 0x471   : > { %10016 = vmatprep.mubr.bf16.mxu0 %v12536_v3  ;;  %v6941_v3 = vor.u32 %v6940_v2, %v6937_v36  ;;  %v7507_v62 = vsel %vm13361_vm0, %v7505_v31, %v7506_v37  ;;  %v6978_v11 = vshll.u32 %v6891_v7, 16  ;;  %v7504_v13 = vsel %vm13361_vm0, %v11288_v35, %v7503_v39  ;;  %v7404_v2 = vld [vmem:[#allocation3 + $0x24] sm:$0xe]  ;;  %v12552_v24 = vld [vmem:[%s15858_s5 + $0x320] ss:$8 sps:$4 sm:$0xff]  }
 0x472   : > { %v11304_v51 = vcombine.low %v7504_v13, %v7507_v62  ;;  %v7512_v38 = vrot.slane %v7510_v6, 4  ;;  %v6985_v44 = vrot.slane %v6983_v5, 4  ;;  %v6988_v22 = vrot.slane %v6986_v57, 5  ;;  %v6897_v7 = vld [vmem:[#allocation3 + $0x38] sm:$0x1] }
 0x473   : > { %9814 = vmatmul.mubr.bf16.gmra.mrb[244].mxu1 %v12535_v46  ;;  %v15067_v46 = vrot.slane %v6968_v20, 5  ;;  %v6942_v33 = vrot.slane %v6941_v3, 4  ;;  %v6980_v10 = vrot.slane %v6978_v11, 5  ;;  %v6894_v20 = vld [vmem:[#allocation3 + $0x2c] sm:$0x1]  ;;  %v7513_v45 = vrot.slane %v7406_v4, 5 }
 0x474   : > { %9823 = vmatprep.mubr.bf16.mxu1 %v11221_v41  ;;  %v6956_v41 = vrot.slane %v6954_v23, 5  ;;  %v7016_v23 = vshll.u32 %v6896_v40, 16  ;;  %v7020_v55 = vshrl.u32 %v6896_v40, 16  ;;  %v11289_v34 = vrot.slane %v7404_v2, 9  ;;  %v6898_v57 = vld [vmem:[#allocation3 + $0x3c] sm:$0xf] }
 0x475   : > { %v6975_v9 = vor.u32 %v6974_v43, %v15067_v46  ;;  %v6947_v54 = vsel %vm12940_vm8, %v6942_v33, %v15051_v50  ;;  %v12549_v50 = vld [vmem:[%s15858_s5 + $0x310] ss:$8 sps:$4 sm:$0xff]   ;;  %v6989_v32 = vor.u32 %v6988_v22, %v6985_v44  ;;  %v7517_v48 = vrot.slane %v7408_v21, 5  ;;  %v12557_v33 = vld [vmem:[%s15858_s5 + $0x334] ss:$8 sps:$4 sm:$0xff]  }
 0x476   : > { %v6957_v12 = vsel %vm12940_vm8, %v6952_v0, %v6956_v41  ;;  %v7002_v0 = vshll.u32 %v6894_v20, 16  ;;  %v7007_v43 = vshrl.u32 %v6895_v47, 16  ;;  %v7010_v31 = vshll.u32 %v6895_v47, 16  ;;  %v7410_v40 = vld [vmem:[#allocation3 + $0x3c] sm:$0xe] }
 0x477   : > { %v11271_v17 = vcombine.low %v6947_v54, %v6957_v12  ;;  %v6976_v36 = vrot.slane %v6975_v9, 4  ;;  %v15112_v56 = vrot.slane %v7016_v23, 5  ;;  %v6990_v35 = vrot.slane %v6989_v32, 4  ;;  %v12555_v12 = vld [vmem:[%s15858_s5 + $0x330] ss:$8 sps:$4 sm:$0xff]  }
 0x478   : > { %10017 = vmatmul.mubr.bf16.gmra.mrb[56].mxu0 %v11253_v25  ;;  %v6992_v25 = vshll.u32 %v6893_v60, 16  ;;  %v7519_v37 = vrot.slane %v7517_v48, 4  ;;  %v6899_v9 = vld [vmem:[#allocation3 + $0x40] sm:$0xf]  ;;  %v7012_v62 = vrot.slane %v7010_v31, 5  ;;  %v7026_v2 = vshll.u32 %v6897_v7, 16 }
 0x479   : > { %10026 = vmatprep.mubr.bf16.mxu0 %v12541_v8  ;;  %v6996_v8 = vshrl.u32 %v6893_v60, 16  ;;  %v6981_v39 = vsel %vm12940_vm8, %v6976_v36, %v6980_v10  ;;  %v7511_v60 = vsel %vm13361_vm0, %v11289_v34, %v7510_v6  ;;  %v7411_v6 = vld [vmem:[#allocation3 + $0x40] sm:$0xf]  ;;  %v12560_v54 = vld [vmem:[%s15858_s5 + $0x344] ss:$8 sps:$4 sm:$0xff]   ;;  %v7040_v11 = vshll.u32 %v6899_v9, 16 }
 0x47a   : > { %v15091_v1 = vrot.slane %v6992_v25, 5  ;;  %v7004_v25 = vrot.slane %v7002_v0, 5  ;;  %v7524_v36 = vrot.slane %v7411_v6, 5  ;;  %v7031_v4 = vshrl.u32 %v6898_v57, 16  ;;  %v12561_v32 = vld [vmem:[%s15858_s5 + $0x350] ss:$8 sps:$4 sm:$0xff]  }
 0x47b   : > { %9824 = vmatmul.mubr.bf16.gmra.mrb[248].mxu1 %v12540_v52  ;;  %v6965_v52 = vor.u32 %v6964_v16, %v6961_v28  ;;  %v6998_v19 = vrot.slane %v6996_v8, 4  ;;  %v7409_v16 = vld [vmem:[#allocation3 + $0x38] sm:$0x1]  ;;  %v7009_v8 = vrot.slane %v7007_v43, 4  ;;  %v15136_v21 = vrot.slane %v7040_v11, 5 }
 0x47c   : > { %9833 = vmatprep.mubr.bf16.mxu1 %v11222_v61  ;;  %v7520_v5 = vrot.slane %v7409_v16, 5  ;;  %v6995_v13 = vsel %vm12940_vm8, %v6990_v35, %v15091_v1  ;;  %v7526_v47 = vrot.slane %v7524_v36, 4  ;;  %v7033_v34 = vrot.slane %v7031_v4, 4  ;;  %v6900_v0 = vld [vmem:[#allocation3 + $0x44] sm:$0x1] }
 0x47d   : > { %v6966_v61 = vrot.slane %v6965_v52, 4  ;;  %v6999_v3 = vor.u32 %v6998_v19, %v15091_v1  ;;  %v7034_v19 = vshll.u32 %v6898_v57, 16  ;;  %v7412_v1 = vld [vmem:[#allocation3 + $0x44] sm:$0x1]  ;;  %v7050_v35 = vshll.u32 %v6900_v0, 16 }
 0x47e   : > { %v6903_v6 = vld [vmem:[#allocation3 + $0x50] sm:$0x1]  ;;  %v6905_v11 = vld [vmem:[#allocation3 + $0x58] sm:$0xf]  ;;  %v12572_v4 = vld [vmem:[%s15858_s5 + $0x384] ss:$8 sps:$4 sm:$0xff]  }
 0x47f   : > { %v7000_v28 = vrot.slane %v6999_v3, 4  ;;  %v6902_v3 = vld [vmem:[#allocation3 + $0x4c] sm:$0xf]  ;;  %v6908_v0 = vld [vmem:[#allocation3 + $0x64] sm:$0xf] }
 0x480   : > { %10027 = vmatmul.mubr.bf16.gmra.mrb[60].mxu0 %v11254_v27  ;;  %v7514_v27 = vsel %vm13361_vm0, %v7512_v38, %v7513_v45  ;;  %v12558_v38 = vld [vmem:[%s15858_s5 + $0x340] ss:$8 sps:$4 sm:$0xff]  }
 0x481   : > { %10069 = vmatprep.mubr.bf16.mxu0 %v11303_v14  ;;  %v6971_v14 = vsel %vm12940_vm8, %v6966_v61, %v15067_v46  ;;  %v11305_v41 = vcombine.low %v7511_v60, %v7514_v27  ;;  %v7407_v46 = vld [vmem:[#allocation3 + $0x30] sm:$0xe]  ;;  %v12563_v61 = vld [vmem:[%s15858_s5 + $0x354] ss:$8 sps:$4 sm:$0xff]   ;;  %v7036_v27 = vrot.slane %v7034_v19, 5  ;;  %v7068_v60 = vshrl.u32 %v6902_v3, 16 }
 0x482   : > { %v11272_v59 = vcombine.low %v6971_v14, %v6981_v39  ;;  %v6901_v39 = vld [vmem:[#allocation3 + $0x48] sm:$0xf]  ;;  %v7527_v14 = vrot.slane %v7412_v1, 5 }
 0x483   : > { %9834 = vmatmul.mubr.bf16.gmra.mrb[252].mxu1 %v12545_v18  ;;  %v7022_v18 = vrot.slane %v7020_v55, 4  ;;  %v7028_v55 = vrot.slane %v7026_v2, 5  ;;  %v7070_v57 = vrot.slane %v7068_v60, 4  ;;  %v6904_v2 = vld [vmem:[#allocation3 + $0x54] sm:$0xf] }
 0x484   : > { %v12573_v60 = vld [vmem:[%s15858_s5 + $0x390] ss:$8 sps:$4 sm:$0xff]  }
 0x485   : > { %v7023_v52 = vor.u32 %v7022_v18, %v15112_v56  ;;  %v7037_v18 = vor.u32 %v7036_v27, %v7033_v34 }
 0x487   : > { %v7024_v20 = vrot.slane %v7023_v52, 4 }
 0x488   : > { %10070 = vmatmul.mubr.bf16.vlgmr.msra.gmra.mrb[0].mxu0 %v11271_v17  ;;  %v7044_v17 = vshrl.u32 %v6899_v9, 16  ;;  %v7413_v9 = vld [vmem:[#allocation3 + $0x48] sm:$0xe] }
 0x489   : > { %10079 = vmatprep.mubr.bf16.mxu0 %v11304_v51  ;;  %10231 = vmatpush1.bf16.msra.mxu0 %v12546_v29  ;;  %v7005_v29 = vsel %vm12940_vm8, %v7000_v28, %v7004_v25  ;;  %v7521_v51 = vsel %vm13361_vm0, %v7519_v37, %v7520_v5  ;;  %v7029_v43 = vsel %vm12940_vm8, %v7024_v20, %v7028_v55  ;;  %v7055_v28 = vshrl.u32 %v6901_v39, 16  ;;  %v12564_v37 = vld [vmem:[%s15858_s5 + $0x360] ss:$8 sps:$4 sm:$0xff]   ;;  %v12575_v55 = vld [vmem:[%s15858_s5 + $0x394] ss:$8 sps:$4 sm:$0xff]  }
 0x48a   : > { %10232 = vmatprep.subr.bf16.mxu0 %v12551_v63  ;;  %v11290_v63 = vrot.slane %v7407_v46, 9  ;;  %v11273_v44 = vcombine.low %v6995_v13, %v7005_v29  ;;  %v7046_v45 = vrot.slane %v7044_v17, 4  ;;  %v7058_v46 = vshll.u32 %v6901_v39, 16  ;;  %v7415_v25 = vld [vmem:[#allocation3 + $0x50] sm:$0x1] }
 0x48b   : > { %v7057_v29 = vrot.slane %v7055_v28, 4  ;;  %v7038_v17 = vrot.slane %v7037_v18, 4  ;;  %v7052_v13 = vrot.slane %v7050_v35, 5 }
 0x48c   : > { %v7518_v22 = vsel %vm13361_vm0, %v11290_v63, %v7517_v48  ;;  %v11291_v48 = vrot.slane %v7410_v40, 9  ;;  %v7047_v31 = vor.u32 %v7046_v45, %v15136_v21  ;;  %v7060_v52 = vrot.slane %v7058_v46, 5  ;;  %v15165_v63 = vld [vmem:[#allocation3 + $0x58] sm:$0xf]  ;;  %v6907_v46 = vld [vmem:[#allocation3 + $0x60] sm:$0xf] }
 0x48d   : > { %10233 = vmatpush1.bf16.msra.mxu0 %v12549_v50  ;;  %v7013_v50 = vor.u32 %v7012_v62, %v7009_v8  ;;  %v11306_v10 = vcombine.low %v7518_v22, %v7521_v51  ;;  %v12569_v8 = vld [vmem:[%s15858_s5 + $0x374] ss:$8 sps:$4 sm:$0xff]   ;;  %v12567_v51 = vld [vmem:[%s15858_s5 + $0x370] ss:$8 sps:$4 sm:$0xff]   ;;  %v7092_v22 = vshrl.u32 %v6905_v11, 16  ;;  %v7043_v20 = vsel %vm12940_vm8, %v7038_v17, %v15136_v21 }
 0x48e   : > { %10234 = vmatprep.subr.bf16.mxu0 %v12554_v53  ;;  %v15138_v53 = vld [vmem:[#allocation3 + $0x4c] sm:$0xf]  ;;  %v7061_v1 = vor.u32 %v7060_v52, %v7057_v29  ;;  %v7079_v45 = vshrl.u32 %v6904_v2, 16  ;;  %v7416_v21 = vld [vmem:[#allocation3 + $0x54] sm:$0xe]  ;;  %v7106_v29 = vshll.u32 %v6907_v46, 16 }
 0x48f   : > { %v7014_v23 = vrot.slane %v7013_v50, 4  ;;  %v7534_v50 = vrot.slane %v7415_v25, 5  ;;  %v11293_v25 = vrot.slane %v7416_v21, 9  ;;  %v15214_v17 = vld [vmem:[#allocation3 + $0x70] sm:$0xf] }
 0x490   : > { %10080 = vmatmul.mubr.bf16.gmra.mrb[4].mxu0 %v11272_v59  ;;  %v7064_v59 = vshll.u32 %v6902_v3, 16 }
 0x491   : > { %10089 = vmatprep.mubr.bf16.mxu0 %v11305_v41  ;;  %10235 = vmatpush1.bf16.msra.mxu0 %v12552_v24  ;;  %v12566_v24 = vld [vmem:[%s15858_s5 + $0x364] ss:$8 sps:$4 sm:$0xff]   ;;  %v7531_v41 = vrot.slane %v15138_v53, 5  ;;  %v7019_v16 = vsel %vm12940_vm8, %v7014_v23, %v15112_v56  ;;  %v7048_v56 = vrot.slane %v7047_v31, 4  ;;  %v7082_v53 = vshll.u32 %v6904_v2, 16 }
 0x492   : > { %10236 = vmatprep.subr.bf16.mxu0 %v12557_v33  ;;  %v7528_v33 = vsel %vm13361_vm0, %v7526_v47, %v7527_v14  ;;  %v11274_v7 = vcombine.low %v7019_v16, %v7029_v43  ;;  %v15163_v5 = vrot.slane %v7064_v59, 5  ;;  %v12570_v47 = vld [vmem:[%s15858_s5 + $0x380] ss:$8 sps:$4 sm:$0xff]   ;;  %v7418_v23 = vld [vmem:[#allocation3 + $0x5c] sm:$0x1] }
 0x493   : > { %v7053_v19 = vsel %vm12940_vm8, %v7048_v56, %v7052_v13  ;;  %v15192_v14 = vld [vmem:[#allocation3 + $0x64] sm:$0xf]  ;;  %v6906_v59 = vld [vmem:[#allocation3 + $0x5c] sm:$0x1]  ;;  %v7541_v28 = vrot.slane %v7418_v23, 5 }
 0x494   : > { %v11275_v39 = vcombine.low %v7043_v20, %v7053_v19  ;;  %v12578_v16 = vld [vmem:[%s15858_s5 + $0x3a4] ss:$8 sps:$4 sm:$0xff]   ;;  %v12576_v56 = vld [vmem:[%s15858_s5 + $0x3a0] ss:$8 sps:$4 sm:$0xff]   ;;  %v12581_v13 = vld [vmem:[%s15858_s5 + $0x3b4] ss:$8 sps:$4 sm:$0xff]  }
 0x495   : > { %10237 = vmatpush1.bf16.msra.mxu0 %v12555_v12  ;;  %v7525_v12 = vsel %vm13361_vm0, %v11291_v48, %v7524_v36  ;;  %v11292_v36 = vrot.slane %v7413_v9, 9  ;;  %v7094_v48 = vrot.slane %v7092_v22, 4  ;;  %v6910_v2 = vld [vmem:[#allocation3 + $0x6c] sm:$0xf]  ;;  %v12579_v22 = vld [vmem:[%s15858_s5 + $0x3b0] ss:$8 sps:$4 sm:$0xff]  }
 0x496   : > { %10238 = vmatprep.subr.bf16.mxu0 %v12560_v54  ;;  %v11307_v62 = vcombine.low %v7525_v12, %v7528_v33  ;;  %v7533_v54 = vrot.slane %v7531_v41, 4  ;;  %v7081_v33 = vrot.slane %v7079_v45, 4  ;;  %v7116_v12 = vshrl.u32 %v6908_v0, 16 }
 0x497   : > { %v7532_v3 = vsel %vm13361_vm0, %v11292_v36, %v7531_v41  ;;  %v7084_v41 = vrot.slane %v7082_v53, 5  ;;  %v7552_v45 = vrot.slane %v15214_v17, 5  ;;  %v12584_v53 = vld [vmem:[%s15858_s5 + $0x3c4] ss:$8 sps:$4 sm:$0xff]  }
 0x498   : > { %10090 = vmatmul.mubr.bf16.gmra.mrb[8].mxu0 %v11273_v44  ;;  %v7088_v44 = vshll.u32 %v6905_v11, 16  ;;  %v7535_v40 = vsel %vm13361_vm0, %v7533_v54, %v7534_v50  ;;  %v7103_v54 = vshrl.u32 %v6907_v46, 16  ;;  %v7118_v50 = vrot.slane %v7116_v12, 4 }
 0x499   : > { %10099 = vmatprep.mubr.bf16.mxu0 %v11306_v10  ;;  %10239 = vmatpush1.bf16.msra.mxu0 %v12558_v38  ;;  %v7071_v38 = vor.u32 %v7070_v57, %v15163_v5  ;;  %v7538_v10 = vrot.slane %v15165_v63, 5  ;;  %v11308_v34 = vcombine.low %v7532_v3, %v7535_v40  ;;  %v7098_v57 = vshll.u32 %v6906_v59, 16 }
 0x49a   : > { %10240 = vmatprep.subr.bf16.mxu0 %v12563_v61  ;;  %v7074_v61 = vshll.u32 %v6903_v6, 16  ;;  %v7085_v6 = vor.u32 %v7084_v41, %v7081_v33  ;;  %v6912_v33 = vld [vmem:[#allocation3 + $0x74] sm:$0x1] }
 0x49b   : > { %v7072_v27 = vrot.slane %v7071_v38, 4  ;;  %v7540_v31 = vrot.slane %v7538_v10, 4  ;;  %v7539_v11 = vsel %vm13361_vm0, %v11293_v25, %v7538_v10  ;;  %v6909_v38 = vld [vmem:[#allocation3 + $0x68] sm:$0x1]  ;;  %v7108_v10 = vrot.slane %v7106_v29, 5 }
 0x49c   : > { %v7076_v43 = vrot.slane %v7074_v61, 5  ;;  %v7086_v40 = vrot.slane %v7085_v6, 4  ;;  %v7105_v61 = vrot.slane %v7103_v54, 4  ;;  %v12585_v25 = vld [vmem:[%s15858_s5 + $0x3d0] ss:$8 sps:$4 sm:$0xff]  }
 0x49d   : > { %10241 = vmatpush1.bf16.msra.mxu0 %v12561_v32  ;;  %v15190_v32 = vrot.slane %v7088_v44, 5  ;;  %v6911_v44 = vld [vmem:[#allocation3 + $0x70] sm:$0xf]  ;;  %v12590_v54 = vld [vmem:[%s15858_s5 + $0x3e4] ss:$8 sps:$4 sm:$0xff]  }
 0x49e   : > { %10242 = vmatprep.subr.bf16.mxu0 %v12566_v24  ;;  %v7062_v24 = vrot.slane %v7061_v1, 4  ;;  %v7077_v18 = vsel %vm12940_vm8, %v7072_v27, %v7076_v43  ;;  %v7100_v1 = vrot.slane %v7098_v57, 5  ;;  %v7136_v3 = vshll.u32 %v6911_v44, 16  ;;  %v12582_v43 = vld [vmem:[%s15858_s5 + $0x3c0] ss:$8 sps:$4 sm:$0xff]  }
 0x49f   : > { %v7095_v35 = vor.u32 %v7094_v48, %v15190_v32  ;;  %v7140_v23 = vshrl.u32 %v6911_v44, 16  ;;  %v7130_v27 = vshll.u32 %v6910_v2, 16  ;;  %v7091_v21 = vsel %vm12940_vm8, %v7086_v40, %v15190_v32  ;;  %v12587_v32 = vld [vmem:[%s15858_s5 + $0x3d4] ss:$8 sps:$4 sm:$0xff]   ;;  %v7427_v44 = vld [vmem:[#allocation3 + $0x80] sm:$0x1] }
 0x4a0   : > { %10100 = vmatmul.mubr.bf16.gmra.mrb[12].mxu0 %v11274_v7  ;;  %v7112_v7 = vshll.u32 %v6908_v0, 16  ;;  %v7067_v9 = vsel %vm12940_vm8, %v7062_v24, %v15163_v5  ;;  %v7421_v5 = vld [vmem:[#allocation3 + $0x68] sm:$0x1]  ;;  %v7109_v48 = vor.u32 %v7108_v10, %v7105_v61  ;;  %v7422_v0 = vld [vmem:[#allocation3 + $0x6c] sm:$0xe]  ;;  %v15244_v46 = vrot.slane %v7136_v3, 5 }
 0x4a1   : > { %10109 = vmatprep.mubr.bf16.mxu0 %v11307_v62  ;;  %10243 = vmatpush1.bf16.msra.mxu0 %v12564_v37  ;;  %v7419_v37 = vld [vmem:[#allocation3 + $0x60] sm:$0xe]  ;;  %v7545_v62 = vrot.slane %v15192_v14, 5  ;;  %v11276_v52 = vcombine.low %v7067_v9, %v7077_v18  ;;  %v7548_v20 = vrot.slane %v7421_v5, 5  ;;  %v7122_v14 = vshll.u32 %v6909_v38, 16 }
 0x4a2   : > { %10244 = vmatprep.subr.bf16.mxu0 %v12569_v8  ;;  %v7542_v8 = vsel %vm13361_vm0, %v7540_v31, %v7541_v28  ;;  %v15219_v36 = vrot.slane %v7112_v7, 5  ;;  %v7424_v24 = vld [vmem:[#allocation3 + $0x74] sm:$0x1]  ;;  %v15246_v18 = vld [vmem:[#allocation3 + $0x7c] sm:$0xf]  ;;  %v7132_v9 = vrot.slane %v7130_v27, 5 }
 0x4a3   : > { %v11309_v63 = vcombine.low %v7539_v11, %v7542_v8  ;;  %v7547_v19 = vrot.slane %v7545_v62, 4  ;;  %v7555_v7 = vrot.slane %v7424_v24, 5  ;;  %v7110_v8 = vrot.slane %v7109_v48, 4  ;;  %v7425_v61 = vld [vmem:[#allocation3 + $0x78] sm:$0xe] }
 0x4a4   : > { %v7146_v57 = vshll.u32 %v6912_v33, 16  ;;  %v7562_v27 = vrot.slane %v7427_v44, 5 }
 0x4a5   : > { %10245 = vmatpush1.bf16.msra.mxu0 %v12567_v51  ;;  %v7096_v51 = vrot.slane %v7095_v35, 4  ;;  %v6913_v35 = vld [vmem:[#allocation3 + $0x78] sm:$0xf] }
 0x4a6   : > { %10246 = vmatprep.subr.bf16.mxu0 %v12572_v4  ;;  %v11294_v4 = vrot.slane %v7419_v37, 9  ;;  %v6914_v37 = vld [vmem:[#allocation3 + $0x7c] sm:$0xf] }
 0x4a7   : > { %v7160_v11 = vshll.u32 %v6914_v37, 16  ;;  %v7164_v5 = vshrl.u32 %v6914_v37, 16  ;;  %v7430_v37 = vld [vmem:[#allocation3 + $0x8c] sm:$0x1] }
 0x4a8   : > { %10110 = vmatmul.mubr.bf16.gmra.mrb[16].mxu0 %v11275_v39  ;;  %v7119_v39 = vor.u32 %v7118_v50, %v15219_v36  ;;  %v7546_v59 = vsel %vm13361_vm0, %v11294_v4, %v7545_v62  ;;  %v7124_v62 = vrot.slane %v7122_v14, 5  ;;  %v7115_v50 = vsel %vm12940_vm8, %v7110_v8, %v15219_v36  ;;  %v12588_v4 = vld [vmem:[%s15858_s5 + $0x3e0] ss:$8 sps:$4 sm:$0xff]   ;;  %v12597_v14 = vld [vmem:[%s15858_s5 + $0x404] ss:$8 sps:$4 sm:$0xff]  }
 0x4a9   : > { %10119 = vmatprep.mubr.bf16.mxu0 %v11308_v34  ;;  %10247 = vmatpush1.bf16.msra.mxu0 %v12570_v47  ;;  %v7101_v47 = vsel %vm12940_vm8, %v7096_v51, %v7100_v1  ;;  %v7127_v34 = vshrl.u32 %v6910_v2, 16  ;;  %v7154_v51 = vshll.u32 %v6913_v35, 16  ;;  %v7148_v1 = vrot.slane %v7146_v57, 5  ;;  %v7432_v8 = vld [vmem:[#allocation3 + $0x94] sm:$0xf] }
 0x4aa   : > { %10248 = vmatprep.subr.bf16.mxu0 %v12575_v55  ;;  %v7549_v55 = vsel %vm13361_vm0, %v7547_v19, %v7548_v20  ;;  %v11277_v31 = vcombine.low %v7091_v21, %v7101_v47  ;;  %v7120_v28 = vrot.slane %v7119_v39, 4  ;;  %v15271_v36 = vrot.slane %v7160_v11, 5  ;;  %v15273_v20 = vld [vmem:[#allocation3 + $0x88] sm:$0xf]  ;;  %v6915_v39 = vld [vmem:[#allocation3 + $0x80] sm:$0x1] }
 0x4ab   : > { %v11310_v41 = vcombine.low %v7546_v59, %v7549_v55  ;;  %v7129_v12 = vrot.slane %v7127_v34, 4  ;;  %v7166_v10 = vrot.slane %v7164_v5, 4  ;;  %v6916_v55 = vld [vmem:[#allocation3 + $0x84] sm:$0xf]  ;;  %v12591_v34 = vld [vmem:[%s15858_s5 + $0x3f0] ss:$8 sps:$4 sm:$0xff]  }
 0x4ac   : > { %v7125_v29 = vsel %vm12940_vm8, %v7120_v28, %v7124_v62  ;;  %v7178_v28 = vshll.u32 %v6916_v55, 16  ;;  %v6920_v62 = vld [vmem:[#allocation3 + $0x94] sm:$0xf]  ;;  %v7569_v5 = vrot.slane %v7430_v37, 5 }
 0x4ad   : > { %10249 = vmatpush1.bf16.msra.mxu0 %v12573_v60  ;;  %v7554_v60 = vrot.slane %v7552_v45, 4  ;;  %v7133_v17 = vor.u32 %v7132_v9, %v7129_v12  ;;  %v11278_v19 = vcombine.low %v7115_v50, %v7125_v29  ;;  %v7167_v24 = vor.u32 %v7166_v10, %v15271_v36 }
 0x4ae   : > { %10250 = vmatprep.subr.bf16.mxu0 %v12578_v16  ;;  %v7142_v16 = vrot.slane %v7140_v23, 4  ;;  %v7156_v23 = vrot.slane %v7154_v51, 5  ;;  %v7180_v29 = vrot.slane %v7178_v28, 5  ;;  %v7208_v51 = vshll.u32 %v6920_v62, 16 }
 0x4af   : > { %v7556_v6 = vsel %vm13361_vm0, %v7554_v60, %v7555_v7  ;;  %v7566_v60 = vrot.slane %v15273_v20, 5  ;;  %v7168_v9 = vrot.slane %v7167_v24, 4  ;;  %v7212_v50 = vshrl.u32 %v6920_v62, 16  ;;  %v7433_v20 = vld [vmem:[#allocation3 + $0x98] sm:$0x1] }
 0x4b0   : > { %10120 = vmatmul.mubr.bf16.gmra.mrb[20].mxu0 %v11276_v52  ;;  %v7143_v52 = vor.u32 %v7142_v16, %v15244_v46  ;;  %v6925_v62 = vld [vmem:[#allocation3 + $0xa8] sm:$0xf] }
 0x4b1   : > { %10129 = vmatprep.mubr.bf16.mxu0 %v11309_v63  ;;  %10251 = vmatpush1.bf16.msra.mxu0 %v12576_v56  ;;  %v11295_v56 = vrot.slane %v7422_v0, 9  ;;  %v7151_v63 = vshrl.u32 %v6913_v35, 16  ;;  %v7428_v35 = vld [vmem:[#allocation3 + $0x84] sm:$0xe] }
 0x4b2   : > { %10252 = vmatprep.subr.bf16.mxu0 %v12581_v13  ;;  %v7559_v13 = vrot.slane %v15246_v18, 5  ;;  %v7144_v40 = vrot.slane %v7143_v52, 4  ;;  %v6919_v52 = vld [vmem:[#allocation3 + $0x90] sm:$0xf]  ;;  %v11297_v11 = vrot.slane %v7428_v35, 9 }
 0x4b3   : > { %v7553_v2 = vsel %vm13361_vm0, %v11295_v56, %v7552_v45  ;;  %v6917_v45 = vld [vmem:[#allocation3 + $0x88] sm:$0xf]  ;;  %v7153_v3 = vrot.slane %v7151_v63, 4  ;;  %v7568_v56 = vrot.slane %v7566_v60, 4  ;;  %v7573_v63 = vrot.slane %v7432_v8, 5 }
 0x4b4   : > { %v11311_v38 = vcombine.low %v7553_v2, %v7556_v6  ;;  %v7561_v47 = vrot.slane %v7559_v13, 4  ;;  %v7184_v21 = vshll.u32 %v6917_v45, 16  ;;  %v7188_v48 = vshrl.u32 %v6917_v45, 16  ;;  %v7436_v8 = vld [vmem:[#allocation3 + $0xa4] sm:$0x1] }
 0x4b5   : > { %10253 = vmatpush1.bf16.msra.mxu0 %v12579_v22  ;;  %v12593_v22 = vld [vmem:[%s15858_s5 + $0x3f4] ss:$8 sps:$4 sm:$0xff]   ;;  %v7149_v0 = vsel %vm12940_vm8, %v7144_v40, %v7148_v1  ;;  %v7157_v33 = vor.u32 %v7156_v23, %v7153_v3  ;;  %v7570_v2 = vsel %vm13361_vm0, %v7568_v56, %v7569_v5  ;;  %v7431_v40 = vld [vmem:[#allocation3 + $0x90] sm:$0xe]  ;;  %v7214_v3 = vrot.slane %v7212_v50, 4 }
 0x4b6   : > { %10254 = vmatprep.subr.bf16.mxu0 %v12584_v53  ;;  %v7134_v53 = vrot.slane %v7133_v17, 4  ;;  %v7563_v59 = vsel %vm13361_vm0, %v7561_v47, %v7562_v27  ;;  %v15292_v7 = vrot.slane %v7184_v21, 5  ;;  %v6921_v47 = vld [vmem:[#allocation3 + $0x98] sm:$0x1]  ;;  %v15306_v23 = vld [vmem:[#allocation3 + $0xa0] sm:$0xf] }
 0x4b7   : > { %v7158_v6 = vrot.slane %v7157_v33, 4  ;;  %v7580_v35 = vrot.slane %v15306_v23, 5  ;;  %v6926_v5 = vld [vmem:[#allocation3 + $0xac] sm:$0xf] }
 0x4b8   : > { %10130 = vmatmul.mubr.bf16.gmra.mrb[24].mxu0 %v11277_v31  ;;  %v11296_v31 = vrot.slane %v7425_v61, 9  ;;  %v7567_v61 = vsel %vm13361_vm0, %v11297_v11, %v7566_v60  ;;  %v15329_v11 = vld [vmem:[#allocation3 + $0xac] sm:$0xf] }
 0x4b9   : > { %10139 = vmatprep.mubr.bf16.mxu0 %v11310_v41  ;;  %10255 = vmatpush1.bf16.msra.mxu0 %v12582_v43  ;;  %v7139_v43 = vsel %vm12940_vm8, %v7134_v53, %v15244_v46  ;;  %v7175_v41 = vshrl.u32 %v6916_v55, 16  ;;  %v7190_v46 = vrot.slane %v7188_v48, 4  ;;  %v7163_v44 = vsel %vm12940_vm8, %v7158_v6, %v15271_v36  ;;  %v6923_v48 = vld [vmem:[#allocation3 + $0xa0] sm:$0xf] }
 0x4ba   : > { %10256 = vmatprep.subr.bf16.mxu0 %v12587_v32  ;;  %v7170_v32 = vshll.u32 %v6915_v39, 16  ;;  %v11279_v16 = vcombine.low %v7139_v43, %v7149_v0  ;;  %v7560_v18 = vsel %vm13361_vm0, %v11296_v31, %v7559_v13  ;;  %v11313_v45 = vcombine.low %v7567_v61, %v7570_v2  ;;  %v6922_v43 = vld [vmem:[#allocation3 + $0x9c] sm:$0xf] }
 0x4bb   : > { %v11312_v12 = vcombine.low %v7560_v18, %v7563_v59  ;;  %v7191_v17 = vor.u32 %v7190_v46, %v15292_v7  ;;  %v7575_v53 = vrot.slane %v7573_v63, 4  ;;  %v15304_v39 = vrot.slane %v7208_v51, 5 }
 0x4bc   : > { %v7172_v57 = vrot.slane %v7170_v32, 5  ;;  %v7576_v0 = vrot.slane %v7433_v20, 5  ;;  %v11298_v59 = vrot.slane %v7431_v40, 9  ;;  %v7236_v28 = vshrl.u32 %v6923_v48, 16 }
 0x4bd   : > { %10257 = vmatpush1.bf16.msra.mxu0 %v12585_v25  ;;  %v6918_v25 = vld [vmem:[#allocation3 + $0x8c] sm:$0x1]  ;;  %v7192_v10 = vrot.slane %v7191_v17, 4  ;;  %v7215_v32 = vor.u32 %v7214_v3, %v15304_v39  ;;  %v7218_v18 = vshll.u32 %v6921_v47, 16  ;;  %v7223_v37 = vshrl.u32 %v6922_v43, 16 }
 0x4be   : > { %10258 = vmatprep.subr.bf16.mxu0 %v12590_v54  ;;  %v7177_v54 = vrot.slane %v7175_v41, 4  ;;  %v7173_v13 = vsel %vm12940_vm8, %v7168_v9, %v7172_v57  ;;  %v7577_v33 = vsel %vm13361_vm0, %v7575_v53, %v7576_v0  ;;  %v7232_v41 = vshll.u32 %v6923_v48, 16  ;;  %v7434_v57 = vld [vmem:[#allocation3 + $0x9c] sm:$0xe] }
 0x4bf   : > { %v11280_v1 = vcombine.low %v7163_v44, %v7173_v13  ;;  %v7216_v6 = vrot.slane %v7215_v32, 4  ;;  %v7582_v13 = vrot.slane %v7580_v35, 4  ;;  %v7225_v51 = vrot.slane %v7223_v37, 4  ;;  %v7441_v32 = vld [vmem:[#allocation3 + $0xb8] sm:$0xf] }
 0x4c0   : > { %10140 = vmatmul.mubr.bf16.gmra.mrb[28].mxu0 %v11278_v19  ;;  %v7199_v19 = vshrl.u32 %v6919_v52, 16  ;;  %v7247_v2 = vshrl.u32 %v6925_v62, 16  ;;  %v7256_v44 = vshll.u32 %v6926_v5, 16  ;;  %v7587_v53 = vrot.slane %v15329_v11, 5  ;;  %v6927_v37 = vld [vmem:[#allocation3 + $0xb0] sm:$0x1] }
 0x4c1   : > { %10149 = vmatprep.mubr.bf16.mxu0 %v11311_v38  ;;  %10259 = vmatpush1.bf16.msra.mxu0 %v12588_v4  ;;  %v7194_v4 = vshll.u32 %v6918_v25, 16  ;;  %v7202_v38 = vshll.u32 %v6919_v52, 16  ;;  %v7574_v25 = vsel %vm13361_vm0, %v11298_v59, %v7573_v63  ;;  %v7238_v52 = vrot.slane %v7236_v28, 4  ;;  %v7437_v28 = vld [vmem:[#allocation3 + $0xa8] sm:$0xe] }
 0x4c2   : > { %10260 = vmatprep.subr.bf16.mxu0 %v12593_v22  ;;  %v7181_v22 = vor.u32 %v7180_v29, %v7177_v54  ;;  %v11314_v56 = vcombine.low %v7574_v25, %v7577_v33  ;;  %v6924_v54 = vld [vmem:[#allocation3 + $0xa4] sm:$0x1]  ;;  %v15327_v29 = vrot.slane %v7232_v41, 5  ;;  %v15350_v0 = vrot.slane %v7256_v44, 5 }
 0x4c3   : > { %v7196_v36 = vrot.slane %v7194_v4, 5  ;;  %v7204_v27 = vrot.slane %v7202_v38, 5  ;;  %v7250_v4 = vshll.u32 %v6925_v62, 16 }
 0x4c5   : > { %10261 = vmatpush1.bf16.msra.mxu0 %v12591_v34  ;;  %v7201_v34 = vrot.slane %v7199_v19, 4  ;;  %v7197_v31 = vsel %vm12940_vm8, %v7192_v10, %v7196_v36  ;;  %v7583_v19 = vrot.slane %v7436_v8, 5  ;;  %v11299_v10 = vrot.slane %v7434_v57, 9  ;;  %v7439_v36 = vld [vmem:[#allocation3 + $0xb0] sm:$0x1] }
 0x4c6   : > { %10423 = vmatprep.subr.bf16.mxu0 %v12597_v14  ;;  %v7182_v14 = vrot.slane %v7181_v22, 4  ;;  %v7260_v22 = vshrl.u32 %v6926_v5, 16  ;;  %v7590_v25 = vrot.slane %v7439_v36, 5  ;;  %v7594_v8 = vrot.slane %v7441_v32, 5 }
 0x4c7   : > { %v7584_v20 = vsel %vm13361_vm0, %v7582_v13, %v7583_v19  ;;  %v11300_v57 = vrot.slane %v7437_v28, 9 }
 0x4c8   : > { %10150 = vmatmul.mubr.bf16.gmra.mrb[32].mxu0 %v11279_v16  ;;  %v7205_v16 = vor.u32 %v7204_v27, %v7201_v34  ;;  %v7187_v46 = vsel %vm12940_vm8, %v7182_v14, %v15292_v7  ;;  %v7220_v7 = vrot.slane %v7218_v18, 5  ;;  %v7249_v34 = vrot.slane %v7247_v2, 4 }
 0x4c9   : > { %10159 = vmatprep.mubr.bf16.mxu0 %v11312_v12  ;;  %v7226_v12 = vshll.u32 %v6922_v43, 16  ;;  %v11281_v9 = vcombine.low %v7187_v46, %v7197_v31  ;;  %v7252_v27 = vrot.slane %v7250_v4, 5  ;;  %v7581_v14 = vsel %vm13361_vm0, %v11299_v10, %v7580_v35  ;;  %v6929_v31 = vld [vmem:[#allocation3 + $0xb8] sm:$0xf]  ;;  %v7440_v4 = vld [vmem:[#allocation3 + $0xb4] sm:$0xe] }
 0x4ca   : > { %v7206_v17 = vrot.slane %v7205_v16, 4  ;;  %v7221_v40 = vsel %vm12940_vm8, %v7216_v6, %v7220_v7  ;;  %v7262_v43 = vrot.slane %v7260_v22, 4  ;;  %v11315_v59 = vcombine.low %v7581_v14, %v7584_v20  ;;  %v6932_v10 = vld [vmem:[#allocation3 + $0xc4] sm:$0xf] }
 0x4cb   : > { %v7228_v50 = vrot.slane %v7226_v12, 5  ;;  %v7589_v16 = vrot.slane %v7587_v53, 4  ;;  %v7253_v46 = vor.u32 %v7252_v27, %v7249_v34  ;;  %v7280_v12 = vshll.u32 %v6929_v31, 16  ;;  %v6930_v34 = vld [vmem:[#allocation3 + $0xbc] sm:$0x1] }
 0x4cc   : > { %v7211_v3 = vsel %vm12940_vm8, %v7206_v17, %v15304_v39  ;;  %v6928_v39 = vld [vmem:[#allocation3 + $0xb4] sm:$0xf]  ;;  %v7263_v35 = vor.u32 %v7262_v43, %v15350_v0  ;;  %v7442_v17 = vld [vmem:[#allocation3 + $0xbc] sm:$0x1]  ;;  %v7596_v19 = vrot.slane %v7594_v8, 4 }
 0x4cd   : > { %v7229_v23 = vor.u32 %v7228_v50, %v7225_v51  ;;  %v11282_v48 = vcombine.low %v7211_v3, %v7221_v40  ;;  %v7274_v6 = vshll.u32 %v6928_v39, 16  ;;  %v7254_v5 = vrot.slane %v7253_v46, 4  ;;  %v6931_v3 = vld [vmem:[#allocation3 + $0xc0] sm:$0xf] }
 0x4ce   : > { %v15308_v55 = vpop.f32.mrb[196].mxu1  ;;  %v15360_v7 = vrot.slane %v7280_v12, 5  ;;  %v7588_v50 = vsel %vm13361_vm0, %v11300_v57, %v7587_v53  ;;  %v7264_v2 = vrot.slane %v7263_v35, 4  ;;  %v7597_v20 = vrot.slane %v7442_v17, 5 }
 0x4cf   : > { %v15310_v21 = vpop.f32.mrb[197].mxu1  ;;  %v7230_v18 = vrot.slane %v7229_v23, 4  ;;  %v7276_v40 = vrot.slane %v7274_v6, 5  ;;  %v7259_v53 = vsel %vm12940_vm8, %v7254_v5, %v15350_v0  ;;  %v11301_v23 = vrot.slane %v7440_v4, 9  ;;  %v6933_v4 = vld [vmem:[#allocation3 + $0xc8] sm:$0x1] }
 0x4d0   : > { %10160 = vmatmul.mubr.bf16.gmra.mrb[36].mxu0 %v11280_v1  ;;  %v15312_v24 = vpop.f32.mrb[198].mxu1  ;;  %v7239_v1 = vor.u32 %v7238_v52, %v15327_v29  ;;  %v7266_v52 = vshll.u32 %v6927_v37, 16  ;;  %v7598_v43 = vsel %vm13361_vm0, %v7596_v19, %v7597_v20  ;;  %v7295_v28 = vshrl.u32 %v6931_v3, 16  ;;  %v7835_v19 = vld [vmem:[#allocation3 + $0x28] sm:$0xf] }
 0x4d1   : > { %10169 = vmatprep.mubr.bf16.mxu0 %v11313_v45  ;;  %v15316_v60 = vpop.f32.mrb[199].mxu1  ;;  %v7242_v45 = vshll.u32 %v6924_v54, 16  ;;  %v7591_v54 = vsel %vm13361_vm0, %v7589_v16, %v7590_v25  ;;  %v7235_v11 = vsel %vm12940_vm8, %v7230_v18, %v15327_v29  ;;  %v7298_v16 = vshll.u32 %v6931_v3, 16 }
 0x4d2   : > { %v7240_v33 = vrot.slane %v7239_v1, 4  ;;  %v11316_v44 = vcombine.low %v7588_v50, %v7591_v54  ;;  %v15364_v1 = vld [vmem:[#allocation3 + $0xc4] sm:$0xf]  ;;  %v7268_v29 = vrot.slane %v7266_v52, 5  ;;  %v7595_v18 = vsel %vm13361_vm0, %v11301_v23, %v7594_v8 }
 0x4d3   : > { %v7244_v41 = vrot.slane %v7242_v45, 5  ;;  %v7290_v37 = vshll.u32 %v6930_v34, 16  ;;  %v11317_v25 = vcombine.low %v7595_v18, %v7598_v43  ;;  %v7297_v5 = vrot.slane %v7295_v28, 4  ;;  %v7834_v23 = vld [vmem:[#allocation3 + $0x24] sm:$0xf] }
 0x4d4   : > { %v7269_v14 = vsel %vm12940_vm8, %v7264_v2, %v7268_v29  ;;  %v7300_v17 = vrot.slane %v7298_v16, 5  ;;  %v7314_v34 = vshll.u32 %v6933_v4, 16  ;;  %v7904_v16 = vshrl.u32 %v7834_v23, 16 }
 0x4d5   : > { %v7245_v62 = vsel %vm12940_vm8, %v7240_v33, %v7244_v41  ;;  %v7308_v33 = vshrl.u32 %v6932_v10, 16  ;;  %v7601_v41 = vrot.slane %v15364_v1, 5 }
 0x4d6   : > { %v11283_v51 = vcombine.low %v7235_v11, %v7245_v62  ;;  %v7445_v62 = vld [vmem:[#allocation3 + $0xc8] sm:$0x1] }
 0x4d7   : > { %v7310_v6 = vrot.slane %v7308_v33, 4  ;;  %v7603_v11 = vrot.slane %v7601_v41, 4  ;;  %v7604_v2 = vrot.slane %v7445_v62, 5 }
 0x4d8   : > { %10170 = vmatmul.mubr.bf16.gmra.mrb[40].mxu0 %v11281_v9  ;;  %v15331_v63 = vpop.f32.mrb[200].mxu1  ;;  %v7284_v9 = vshrl.u32 %v6929_v31, 16 }
 0x4d9   : > { %10179 = vmatprep.mubr.bf16.mxu0 %v11314_v56  ;;  %v15333_v38 = vpop.f32.mrb[201].mxu1  ;;  %v7271_v56 = vshrl.u32 %v6928_v39, 16  ;;  %v7831_v39 = vld [vmem:[#allocation3 + $0x18] sm:$0xf]  ;;  %v7605_v3 = vsel %vm13361_vm0, %v7603_v11, %v7604_v2  ;;  %v7836_v11 = vld [vmem:[#allocation3 + $0x2c] sm:$0x1] }
 0x4da   : > { %v15338_v61 = vpop.f32.mrb[202].mxu1  ;;  %v7286_v13 = vrot.slane %v7284_v9, 4  ;;  %v11284_v9 = vcombine.low %v7259_v53, %v7269_v14  ;;  %v7880_v57 = vshrl.u32 %v7831_v39, 16  ;;  %v7883_v54 = vshll.u32 %v7831_v39, 16 }
 0x4db   : > { %v15343_v47 = vpop.f32.mrb[203].mxu1  ;;  %v7273_v22 = vrot.slane %v7271_v56, 4  ;;  %v7301_v53 = vor.u32 %v7300_v17, %v7297_v5  ;;  %v7917_v14 = vshrl.u32 %v7835_v19, 16  ;;  %v7907_v39 = vshll.u32 %v7834_v23, 16  ;;  %v7841_v23 = vld [vmem:[#allocation3 + $0x40] sm:$0xf] }
 0x4dc   : > { %v7287_v27 = vor.u32 %v7286_v13, %v15360_v7  ;;  %v7292_v13 = vrot.slane %v7290_v37, 5  ;;  %v7882_v1 = vrot.slane %v7880_v57, 4  ;;  %v7906_v5 = vrot.slane %v7904_v16, 4  ;;  %v12595_v16 = vld [vmem:[%s15858_s5 + $0x400] ss:$8 sps:$4 sm:$0xff]  }
 0x4dd   : > { %v7277_v0 = vor.u32 %v7276_v40, %v7273_v22  ;;  %v7833_v40 = vld [vmem:[#allocation3 + $0x20] sm:$0x1]  ;;  %v7302_v37 = vrot.slane %v7301_v53, 4  ;;  %v7909_v17 = vrot.slane %v7907_v39, 5 }
 0x4de   : > { %v7288_v35 = vrot.slane %v7287_v27, 4  ;;  %v7899_v33 = vshll.u32 %v7833_v40, 16 }
 0x4df   : > { %v7278_v52 = vrot.slane %v7277_v0, 4 }
 0x4e0   : > { %10180 = vmatmul.mubr.bf16.gmra.mrb[44].mxu0 %v11282_v48  ;;  %v7832_v48 = vld [vmem:[#allocation3 + $0x1c] sm:$0xf] }
 0x4e1   : > { %10189 = vmatprep.mubr.bf16.mxu0 %v11315_v59  ;;  %v7304_v59 = vshll.u32 %v6932_v10, 16  ;;  %v7889_v46 = vshll.u32 %v7832_v48, 16  ;;  %v7893_v12 = vshrl.u32 %v7832_v48, 16  ;;  %v7885_v10 = vrot.slane %v7883_v54, 5 }
 0x4e2   : > { %v7283_v29 = vsel %vm12940_vm8, %v7278_v52, %v15360_v7  ;;  %v7913_v48 = vshll.u32 %v7835_v19, 16 }
 0x4e3   : > { %v15385_v56 = vrot.slane %v7304_v59, 5  ;;  %v7891_v8 = vrot.slane %v7889_v46, 5  ;;  %v7895_v50 = vrot.slane %v7893_v12, 4  ;;  %v7886_v28 = vor.u32 %v7885_v10, %v7882_v1 }
 0x4e4   : > { %v7316_v12 = vrot.slane %v7314_v34, 5  ;;  %v7910_v1 = vor.u32 %v7909_v17, %v7906_v5  ;;  %v7842_v17 = vld [vmem:[#allocation3 + $0x44] sm:$0x1] }
 0x4e5   : > { %v7311_v22 = vor.u32 %v7310_v6, %v15385_v56  ;;  %v7896_v27 = vor.u32 %v7895_v50, %v7891_v8  ;;  %v7838_v6 = vld [vmem:[#allocation3 + $0x34] sm:$0xf]  ;;  %v7887_v52 = vrot.slane %v7886_v28, 4  ;;  %v7965_v28 = vshrl.u32 %v7841_v23, 16 }
 0x4e6   : > { %v7937_v4 = vshll.u32 %v7838_v6, 16  ;;  %v7941_v19 = vshrl.u32 %v7838_v6, 16  ;;  %v7911_v34 = vrot.slane %v7910_v1, 4  ;;  %v7843_v1 = vld [vmem:[#allocation3 + $0x48] sm:$0xf] }
 0x4e7   : > { %v15366_v45 = vpop.f32.mrb[204].mxu1  ;;  %v7312_v0 = vrot.slane %v7311_v22, 4  ;;  %v7923_v22 = vshll.u32 %v7836_v11, 16  ;;  %v7892_v40 = vsel %vm12940_vm8, %v7887_v52, %v7891_v8  ;;  %v12600_v52 = vld [vmem:[%s15858_s5 + $0x410] ss:$8 sps:$4 sm:$0xff]  }
 0x4e8   : > { %10190 = vmatmul.mubr.bf16.gmra.mrb[48].mxu0 %v11283_v51  ;;  %v15371_v36 = vpop.f32.mrb[205].mxu1  ;;  %v7443_v51 = vld [vmem:[#allocation3 + $0xc0] sm:$0xe]  ;;  %v7939_v53 = vrot.slane %v7937_v4, 5 }
 0x4e9   : > { %10199 = vmatprep.mubr.bf16.mxu0 %v11316_v44  ;;  %v15378_v31 = vpop.f32.mrb[206].mxu1  ;;  %v7293_v44 = vsel %vm12940_vm8, %v7288_v35, %v7292_v13  ;;  %v11302_v20 = vrot.slane %v7443_v51, 9  ;;  %v7919_v35 = vrot.slane %v7917_v14, 4  ;;  %v7317_v54 = vsel %vm12940_vm8, %v7312_v0, %v7316_v12  ;;  %v7837_v51 = vld [vmem:[#allocation3 + $0x30] sm:$0xf] }
 0x4ea   : > { %v15380_v32 = vpop.f32.mrb[207].mxu1  ;;  %v11285_v43 = vcombine.low %v7283_v29, %v7293_v44  ;;  %v7307_v13 = vsel %vm12940_vm8, %v7302_v37, %v15385_v56  ;;  %v7928_v10 = vshrl.u32 %v7837_v51, 16  ;;  %v7931_v29 = vshll.u32 %v7837_v51, 16 }
 0x4eb   : > { %v7602_v59 = vsel %vm13361_vm0, %v11302_v20, %v7601_v41  ;;  %v7901_v41 = vrot.slane %v7899_v33, 5  ;;  %v11286_v44 = vcombine.low %v7307_v13, %v7317_v54  ;;  %v7943_v56 = vrot.slane %v7941_v19, 4 }
 0x4ec   : > { %v11318_v7 = vcombine.low %v7602_v59, %v7605_v3  ;;  %v7930_v14 = vrot.slane %v7928_v10, 4  ;;  %v7840_v59 = vld [vmem:[#allocation3 + $0x3c] sm:$0xf]  ;;  %v7961_v0 = vshll.u32 %v7841_v23, 16  ;;  %v7967_v13 = vrot.slane %v7965_v28, 4 }
 0x4ed   : > { %v7944_v8 = vor.u32 %v7943_v56, %v7939_v53  ;;  %v7971_v56 = vshll.u32 %v7842_v17, 16  ;;  %v12605_v23 = vld [vmem:[%s15858_s5 + $0x420] ss:$8 sps:$4 sm:$0xff]   ;;  %v7846_v17 = vld [vmem:[#allocation3 + $0x54] sm:$0xf] }
 0x4ef   : > { %v7945_v5 = vrot.slane %v7944_v8, 4 }
 0x4f0   : > { %10200 = vmatmul.mubr.bf16.gmra.mrb[52].mxu0 %v11284_v9  ;;  %v7897_v9 = vrot.slane %v7896_v27, 4  ;;  %v7925_v27 = vrot.slane %v7923_v22, 5 }
 0x4f1   : > { %10209 = vmatprep.mubr.bf16.mxu0 %v11317_v25  ;;  %v7915_v25 = vrot.slane %v7913_v48, 5  ;;  %v7839_v48 = vld [vmem:[#allocation3 + $0x38] sm:$0x1] }
 0x4f2   : > { %v7902_v50 = vsel %vm12940_vm8, %v7897_v9, %v7901_v41  ;;  %v7947_v39 = vshll.u32 %v7839_v48, 16  ;;  %v12602_v9 = vld [vmem:[%s15858_s5 + $0x414] ss:$8 sps:$4 sm:$0xff]   ;;  %v7955_v41 = vshll.u32 %v7840_v59, 16 }
 0x4f3   : > { %v7920_v2 = vor.u32 %v7919_v35, %v7915_v25  ;;  %v11335_v20 = vcombine.low %v7892_v40, %v7902_v50  ;;  %v7916_v37 = vsel %vm12940_vm8, %v7911_v34, %v7915_v25  ;;  %v7952_v35 = vshrl.u32 %v7840_v59, 16  ;;  %v7844_v50 = vld [vmem:[#allocation3 + $0x4c] sm:$0xf]  ;;  %v12598_v34 = vld [vmem:[#allocation3 + $0x24] sm:$0xff]  }
 0x4f4   : > { %v15431_v25 = vrot.slane %v7961_v0, 5  ;;  %v7957_v40 = vrot.slane %v7955_v41, 5  ;;  %v12612_v59 = vld [vmem:[%s15858_s5 + $0x434] ss:$8 sps:$4 sm:$0xff]  }
 0x4f5   : > { %v7921_v3 = vrot.slane %v7920_v2, 4  ;;  %v12607_v2 = vld [vmem:[%s15858_s5 + $0x424] ss:$8 sps:$4 sm:$0xff]   ;;  %v7954_v22 = vrot.slane %v7952_v35, 4 }
 0x4f6   : > { %v15397_v18 = vpop.f32.mrb[208].mxu1 }
 0x4f7   : > { %v15399_v46 = vpop.f32.mrb[209].mxu1  ;;  %v7926_v33 = vsel %vm12940_vm8, %v7921_v3, %v7925_v27  ;;  %v7989_v3 = vshrl.u32 %v7844_v50, 16  ;;  %v7958_v48 = vor.u32 %v7957_v40, %v7954_v22  ;;  %v12615_v22 = vld [vmem:[%s15858_s5 + $0x440] ss:$8 sps:$4 sm:$0xff]  }
 0x4f8   : > { %10210 = vmatmul.mubr.bf16.gmra.mrb[56].mxu0 %v11285_v43  ;;  %v15401_v62 = vpop.f32.mrb[210].mxu1  ;;  %v7933_v43 = vrot.slane %v7931_v29, 5  ;;  %v11336_v54 = vcombine.low %v7916_v37, %v7926_v33  ;;  %v7968_v29 = vor.u32 %v7967_v13, %v15431_v25  ;;  %v12599_v40 = vld [vmem:[#allocation3 + $0x30] sm:$0xff]  }
 0x4f9   : > { %10219 = vmatprep.mubr.bf16.mxu0 %v11318_v7  ;;  %v15403_v57 = vpop.f32.mrb[211].mxu1  ;;  %v12594_v7 = vld [vmem:[#allocation3 + $0x18] sm:$0xff]   ;;  %v7959_v41 = vrot.slane %v7958_v48, 4 }
 0x4fa   : > { %v7934_v12 = vor.u32 %v7933_v43, %v7930_v14  ;;  %v7976_v14 = vshrl.u32 %v7843_v1, 16  ;;  %v7979_v43 = vshll.u32 %v7843_v1, 16  ;;  %v7969_v28 = vrot.slane %v7968_v29, 4 }
 0x4fb   : > { %v7964_v1 = vsel %vm12940_vm8, %v7959_v41, %v15431_v25  ;;  %v8000_v29 = vshrl.u32 %v7846_v17, 16  ;;  %v7848_v41 = vld [vmem:[#allocation3 + $0x5c] sm:$0x1] }
 0x4fc   : > { %v7935_v19 = vrot.slane %v7934_v12, 4  ;;  %v12610_v12 = vld [vmem:[%s15858_s5 + $0x430] ss:$8 sps:$4 sm:$0xff]  }
 0x4fe   : > { %v7940_v27 = vsel %vm12940_vm8, %v7935_v19, %v7939_v53  ;;  %v7847_v53 = vld [vmem:[#allocation3 + $0x58] sm:$0xf] }
 0x4ff   : > { %v8013_v19 = vshrl.u32 %v7847_v53, 16 }
 0x500   : > { %10220 = vmatmul.mubr.bf16.gmra.mrb[60].mxu0 %v11286_v44  ;;  %v7949_v44 = vrot.slane %v7947_v39, 5 }
 0x501   : > { %10262 = vmatprep.mubr.bf16.mxu0 %v11335_v20  ;;  %v7985_v20 = vshll.u32 %v7844_v50, 16 }
 0x502   : > { %v7950_v10 = vsel %vm12940_vm8, %v7945_v5, %v7949_v44  ;;  %v7981_v5 = vrot.slane %v7979_v43, 5  ;;  %v7849_v43 = vld [vmem:[#allocation3 + $0x60] sm:$0xf] }
 0x503   : > { %v11337_v8 = vcombine.low %v7940_v27, %v7950_v10  ;;  %v15455_v39 = vrot.slane %v7985_v20, 5  ;;  %v8003_v20 = vshll.u32 %v7846_v17, 16 }
 0x506   : > { %v15424_v6 = vpop.f32.mrb[212].mxu1 }
 0x507   : > { %v15429_v11 = vpop.f32.mrb[213].mxu1 }
 0x508   : > { %10263 = vmatmul.mubr.bf16.vlgmr.msra.gmra.mrb[0].mxu0 %v12594_v7  ;;  %v15433_v51 = vpop.f32.mrb[214].mxu1  ;;  %v7991_v7 = vrot.slane %v7989_v3, 4  ;;  %v12622_v3 = vld [vmem:[%s15858_s5 + $0x454] ss:$8 sps:$4 sm:$0xff]  }
 0x509   : > { %10272 = vmatprep.mubr.bf16.mxu0 %v11336_v54  ;;  %10424 = vmatpush1.bf16.msra.mxu0 %v12595_v16  ;;  %v15438_v4 = vpop.f32.mrb[215].mxu1  ;;  %v7845_v16 = vld [vmem:[#allocation3 + $0x50] sm:$0x1]  ;;  %v7973_v54 = vrot.slane %v7971_v56, 5 }
 0x50a   : > { %10425 = vmatprep.subr.bf16.mxu0 %v12602_v9  ;;  %v12617_v9 = vld [vmem:[%s15858_s5 + $0x444] ss:$8 sps:$4 sm:$0xff]   ;;  %v7992_v50 = vor.u32 %v7991_v7, %v15455_v39  ;;  %v7995_v44 = vshll.u32 %v7845_v16, 16 }
 0x50b   : > { %v7974_v13 = vsel %vm12940_vm8, %v7969_v28, %v7973_v54  ;;  %v12620_v28 = vld [vmem:[%s15858_s5 + $0x450] ss:$8 sps:$4 sm:$0xff]  }
 0x50c   : > { %v7993_v27 = vrot.slane %v7992_v50, 4  ;;  %v8027_v50 = vshll.u32 %v7849_v43, 16 }
 0x50d   : > { %10426 = vmatpush1.bf16.msra.mxu0 %v12600_v52  ;;  %v7978_v52 = vrot.slane %v7976_v14, 4  ;;  %v8015_v14 = vrot.slane %v8013_v19, 4  ;;  %v12603_v19 = vld [vmem:[#allocation3 + $0x3c] sm:$0xff]  }
 0x50e   : > { %10427 = vmatprep.subr.bf16.mxu0 %v12607_v2  ;;  %v15451_v33 = vpop.f32.mrb[216].mxu1  ;;  %v8009_v2 = vshll.u32 %v7847_v53, 16  ;;  %v8002_v53 = vrot.slane %v8000_v29, 4 }
 0x50f   : > { %v15453_v0 = vpop.f32.mrb[217].mxu1  ;;  %v7982_v10 = vor.u32 %v7981_v5, %v7978_v52 }
 0x510   : > { %10273 = vmatmul.mubr.bf16.gmra.mrb[4].mxu0 %v12598_v34  ;;  %v15457_v37 = vpop.f32.mrb[218].mxu1  ;;  %v15483_v48 = vrot.slane %v8009_v2, 5  ;;  %v12625_v2 = vld [vmem:[%s15858_s5 + $0x460] ss:$8 sps:$4 sm:$0xff]  }
 0x511   : > { %10282 = vmatprep.mubr.bf16.mxu0 %v11337_v8  ;;  %10428 = vmatpush1.bf16.msra.mxu0 %v12605_v23  ;;  %v15465_v35 = vpop.f32.mrb[219].mxu1  ;;  %v11338_v23 = vcombine.low %v7964_v1, %v7974_v13  ;;  %v7850_v8 = vld [vmem:[#allocation3 + $0x64] sm:$0xf]  ;;  %v7983_v7 = vrot.slane %v7982_v10, 4  ;;  %v8024_v13 = vshrl.u32 %v7849_v43, 16 }
 0x512   : > { %10429 = vmatprep.subr.bf16.mxu0 %v12612_v59  ;;  %v7997_v59 = vrot.slane %v7995_v44, 5  ;;  %v8016_v52 = vor.u32 %v8015_v14, %v15483_v48  ;;  %v8033_v5 = vshll.u32 %v7850_v8, 16  ;;  %v8037_v17 = vshrl.u32 %v7850_v8, 16  ;;  %v12632_v1 = vld [vmem:[%s15858_s5 + $0x474] ss:$8 sps:$4 sm:$0xff]  }
 0x513   : > { %v7988_v44 = vsel %vm12940_vm8, %v7983_v7, %v15455_v39  ;;  %v7853_v14 = vld [vmem:[#allocation3 + $0x70] sm:$0xf]  ;;  %v8026_v39 = vrot.slane %v8024_v13, 4  ;;  %v12630_v8 = vld [vmem:[%s15858_s5 + $0x470] ss:$8 sps:$4 sm:$0xff]   ;;  %v12604_v13 = vld [vmem:[#allocation3 + $0x48] sm:$0xff]  }
 0x514   : > { %v7998_v54 = vsel %vm12940_vm8, %v7993_v27, %v7997_v59  ;;  %v8039_v27 = vrot.slane %v8037_v17, 4  ;;  %v8029_v59 = vrot.slane %v8027_v50, 5 }
 0x515   : > { %10430 = vmatpush1.bf16.msra.mxu0 %v12610_v12  ;;  %v8005_v12 = vrot.slane %v8003_v20, 5  ;;  %v11339_v29 = vcombine.low %v7988_v44, %v7998_v54 }
 0x516   : > { %10431 = vmatprep.subr.bf16.mxu0 %v12617_v9  ;;  %v15479_v56 = vpop.f32.mrb[220].mxu1  ;;  %v12627_v9 = vld [vmem:[%s15858_s5 + $0x464] ss:$8 sps:$4 sm:$0xff]   ;;  %v8030_v17 = vor.u32 %v8029_v59, %v8026_v39  ;;  %v7856_v59 = vld [vmem:[#allocation3 + $0x7c] sm:$0xf] }
 0x517   : > { %v15481_v34 = vpop.f32.mrb[221].mxu1 }
 0x518   : > { %10283 = vmatmul.mubr.bf16.gmra.mrb[8].mxu0 %v12599_v40  ;;  %v15485_v25 = vpop.f32.mrb[222].mxu1  ;;  %v8019_v40 = vshll.u32 %v7848_v41, 16  ;;  %v8031_v39 = vrot.slane %v8030_v17, 4 }
 0x519   : > { %10292 = vmatprep.mubr.bf16.mxu0 %v11338_v23  ;;  %10432 = vmatpush1.bf16.msra.mxu0 %v12615_v22  ;;  %v15490_v16 = vpop.f32.mrb[223].mxu1  ;;  %v8006_v22 = vor.u32 %v8005_v12, %v8002_v53  ;;  %v8035_v23 = vrot.slane %v8033_v5, 5  ;;  %v7851_v12 = vld [vmem:[#allocation3 + $0x68] sm:$0x1]  ;;  %v8061_v5 = vshrl.u32 %v7853_v14, 16 }
 0x51a   : > { %10433 = vmatprep.subr.bf16.mxu0 %v12622_v3  ;;  %v8017_v3 = vrot.slane %v8016_v52, 4  ;;  %v8021_v53 = vrot.slane %v8019_v40, 5  ;;  %v8057_v52 = vshll.u32 %v7853_v14, 16 }
 0x51b   : > { %v8007_v7 = vrot.slane %v8006_v22, 4  ;;  %v8040_v54 = vor.u32 %v8039_v27, %v8035_v23  ;;  %v8063_v27 = vrot.slane %v8061_v5, 4  ;;  %v12608_v5 = vld [vmem:[#allocation3 + $0x54] sm:$0xff]  }
 0x51c   : > { %v8022_v41 = vsel %vm12940_vm8, %v8017_v3, %v8021_v53  ;;  %v8059_v3 = vrot.slane %v8057_v52, 5  ;;  %v8036_v52 = vsel %vm12940_vm8, %v8031_v39, %v8035_v23 }
 0x51d   : > { %10434 = vmatpush1.bf16.msra.mxu0 %v12620_v28  ;;  %v8012_v50 = vsel %vm12940_vm8, %v8007_v7, %v15483_v48 }
 0x51e   : > { %10435 = vmatprep.subr.bf16.mxu0 %v12627_v9  ;;  %v15507_v10 = vpop.f32.mrb[224].mxu1  ;;  %v7852_v9 = vld [vmem:[#allocation3 + $0x6c] sm:$0xf]  ;;  %v11340_v40 = vcombine.low %v8012_v50, %v8022_v41  ;;  %v8064_v50 = vor.u32 %v8063_v27, %v8059_v3 }
 0x51f   : > { %v15509_v20 = vpop.f32.mrb[225].mxu1  ;;  %v8051_v44 = vshll.u32 %v7852_v9, 16 }
 0x520   : > { %15922 = vst [vmem:[#allocation19_spill] sm:$0xff] %v15509_v20  ;;  %10293 = vmatmul.mubr.bf16.gmra.mrb[12].mxu0 %v12603_v19  ;;  %v15511_v43 = vpop.f32.mrb[226].mxu1  ;;  %v8048_v19 = vshrl.u32 %v7852_v9, 16  ;;  %v7855_v9 = vld [vmem:[#allocation3 + $0x78] sm:$0xf] }
 0x521   : > { %15923 = vst [vmem:[#allocation21_spill] sm:$0xff] %v15511_v43  ;;  %10302 = vmatprep.mubr.bf16.mxu0 %v11339_v29  ;;  %10436 = vmatpush1.bf16.msra.mxu0 %v12625_v2  ;;  %v15516_v28 = vpop.f32.mrb[227].mxu1  ;;  %v8043_v2 = vshll.u32 %v7851_v12, 16  ;;  %v8041_v29 = vrot.slane %v8040_v54, 4  ;;  %v8053_v53 = vrot.slane %v8051_v44, 5  ;;  %v8085_v54 = vshrl.u32 %v7856_v59, 16 }
 0x522   : > { %15924 = vst [vmem:[#allocation14_spill] sm:$0xff] %v15516_v28  ;;  %10437 = vmatprep.subr.bf16.mxu0 %v12632_v1  ;;  %v8050_v7 = vrot.slane %v8048_v19, 4  ;;  %v7854_v12 = vld [vmem:[#allocation3 + $0x74] sm:$0x1]  ;;  %v8065_v44 = vrot.slane %v8064_v50, 4 }
 0x523   : > { %v8045_v48 = vrot.slane %v8043_v2, 5  ;;  %v8067_v17 = vshll.u32 %v7854_v12, 16 }
 0x525   : > { %10438 = vmatpush1.bf16.msra.mxu0 %v12630_v8  ;;  %v8046_v41 = vsel %vm12940_vm8, %v8041_v29, %v8045_v48  ;;  %v8087_v29 = vrot.slane %v8085_v54, 4  ;;  %v7859_v48 = vld [vmem:[#allocation3 + $0x88] sm:$0xf]  ;;  %v12609_v54 = vld [vmem:[#allocation3 + $0x60] sm:$0xff]  }
 0x526   : > { %v15523_v22 = vpop.f32.mrb[228].mxu1  ;;  %v11341_v2 = vcombine.low %v8036_v52, %v8046_v41  ;;  %v8109_v50 = vshrl.u32 %v7859_v48, 16 }
 0x527   : > { %15925 = vst [vmem:[#allocation12_spill] sm:$0xff] %v15523_v22  ;;  %v15525_v1 = vpop.f32.mrb[229].mxu1 }
 0x528   : > { %15926 = vst [vmem:[#allocation13_spill] sm:$0xff] %v15525_v1  ;;  %10303 = vmatmul.mubr.bf16.gmra.mrb[16].mxu0 %v12604_v13  ;;  %v15527_v14 = vpop.f32.mrb[230].mxu1  ;;  %v8081_v13 = vshll.u32 %v7856_v59, 16  ;;  %v8075_v1 = vshll.u32 %v7855_v9, 16  ;;  %v7857_v59 = vld [vmem:[#allocation3 + $0x80] sm:$0x1] }
 0x529   : > { %15927 = vst [vmem:[#allocation15_spill] sm:$0xff] %v15527_v14  ;;  %10312 = vmatprep.mubr.bf16.mxu0 %v11340_v40  ;;  %v15529_v8 = vpop.f32.mrb[231].mxu1  ;;  %v8054_v40 = vor.u32 %v8053_v53, %v8050_v7  ;;  %v8072_v14 = vshrl.u32 %v7855_v9, 16  ;;  %v8069_v7 = vrot.slane %v8067_v17, 5  ;;  %v7858_v9 = vld [vmem:[#allocation3 + $0x84] sm:$0xf] }
 0x52a   : > { %15928 = vst [vmem:[#allocation16_spill] sm:$0xff] %v15529_v8  ;;  %v8083_v22 = vrot.slane %v8081_v13, 5  ;;  %v8077_v12 = vrot.slane %v8075_v1, 5  ;;  %v8091_v13 = vshll.u32 %v7857_v59, 16  ;;  %v7861_v59 = vld [vmem:[#allocation3 + $0x90] sm:$0xf] }
 0x52b   : > { %v8055_v39 = vrot.slane %v8054_v40, 4  ;;  %v8074_v53 = vrot.slane %v8072_v14, 4  ;;  %v8070_v41 = vsel %vm12940_vm8, %v8065_v44, %v8069_v7  ;;  %v8111_v44 = vrot.slane %v8109_v50, 4 }
 0x52c   : > { %v8088_v52 = vor.u32 %v8087_v29, %v8083_v22  ;;  %v8123_v50 = vshll.u32 %v7861_v59, 16 }
 0x52e   : > { %v15535_v8 = vpop.f32.mrb[232].mxu1  ;;  %v8089_v1 = vrot.slane %v8088_v52, 4 }
 0x52f   : > { %15929 = vst [vmem:[#allocation17_spill] sm:$0xff] %v15535_v8  ;;  %v15537_v19 = vpop.f32.mrb[233].mxu1  ;;  %v8099_v8 = vshll.u32 %v7858_v9, 16 }
 0x530   : > { %15930 = vst [vmem:[#allocation18_spill] sm:$0xff] %v15537_v19  ;;  %10313 = vmatmul.mubr.bf16.gmra.mrb[20].mxu0 %v12608_v5  ;;  %v15539_v27 = vpop.f32.mrb[234].mxu1  ;;  %v8105_v5 = vshll.u32 %v7859_v48, 16  ;;  %v8096_v19 = vshrl.u32 %v7858_v9, 16  ;;  %v7862_v48 = vld [vmem:[#allocation3 + $0x94] sm:$0xf] }
 0x531   : > { %15931 = vst [vmem:[#allocation20_spill] sm:$0xff] %v15539_v27  ;;  %10322 = vmatprep.mubr.bf16.mxu0 %v11341_v2  ;;  %v15541_v23 = vpop.f32.mrb[235].mxu1  ;;  %v8060_v2 = vsel %vm12940_vm8, %v8055_v39, %v8059_v3  ;;  %v8078_v27 = vor.u32 %v8077_v12, %v8074_v53  ;;  %v8093_v39 = vrot.slane %v8091_v13, 5  ;;  %v8101_v12 = vrot.slane %v8099_v8, 5  ;;  %v7860_v9 = vld [vmem:[#allocation3 + $0x8c] sm:$0x1] }
 0x532   : > { %15932 = vst [vmem:[#allocation9_spill] sm:$0xff] %v15541_v23  ;;  %v11342_v40 = vcombine.low %v8060_v2, %v8070_v41  ;;  %v8107_v17 = vrot.slane %v8105_v5, 5  ;;  %v8098_v53 = vrot.slane %v8096_v19, 4  ;;  %v8133_v52 = vshrl.u32 %v7862_v48, 16 }
 0x533   : > { %v8079_v3 = vrot.slane %v8078_v27, 4  ;;  %v8094_v41 = vsel %vm12940_vm8, %v8089_v1, %v8093_v39  ;;  %v8120_v5 = vshrl.u32 %v7861_v59, 16  ;;  %v8125_v59 = vrot.slane %v8123_v50, 5  ;;  %v7865_v39 = vld [vmem:[#allocation3 + $0xa0] sm:$0xf] }
 0x534   : > { %v8112_v2 = vor.u32 %v8111_v44, %v8107_v17  ;;  %v8135_v1 = vrot.slane %v8133_v52, 4  ;;  %v12614_v52 = vld [vmem:[#allocation3 + $0x78] sm:$0xff]  }
 0x536   : > { %v15547_v23 = vpop.f32.mrb[236].mxu1  ;;  %v8113_v8 = vrot.slane %v8112_v2, 4  ;;  %v8157_v2 = vshrl.u32 %v7865_v39, 16 }
 0x537   : > { %15933 = vst [vmem:[#allocation8_spill] sm:$0xff] %v15547_v23  ;;  %v15549_v14 = vpop.f32.mrb[237].mxu1  ;;  %v8115_v23 = vshll.u32 %v7860_v9, 16 }
 0x538   : > { %15934 = vst [vmem:[#allocation10_spill] sm:$0xff] %v15549_v14  ;;  %10323 = vmatmul.mubr.bf16.gmra.mrb[24].mxu0 %v12609_v54  ;;  %v15551_v29 = vpop.f32.mrb[238].mxu1  ;;  %v8129_v54 = vshll.u32 %v7862_v48, 16  ;;  %v12613_v14 = vld [vmem:[#allocation3 + $0x6c] sm:$0xff]   ;;  %v8122_v48 = vrot.slane %v8120_v5, 4 }
 0x539   : > { %15935 = vst [vmem:[#allocation11_spill] sm:$0xff] %v15551_v29  ;;  %10332 = vmatprep.mubr.bf16.mxu0 %v11342_v40  ;;  %v15553_v7 = vpop.f32.mrb[239].mxu1  ;;  %v8084_v40 = vsel %vm12940_vm8, %v8079_v3, %v8083_v22  ;;  %v8102_v29 = vor.u32 %v8101_v12, %v8098_v53  ;;  %v8117_v3 = vrot.slane %v8115_v23, 5  ;;  %v7863_v53 = vld [vmem:[#allocation3 + $0x98] sm:$0x1] }
 0x53a   : > { %15936 = vst [vmem:[#allocation7_spill] sm:$0xff] %v15553_v7  ;;  %v11343_v27 = vcombine.low %v8084_v40, %v8094_v41  ;;  %v8131_v13 = vrot.slane %v8129_v54, 5  ;;  %v7864_v12 = vld [vmem:[#allocation3 + $0x9c] sm:$0xf]  ;;  %v8126_v54 = vor.u32 %v8125_v59, %v8122_v48  ;;  %v8139_v5 = vshll.u32 %v7863_v53, 16 }
 0x53b   : > { %v8103_v22 = vrot.slane %v8102_v29, 4  ;;  %v8118_v9 = vsel %vm12940_vm8, %v8113_v8, %v8117_v3  ;;  %v8144_v50 = vshrl.u32 %v7864_v12, 16  ;;  %v8159_v8 = vrot.slane %v8157_v2, 4  ;;  %v7868_v59 = vld [vmem:[#allocation3 + $0xac] sm:$0xf]  ;;  %v12618_v2 = vld [vmem:[#allocation3 + $0x84] sm:$0xff]  }
 0x53c   : > { %v8136_v41 = vor.u32 %v8135_v1, %v8131_v13  ;;  %v8127_v48 = vrot.slane %v8126_v54, 4  ;;  %v7866_v53 = vld [vmem:[#allocation3 + $0xa4] sm:$0x1] }
 0x53d   : > { %v8108_v40 = vsel %vm12940_vm8, %v8103_v22, %v8107_v17  ;;  %v8141_v17 = vrot.slane %v8139_v5, 5  ;;  %v8146_v22 = vrot.slane %v8144_v50, 4  ;;  %v8163_v54 = vshll.u32 %v7866_v53, 16 }
 0x53e   : > { %v15559_v7 = vpop.f32.mrb[240].mxu1  ;;  %v11344_v29 = vcombine.low %v8108_v40, %v8118_v9 }
 0x53f   : > { %15937 = vst [vmem:[#allocation6_spill] sm:$0xff] %v15559_v7  ;;  %v15561_v19 = vpop.f32.mrb[241].mxu1  ;;  %v7874_v7 = vld [vmem:[#allocation3 + $0xc4] sm:$0xf] }
 0x540   : > { %15938 = vst [vmem:[#allocation22_spill] sm:$0xff] %v15561_v19  ;;  %10333 = vmatmul.mubr.bf16.gmra.mrb[28].mxu0 %v12613_v14  ;;  %v15563_v44 = vpop.f32.mrb[242].mxu1  ;;  %v8153_v14 = vshll.u32 %v7865_v39, 16 }
 0x541   : > { %15939 = vst [vmem:[#allocation23_spill] sm:$0xff] %v15563_v44  ;;  %10342 = vmatprep.mubr.bf16.mxu0 %v11343_v27  ;;  %v15565_v28 = vpop.f32.mrb[243].mxu1  ;;  %v8147_v27 = vshll.u32 %v7864_v12, 16  ;;  %v7867_v12 = vld [vmem:[#allocation3 + $0xa8] sm:$0xf] }
 0x542   : > { %15940 = vst [vmem:[#allocation24_spill] sm:$0xff] %v15565_v28  ;;  %v8137_v28 = vrot.slane %v8136_v41, 4  ;;  %v8155_v19 = vrot.slane %v8153_v14, 5  ;;  %v8181_v41 = vshrl.u32 %v7868_v59, 16  ;;  %v8132_v14 = vsel %vm12940_vm8, %v8127_v48, %v8131_v13 }
 0x543   : > { %v8149_v3 = vrot.slane %v8147_v27, 5 }
 0x544   : > { %v8142_v9 = vsel %vm12940_vm8, %v8137_v28, %v8141_v17  ;;  %v8160_v40 = vor.u32 %v8159_v8, %v8155_v19  ;;  %v8183_v28 = vrot.slane %v8181_v41, 4  ;;  %v7871_v17 = vld [vmem:[#allocation3 + $0xb8] sm:$0xf] }
 0x545   : > { %v11345_v5 = vcombine.low %v8132_v14, %v8142_v9 }
 0x546   : > { %v15571_v44 = vpop.f32.mrb[244].mxu1  ;;  %v8161_v27 = vrot.slane %v8160_v40, 4  ;;  %v8205_v40 = vshrl.u32 %v7871_v17, 16 }
 0x547   : > { %15941 = vst [vmem:[#allocation25_spill] sm:$0xff] %v15571_v44  ;;  %v15573_v23 = vpop.f32.mrb[245].mxu1 }
 0x548   : > { %15942 = vst [vmem:[#allocation26_spill] sm:$0xff] %v15573_v23  ;;  %10343 = vmatmul.mubr.bf16.gmra.mrb[32].mxu0 %v12614_v52  ;;  %v15575_v1 = vpop.f32.mrb[246].mxu1  ;;  %v8177_v52 = vshll.u32 %v7868_v59, 16  ;;  %v8171_v23 = vshll.u32 %v7867_v12, 16  ;;  %v7870_v59 = vld [vmem:[#allocation3 + $0xb4] sm:$0xf] }
 0x549   : > { %15943 = vst [vmem:[#allocation27_spill] sm:$0xff] %v15575_v1  ;;  %10352 = vmatprep.mubr.bf16.mxu0 %v11344_v29  ;;  %v15577_v39 = vpop.f32.mrb[247].mxu1  ;;  %v8150_v29 = vor.u32 %v8149_v3, %v8146_v22  ;;  %v8168_v1 = vshrl.u32 %v7867_v12, 16  ;;  %v8165_v22 = vrot.slane %v8163_v54, 5  ;;  %v7869_v12 = vld [vmem:[#allocation3 + $0xb0] sm:$0x1] }
 0x54a   : > { %15944 = vst [vmem:[#allocation28_spill] sm:$0xff] %v15577_v39  ;;  %v8179_v44 = vrot.slane %v8177_v52, 5  ;;  %v8173_v53 = vrot.slane %v8171_v23, 5  ;;  %v8192_v52 = vshrl.u32 %v7870_v59, 16  ;;  %v8195_v41 = vshll.u32 %v7870_v59, 16 }
 0x54b   : > { %v8151_v48 = vrot.slane %v8150_v29, 4  ;;  %v8170_v3 = vrot.slane %v8168_v1, 4  ;;  %v8166_v9 = vsel %vm12940_vm8, %v8161_v27, %v8165_v22  ;;  %v7872_v54 = vld [vmem:[#allocation3 + $0xbc] sm:$0x1] }
 0x54c   : > { %v8184_v14 = vor.u32 %v8183_v28, %v8179_v44  ;;  %v8207_v28 = vrot.slane %v8205_v40, 4  ;;  %v8194_v59 = vrot.slane %v8192_v52, 4 }
 0x54e   : > { %v15583_v39 = vpop.f32.mrb[248].mxu1  ;;  %v8185_v23 = vrot.slane %v8184_v14, 4 }
 0x54f   : > { %15945 = vst [vmem:[#allocation29_spill] sm:$0xff] %v15583_v39  ;;  %v15585_v50 = vpop.f32.mrb[249].mxu1  ;;  %v8187_v39 = vshll.u32 %v7869_v12, 16 }
 0x550   : > { %15946 = vst [vmem:[#allocation30_spill] sm:$0xff] %v15585_v50  ;;  %10353 = vmatmul.mubr.bf16.gmra.mrb[36].mxu0 %v12618_v2  ;;  %v15587_v8 = vpop.f32.mrb[250].mxu1  ;;  %v8201_v2 = vshll.u32 %v7871_v17, 16  ;;  %v12619_v50 = vld [vmem:[#allocation3 + $0x90] sm:$0xff]   ;;  %v8197_v17 = vrot.slane %v8195_v41, 5 }
 0x551   : > { %15947 = vst [vmem:[#allocation31_spill] sm:$0xff] %v15587_v8  ;;  %10362 = vmatprep.mubr.bf16.mxu0 %v11345_v5  ;;  %v15589_v13 = vpop.f32.mrb[251].mxu1  ;;  %v8156_v5 = vsel %vm12940_vm8, %v8151_v48, %v8155_v19  ;;  %v8174_v8 = vor.u32 %v8173_v53, %v8170_v3  ;;  %v8189_v48 = vrot.slane %v8187_v39, 5  ;;  %v7873_v3 = vld [vmem:[#allocation3 + $0xc0] sm:$0xf] }
 0x552   : > { %15948 = vst [vmem:[#allocation32_spill] sm:$0xff] %v15589_v13  ;;  %v11346_v29 = vcombine.low %v8156_v5, %v8166_v9  ;;  %v8203_v27 = vrot.slane %v8201_v2, 5  ;;  %v8229_v9 = vshrl.u32 %v7874_v7, 16  ;;  %v8198_v14 = vor.u32 %v8197_v17, %v8194_v59  ;;  %v7875_v59 = vld [vmem:[#allocation3 + $0xc8] sm:$0x1] }
 0x553   : > { %v8175_v19 = vrot.slane %v8174_v8, 4  ;;  %v8190_v53 = vsel %vm12940_vm8, %v8185_v23, %v8189_v48  ;;  %v8211_v2 = vshll.u32 %v7872_v54, 16  ;;  %v8216_v40 = vshrl.u32 %v7873_v3, 16 }
 0x554   : > { %v8208_v12 = vor.u32 %v8207_v28, %v8203_v27  ;;  %v8219_v5 = vshll.u32 %v7873_v3, 16  ;;  %v8199_v23 = vrot.slane %v8198_v14, 4 }
 0x555   : > { %v8180_v52 = vsel %vm12940_vm8, %v8175_v19, %v8179_v44  ;;  %v8213_v28 = vrot.slane %v8211_v2, 5  ;;  %v8218_v48 = vrot.slane %v8216_v40, 4 }
 0x556   : > { %v15595_v13 = vpop.f32.mrb[252].mxu1  ;;  %v11347_v41 = vcombine.low %v8180_v52, %v8190_v53  ;;  %v8209_v39 = vrot.slane %v8208_v12, 4  ;;  %v8235_v12 = vshll.u32 %v7875_v59, 16  ;;  %v7878_v52 = vld [vmem:[#allocation3 + $0xd4] sm:$0x1] }
 0x557   : > { %15949 = vst [vmem:[#allocation33_spill] sm:$0xff] %v15595_v13  ;;  %v15597_v1 = vpop.f32.mrb[253].mxu1 }
 0x558   : > { %15950 = vst [vmem:[#allocation34_spill] sm:$0xff] %v15597_v1  ;;  %10363 = vmatmul.mubr.bf16.gmra.mrb[40].mxu0 %v12619_v50  ;;  %v15599_v22 = vpop.f32.mrb[254].mxu1  ;;  %v8225_v50 = vshll.u32 %v7874_v7, 16  ;;  %v8231_v1 = vrot.slane %v8229_v9, 4  ;;  %v8221_v7 = vrot.slane %v8219_v5, 5  ;;  %v8214_v44 = vsel %vm12940_vm8, %v8209_v39, %v8213_v28 }
 0x559   : > { %15951 = vst [vmem:[#allocation35_spill] sm:$0xff] %v15599_v22  ;;  %10372 = vmatprep.mubr.bf16.mxu0 %v11346_v29  ;;  %v15601_v43 = vpop.f32.mrb[255].mxu1  ;;  %v12623_v22 = vld [vmem:[#allocation3 + $0x9c] sm:$0xff]   ;;  %v7876_v29 = vld [vmem:[#allocation3 + $0xcc] sm:$0xf] }
 0x55a   : > { %15952 = vst [vmem:[#allocation36_spill] sm:$0xff] %v15601_v43  ;;  %v7877_v43 = vld [vmem:[#allocation3 + $0xd0] sm:$0xf]  ;;  %v8227_v8 = vrot.slane %v8225_v50, 5  ;;  %v8240_v54 = vshrl.u32 %v7876_v29, 16  ;;  %v8243_v17 = vshll.u32 %v7876_v29, 16  ;;  %v8222_v53 = vor.u32 %v8221_v7, %v8218_v48 }
 0x55b   : > { %v8249_v3 = vshll.u32 %v7877_v43, 16  ;;  %v8253_v13 = vshrl.u32 %v7877_v43, 16  ;;  %v12624_v50 = vld [vmem:[#allocation3 + $0xa8] sm:$0xff]   ;;  %v8237_v43 = vrot.slane %v8235_v12, 5  ;;  %v8343_v12 = vld [vmem:[#allocation3 + $0x18] sm:$0xe] }
 0x55c   : > { %v8232_v19 = vor.u32 %v8231_v1, %v8227_v8  ;;  %v8242_v9 = vrot.slane %v8240_v54, 4  ;;  %v8245_v14 = vrot.slane %v8243_v17, 5  ;;  %v8223_v29 = vrot.slane %v8222_v53, 4  ;;  %v12633_v53 = vld [vmem:[#allocation3 + $0xcc] sm:$0xff]  }
 0x55d   : > { %v8251_v2 = vrot.slane %v8249_v3, 5  ;;  %v8255_v40 = vrot.slane %v8253_v13, 4  ;;  %v8259_v1 = vshll.u32 %v7878_v52, 16 }
 0x55e   : > { %v8246_v20 = vor.u32 %v8245_v14, %v8242_v9  ;;  %v8228_v28 = vsel %vm12940_vm8, %v8223_v29, %v8227_v8  ;;  %v8345_v8 = vld [vmem:[#allocation3 + $0x20] sm:$0x1]  ;;  %v15953_v9 = vmov 0   ;;  %v8346_v29 = vld [vmem:[#allocation3 + $0x24] sm:$0xe] }
 0x55f   : > { %v8256_v39 = vor.u32 %v8255_v40, %v8251_v2  ;;  %v8261_v13 = vrot.slane %v8259_v1, 5  ;;  %v8444_v14 = vrot.slane %v8345_v8, 5  ;;  %v11351_v40 = vrot.slane %v8343_v12, 9 }
 0x560   : > { %10373 = vmatmul.mubr.bf16.gmra.mrb[44].mxu0 %v12623_v22  ;;  %v8204_v22 = vsel %vm12940_vm8, %v8199_v23, %v8203_v27  ;;  %v12628_v23 = vld [vmem:[#allocation3 + $0xb4] sm:$0xff]   ;;  %v8247_v48 = vrot.slane %v8246_v20, 4 }
 0x561   : > { %10382 = vmatprep.mubr.bf16.mxu0 %v11347_v41  ;;  %v11348_v5 = vcombine.low %v8204_v22, %v8214_v44  ;;  %v8233_v41 = vrot.slane %v8232_v19, 4  ;;  %v8257_v7 = vrot.slane %v8256_v39, 4  ;;  %v12629_v44 = vld [vmem:[#allocation3 + $0xc0] sm:$0xff]   ;;  %v8344_v19 = vld [vmem:[#allocation3 + $0x1c] sm:$0xf] }
 0x562   : > { %v8252_v54 = vsel %vm12940_vm8, %v8247_v48, %v8251_v2  ;;  %v8441_v22 = vrot.slane %v8344_v19, 5  ;;  %v8350_v39 = vld [vmem:[#allocation3 + $0x34] sm:$0xf] }
 0x563   : > { %v8238_v27 = vsel %vm12940_vm8, %v8233_v41, %v8237_v43  ;;  %v8262_v17 = vsel %vm12940_vm8, %v8257_v7, %v8261_v13  ;;  %v8348_v41 = vld [vmem:[#allocation3 + $0x2c] sm:$0x1]  ;;  %v8351_v13 = vld [vmem:[#allocation3 + $0x38] sm:$0x1] }
 0x564   : > { %v11349_v59 = vcombine.low %v8228_v28, %v8238_v27  ;;  %v11350_v3 = vcombine.low %v8252_v54, %v8262_v17  ;;  %v8443_v20 = vrot.slane %v8441_v22, 4  ;;  %v8451_v1 = vrot.slane %v8348_v41, 5  ;;  %v8349_v54 = vld [vmem:[#allocation3 + $0x30] sm:$0xe]  ;;  %v8353_v17 = vld [vmem:[#allocation3 + $0x40] sm:$0xf] }
 0x565   : > { %v11352_v27 = vrot.slane %v8346_v29, 9  ;;  %v8455_v28 = vrot.slane %v8350_v39, 5  ;;  %v8355_v39 = vld [vmem:[#allocation3 + $0x48] sm:$0xe] }
 0x566   : > { %v8445_v49 = vsel %vm13361_vm0, %v8443_v20, %v8444_v14  ;;  %v8354_v20 = vld [vmem:[#allocation3 + $0x44] sm:$0x1]  ;;  %v8356_v14 = vld [vmem:[#allocation3 + $0x4c] sm:$0xf] }
 0x568   : > { %10383 = vmatmul.mubr.bf16.gmra.mrb[48].mxu0 %v12624_v50  ;;  %v8347_v50 = vld [vmem:[#allocation3 + $0x28] sm:$0xf] }
 0x569   : > { %10392 = vmatprep.mubr.bf16.mxu0 %v11348_v5  ;;  %v8448_v2 = vrot.slane %v8347_v50, 5  ;;  %v8442_v5 = vsel %vm13361_vm0, %v11351_v40, %v8441_v22  ;;  %v8462_v22 = vrot.slane %v8353_v17, 5  ;;  %v8352_v50 = vld [vmem:[#allocation3 + $0x3c] sm:$0xe]  ;;  %v8465_v40 = vrot.slane %v8354_v20, 5 }
 0x56a   : > { %v11367_v52 = vcombine.low %v8442_v5, %v8445_v49  ;;  %v11354_v49 = vrot.slane %v8352_v50, 9  ;;  %v8469_v5 = vrot.slane %v8356_v14, 5  ;;  %v8358_v17 = vld [vmem:[#allocation3 + $0x54] sm:$0xe]  ;;  %v8361_v14 = vld [vmem:[#allocation3 + $0x60] sm:$0xe] }
 0x56b   : > { %v8450_v43 = vrot.slane %v8448_v2, 4  ;;  %v8449_v48 = vsel %vm13361_vm0, %v11352_v27, %v8448_v2  ;;  %v8464_v12 = vrot.slane %v8462_v22, 4 }
 0x56c   : > { %v8471_v29 = vrot.slane %v8469_v5, 4 }
 0x56d   : > { %v8466_v2 = vsel %vm13361_vm0, %v8464_v12, %v8465_v40  ;;  %v8363_v12 = vld [vmem:[#allocation3 + $0x68] sm:$0x1]  ;;  %v8365_v40 = vld [vmem:[#allocation3 + $0x70] sm:$0xf] }
 0x570   : > { %10393 = vmatmul.mubr.bf16.gmra.mrb[52].mxu0 %v12628_v23  ;;  %v8452_v23 = vsel %vm13361_vm0, %v8450_v43, %v8451_v1  ;;  %v8357_v43 = vld [vmem:[#allocation3 + $0x50] sm:$0x1]  ;;  %v8359_v1 = vld [vmem:[#allocation3 + $0x58] sm:$0xf] }
 0x571   : > { %10402 = vmatprep.mubr.bf16.mxu0 %v11349_v59  ;;  %v11368_v7 = vcombine.low %v8449_v48, %v8452_v23  ;;  %v8457_v59 = vrot.slane %v8455_v28, 4  ;;  %v8472_v27 = vrot.slane %v8357_v43, 5  ;;  %v11355_v23 = vrot.slane %v8355_v39, 9 }
 0x572   : > { %v8476_v48 = vrot.slane %v8359_v1, 5  ;;  %v8364_v1 = vld [vmem:[#allocation3 + $0x6c] sm:$0xe] }
 0x578   : > { %10403 = vmatmul.mubr.bf16.gmra.mrb[56].mxu0 %v12629_v44  ;;  %v11353_v44 = vrot.slane %v8349_v54, 9  ;;  %v8478_v54 = vrot.slane %v8476_v48, 4 }
 0x579   : > { %10412 = vmatprep.mubr.bf16.mxu0 %v11350_v3  ;;  %v8458_v3 = vrot.slane %v8351_v13, 5 }
 0x57b   : > { %v8459_v19 = vsel %vm13361_vm0, %v8457_v59, %v8458_v3  ;;  %v8360_v59 = vld [vmem:[#allocation3 + $0x5c] sm:$0x1]  ;;  %v8362_v3 = vld [vmem:[#allocation3 + $0x64] sm:$0xf] }
 0x580   : > { %10413 = vmatmul.mubr.bf16.gmra.mrb[60].mxu0 %v12633_v53  ;;  %v8456_v53 = vsel %vm13361_vm0, %v11353_v44, %v8455_v28  ;;  %v8473_v28 = vsel %vm13361_vm0, %v8471_v29, %v8472_v27  ;;  %v8479_v44 = vrot.slane %v8360_v59, 5  ;;  %v8366_v29 = vld [vmem:[#allocation3 + $0x74] sm:$0x1]  ;;  %v8368_v27 = vld [vmem:[#allocation3 + $0x7c] sm:$0xf] }
 0x581   : > { %10455 = vmatprep.mubr.bf16.mxu0 %v15953_v9  ;;  %v11369_v8 = vcombine.low %v8456_v53, %v8459_v19  ;;  %v11356_v19 = vrot.slane %v8358_v17, 9  ;;  %v8483_v53 = vrot.slane %v8362_v3, 5  ;;  %v8367_v3 = vld [vmem:[#allocation3 + $0x78] sm:$0xe] }
 0x583   : > { %v8485_v50 = vrot.slane %v8483_v53, 4 }
 0x588   : > { %10456 = vmatmul.mubr.bf16.vlgmr.msra.gmra.mrb[0].mxu0 %v11367_v52  ;;  %v8463_v52 = vsel %vm13361_vm0, %v11354_v49, %v8462_v22  ;;  %v8480_v22 = vsel %vm13361_vm0, %v8478_v54, %v8479_v44  ;;  %v8486_v49 = vrot.slane %v8363_v12, 5  ;;  %v8369_v54 = vld [vmem:[#allocation3 + $0x80] sm:$0x1]  ;;  %v8371_v44 = vld [vmem:[#allocation3 + $0x88] sm:$0xf] }
 0x589   : > { %10465 = vmatprep.mubr.bf16.mxu0 %v15953_v9  ;;  %v11370_v41 = vcombine.low %v8463_v52, %v8466_v2  ;;  %v11357_v2 = vrot.slane %v8361_v14, 9  ;;  %v8490_v52 = vrot.slane %v8365_v40, 5  ;;  %v8370_v40 = vld [vmem:[#allocation3 + $0x84] sm:$0xe] }
 0x58b   : > { %v8492_v39 = vrot.slane %v8490_v52, 4 }
 0x590   : > { %10466 = vmatmul.mubr.bf16.gmra.mrb[4].mxu0 %v11368_v7  ;;  %v8470_v7 = vsel %vm13361_vm0, %v11355_v23, %v8469_v5  ;;  %v8487_v5 = vsel %vm13361_vm0, %v8485_v50, %v8486_v49  ;;  %v8493_v23 = vrot.slane %v8366_v29, 5  ;;  %v8372_v50 = vld [vmem:[#allocation3 + $0x8c] sm:$0x1]  ;;  %v8374_v49 = vld [vmem:[#allocation3 + $0x94] sm:$0xf] }
 0x591   : > { %10475 = vmatprep.mubr.bf16.mxu0 %v15953_v9  ;;  %v11371_v13 = vcombine.low %v8470_v7, %v8473_v28  ;;  %v11358_v28 = vrot.slane %v8364_v1, 9  ;;  %v8497_v7 = vrot.slane %v8368_v27, 5  ;;  %v8373_v27 = vld [vmem:[#allocation3 + $0x90] sm:$0xe] }
 0x593   : > { %v8499_v17 = vrot.slane %v8497_v7, 4 }
 0x598   : > { %10476 = vmatmul.mubr.bf16.gmra.mrb[8].mxu0 %v11369_v8  ;;  %v8477_v8 = vsel %vm13361_vm0, %v11356_v19, %v8476_v48  ;;  %v8494_v48 = vsel %vm13361_vm0, %v8492_v39, %v8493_v23  ;;  %v8500_v19 = vrot.slane %v8369_v54, 5  ;;  %v8375_v39 = vld [vmem:[#allocation3 + $0x98] sm:$0x1]  ;;  %v8377_v23 = vld [vmem:[#allocation3 + $0xa0] sm:$0xf] }
 0x599   : > { %10485 = vmatprep.mubr.bf16.mxu0 %v15953_v9  ;;  %v11372_v20 = vcombine.low %v8477_v8, %v8480_v22  ;;  %v11359_v22 = vrot.slane %v8367_v3, 9  ;;  %v8504_v8 = vrot.slane %v8371_v44, 5  ;;  %v8376_v44 = vld [vmem:[#allocation3 + $0x9c] sm:$0xe] }
 0x59b   : > { %v8506_v14 = vrot.slane %v8504_v8, 4 }
 0x5a0   : > { %10486 = vmatmul.mubr.bf16.gmra.mrb[12].mxu0 %v11370_v41  ;;  %v8484_v41 = vsel %vm13361_vm0, %v11357_v2, %v8483_v53  ;;  %v8501_v53 = vsel %vm13361_vm0, %v8499_v17, %v8500_v19  ;;  %v8507_v2 = vrot.slane %v8372_v50, 5  ;;  %v8378_v17 = vld [vmem:[#allocation3 + $0xa4] sm:$0x1]  ;;  %v8380_v19 = vld [vmem:[#allocation3 + $0xac] sm:$0xf] }
 0x5a1   : > { %10495 = vmatprep.mubr.bf16.mxu0 %v15953_v9  ;;  %v11373_v43 = vcombine.low %v8484_v41, %v8487_v5  ;;  %v11360_v5 = vrot.slane %v8370_v40, 9  ;;  %v8511_v41 = vrot.slane %v8374_v49, 5  ;;  %v8379_v49 = vld [vmem:[#allocation3 + $0xa8] sm:$0xe] }
 0x5a3   : > { %v8513_v1 = vrot.slane %v8511_v41, 4 }
 0x5a8   : > { %10496 = vmatmul.mubr.bf16.gmra.mrb[16].mxu0 %v11371_v13  ;;  %v8491_v13 = vsel %vm13361_vm0, %v11358_v28, %v8490_v52  ;;  %v8508_v52 = vsel %vm13361_vm0, %v8506_v14, %v8507_v2  ;;  %v8514_v28 = vrot.slane %v8375_v39, 5  ;;  %v8381_v14 = vld [vmem:[#allocation3 + $0xb0] sm:$0x1]  ;;  %v8383_v2 = vld [vmem:[#allocation3 + $0xb8] sm:$0xf] }
 0x5a9   : > { %10505 = vmatprep.mubr.bf16.mxu0 %v15953_v9  ;;  %v11374_v59 = vcombine.low %v8491_v13, %v8494_v48  ;;  %v11361_v48 = vrot.slane %v8373_v27, 9  ;;  %v8518_v13 = vrot.slane %v8377_v23, 5  ;;  %v8382_v23 = vld [vmem:[#allocation3 + $0xb4] sm:$0xe] }
 0x5ab   : > { %v8520_v3 = vrot.slane %v8518_v13, 4 }
 0x5b0   : > { %10506 = vmatmul.mubr.bf16.gmra.mrb[20].mxu0 %v11372_v20  ;;  %v8498_v20 = vsel %vm13361_vm0, %v11359_v22, %v8497_v7  ;;  %v8515_v7 = vsel %vm13361_vm0, %v8513_v1, %v8514_v28  ;;  %v8521_v22 = vrot.slane %v8378_v17, 5  ;;  %v8384_v1 = vld [vmem:[#allocation3 + $0xbc] sm:$0x1]  ;;  %v8386_v28 = vld [vmem:[#allocation3 + $0xc4] sm:$0xf] }
 0x5b1   : > { %10515 = vmatprep.mubr.bf16.mxu0 %v15953_v9  ;;  %v11375_v12 = vcombine.low %v8498_v20, %v8501_v53  ;;  %v11362_v53 = vrot.slane %v8376_v44, 9  ;;  %v8525_v20 = vrot.slane %v8380_v19, 5  ;;  %v8389_v44 = vld [vmem:[#allocation3 + $0xd0] sm:$0xf] }
 0x5b3   : > { %v8527_v40 = vrot.slane %v8525_v20, 4 }
 0x5b8   : > { %10516 = vmatmul.mubr.bf16.gmra.mrb[24].mxu0 %v11373_v43  ;;  %v8505_v43 = vsel %vm13361_vm0, %v11360_v5, %v8504_v8  ;;  %v8522_v8 = vsel %vm13361_vm0, %v8520_v3, %v8521_v22  ;;  %v8528_v5 = vrot.slane %v8381_v14, 5  ;;  %v8387_v3 = vld [vmem:[#allocation3 + $0xc8] sm:$0x1]  ;;  %v8385_v22 = vld [vmem:[#allocation3 + $0xc0] sm:$0xe] }
 0x5b9   : > { %10525 = vmatprep.mubr.bf16.mxu0 %v15953_v9  ;;  %v11376_v29 = vcombine.low %v8505_v43, %v8508_v52  ;;  %v11363_v52 = vrot.slane %v8379_v49, 9  ;;  %v8532_v43 = vrot.slane %v8383_v2, 5 }
 0x5bb   : > { %v8534_v27 = vrot.slane %v8532_v43, 4 }
 0x5c0   : > { %10526 = vmatmul.mubr.bf16.gmra.mrb[28].mxu0 %v11374_v59  ;;  %v8512_v59 = vsel %vm13361_vm0, %v11361_v48, %v8511_v41  ;;  %v8529_v41 = vsel %vm13361_vm0, %v8527_v40, %v8528_v5  ;;  %v8535_v48 = vrot.slane %v8384_v1, 5 }
 0x5c1   : > { %10535 = vmatprep.mubr.bf16.mxu0 %v15953_v9  ;;  %v11377_v54 = vcombine.low %v8512_v59, %v8515_v7  ;;  %v11364_v7 = vrot.slane %v8382_v23, 9  ;;  %v8539_v59 = vrot.slane %v8386_v28, 5  ;;  %v8919_v23 = vld [vmem:[%s15859_s6] sm:$0x3] }
 0x5c3   : > { %v8541_v19 = vrot.slane %v8539_v59, 4 }
 0x5c8   : > { %10536 = vmatmul.mubr.bf16.gmra.mrb[32].mxu0 %v11375_v12  ;;  %v8519_v12 = vsel %vm13361_vm0, %v11362_v53, %v8518_v13  ;;  %v8536_v13 = vsel %vm13361_vm0, %v8534_v27, %v8535_v48  ;;  %v8542_v53 = vrot.slane %v8387_v3, 5 }
 0x5c9   : > { %10545 = vmatprep.mubr.bf16.mxu0 %v15953_v9  ;;  %v11378_v50 = vcombine.low %v8519_v12, %v8522_v8  ;;  %v8546_v8 = vrot.slane %v8389_v44, 5  ;;  %v8390_v12 = vld [vmem:[#allocation3 + $0xd4] sm:$0x1] }
 0x5ca   : > { %v8543_v14 = vsel %vm13361_vm0, %v8541_v19, %v8542_v53  ;;  %v8549_v5 = vrot.slane %v8390_v12, 5 }
 0x5cb   : > { %v8548_v2 = vrot.slane %v8546_v8, 4 }
 0x5d0   : > { %10546 = vmatmul.mubr.bf16.gmra.mrb[36].mxu0 %v11376_v29  ;;  %v8526_v29 = vsel %vm13361_vm0, %v11363_v52, %v8525_v20  ;;  %v8388_v20 = vld [vmem:[#allocation3 + $0xcc] sm:$0xe] }
 0x5d1   : > { %10555 = vmatprep.mubr.bf16.mxu0 %v15953_v9  ;;  %v11379_v39 = vcombine.low %v8526_v29, %v8529_v41  ;;  %v11366_v49 = vrot.slane %v8388_v20, 9 }
 0x5d3   : > { %v8547_v41 = vsel %vm13361_vm0, %v11366_v49, %v8546_v8 }
 0x5d8   : > { %10556 = vmatmul.mubr.bf16.gmra.mrb[40].mxu0 %v11377_v54  ;;  %v8533_v54 = vsel %vm13361_vm0, %v11364_v7, %v8532_v43  ;;  %v8550_v43 = vsel %vm13361_vm0, %v8548_v2, %v8549_v5 }
 0x5d9   : > { %10565 = vmatprep.mubr.bf16.mxu0 %v15953_v9  ;;  %v11380_v17 = vcombine.low %v8533_v54, %v8536_v13  ;;  %v11382_v29 = vcombine.low %v8547_v41, %v8550_v43 }
 0x5e0   : > { %10566 = vmatmul.mubr.bf16.gmra.mrb[44].mxu0 %v11378_v50  ;;  %v11365_v50 = vrot.slane %v8385_v22, 9 }
 0x5e1   : > { %10575 = vmatprep.mubr.bf16.mxu0 %v15953_v9 }
 0x5e2   : > { %v8540_v40 = vsel %vm13361_vm0, %v11365_v50, %v8539_v59 }
 0x5e3   : > { %v11381_v52 = vcombine.low %v8540_v40, %v8543_v14 }
 0x5e8   : > { %10576 = vmatmul.mubr.bf16.gmra.mrb[48].mxu0 %v11379_v39  ;;  %v8921_v39 = vlaneseq }
 0x5e9   : > { %10585 = vmatprep.mubr.bf16.mxu0 %v15953_v9 }
 0x5ea   : > { %v8922_v1 = vshrl.u32 %v8921_v39, 7 }
 0x5ec   : > { %v8923_v27 = vsub.s32 0, %v8922_v1  ;;  %v8927_v28 = vsub.s32 1, %v8922_v1 }
 0x5ee   : > { %v15702_v48 = vrot.slane %v8919_v23, %v8923_v27  ;;  %v15704_v7 = vrot.slane %v8919_v23, %v8927_v28 }
 0x5f0   : > { %10586 = vmatmul.mubr.bf16.gmra.mrb[52].mxu0 %v11380_v17  ;;  %v9688_v30 = vadd.f32 %v15017_v26, %v15704_v7  ;;  %v9690_v59 = vadd.f32 %v15021_v58, %v15702_v48  ;;  %v9692_v3 = vadd.f32 %v15027_v15, %v15704_v7  ;;  %v9696_v58 = vadd.f32 %v15308_v55, %v15702_v48  ;;  %v10714_v55 = vld [vmem:[%s15861_s8] sm:$0xff] }
 0x5f1   : > { %10595 = vmatprep.mubr.bf16.mxu0 %v15953_v9  ;;  %v9698_v15 = vadd.f32 %v15310_v21, %v15704_v7  ;;  %v9700_v2 = vadd.f32 %v15312_v24, %v15702_v48  ;;  %v9702_v41 = vadd.f32 %v15316_v60, %v15704_v7  ;;  %v10715_v21 = vld [vmem:[%s15861_s8 + $0x8] sm:$0x3]  ;;  %10718 = vperm.xlu0 %12266, %v10714_v55  }
 0x5f2   : > { %10723 = vperm.xlu1 %12267, %v10715_v21  }
 0x5f8   : > { %10596 = vmatmul.mubr.bf16.gmra.mrb[56].mxu0 %v11381_v52 }
 0x5f9   : > { %10605 = vmatprep.mubr.bf16.mxu0 %v15953_v9  ;;  %v9686_v9 = vadd.f32 %v14997_v42, %v15702_v48  ;;  %v12636_v42 = vld [vmem:[%s15860_s7 + $0x4] ss:$8 sps:$4 sm:$0x1f]  }
 0x5fa   : > { %10768 = vmatprep.mubr.bf16.mxu1 %v12636_v42 }
 0x600   : > { %10606 = vmatmul.mubr.bf16.gmra.mrb[60].mxu0 %v11382_v29 }
 0x65b   : > { %v10457_v13 = vpop.f32.mrb[0].mxu0 }
 0x65c   : > { %v11936_v54 = vadd.f32 %v10457_v13, %v9686_v9  ;;  %v10459_v17 = vpop.f32.mrb[1].mxu0  ;;  %v9706_v9 = vadd.f32 %v15331_v63, %v15702_v48  ;;  %v9708_v13 = vadd.f32 %v15333_v38, %v15704_v7 }
 0x65d   : > { %v11938_v44 = vadd.f32 %v10459_v17, %v9688_v30  ;;  %v10461_v19 = vpop.f32.mrb[2].mxu0  ;;  %v9710_v17 = vadd.f32 %v15338_v61, %v15702_v48 }
 0x65e   : > { %v11940_v22 = vadd.f32 %v10461_v19, %v9690_v59  ;;  %v10463_v53 = vpop.f32.mrb[3].mxu0  ;;  %v10616_v20 = vmax.f32 %v11936_v54, 0.0  ;;  %v9712_v19 = vadd.f32 %v15343_v47, %v15704_v7 }
 0x65f   : > { %v11942_v8 = vadd.f32 %v10463_v53, %v9692_v3  ;;  %v10617_v12 = vmax.f32 %v11938_v44, 0.0 }
 0x660   : > { %v10618_v26 = vmax.f32 %v11940_v22, 0.0 }
 0x661   : > { %v10619_v50 = vmax.f32 %v11942_v8, 0.0 }
 0x662   : > { %v10680_v14 = vpack.c.bf16 %v10618_v26, %v10616_v20 }
 0x663   : > { %v10681_v40 = vpack.c.bf16 %v10619_v50, %v10617_v12  ;;  %v10467_v49 = vpop.f32.mrb[4].mxu0  ;;  %v9716_v50 = vadd.f32 %v15366_v45, %v15702_v48 }
 0x664   : > { %v11944_v5 = vadd.f32 %v10467_v49, %v9696_v58  ;;  %v10469_v52 = vpop.f32.mrb[5].mxu0  ;;  %v9718_v58 = vadd.f32 %v15371_v36, %v15704_v7 }
 0x665   : > { %v11946_v43 = vadd.f32 %v10469_v52, %v9698_v15  ;;  %v10471_v29 = vpop.f32.mrb[6].mxu0  ;;  %10736 = vmatprep.subr.bf16.mxu1 %v10681_v40  ;;  %v9720_v15 = vadd.f32 %v15378_v31, %v15702_v48 }
 0x666   : > { %v11948_v39 = vadd.f32 %v10471_v29, %v9700_v2  ;;  %v10473_v1 = vpop.f32.mrb[7].mxu0  ;;  %10737 = vmatpush1.bf16.xpose.msra.mxu1 %v10680_v14  ;;  %v10620_v27 = vmax.f32 %v11944_v5, 0.0  ;;  %v9722_v2 = vadd.f32 %v15380_v32, %v15704_v7 }
 0x667   : > { %v11950_v24 = vadd.f32 %v10473_v1, %v9702_v41  ;;  %v10621_v60 = vmax.f32 %v11946_v43, 0.0  ;;  %v9728_v1 = vadd.f32 %v15399_v46, %v15704_v7 }
 0x668   : > { %v10622_v23 = vmax.f32 %v11948_v39, 0.0  ;;  %v9726_v39 = vadd.f32 %v15397_v18, %v15702_v48 }
 0x669   : > { %v10623_v28 = vmax.f32 %v11950_v24, 0.0 }
 0x66a   : > { %v10682_v30 = vpack.c.bf16 %v10622_v23, %v10620_v27  ;;  %v9730_v27 = vadd.f32 %v15401_v62, %v15702_v48 }
 0x66b   : > { %v10683_v59 = vpack.c.bf16 %v10623_v28, %v10621_v60  ;;  %v10477_v54 = vpop.f32.mrb[8].mxu0  ;;  %v9732_v28 = vadd.f32 %v15403_v57, %v15704_v7 }
 0x66c   : > { %v11952_v3 = vadd.f32 %v10477_v54, %v9706_v9  ;;  %v10479_v44 = vpop.f32.mrb[9].mxu0 }
 0x66d   : > { %v11954_v22 = vadd.f32 %v10479_v44, %v9708_v13  ;;  %v10481_v53 = vpop.f32.mrb[10].mxu0  ;;  %10738 = vmatprep.subr.bf16.mxu1 %v10683_v59  ;;  %v9736_v44 = vadd.f32 %v15424_v6, %v15702_v48 }
 0x66e   : > { %v11956_v8 = vadd.f32 %v10481_v53, %v9710_v17  ;;  %v10483_v42 = vpop.f32.mrb[11].mxu0  ;;  %10739 = vmatpush1.bf16.xpose.msra.mxu1 %v10682_v30  ;;  %v10624_v20 = vmax.f32 %v11952_v3, 0.0  ;;  %v9740_v53 = vadd.f32 %v15433_v51, %v15702_v48 }
 0x66f   : > { %v11958_v63 = vadd.f32 %v10483_v42, %v9712_v19  ;;  %v10625_v38 = vmax.f32 %v11954_v22, 0.0  ;;  %v9738_v19 = vadd.f32 %v15429_v11, %v15704_v7 }
 0x670   : > { %v10626_v26 = vmax.f32 %v11956_v8, 0.0 }
 0x671   : > { %v10627_v12 = vmax.f32 %v11958_v63, 0.0  ;;  %v9742_v63 = vadd.f32 %v15438_v4, %v15704_v7 }
 0x672   : > { %v10684_v61 = vpack.c.bf16 %v10626_v26, %v10624_v20 }
 0x673   : > { %v10685_v14 = vpack.c.bf16 %v10627_v12, %v10625_v38  ;;  %v10487_v47 = vpop.f32.mrb[12].mxu0 }
 0x674   : > { %v11960_v40 = vadd.f32 %v10487_v47, %v9716_v50  ;;  %v10489_v49 = vpop.f32.mrb[13].mxu0  ;;  %v9748_v47 = vadd.f32 %v15453_v0, %v15704_v7 }
 0x675   : > { %v11962_v5 = vadd.f32 %v10489_v49, %v9718_v58  ;;  %v10491_v52 = vpop.f32.mrb[14].mxu0  ;;  %10740 = vmatprep.subr.bf16.mxu1 %v10685_v14  ;;  %v9746_v14 = vadd.f32 %v15451_v33, %v15702_v48 }
 0x676   : > { %v11964_v41 = vadd.f32 %v10491_v52, %v9720_v15  ;;  %v10493_v43 = vpop.f32.mrb[15].mxu0  ;;  %10741 = vmatpush1.bf16.xpose.msra.mxu1 %v10684_v61  ;;  %v10628_v29 = vmax.f32 %v11960_v40, 0.0  ;;  %v9750_v40 = vadd.f32 %v15457_v37, %v15702_v48 }
 0x677   : > { %v11966_v45 = vadd.f32 %v10493_v43, %v9722_v2  ;;  %v10629_v36 = vmax.f32 %v11962_v5, 0.0  ;;  %v9752_v5 = vadd.f32 %v15465_v35, %v15704_v7 }
 0x678   : > { %v10630_v55 = vmax.f32 %v11964_v41, 0.0 }
 0x679   : > { %v10631_v21 = vmax.f32 %v11966_v45, 0.0 }
 0x67a   : > { %v10686_v31 = vpack.c.bf16 %v10630_v55, %v10628_v29 }
 0x67b   : > { %v10687_v24 = vpack.c.bf16 %v10631_v21, %v10629_v36  ;;  %v10497_v32 = vpop.f32.mrb[16].mxu0  ;;  %v9756_v21 = vadd.f32 %v15479_v56, %v15702_v48 }
 0x67c   : > { %v11968_v23 = vadd.f32 %v10497_v32, %v9726_v39  ;;  %v10499_v60 = vpop.f32.mrb[17].mxu0  ;;  %v9758_v39 = vadd.f32 %v15481_v34, %v15704_v7 }
 0x67d   : > { %v11970_v9 = vadd.f32 %v10499_v60, %v9728_v1  ;;  %v10501_v30 = vpop.f32.mrb[18].mxu0  ;;  %10742 = vmatprep.subr.bf16.mxu1 %v10687_v24  ;;  %v9760_v1 = vadd.f32 %v15485_v25, %v15702_v48 }
 0x67e   : > { %v11972_v13 = vadd.f32 %v10501_v30, %v9730_v27  ;;  %v10503_v59 = vpop.f32.mrb[19].mxu0  ;;  %10743 = vmatpush1.bf16.xpose.msra.mxu1 %v10686_v31  ;;  %v10632_v54 = vmax.f32 %v11968_v23, 0.0  ;;  %v9762_v27 = vadd.f32 %v15490_v16, %v15704_v7 }
 0x67f   : > { %v11974_v18 = vadd.f32 %v10503_v59, %v9732_v28  ;;  %v10633_v46 = vmax.f32 %v11970_v9, 0.0 }
 0x680   : > { %v10634_v17 = vmax.f32 %v11972_v13, 0.0 }
 0x681   : > { %v10635_v3 = vmax.f32 %v11974_v18, 0.0  ;;  %v9766_v18 = vadd.f32 %v15507_v10, %v15702_v48 }
 0x682   : > { %v10688_v62 = vpack.c.bf16 %v10634_v17, %v10632_v54  ;;  %v15954_v54 = vld [vmem:[#allocation19_spill] sm:$0xff] }
 0x683   : > { %v10689_v22 = vpack.c.bf16 %v10635_v3, %v10633_v46  ;;  %v10507_v57 = vpop.f32.mrb[20].mxu0  ;;  %v9768_v17 = vadd.f32 %v15954_v54, %v15704_v7  ;;  %v15955_v3 = vld [vmem:[#allocation21_spill] sm:$0xff] }
 0x684   : > { %v11976_v8 = vadd.f32 %v10507_v57, %v9736_v44  ;;  %v10509_v42 = vpop.f32.mrb[21].mxu0  ;;  %v9770_v44 = vadd.f32 %v15955_v3, %v15702_v48  ;;  %v15966_v3 = vld [vmem:[#allocation10_spill] sm:$0xff] }
 0x685   : > { %v11978_v20 = vadd.f32 %v10509_v42, %v9738_v19  ;;  %v10511_v26 = vpop.f32.mrb[22].mxu0  ;;  %10744 = vmatprep.subr.bf16.mxu1 %v10689_v22  ;;  %v15956_v22 = vld [vmem:[#allocation14_spill] sm:$0xff] }
 0x686   : > { %v11980_v38 = vadd.f32 %v10511_v26, %v9740_v53  ;;  %v10513_v12 = vpop.f32.mrb[23].mxu0  ;;  %10745 = vmatpush1.bf16.xpose.msra.mxu1 %v10688_v62  ;;  %v10636_v50 = vmax.f32 %v11976_v8, 0.0  ;;  %v9772_v57 = vadd.f32 %v15956_v22, %v15704_v7  ;;  %v15967_v22 = vld [vmem:[#allocation11_spill] sm:$0xff] }
 0x687   : > { %v11982_v6 = vadd.f32 %v10513_v12, %v9742_v63  ;;  %v10637_v11 = vmax.f32 %v11978_v20, 0.0 }
 0x688   : > { %v10638_v61 = vmax.f32 %v11980_v38, 0.0 }
 0x689   : > { %v10639_v58 = vmax.f32 %v11982_v6, 0.0  ;;  %v15957_v6 = vld [vmem:[#allocation12_spill] sm:$0xff] }
 0x68a   : > { %v10690_v51 = vpack.c.bf16 %v10638_v61, %v10636_v50  ;;  %v9776_v50 = vadd.f32 %v15957_v6, %v15702_v48 }
 0x68b   : > { %v10691_v15 = vpack.c.bf16 %v10639_v58, %v10637_v11  ;;  %v10517_v4 = vpop.f32.mrb[24].mxu0  ;;  %v15958_v11 = vld [vmem:[#allocation13_spill] sm:$0xff] }
 0x68c   : > { %v11984_v49 = vadd.f32 %v10517_v4, %v9746_v14  ;;  %v10519_v2 = vpop.f32.mrb[25].mxu0  ;;  %v9778_v58 = vadd.f32 %v15958_v11, %v15704_v7 }
 0x68d   : > { %v11986_v52 = vadd.f32 %v10519_v2, %v9748_v47  ;;  %v10521_v41 = vpop.f32.mrb[26].mxu0  ;;  %10746 = vmatprep.subr.bf16.mxu1 %v10691_v15  ;;  %v15959_v47 = vld [vmem:[#allocation15_spill] sm:$0xff] }
 0x68e   : > { %v11988_v43 = vadd.f32 %v10521_v41, %v9750_v40  ;;  %v10523_v45 = vpop.f32.mrb[27].mxu0  ;;  %10747 = vmatpush1.bf16.xpose.msra.mxu1 %v10690_v51  ;;  %v10640_v29 = vmax.f32 %v11984_v49, 0.0  ;;  %v9780_v15 = vadd.f32 %v15959_v47, %v15702_v48  ;;  %v15960_v49 = vld [vmem:[#allocation16_spill] sm:$0xff]  ;;  %v15970_v47 = vld [vmem:[#allocation22_spill] sm:$0xff] }
 0x68f   : > { %v11990_v33 = vadd.f32 %v10523_v45, %v9752_v5  ;;  %v10641_v0 = vmax.f32 %v11986_v52, 0.0  ;;  %v9782_v2 = vadd.f32 %v15960_v49, %v15704_v7  ;;  %v15971_v49 = vld [vmem:[#allocation23_spill] sm:$0xff] }
 0x690   : > { %v10642_v55 = vmax.f32 %v11988_v43, 0.0 }
 0x691   : > { %v10643_v36 = vmax.f32 %v11990_v33, 0.0 }
 0x692   : > { %v10692_v37 = vpack.c.bf16 %v10642_v55, %v10640_v29 }
 0x693   : > { %v10693_v31 = vpack.c.bf16 %v10643_v36, %v10641_v0  ;;  %v10527_v35 = vpop.f32.mrb[28].mxu0  ;;  %v15961_v36 = vld [vmem:[#allocation17_spill] sm:$0xff] }
 0x694   : > { %v11992_v24 = vadd.f32 %v10527_v35, %v9756_v21  ;;  %v10529_v32 = vpop.f32.mrb[29].mxu0  ;;  %v9786_v21 = vadd.f32 %v15961_v36, %v15702_v48 }
 0x695   : > { %v11994_v23 = vadd.f32 %v10529_v32, %v9758_v39  ;;  %v10531_v60 = vpop.f32.mrb[30].mxu0  ;;  %10748 = vmatprep.subr.bf16.mxu1 %v10693_v31  ;;  %v15962_v39 = vld [vmem:[#allocation18_spill] sm:$0xff] }
 0x696   : > { %v11996_v28 = vadd.f32 %v10531_v60, %v9760_v1  ;;  %v10533_v9 = vpop.f32.mrb[31].mxu0  ;;  %10749 = vmatpush1.bf16.xpose.msra.mxu1 %v10692_v37  ;;  %v10644_v30 = vmax.f32 %v11992_v24, 0.0  ;;  %v9788_v31 = vadd.f32 %v15962_v39, %v15704_v7  ;;  %v15963_v24 = vld [vmem:[#allocation20_spill] sm:$0xff]  ;;  %v15964_v60 = vld [vmem:[#allocation9_spill] sm:$0xff] }
 0x697   : > { %v11998_v56 = vadd.f32 %v10533_v9, %v9762_v27  ;;  %v10645_v34 = vmax.f32 %v11994_v23, 0.0  ;;  %v9790_v32 = vadd.f32 %v15963_v24, %v15702_v48  ;;  %v15974_v24 = vld [vmem:[#allocation26_spill] sm:$0xff] }
 0x698   : > { %v10646_v13 = vmax.f32 %v11996_v28, 0.0  ;;  %v9792_v28 = vadd.f32 %v15964_v60, %v15704_v7  ;;  %v15975_v60 = vld [vmem:[#allocation27_spill] sm:$0xff] }
 0x699   : > { %v10647_v59 = vmax.f32 %v11998_v56, 0.0 }
 0x69a   : > { %v10694_v25 = vpack.c.bf16 %v10646_v13, %v10644_v30 }
 0x69b   : > { %v10695_v46 = vpack.c.bf16 %v10647_v59, %v10645_v34  ;;  %v10537_v16 = vpop.f32.mrb[32].mxu0 }
 0x69c   : > { %v12000_v62 = vadd.f32 %v10537_v16, %v9766_v18  ;;  %v10539_v19 = vpop.f32.mrb[33].mxu0 }
 0x69d   : > { %v12002_v53 = vadd.f32 %v10539_v19, %v9768_v17  ;;  %v10541_v8 = vpop.f32.mrb[34].mxu0  ;;  %10750 = vmatprep.subr.bf16.mxu1 %v10695_v46  ;;  %v15965_v17 = vld [vmem:[#allocation8_spill] sm:$0xff] }
 0x69e   : > { %v12004_v42 = vadd.f32 %v10541_v8, %v9770_v44  ;;  %v10543_v63 = vpop.f32.mrb[35].mxu0  ;;  %10751 = vmatpush1.bf16.xpose.msra.mxu1 %v10694_v25  ;;  %v10648_v20 = vmax.f32 %v12000_v62, 0.0  ;;  %v9796_v46 = vadd.f32 %v15965_v17, %v15702_v48  ;;  %v9798_v44 = vadd.f32 %v15966_v3, %v15704_v7 }
 0x69f   : > { %v12006_v10 = vadd.f32 %v10543_v63, %v9772_v57  ;;  %v10649_v38 = vmax.f32 %v12002_v53, 0.0  ;;  %v9800_v57 = vadd.f32 %v15967_v22, %v15702_v48  ;;  %v15978_v22 = vld [vmem:[#allocation30_spill] sm:$0xff] }
 0x6a0   : > { %v10650_v26 = vmax.f32 %v12004_v42, 0.0  ;;  %v15968_v42 = vld [vmem:[#allocation7_spill] sm:$0xff] }
 0x6a1   : > { %v10651_v12 = vmax.f32 %v12006_v10, 0.0  ;;  %v9802_v63 = vadd.f32 %v15968_v42, %v15704_v7  ;;  %v15979_v42 = vld [vmem:[#allocation31_spill] sm:$0xff] }
 0x6a2   : > { %v10696_v61 = vpack.c.bf16 %v10650_v26, %v10648_v20 }
 0x6a3   : > { %v10697_v14 = vpack.c.bf16 %v10651_v12, %v10649_v38  ;;  %v10547_v51 = vpop.f32.mrb[36].mxu0 }
 0x6a4   : > { %v12008_v4 = vadd.f32 %v10547_v51, %v9776_v50  ;;  %v10549_v40 = vpop.f32.mrb[37].mxu0 }
 0x6a5   : > { %v12010_v5 = vadd.f32 %v10549_v40, %v9778_v58  ;;  %v10551_v52 = vpop.f32.mrb[38].mxu0  ;;  %10752 = vmatprep.subr.bf16.mxu1 %v10697_v14  ;;  %v15969_v58 = vld [vmem:[#allocation6_spill] sm:$0xff] }
 0x6a6   : > { %v12012_v41 = vadd.f32 %v10551_v52, %v9780_v15  ;;  %v10553_v43 = vpop.f32.mrb[39].mxu0  ;;  %10753 = vmatpush1.bf16.xpose.msra.mxu1 %v10696_v61  ;;  %v10652_v33 = vmax.f32 %v12008_v4, 0.0  ;;  %v9806_v14 = vadd.f32 %v15969_v58, %v15702_v48  ;;  %v9808_v15 = vadd.f32 %v15970_v47, %v15704_v7 }
 0x6a7   : > { %v12014_v45 = vadd.f32 %v10553_v43, %v9782_v2  ;;  %v10653_v55 = vmax.f32 %v12010_v5, 0.0  ;;  %v9810_v2 = vadd.f32 %v15971_v49, %v15702_v48  ;;  %v15982_v49 = vld [vmem:[#allocation34_spill] sm:$0xff] }
 0x6a8   : > { %v10654_v29 = vmax.f32 %v12012_v41, 0.0  ;;  %v15972_v41 = vld [vmem:[#allocation24_spill] sm:$0xff] }
 0x6a9   : > { %v10655_v0 = vmax.f32 %v12014_v45, 0.0  ;;  %v9812_v43 = vadd.f32 %v15972_v41, %v15704_v7  ;;  %v15983_v41 = vld [vmem:[#allocation35_spill] sm:$0xff] }
 0x6aa   : > { %v10698_v37 = vpack.c.bf16 %v10654_v29, %v10652_v33 }
 0x6ab   : > { %v10699_v35 = vpack.c.bf16 %v10655_v0, %v10653_v55  ;;  %v10557_v1 = vpop.f32.mrb[40].mxu0 }
 0x6ac   : > { %v12016_v27 = vadd.f32 %v10557_v1, %v9786_v21  ;;  %v10559_v23 = vpop.f32.mrb[41].mxu0 }
 0x6ad   : > { %v12018_v9 = vadd.f32 %v10559_v23, %v9788_v31  ;;  %v10561_v56 = vpop.f32.mrb[42].mxu0  ;;  %10754 = vmatprep.subr.bf16.mxu1 %v10699_v35  ;;  %v15973_v31 = vld [vmem:[#allocation25_spill] sm:$0xff] }
 0x6ae   : > { %v12020_v30 = vadd.f32 %v10561_v56, %v9790_v32  ;;  %v10563_v13 = vpop.f32.mrb[43].mxu0  ;;  %10755 = vmatpush1.bf16.xpose.msra.mxu1 %v10698_v37  ;;  %v10656_v59 = vmax.f32 %v12016_v27, 0.0  ;;  %v9816_v35 = vadd.f32 %v15973_v31, %v15702_v48  ;;  %v9818_v32 = vadd.f32 %v15974_v24, %v15704_v7 }
 0x6af   : > { %v12022_v34 = vadd.f32 %v10563_v13, %v9792_v28  ;;  %v10657_v25 = vmax.f32 %v12018_v9, 0.0  ;;  %v9820_v28 = vadd.f32 %v15975_v60, %v15702_v48  ;;  %v10724_v60 = vpop.permute.xlu1 %10723 }
 0x6b0   : > { %v10658_v18 = vmax.f32 %v12020_v30, 0.0  ;;  %v15976_v30 = vld [vmem:[#allocation28_spill] sm:$0xff] }
 0x6b1   : > { %v10659_v54 = vmax.f32 %v12022_v34, 0.0  ;;  %v9822_v13 = vadd.f32 %v15976_v30, %v15704_v7 }
 0x6b2   : > { %v10700_v16 = vpack.c.bf16 %v10658_v18, %v10656_v59 }
 0x6b3   : > { %v10701_v62 = vpack.c.bf16 %v10659_v54, %v10657_v25  ;;  %v10567_v19 = vpop.f32.mrb[44].mxu0 }
 0x6b4   : > { %v12024_v53 = vadd.f32 %v10567_v19, %v9796_v46  ;;  %v10569_v8 = vpop.f32.mrb[45].mxu0 }
 0x6b5   : > { %v12026_v10 = vadd.f32 %v10569_v8, %v9798_v44  ;;  %v10571_v20 = vpop.f32.mrb[46].mxu0  ;;  %10756 = vmatprep.subr.bf16.mxu1 %v10701_v62  ;;  %v15977_v44 = vld [vmem:[#allocation29_spill] sm:$0xff] }
 0x6b6   : > { %v12028_v26 = vadd.f32 %v10571_v20, %v9800_v57  ;;  %v10573_v38 = vpop.f32.mrb[47].mxu0  ;;  %10757 = vmatpush1.bf16.xpose.msra.mxu1 %v10700_v16  ;;  %v10660_v6 = vmax.f32 %v12024_v53, 0.0  ;;  %v9826_v62 = vadd.f32 %v15977_v44, %v15702_v48  ;;  %v9828_v57 = vadd.f32 %v15978_v22, %v15704_v7 }
 0x6b7   : > { %v12030_v12 = vadd.f32 %v10573_v38, %v9802_v63  ;;  %v10661_v61 = vmax.f32 %v12026_v10, 0.0  ;;  %v9830_v63 = vadd.f32 %v15979_v42, %v15702_v48 }
 0x6b8   : > { %v10662_v50 = vmax.f32 %v12028_v26, 0.0  ;;  %v15980_v26 = vld [vmem:[#allocation32_spill] sm:$0xff] }
 0x6b9   : > { %v10663_v11 = vmax.f32 %v12030_v12, 0.0  ;;  %v9832_v38 = vadd.f32 %v15980_v26, %v15704_v7 }
 0x6ba   : > { %v10702_v51 = vpack.c.bf16 %v10662_v50, %v10660_v6 }
 0x6bb   : > { %v10703_v4 = vpack.c.bf16 %v10663_v11, %v10661_v61  ;;  %v10577_v40 = vpop.f32.mrb[48].mxu0 }
 0x6bc   : > { %v12032_v5 = vadd.f32 %v10577_v40, %v9806_v14  ;;  %v10579_v52 = vpop.f32.mrb[49].mxu0 }
 0x6bd   : > { %v12034_v45 = vadd.f32 %v10579_v52, %v9808_v15  ;;  %v10581_v33 = vpop.f32.mrb[50].mxu0  ;;  %10758 = vmatprep.subr.bf16.mxu1 %v10703_v4  ;;  %v15981_v15 = vld [vmem:[#allocation33_spill] sm:$0xff] }
 0x6be   : > { %v12036_v29 = vadd.f32 %v10581_v33, %v9810_v2  ;;  %v10583_v55 = vpop.f32.mrb[51].mxu0  ;;  %10759 = vmatpush1.bf16.xpose.msra.mxu1 %v10702_v51  ;;  %v10664_v36 = vmax.f32 %v12032_v5, 0.0  ;;  %v9836_v4 = vadd.f32 %v15981_v15, %v15702_v48  ;;  %v9838_v2 = vadd.f32 %v15982_v49, %v15704_v7 }
 0x6bf   : > { %v12038_v0 = vadd.f32 %v10583_v55, %v9812_v43  ;;  %v10665_v37 = vmax.f32 %v12034_v45, 0.0  ;;  %v9840_v43 = vadd.f32 %v15983_v41, %v15702_v48  ;;  %v12634_v48 = vld [vmem:[%s15860_s7] ss:$8 sps:$4 sm:$0x1f]  }
 0x6c0   : > { %v10666_v21 = vmax.f32 %v12036_v29, 0.0  ;;  %v15984_v29 = vld [vmem:[#allocation36_spill] sm:$0xff] }
 0x6c1   : > { %v10667_v39 = vmax.f32 %v12038_v0, 0.0  ;;  %v9842_v55 = vadd.f32 %v15984_v29, %v15704_v7  ;;  %v10719_v7 = vpop.permute.xlu0 %10718 }
 0x6c2   : > { %v10704_v1 = vpack.c.bf16 %v10666_v21, %v10664_v36 }
 0x6c3   : > { %v10705_v27 = vpack.c.bf16 %v10667_v39, %v10665_v37  ;;  %v10587_v23 = vpop.f32.mrb[52].mxu0 }
 0x6c4   : > { %v12040_v9 = vadd.f32 %v10587_v23, %v9816_v35  ;;  %v10589_v56 = vpop.f32.mrb[53].mxu0 }
 0x6c5   : > { %v12042_v34 = vadd.f32 %v10589_v56, %v9818_v32  ;;  %v10591_v59 = vpop.f32.mrb[54].mxu0  ;;  %10760 = vmatprep.subr.bf16.mxu1 %v10705_v27 }
 0x6c6   : > { %v12044_v18 = vadd.f32 %v10591_v59, %v9820_v28  ;;  %v10593_v25 = vpop.f32.mrb[55].mxu0  ;;  %10761 = vmatpush1.bf16.xpose.msra.mxu1 %v10704_v1  ;;  %v10668_v17 = vmax.f32 %v12040_v9, 0.0 }
 0x6c7   : > { %v12046_v54 = vadd.f32 %v10593_v25, %v9822_v13  ;;  %v10669_v16 = vmax.f32 %v12042_v34, 0.0 }
 0x6c8   : > { %v10670_v46 = vmax.f32 %v12044_v18, 0.0 }
 0x6c9   : > { %v10671_v3 = vmax.f32 %v12046_v54, 0.0 }
 0x6ca   : > { %v10706_v19 = vpack.c.bf16 %v10670_v46, %v10668_v17 }
 0x6cb   : > { %v10707_v53 = vpack.c.bf16 %v10671_v3, %v10669_v16  ;;  %v10597_v8 = vpop.f32.mrb[56].mxu0 }
 0x6cc   : > { %v12048_v10 = vadd.f32 %v10597_v8, %v9826_v62  ;;  %v10599_v20 = vpop.f32.mrb[57].mxu0 }
 0x6cd   : > { %v12050_v12 = vadd.f32 %v10599_v20, %v9828_v57  ;;  %v10601_v6 = vpop.f32.mrb[58].mxu0  ;;  %10762 = vmatprep.subr.bf16.mxu1 %v10707_v53 }
 0x6ce   : > { %v12052_v50 = vadd.f32 %v10601_v6, %v9830_v63  ;;  %v10603_v61 = vpop.f32.mrb[59].mxu0  ;;  %10763 = vmatpush1.bf16.xpose.msra.mxu1 %v10706_v19  ;;  %v10672_v58 = vmax.f32 %v12048_v10, 0.0 }
 0x6cf   : > { %v12054_v11 = vadd.f32 %v10603_v61, %v9832_v38  ;;  %v10673_v51 = vmax.f32 %v12050_v12, 0.0 }
 0x6d0   : > { %v10674_v14 = vmax.f32 %v12052_v50, 0.0 }
 0x6d1   : > { %v10675_v47 = vmax.f32 %v12054_v11, 0.0 }
 0x6d2   : > { %v10708_v40 = vpack.c.bf16 %v10674_v14, %v10672_v58 }
 0x6d3   : > { %v10709_v5 = vpack.c.bf16 %v10675_v47, %v10673_v51  ;;  %v10607_v52 = vpop.f32.mrb[60].mxu0 }
 0x6d4   : > { %v12056_v45 = vadd.f32 %v10607_v52, %v9836_v4  ;;  %v10609_v33 = vpop.f32.mrb[61].mxu0 }
 0x6d5   : > { %v12058_v0 = vadd.f32 %v10609_v33, %v9838_v2  ;;  %v10611_v36 = vpop.f32.mrb[62].mxu0  ;;  %10764 = vmatprep.subr.bf16.mxu1 %v10709_v5 }
 0x6d6   : > { %v12060_v21 = vadd.f32 %v10611_v36, %v9840_v43  ;;  %v10613_v37 = vpop.f32.mrb[63].mxu0  ;;  %10765 = vmatpush1.bf16.xpose.msra.mxu1 %v10708_v40  ;;  %v10676_v31 = vmax.f32 %v12056_v45, 0.0 }
 0x6d7   : > { %v12062_v39 = vadd.f32 %v10613_v37, %v9842_v55  ;;  %v10677_v1 = vmax.f32 %v12058_v0, 0.0 }
 0x6d8   : > { %v10678_v35 = vmax.f32 %v12060_v21, 0.0 }
 0x6d9   : > { %v10679_v24 = vmax.f32 %v12062_v39, 0.0 }
 0x6da   : > { %v10710_v32 = vpack.c.bf16 %v10678_v35, %v10676_v31 }
 0x6db   : > { %v10711_v27 = vpack.c.bf16 %v10679_v24, %v10677_v1 }
 0x6dd   : > { %10766 = vmatprep.subr.bf16.mxu1 %v10711_v27 }
 0x6de   : > { %10767 = vmatpush1.bf16.xpose.msra.mxu1 %v10710_v32 }
 0x6e5   : > { %10769 = vmatmul.mubr.bf16.vlgmr.msra.gmra.mrb[0].mxu1 %v12634_v48 }
 0x7b8   : > { %v10770_v23 = vpop.f32.mrb[0].mxu1 }
 0x7b9   : > { %v10771_v28 = vadd.f32 %v10770_v23, %v10719_v7  ;;  %v10772_v9 = vpop.f32.mrb[1].mxu1 }
 0x7ba   : > { %v10773_v56 = vadd.f32 %v10772_v9, %v10719_v7  ;;  %v10774_v30 = vpop.f32.mrb[2].mxu1 }
 0x7bb   : > { %10779 = vst [vmem:[%s332_s23] sm:$0xff] %v10771_v28  ;;  %v10775_v13 = vadd.f32 %v10774_v30, %v10724_v60  ;;  %v10776_v34 = vpop.f32.mrb[3].mxu1 }
 0x7bc   : > { %10780 = vst [vmem:[%s332_s23 + $0x8] sm:$0xff] %v10773_v56  ;;  %v10777_v59 = vadd.f32 %v10776_v34, %v10724_v60 }
 0x7bd   : > { %10781 = vst [vmem:[%s332_s23 + $0x10] sm:$0x3] %v10775_v13 }
 0x7be   : > { %10782 = vst [vmem:[%s332_s23 + $0x18] sm:$0x3] %v10777_v59 }
 0x7bf PF: > { %s19_s30 = sadd.s32 1, %s12645_s30  }
 0x7c0   : > { %p16_p4 = scmp.ge.s32.totalorder %s19_s30, 4  }
 0x7c2   :  { %18 = sbr.rel (!%p16_p4) target bundleno = 1 (0x1), region = 90 }

</bundles_post_ra>
